<compile_context>
chip_gen: v5e
topology: v5e:2x2
jax: 0.10.0
libtpu: 0.0.40
codegen_flags: <defaults>
</compile_context>

<pallas_src>
import functools

import jax
import jax.numpy as jnp
from jax.experimental import pallas as pl
from jax.experimental.pallas import tpu as pltpu


KERNEL_SIZES = (2, 3, 4)
LANE = 128          # lane width
SUBLANE_F32 = 8     # f32 sublane tile


def _round_up(x, m):
    return (x + m - 1) // m * m


# -----------------------------------------------------------------------------
# One-time, import-time probe of pltpu.roll's sublane-rotation direction.
# Runs eagerly (never inside a jit trace) on a single tiny shape; falls back to
# a slice+concat shift if roll is unavailable.  Guarantees correct convolution
# semantics under either roll convention on any backend/version.
# -----------------------------------------------------------------------------
def _detect_roll_convention():
    rows, cols = 64, 384

    def probe_kernel(x_ref, o_ref):
        o_ref[...] = pltpu.roll(x_ref[...], 1, 0)

    try:
        x = jax.lax.broadcasted_iota(jnp.float32, (rows, cols), 0)
        x = x.astype(jnp.bfloat16)
        out = pl.pallas_call(
            probe_kernel,
            out_shape=jax.ShapeDtypeStruct((rows, cols), jnp.bfloat16),
        )(x)
        first = float(out[0, 0])
        if first == float(rows - 1):    # np.roll convention: out[i] = x[i - s]
            return True, True
        if first == 1.0:                # opposite convention: out[i] = x[i + s]
            return True, False
    except Exception:
        pass
    return False, True                  # roll not lowerable -> slice fallback


_USE_ROLL, _ROLL_LIKE_NP = _detect_roll_convention()


# -----------------------------------------------------------------------------
# Kernel
# -----------------------------------------------------------------------------
def _textcnn_kernel(x_ref, wt0_ref, wt1_ref, wt2_ref, wt3_ref,
                    b2_ref, b3_ref, b4_ref,
                    wf2_ref, wf3_ref, wf4_ref, bf_ref, out_ref, *,
                    seq_len, l_pad, kp, use_roll, roll_like_np):
    n, ep = x_ref.shape                  # n = TILE_B * l_pad flat token rows
    tile_b = n // l_pad
    x = x_ref[...]                       # (n, Ep) bf16, lane/sublane aligned

    # shifted(j)[r] = x[r + j] (mod n).  Wrap-around / cross-sequence rows only
    # land at in-sequence positions t >= l_pad - j >= seq_len - (k - 1) for any
    # branch k that consumes tap j (j <= k - 1), i.e. exactly the positions the
    # validity mask (t <= seq_len - k) below removes.  Requires l_pad >= seq_len
    # (asserted in the wrapper).
    def shifted(j):
        if j == 0:
            return x
        if use_roll:
            amount = (n - j) if roll_like_np else j
            return pltpu.roll(x, amount, 0)            # XLU sublane rotation
        tail = jnp.zeros((j, ep), x.dtype)             # fallback: slice + concat
        return jnp.concatenate([x[j:], tail], axis=0)

    # 4 per-tap matmuls (bf16 x bf16 -> f32 accumulation) instead of 9:
    #   wt0/wt1: [W2[j] | W3[j] | W4[j]]  (Ep, 3*Kp)
    #   wt2:     [W3[2] | W4[2]]          (Ep, 2*Kp)
    #   wt3:     [W4[3]]                  (Ep, Kp)
    acc_a = jnp.dot(x, wt0_ref[...], preferred_element_type=jnp.float32)
    acc_a = acc_a + jnp.dot(shifted(1), wt1_ref[...],
                            preferred_element_type=jnp.float32)
    acc_b = jnp.dot(shifted(2), wt2_ref[...], preferred_element_type=jnp.float32)
    acc_c = jnp.dot(shifted(3), wt3_ref[...], preferred_element_type=jnp.float32)

    # Lane-aligned (multiples of Kp = 384 = 3*128) slices: no tile crossings.
    conv2 = acc_a[:, 0 * kp:1 * kp]
    conv3 = acc_a[:, 1 * kp:2 * kp] + acc_b[:, 0 * kp:1 * kp]
    conv4 = acc_a[:, 2 * kp:3 * kp] + acc_b[:, 1 * kp:2 * kp] + acc_c

    # time index of each position within a sequence.
    t2d = jax.lax.broadcasted_iota(jnp.int32, (l_pad, kp), 0)

    def pool(conv, b_ref, k):
        conv = jnp.maximum(conv + b_ref[...], 0.0)               # + bias, ReLU
        conv = conv.reshape(tile_b, l_pad, kp)                   # l_pad % 8 == 0
        valid = (t2d < (seq_len - k + 1))[None]                  # (1, l_pad, Kp)
        conv = jnp.where(valid, conv, 0.0)                       # ReLU out >= 0
        return jnp.max(conv, axis=1).astype(jnp.bfloat16)        # (tile_b, Kp)

    f2 = pool(conv2, b2_ref, 2)
    f3 = pool(conv3, b3_ref, 3)
    f4 = pool(conv4, b4_ref, 4)

    # Dropout(p=0.5) is identity in eval mode.
    # fc1: three small bf16 matmuls accumulated in f32 (no lane concatenation).
    logits = jnp.dot(f2, wf2_ref[...], preferred_element_type=jnp.float32)
    logits = logits + jnp.dot(f3, wf3_ref[...], preferred_element_type=jnp.float32)
    logits = logits + jnp.dot(f4, wf4_ref[...], preferred_element_type=jnp.float32)
    out_ref[...] = logits + bf_ref[...]


# -----------------------------------------------------------------------------
# Wrapper
# -----------------------------------------------------------------------------
def textcnn_forward(x_ids, params, *, tile_b=None):
    """x_ids: (B, L) int32 token ids.  Returns logits (B, class_num) float32."""
    class_num = params["class_num"]
    embed = params["embed"]                       # (V, Ep) bf16, zero-padded cols
    ep = embed.shape[1]
    kp = params["b2"].shape[-1]
    cp = params["bf"].shape[-1]

    b, l = x_ids.shape
    if l < max(KERNEL_SIZES):
        raise ValueError(
            f"sequence length {l} is shorter than the largest conv kernel "
            f"({max(KERNEL_SIZES)}); the PyTorch reference also fails here.")

    # Embedding gather in plain JAX (bf16 table).  See TODO at top of file.
    emb = embed[x_ids]                            # (B, L, Ep) bf16

    # Round L only to the f32 sublane multiple (8) -- no more 16-rounding.
    # l_pad >= l is required by the roll wrap-around argument in the kernel.
    l_pad = _round_up(l, SUBLANE_F32)
    assert l_pad >= l

    # Tile sizing keyed to the f32 conv accumulators (~9 KiB per flat row),
    # not the bf16 activation block; VMEM-capacity aware.
    try:
        vmem_cap = pltpu.get_tpu_info().vmem_capacity_bytes
    except Exception:
        vmem_cap = 64 * 1024 * 1024               # conservative (v7x-sized)
    if vmem_cap >= 100 * 1024 * 1024:             # v5e / v6e: 128 MiB VMEM
        target_rows, vmem_limit = 2048, 80 * 1024 * 1024
    else:                                         # v7x: 64 MiB VMEM per core
        target_rows, vmem_limit = 1024, 40 * 1024 * 1024

    if tile_b is None:
        tile_b = max(8, target_rows // l_pad)
    tile_b = min(tile_b, _round_up(b, 8))
    tile_b = max(8, _round_up(tile_b, 8))
    b_pad = _round_up(b, tile_b)
    # Guarantee >= 2 grid steps whenever the batch allows it, so the "parallel"
    # batch axis can actually split across v7x's two TensorCores.
    if b_pad // tile_b < 2 and tile_b > 8:
        half = max(8, _round_up(tile_b // 2, 8))
        if _round_up(b, half) // half >= 2:
            tile_b = half
            b_pad = _round_up(b, tile_b)

    emb = jnp.pad(emb, ((0, b_pad - b), (0, l_pad - l), (0, 0)))
    x_flat = emb.reshape(b_pad * l_pad, ep)       # flatten outside the kernel
    n_rows = tile_b * l_pad

    kernel = functools.partial(
        _textcnn_kernel, seq_len=l, l_pad=l_pad, kp=kp,
        use_roll=_USE_ROLL, roll_like_np=_ROLL_LIKE_NP)

    resident = lambda i: (0, 0)                   # weights stay put in VMEM

    out = pl.pallas_call(
        kernel,
        out_shape=jax.ShapeDtypeStruct((b_pad, cp), jnp.float32),
        grid=(b_pad // tile_b,),
        in_specs=[
            pl.BlockSpec((n_rows, ep), lambda i: (i, 0)),   # streamed activations
            pl.BlockSpec(params["wt0"].shape, resident),    # packed tap weights
            pl.BlockSpec(params["wt1"].shape, resident),
            pl.BlockSpec(params["wt2"].shape, resident),
            pl.BlockSpec(params["wt3"].shape, resident),
            pl.BlockSpec(params["b2"].shape, resident),     # conv biases
            pl.BlockSpec(params["b3"].shape, resident),
            pl.BlockSpec(params["b4"].shape, resident),
            pl.BlockSpec(params["wf2"].shape, resident),    # fc1 blocks (bf16)
            pl.BlockSpec(params["wf3"].shape, resident),
            pl.BlockSpec(params["wf4"].shape, resident),
            pl.BlockSpec(params["bf"].shape, resident),
        ],
        out_specs=pl.BlockSpec((tile_b, cp), lambda i: (i, 0)),
        compiler_params=pltpu.CompilerParams(
            dimension_semantics=("parallel",),
            vmem_limit_bytes=vmem_limit,
        ),
    )(x_flat, params["wt0"], params["wt1"], params["wt2"], params["wt3"],
      params["b2"], params["b3"], params["b4"],
      params["wf2"], params["wf3"], params["wf4"], params["bf"])

    return out[:b, :class_num]


# -----------------------------------------------------------------------------
# Parameters (mirrors TextCNN.init_weight shapes/init; lane-padded; bf16 where
# it feeds the MXU).  Conv weights are packed per tap for the kernel.
# -----------------------------------------------------------------------------
def init_params(key, vocab_size, class_num, embed_dim=300, kernel_num=300):
    keys = jax.random.split(key, 8)
    ep = _round_up(embed_dim, LANE)
    kp = _round_up(kernel_num, LANE)
    cp = _round_up(class_num, LANE)

    params = {"class_num": class_num}

    # nn.Embedding(vocab_size, embed_dim, padding_idx=1): N(0,1), row 1 zeroed.
    embed = jax.random.normal(keys[0], (vocab_size, embed_dim), jnp.float32)
    embed = embed.at[1].set(0.0)
    embed = jnp.pad(embed, ((0, 0), (0, ep - embed_dim)))
    params["embed"] = embed.astype(jnp.bfloat16)

    # Conv2d(1, kernel_num, (k, embed_dim)): kaiming_uniform_ weights, zero bias.
    branch_w = {}
    for i, k in enumerate(KERNEL_SIZES):
        fan_in = 1 * k * embed_dim
        bound = (6.0 / fan_in) ** 0.5
        # torch weight shape (K, 1, k, E); stored as (k, E, K) internally.
        w_torch = jax.random.uniform(keys[1 + i], (kernel_num, 1, k, embed_dim),
                                     jnp.float32, -bound, bound)
        w = jnp.transpose(w_torch[:, 0, :, :], (1, 2, 0))        # (k, E, K)
        w = jnp.pad(w, ((0, 0), (0, ep - embed_dim), (0, kp - kernel_num)))
        branch_w[k] = w.astype(jnp.bfloat16)
        params[f"b{k}"] = jnp.zeros((1, kp), jnp.float32)

    # Pack tap j of every branch with k > j into one (Ep, m_j*Kp) matrix so the
    # kernel does 4 matmuls per step instead of 9.
    for j in range(max(KERNEL_SIZES)):
        blocks = [branch_w[k][j] for k in KERNEL_SIZES if k > j]
        params[f"wt{j}"] = jnp.concatenate(blocks, axis=1)

    # nn.Linear(3*kernel_num, class_num): normal_ weights, zero bias.
    wf_torch = jax.random.normal(
        keys[5], (class_num, len(KERNEL_SIZES) * kernel_num), jnp.float32)
    wf_t = jnp.transpose(wf_torch, (1, 0))                       # (3K, C)
    for i, k in enumerate(KERNEL_SIZES):                         # split per branch
        blk = wf_t[i * kernel_num:(i + 1) * kernel_num]          # (K, C)
        blk = jnp.pad(blk, ((0, kp - kernel_num), (0, cp - class_num)))
        params[f"wf{k}"] = blk.astype(jnp.bfloat16)              # bf16, resident
    params["bf"] = jnp.zeros((1, cp), jnp.float32)
    return params


# -----------------------------------------------------------------------------
# Pure-JAX reference (f32 math on the same bf16-rounded parameters).
# -----------------------------------------------------------------------------
def _tap_weight(params, k, j):
    """Extract W_k[j] (Ep, Kp) from the packed per-tap weight."""
    wt = params[f"wt{j}"]
    branches = [kk for kk in KERNEL_SIZES if kk > j]
    idx = branches.index(k)
    kp = wt.shape[1] // len(branches)
    return wt[:, idx * kp:(idx + 1) * kp]


def textcnn_reference(x_ids, params):
    class_num = params["class_num"]
    emb = params["embed"][x_ids].astype(jnp.float32)             # (B, L, Ep)
    b, l, _ = emb.shape
    hp = jax.lax.Precision.HIGHEST
    logits = jnp.zeros((b, params["bf"].shape[-1]), jnp.float32) + params["bf"]
    for k in KERNEL_SIZES:
        p = l - k + 1
        conv = None
        for j in range(k):
            w_j = _tap_weight(params, k, j).astype(jnp.float32)  # (Ep, Kp)
            term = jnp.einsum("ble,ek->blk", emb[:, j:j + p, :], w_j,
                              precision=hp)
            conv = term if conv is None else conv + term
        conv = jnp.maximum(conv + params[f"b{k}"][None], 0.0)
        pooled = jnp.max(conv, axis=1)                           # (B, Kp)
        logits = logits + jnp.dot(pooled, params[f"wf{k}"].astype(jnp.float32),
                                  precision=hp)
    return logits[:, :class_num]


if __name__ == "__main__":
    key = jax.random.PRNGKey(0)
    k_param, k_data = jax.random.split(key)

    vocab_size = 50
    class_num = 5
    batch, seq_len = 2, 8

    params = init_params(k_param, vocab_size, class_num)
    x_ids = jax.random.randint(k_data, (batch, seq_len), 0, vocab_size,
                               dtype=jnp.int32)

    logits = textcnn_forward(x_ids, params)
    jax.block_until_ready(logits)
    assert logits.shape == (batch, class_num)

    ref = textcnn_reference(x_ids, params)
    err = float(jnp.max(jnp.abs(logits - ref)))
    scale = float(jnp.max(jnp.abs(ref)))
    assert err <= 5e-2 * scale + 5e-2, (
        f"kernel/reference mismatch: max abs err {err} (scale {scale})")
    print("KERNEL_OK")
</pallas_src>

<mosaic_0001>
module attributes {stable_mosaic.version = 11 : i64} {
  func.func @probe_kernel(%arg0: memref<64x384xbf16, #tpu.memory_space<vmem>>, %arg1: memref<64x384xbf16, #tpu.memory_space<vmem>>) attributes {dimension_semantics = [], scalar_prefetch = 0 : i64, scratch_operands = 0 : i64, tpu.core_type = #tpu.core_type<tc>} {
    %c0 = arith.constant 0 : index
    %c0_0 = arith.constant 0 : index
    %0 = vector.load %arg0[%c0, %c0_0] : memref<64x384xbf16, #tpu.memory_space<vmem>>, vector<64x384xbf16>
    %c1_i32 = arith.constant 1 : i32
    %1 = tpu.dynamic_rotate %0 by %c1_i32 dim 0 : vector<64x384xbf16>, i32 -> vector<64x384xbf16>
    %c0_1 = arith.constant 0 : index
    %c0_2 = arith.constant 0 : index
    %2 = vector.load %arg1[%c0_1, %c0_2] : memref<64x384xbf16, #tpu.memory_space<vmem>>, vector<64x384xbf16>
    tpu.vector_store %arg1[%c0_1, %c0_2], %1 {strides = array<i32>} : memref<64x384xbf16, #tpu.memory_space<vmem>>, vector<64x384xbf16>,
    return
  }
}

module attributes {stable_mosaic.version = 11 : i64} {
  func.func @_textcnn_kernel(%arg0: i32, %arg1: memref<64x384xbf16, #tpu.memory_space<vmem>>, %arg2: memref<384x1152xbf16, #tpu.memory_space<vmem>>, %arg3: memref<384x1152xbf16, #tpu.memory_space<vmem>>, %arg4: memref<384x768xbf16, #tpu.memory_space<vmem>>, %arg5: memref<384x384xbf16, #tpu.memory_space<vmem>>, %arg6: memref<1x384xf32, #tpu.memory_space<vmem>>, %arg7: memref<1x384xf32, #tpu.memory_space<vmem>>, %arg8: memref<1x384xf32, #tpu.memory_space<vmem>>, %arg9: memref<384x128xbf16, #tpu.memory_space<vmem>>, %arg10: memref<384x128xbf16, #tpu.memory_space<vmem>>, %arg11: memref<384x128xbf16, #tpu.memory_space<vmem>>, %arg12: memref<1x128xf32, #tpu.memory_space<vmem>>, %arg13: memref<8x128xf32, #tpu.memory_space<vmem>>) attributes {dimension_semantics = [#tpu.dimension_semantics<parallel>], iteration_bounds = array<i64: 1>, scalar_prefetch = 0 : i64, scratch_operands = 0 : i64, tpu.core_type = #tpu.core_type<tc>, window_params = [{transform_indices = @transform_0, window_bounds = array<i64: 64, 384>}, {pipeline_mode = #tpu.pipeline_mode<synchronous>, transform_indices = @transform_1, window_bounds = array<i64: 384, 1152>}, {pipeline_mode = #tpu.pipeline_mode<synchronous>, transform_indices = @transform_2, window_bounds = array<i64: 384, 1152>}, {pipeline_mode = #tpu.pipeline_mode<synchronous>, transform_indices = @transform_3, window_bounds = array<i64: 384, 768>}, {pipeline_mode = #tpu.pipeline_mode<synchronous>, transform_indices = @transform_4, window_bounds = array<i64: 384, 384>}, {pipeline_mode = #tpu.pipeline_mode<synchronous>, transform_indices = @transform_5, window_bounds = array<i64: 1, 384>}, {pipeline_mode = #tpu.pipeline_mode<synchronous>, transform_indices = @transform_6, window_bounds = array<i64: 1, 384>}, {pipeline_mode = #tpu.pipeline_mode<synchronous>, transform_indices = @transform_7, window_bounds = array<i64: 1, 384>}, {pipeline_mode = #tpu.pipeline_mode<synchronous>, transform_indices = @transform_8, window_bounds = array<i64: 384, 128>}, {pipeline_mode = #tpu.pipeline_mode<synchronous>, transform_indices = @transform_9, window_bounds = array<i64: 384, 128>}, {pipeline_mode = #tpu.pipeline_mode<synchronous>, transform_indices = @transform_10, window_bounds = array<i64: 384, 128>}, {pipeline_mode = #tpu.pipeline_mode<synchronous>, transform_indices = @transform_11, window_bounds = array<i64: 1, 128>}, {transform_indices = @transform_12, window_bounds = array<i64: 8, 128>}]} {
    %c0 = arith.constant 0 : index
    %c0_0 = arith.constant 0 : index
    %0 = vector.load %arg1[%c0, %c0_0] : memref<64x384xbf16, #tpu.memory_space<vmem>>, vector<64x384xbf16>
    %c0_1 = arith.constant 0 : index
    %c0_2 = arith.constant 0 : index
    %1 = vector.load %arg2[%c0_1, %c0_2] : memref<384x1152xbf16, #tpu.memory_space<vmem>>, vector<384x1152xbf16>
    %cst = arith.constant dense<0.000000e+00> : vector<64x1152xf32>
    %2 = tpu.matmul %0, %1, %cst {dimension_numbers = #tpu.dot_dimension_numbers<[1], [0], [0], [1], [0, 0, 1, 1], [], []>} : vector<64x384xbf16>, vector<384x1152xbf16>, vector<64x1152xf32> -> vector<64x1152xf32>
    %cst_3 = arith.constant 0.000000e+00 : bf16
    %3 = vector.broadcast %cst_3 : bf16 to vector<1x384xbf16>
    %4 = vector.extract_strided_slice %0 {offsets = [1, 0], sizes = [63, 384], strides = [1, 1]} : vector<64x384xbf16> to vector<63x384xbf16>
    %5 = tpu.concatenate %4, %3 in 0 : vector<63x384xbf16>, vector<1x384xbf16> -> vector<64x384xbf16>
    %c0_4 = arith.constant 0 : index
    %c0_5 = arith.constant 0 : index
    %6 = vector.load %arg3[%c0_4, %c0_5] : memref<384x1152xbf16, #tpu.memory_space<vmem>>, vector<384x1152xbf16>
    %cst_6 = arith.constant dense<0.000000e+00> : vector<64x1152xf32>
    %7 = tpu.matmul %5, %6, %cst_6 {dimension_numbers = #tpu.dot_dimension_numbers<[1], [0], [0], [1], [0, 0, 1, 1], [], []>} : vector<64x384xbf16>, vector<384x1152xbf16>, vector<64x1152xf32> -> vector<64x1152xf32>
    %8 = arith.addf %2, %7 : vector<64x1152xf32>
    %cst_7 = arith.constant 0.000000e+00 : bf16
    %9 = vector.broadcast %cst_7 : bf16 to vector<2x384xbf16>
    %10 = vector.extract_strided_slice %0 {offsets = [2, 0], sizes = [62, 384], strides = [1, 1]} : vector<64x384xbf16> to vector<62x384xbf16>
    %11 = tpu.concatenate %10, %9 in 0 : vector<62x384xbf16>, vector<2x384xbf16> -> vector<64x384xbf16>
    %c0_8 = arith.constant 0 : index
    %c0_9 = arith.constant 0 : index
    %12 = vector.load %arg4[%c0_8, %c0_9] : memref<384x768xbf16, #tpu.memory_space<vmem>>, vector<384x768xbf16>
    %cst_10 = arith.constant dense<0.000000e+00> : vector<64x768xf32>
    %13 = tpu.matmul %11, %12, %cst_10 {dimension_numbers = #tpu.dot_dimension_numbers<[1], [0], [0], [1], [0, 0, 1, 1], [], []>} : vector<64x384xbf16>, vector<384x768xbf16>, vector<64x768xf32> -> vector<64x768xf32>
    %cst_11 = arith.constant 0.000000e+00 : bf16
    %14 = vector.broadcast %cst_11 : bf16 to vector<3x384xbf16>
    %15 = vector.extract_strided_slice %0 {offsets = [3, 0], sizes = [61, 384], strides = [1, 1]} : vector<64x384xbf16> to vector<61x384xbf16>
    %16 = tpu.concatenate %15, %14 in 0 : vector<61x384xbf16>, vector<3x384xbf16> -> vector<64x384xbf16>
    %c0_12 = arith.constant 0 : index
    %c0_13 = arith.constant 0 : index
    %17 = vector.load %arg5[%c0_12, %c0_13] : memref<384x384xbf16, #tpu.memory_space<vmem>>, vector<384x384xbf16>
    %cst_14 = arith.constant dense<0.000000e+00> : vector<64x384xf32>
    %18 = tpu.matmul %16, %17, %cst_14 {dimension_numbers = #tpu.dot_dimension_numbers<[1], [0], [0], [1], [0, 0, 1, 1], [], []>} : vector<64x384xbf16>, vector<384x384xbf16>, vector<64x384xf32> -> vector<64x384xf32>
    %19 = vector.extract_strided_slice %8 {offsets = [0, 0], sizes = [64, 384], strides = [1, 1]} : vector<64x1152xf32> to vector<64x384xf32>
    %20 = vector.extract_strided_slice %8 {offsets = [0, 384], sizes = [64, 384], strides = [1, 1]} : vector<64x1152xf32> to vector<64x384xf32>
    %21 = vector.extract_strided_slice %13 {offsets = [0, 0], sizes = [64, 384], strides = [1, 1]} : vector<64x768xf32> to vector<64x384xf32>
    %22 = arith.addf %20, %21 : vector<64x384xf32>
    %23 = vector.extract_strided_slice %8 {offsets = [0, 768], sizes = [64, 384], strides = [1, 1]} : vector<64x1152xf32> to vector<64x384xf32>
    %24 = vector.extract_strided_slice %13 {offsets = [0, 384], sizes = [64, 384], strides = [1, 1]} : vector<64x768xf32> to vector<64x384xf32>
    %25 = arith.addf %23, %24 : vector<64x384xf32>
    %26 = arith.addf %25, %18 : vector<64x384xf32>
    %27 = tpu.iota {dimensions = array<i32: 0>} : vector<8x384xi32>
    %c0_15 = arith.constant 0 : index
    %c0_16 = arith.constant 0 : index
    %28 = vector.load %arg6[%c0_15, %c0_16] : memref<1x384xf32, #tpu.memory_space<vmem>>, vector<1x384xf32>
    %29 = vector.broadcast %28 : vector<1x384xf32> to vector<64x384xf32>
    %30 = arith.addf %19, %29 : vector<64x384xf32>
    %cst_17 = arith.constant 0.000000e+00 : f32
    %31 = vector.broadcast %cst_17 : f32 to vector<64x384xf32>
    %32 = arith.maximumf %30, %31 : vector<64x384xf32>
    %33 = vector.shape_cast %32 : vector<64x384xf32> to vector<8x8x384xf32>
    %c7_i32 = arith.constant 7 : i32
    %34 = vector.broadcast %c7_i32 : i32 to vector<8x384xi32>
    %35 = arith.cmpi slt, %27, %34 : vector<8x384xi32>
    %36 = vector.shape_cast %35 : vector<8x384xi1> to vector<1x8x384xi1>
    %cst_18 = arith.constant 0.000000e+00 : f32
    %37 = vector.shape_cast %36 : vector<1x8x384xi1> to vector<1x8x384xi1>
    %38 = vector.broadcast %37 : vector<1x8x384xi1> to vector<8x8x384xi1>
    %39 = vector.broadcast %cst_18 : f32 to vector<8x8x384xf32>
    %40 = arith.select %38, %33, %39 : vector<8x8x384xi1>, vector<8x8x384xf32>
    %cst_19 = arith.constant dense<0xFF800000> : vector<8x384xf32>
    %41 = vector.multi_reduction <maximumf>, %40, %cst_19 [1] : vector<8x8x384xf32> to vector<8x384xf32>
    %42 = arith.truncf %41 : vector<8x384xf32> to vector<8x384xbf16>
    %c0_20 = arith.constant 0 : index
    %c0_21 = arith.constant 0 : index
    %43 = vector.load %arg7[%c0_20, %c0_21] : memref<1x384xf32, #tpu.memory_space<vmem>>, vector<1x384xf32>
    %44 = vector.broadcast %43 : vector<1x384xf32> to vector<64x384xf32>
    %45 = arith.addf %22, %44 : vector<64x384xf32>
    %cst_22 = arith.constant 0.000000e+00 : f32
    %46 = vector.broadcast %cst_22 : f32 to vector<64x384xf32>
    %47 = arith.maximumf %45, %46 : vector<64x384xf32>
    %48 = vector.shape_cast %47 : vector<64x384xf32> to vector<8x8x384xf32>
    %c6_i32 = arith.constant 6 : i32
    %49 = vector.broadcast %c6_i32 : i32 to vector<8x384xi32>
    %50 = arith.cmpi slt, %27, %49 : vector<8x384xi32>
    %51 = vector.shape_cast %50 : vector<8x384xi1> to vector<1x8x384xi1>
    %cst_23 = arith.constant 0.000000e+00 : f32
    %52 = vector.shape_cast %51 : vector<1x8x384xi1> to vector<1x8x384xi1>
    %53 = vector.broadcast %52 : vector<1x8x384xi1> to vector<8x8x384xi1>
    %54 = vector.broadcast %cst_23 : f32 to vector<8x8x384xf32>
    %55 = arith.select %53, %48, %54 : vector<8x8x384xi1>, vector<8x8x384xf32>
    %cst_24 = arith.constant dense<0xFF800000> : vector<8x384xf32>
    %56 = vector.multi_reduction <maximumf>, %55, %cst_24 [1] : vector<8x8x384xf32> to vector<8x384xf32>
    %57 = arith.truncf %56 : vector<8x384xf32> to vector<8x384xbf16>
    %c0_25 = arith.constant 0 : index
    %c0_26 = arith.constant 0 : index
    %58 = vector.load %arg8[%c0_25, %c0_26] : memref<1x384xf32, #tpu.memory_space<vmem>>, vector<1x384xf32>
    %59 = vector.broadcast %58 : vector<1x384xf32> to vector<64x384xf32>
    %60 = arith.addf %26, %59 : vector<64x384xf32>
    %cst_27 = arith.constant 0.000000e+00 : f32
    %61 = vector.broadcast %cst_27 : f32 to vector<64x384xf32>
    %62 = arith.maximumf %60, %61 : vector<64x384xf32>
    %63 = vector.shape_cast %62 : vector<64x384xf32> to vector<8x8x384xf32>
    %c5_i32 = arith.constant 5 : i32
    %64 = vector.broadcast %c5_i32 : i32 to vector<8x384xi32>
    %65 = arith.cmpi slt, %27, %64 : vector<8x384xi32>
    %66 = vector.shape_cast %65 : vector<8x384xi1> to vector<1x8x384xi1>
    %cst_28 = arith.constant 0.000000e+00 : f32
    %67 = vector.shape_cast %66 : vector<1x8x384xi1> to vector<1x8x384xi1>
    %68 = vector.broadcast %67 : vector<1x8x384xi1> to vector<8x8x384xi1>
    %69 = vector.broadcast %cst_28 : f32 to vector<8x8x384xf32>
    %70 = arith.select %68, %63, %69 : vector<8x8x384xi1>, vector<8x8x384xf32>
    %cst_29 = arith.constant dense<0xFF800000> : vector<8x384xf32>
    %71 = vector.multi_reduction <maximumf>, %70, %cst_29 [1] : vector<8x8x384xf32> to vector<8x384xf32>
    %72 = arith.truncf %71 : vector<8x384xf32> to vector<8x384xbf16>
    %c0_30 = arith.constant 0 : index
    %c0_31 = arith.constant 0 : index
    %73 = vector.load %arg9[%c0_30, %c0_31] : memref<384x128xbf16, #tpu.memory_space<vmem>>, vector<384x128xbf16>
    %cst_32 = arith.constant dense<0.000000e+00> : vector<8x128xf32>
    %74 = tpu.matmul %42, %73, %cst_32 {dimension_numbers = #tpu.dot_dimension_numbers<[1], [0], [0], [1], [0, 0, 1, 1], [], []>} : vector<8x384xbf16>, vector<384x128xbf16>, vector<8x128xf32> -> vector<8x128xf32>
    %c0_33 = arith.constant 0 : index
    %c0_34 = arith.constant 0 : index
    %75 = vector.load %arg10[%c0_33, %c0_34] : memref<384x128xbf16, #tpu.memory_space<vmem>>, vector<384x128xbf16>
    %cst_35 = arith.constant dense<0.000000e+00> : vector<8x128xf32>
    %76 = tpu.matmul %57, %75, %cst_35 {dimension_numbers = #tpu.dot_dimension_numbers<[1], [0], [0], [1], [0, 0, 1, 1], [], []>} : vector<8x384xbf16>, vector<384x128xbf16>, vector<8x128xf32> -> vector<8x128xf32>
    %77 = arith.addf %74, %76 : vector<8x128xf32>
    %c0_36 = arith.constant 0 : index
    %c0_37 = arith.constant 0 : index
    %78 = vector.load %arg11[%c0_36, %c0_37] : memref<384x128xbf16, #tpu.memory_space<vmem>>, vector<384x128xbf16>
    %cst_38 = arith.constant dense<0.000000e+00> : vector<8x128xf32>
    %79 = tpu.matmul %72, %78, %cst_38 {dimension_numbers = #tpu.dot_dimension_numbers<[1], [0], [0], [1], [0, 0, 1, 1], [], []>} : vector<8x384xbf16>, vector<384x128xbf16>, vector<8x128xf32> -> vector<8x128xf32>
    %80 = arith.addf %77, %79 : vector<8x128xf32>
    %c0_39 = arith.constant 0 : index
    %c0_40 = arith.constant 0 : index
    %81 = vector.load %arg12[%c0_39, %c0_40] : memref<1x128xf32, #tpu.memory_space<vmem>>, vector<1x128xf32>
    %82 = vector.broadcast %81 : vector<1x128xf32> to vector<8x128xf32>
    %83 = arith.addf %80, %82 : vector<8x128xf32>
    %c0_41 = arith.constant 0 : index
    %c0_42 = arith.constant 0 : index
    %84 = vector.load %arg13[%c0_41, %c0_42] : memref<8x128xf32, #tpu.memory_space<vmem>>, vector<8x128xf32>
    tpu.vector_store %arg13[%c0_41, %c0_42], %83 {strides = array<i32>} : memref<8x128xf32, #tpu.memory_space<vmem>>, vector<8x128xf32>,
    return
  }
  func.func @transform_0(%arg0: i32) -> (i32, i32) {
    %c0_i32 = arith.constant 0 : i32
    %c0_i32_0 = arith.constant 0 : i32
    return %arg0, %c0_i32 : i32, i32
  }
  func.func @transform_1(%arg0: i32) -> (i32, i32) {
    %c0_i32 = arith.constant 0 : i32
    %c0_i32_0 = arith.constant 0 : i32
    %c0_i32_1 = arith.constant 0 : i32
    return %c0_i32, %c0_i32_0 : i32, i32
  }
  func.func @transform_2(%arg0: i32) -> (i32, i32) {
    %c0_i32 = arith.constant 0 : i32
    %c0_i32_0 = arith.constant 0 : i32
    %c0_i32_1 = arith.constant 0 : i32
    return %c0_i32, %c0_i32_0 : i32, i32
  }
  func.func @transform_3(%arg0: i32) -> (i32, i32) {
    %c0_i32 = arith.constant 0 : i32
    %c0_i32_0 = arith.constant 0 : i32
    %c0_i32_1 = arith.constant 0 : i32
    return %c0_i32, %c0_i32_0 : i32, i32
  }
  func.func @transform_4(%arg0: i32) -> (i32, i32) {
    %c0_i32 = arith.constant 0 : i32
    %c0_i32_0 = arith.constant 0 : i32
    %c0_i32_1 = arith.constant 0 : i32
    return %c0_i32, %c0_i32_0 : i32, i32
  }
  func.func @transform_5(%arg0: i32) -> (i32, i32) {
    %c0_i32 = arith.constant 0 : i32
    %c0_i32_0 = arith.constant 0 : i32
    %c0_i32_1 = arith.constant 0 : i32
    return %c0_i32, %c0_i32_0 : i32, i32
  }
  func.func @transform_6(%arg0: i32) -> (i32, i32) {
    %c0_i32 = arith.constant 0 : i32
    %c0_i32_0 = arith.constant 0 : i32
    %c0_i32_1 = arith.constant 0 : i32
    return %c0_i32, %c0_i32_0 : i32, i32
  }
  func.func @transform_7(%arg0: i32) -> (i32, i32) {
    %c0_i32 = arith.constant 0 : i32
    %c0_i32_0 = arith.constant 0 : i32
    %c0_i32_1 = arith.constant 0 : i32
    return %c0_i32, %c0_i32_0 : i32, i32
  }
  func.func @transform_8(%arg0: i32) -> (i32, i32) {
    %c0_i32 = arith.constant 0 : i32
    %c0_i32_0 = arith.constant 0 : i32
    %c0_i32_1 = arith.constant 0 : i32
    return %c0_i32, %c0_i32_0 : i32, i32
  }
  func.func @transform_9(%arg0: i32) -> (i32, i32) {
    %c0_i32 = arith.constant 0 : i32
    %c0_i32_0 = arith.constant 0 : i32
    %c0_i32_1 = arith.constant 0 : i32
    return %c0_i32, %c0_i32_0 : i32, i32
  }
  func.func @transform_10(%arg0: i32) -> (i32, i32) {
    %c0_i32 = arith.constant 0 : i32
    %c0_i32_0 = arith.constant 0 : i32
    %c0_i32_1 = arith.constant 0 : i32
    return %c0_i32, %c0_i32_0 : i32, i32
  }
  func.func @transform_11(%arg0: i32) -> (i32, i32) {
    %c0_i32 = arith.constant 0 : i32
    %c0_i32_0 = arith.constant 0 : i32
    %c0_i32_1 = arith.constant 0 : i32
    return %c0_i32, %c0_i32_0 : i32, i32
  }
  func.func @transform_12(%arg0: i32) -> (i32, i32) {
    %c0_i32 = arith.constant 0 : i32
    %c0_i32_0 = arith.constant 0 : i32
    return %arg0, %c0_i32 : i32, i32
  }
}

</mosaic_0001>

<bundles_post_ra>
// kernel: tpu_custom_call.1
= control target key start
LH: loop header
LB: loop body
LE: loop exit
PB: predicated region body
PF: predicated region fallthrough
CT: control target
= control target key end

     0   :  { %17 = vsyncpa [#allocation3], 0  ;;  %s14582_s0 = inlined_call_operand.hbm [shape: bf16[64,384], index: 0, kind: input, shape index: {}]   ;;  %s14583_s1 = inlined_call_operand.hbm [shape: bf16[384,1152], index: 1, kind: input, shape index: {}]   ;;  %s14584_s2 = inlined_call_operand.hbm [shape: bf16[384,1152], index: 2, kind: input, shape index: {}]   ;;  %s14585_s3 = inlined_call_operand.hbm [shape: bf16[384,768], index: 3, kind: input, shape index: {}]   ;;  %s14586_s4 = inlined_call_operand.hbm [shape: bf16[384,384], index: 4, kind: input, shape index: {}]   ;;  %s14587_s5 = inlined_call_operand.vmem [shape: f32[1,384], index: 5, kind: input, shape index: {}]   ;;  %s14588_s6 = inlined_call_operand.hbm [shape: f32[1,384], index: 6, kind: input, shape index: {}]   ;;  %s14589_s7 = inlined_call_operand.vmem [shape: f32[1,384], index: 7, kind: input, shape index: {}]   ;;  %s14590_s8 = inlined_call_operand.hbm [shape: bf16[384,128], index: 8, kind: input, shape index: {}]   ;;  %s14591_s9 = inlined_call_operand.hbm [shape: bf16[384,128], index: 9, kind: input, shape index: {}]   ;;  %s14592_s10 = inlined_call_operand.hbm [shape: bf16[384,128], index: 10, kind: input, shape index: {}]   ;;  %s14593_s11 = inlined_call_operand.vmem [shape: f32[1,128], index: 11, kind: input, shape index: {}]   ;;  %s14594_s12 = inlined_call_operand.hbm [shape: f32[8,128], index: 12, kind: output, shape index: {}]  }
   0x1   :  { %18 = vsyncpa [#allocation6], 0 }
   0x2   :  { %19 = vsyncpa [#allocation9], 0 }
   0x3   :  { %20 = vsyncpa [#allocation12], 0 }
   0x4   :  { %21 = vsyncpa [#allocation15], 0  ;;  %s40_s23 = sshll.u32 %s14583_s1, 4  ;;  %s41_s23 = int_to_ptr.hbm [resolvable:$true] %s40_s23 }
   0x5   :  { %22 = vsyncpa [#allocation4], 0  ;;  %s12586_s24 = smov [#allocation5]   ;;  %s66_s28 = sshll.u32 %s14585_s3, 4  ;;  %s67_s28 = int_to_ptr.hbm [resolvable:$true] %s66_s28 }
   0x6   :  { %s42_s25 = sshll.u32 %s12586_s24, 4  ;;  %s12587_s29 = smov 576   ;;  %s43_s25 = int_to_ptr.vmem [resolvable:$true] %s42_s25 }
   0x7   :  { %s12588_s30 = smov 36   ;;  %s12589_s13 = smov [#allocation8]  }
   0x8   :  { %48 = dma.hbm_to_vmem [thread:$0]  %s41_s23, 27648, %s43_s25, [#allocation6], %s12587_s29, %s12587_s29, %s12588_s30  }
   0x9   :  { %s68_s14 = sshll.u32 %s12589_s13, 4  ;;  %s12590_s1 = smov 384   ;;  %s69_s14 = int_to_ptr.vmem [resolvable:$true] %s68_s14 }
   0xa   :  { %s12591_s15 = smov 24   ;;  %s95_s18 = sshll.u32 %s14588_s6, 4  ;;  %s96_s18 = int_to_ptr.hbm [resolvable:$true] %s95_s18 }
   0xb   :  { %74 = dma.hbm_to_vmem [thread:$0]  %s67_s28, 18432, %s69_s14, [#allocation9], %s12590_s1, %s12590_s1, %s12591_s15  }
   0xc   :  { %s12592_s19 = smov [#allocation11]   ;;  %s120_s22 = sshll.u32 %s14591_s9, 4  ;;  %s121_s22 = int_to_ptr.hbm [resolvable:$true] %s120_s22 }
   0xd   :  { %s97_s3 = sshll.u32 %s12592_s19, 4  ;;  %s12593_s23 = smov [#allocation14]   ;;  %s98_s3 = int_to_ptr.vmem [resolvable:$true] %s97_s3 }
   0xe   :  { %100 = dma.hbm_to_vmem [thread:$0]  %s96_s18, 48, %s98_s3, [#allocation12]  }
   0xf   :  { %s122_s24 = sshll.u32 %s12593_s23, 4  ;;  %s27_s27 = sshll.u32 %s14582_s0, 4  ;;  %s123_s24 = int_to_ptr.vmem [resolvable:$true] %s122_s24  ;;  %s28_s27 = int_to_ptr.hbm [resolvable:$true] %s27_s27 }
  0x10   :  { %s12594_s28 = smov 64   ;;  %s12595_s6 = smov 4  }
  0x11   :  { %128 = dma.hbm_to_vmem [thread:$0]  %s121_s22, 3072, %s123_s24, [#allocation15], %s12594_s28, %s12594_s28, %s12595_s6  }
  0x12   :  { %s12596_s13 = smov [#allocation2]   ;;  %s53_s15 = sshll.u32 %s14584_s2, 4  ;;  %s54_s15 = int_to_ptr.hbm [resolvable:$true] %s53_s15 }
  0x13   :  { %s29_s14 = sshll.u32 %s12596_s13, 4  ;;  %s12597_s16 = smov 192   ;;  %s30_s14 = int_to_ptr.vmem [resolvable:$true] %s29_s14 }
  0x14   :  { %s12598_s17 = smov 12   ;;  %s12599_s0 = smov [#allocation7]  }
  0x15   :  { %35 = dma.hbm_to_vmem [thread:$0]  %s28_s27, 1536, %s30_s14, [#allocation3], %s12597_s16, %s12597_s16, %s12598_s17  }
  0x16   :  { %s55_s18 = sshll.u32 %s12599_s0, 4  ;;  %s79_s20 = sshll.u32 %s14586_s4, 4  ;;  %s56_s18 = int_to_ptr.vmem [resolvable:$true] %s55_s18  ;;  %s80_s20 = int_to_ptr.hbm [resolvable:$true] %s79_s20 }
  0x17   :  { %61 = dma.hbm_to_vmem [thread:$0]  %s54_s15, 27648, %s56_s18, [#allocation6], %s12587_s29, %s12587_s29, %s12588_s30  }
  0x18   :  { %s107_s2 = sshll.u32 %s14590_s8, 4  ;;  %s12600_s23 = smov [#allocation10]   ;;  %s108_s2 = int_to_ptr.hbm [resolvable:$true] %s107_s2 }
  0x19   :  { %s81_s24 = sshll.u32 %s12600_s23, 4  ;;  %s12601_s25 = smov [#allocation13]   ;;  %s82_s24 = int_to_ptr.vmem [resolvable:$true] %s81_s24 }
  0x1a   :  { %87 = dma.hbm_to_vmem [thread:$0]  %s80_s20, 9216, %s82_s24, [#allocation9], %s12597_s16, %s12597_s16, %s12598_s17  }
  0x1b   :  { %s109_s26 = sshll.u32 %s12601_s25, 4  ;;  %s133_s4 = sshll.u32 %s14592_s10, 4  ;;  %s110_s26 = int_to_ptr.vmem [resolvable:$true] %s109_s26  ;;  %s134_s4 = int_to_ptr.hbm [resolvable:$true] %s133_s4 }
  0x1c   :  { %115 = dma.hbm_to_vmem [thread:$0]  %s108_s2, 3072, %s110_s26, [#allocation12], %s12594_s28, %s12594_s28, %s12595_s6  }
  0x1d   :  { %s12602_s29 = smov [#allocation16]  }
  0x1e   :  { %s135_s30 = sshll.u32 %s12602_s29, 4  ;;  %s136_s30 = int_to_ptr.vmem [resolvable:$true] %s135_s30 }
  0x1f   :  { %141 = dma.hbm_to_vmem [thread:$0]  %s134_s4, 3072, %s136_s30, [#allocation15], %s12594_s28, %s12594_s28, %s12595_s6  }
  0x20   :  { %12574 = dma.done.wait [#allocation3], 1536  }
  0x21   :  { %12575 = vsyncadd [#allocation3], 4294965760 }
  0x22   :  { %12576 = dma.done.wait [#allocation6], 55296  }
  0x23   :  { %12577 = vsyncadd [#allocation6], 4294912000 }
  0x24   :  { %12578 = dma.done.wait [#allocation9], 27648  }
  0x25   :  { %12579 = vsyncadd [#allocation9], 4294939648 }
  0x26   :  { %12580 = dma.done.wait [#allocation12], 3120  }
  0x27   :  { %12581 = vsyncadd [#allocation12], 4294964176 }
  0x28   :  { %12582 = dma.done.wait [#allocation15], 6144  }
  0x29   :  { %12583 = vsyncadd [#allocation15], 4294961152  ;;  %v8939_v0 = vld [vmem:[#allocation7 + $0x1f8] sm:$0xf]  ;;  %v11878_v1 = vld [vmem:[#allocation7 + $0x218] sm:$0xf0] }
  0x2a   :  { %v9227_v2 = vld [vmem:[#allocation7 + $0x438] sm:$0xf]  ;;  %v8940_v3 = vor.u32 %v11878_v1, %v8939_v0  ;;  %v11950_v4 = vld [vmem:[#allocation7 + $0x458] sm:$0xf0]  ;;  %v8941_v10 = vld [vmem:[#allocation7 + $0x21c] sm:$0xf0] }
  0x2b   :  { %v9515_v5 = vld [vmem:[#allocation7 + $0x678] sm:$0xf]  ;;  %v12022_v6 = vld [vmem:[#allocation7 + $0x698] sm:$0xf0]  ;;  %v9228_v7 = vor.u32 %v11950_v4, %v9227_v2  ;;  %v8903_v11 = vld [vmem:[#allocation7 + $0x1b0] sm:$0xf] }
  0x2c   :  { %v9516_v8 = vor.u32 %v12022_v6, %v9515_v5  ;;  %v11874_v9 = vld [vmem:[#allocation7 + $0x1fc] sm:$0xf]  ;;  %1944 = vmatpush.bf16.msra.mxu0 %v8940_v3  ;;  %v11869_v13 = vld [vmem:[#allocation7 + $0x1d0] sm:$0xf0]  ;;  %v9191_v14 = vld [vmem:[#allocation7 + $0x3f0] sm:$0xf] }
  0x2d   :  { %v8944_v12 = vor.u32 %v11874_v9, %v8941_v10  ;;  %v11941_v15 = vld [vmem:[#allocation7 + $0x410] sm:$0xf0]  ;;  %1973 = vmatpush.bf16.msra.mxu1 %v9228_v7  ;;  %v8904_v16 = vor.u32 %v11869_v13, %v8903_v11  ;;  %v9479_v18 = vld [vmem:[#allocation7 + $0x630] sm:$0xf]  ;;  %v8905_v22 = vld [vmem:[#allocation7 + $0x1d4] sm:$0xf0] }
  0x2e   :  { %2002 = vmatpush.bf16.msra.mxu2 %v9516_v8  ;;  %v9192_v17 = vor.u32 %v11941_v15, %v9191_v14  ;;  %v12013_v19 = vld [vmem:[#allocation7 + $0x650] sm:$0xf0]  ;;  %v8867_v23 = vld [vmem:[#allocation7 + $0x168] sm:$0xf]  ;;  %v11860_v24 = vld [vmem:[#allocation7 + $0x188] sm:$0xf0] }
  0x2f   :  { %v11865_v20 = vld [vmem:[#allocation7 + $0x1b4] sm:$0xf]  ;;  %2031 = vmatpush.bf16.msra.mxu3 %v8944_v12  ;;  %v9480_v21 = vor.u32 %v12013_v19, %v9479_v18  ;;  %v9155_v26 = vld [vmem:[#allocation7 + $0x3a8] sm:$0xf]  ;;  %v11932_v27 = vld [vmem:[#allocation7 + $0x3c8] sm:$0xf0]  ;;  %v8868_v29 = vor.u32 %v11860_v24, %v8867_v23 }
  0x30   :  { %v8908_v25 = vor.u32 %v11865_v20, %v8905_v22  ;;  %v9443_v28 = vld [vmem:[#allocation7 + $0x5e8] sm:$0xf]  ;;  %1945 = vmatpush.bf16.msra.mxu0 %v8904_v16  ;;  %v12004_v30 = vld [vmem:[#allocation7 + $0x608] sm:$0xf0]  ;;  %v8869_v32 = vld [vmem:[#allocation7 + $0x18c] sm:$0xf0]  ;;  %v9156_v33 = vor.u32 %v11932_v27, %v9155_v26 }
  0x31   :  { %v11856_v31 = vld [vmem:[#allocation7 + $0x16c] sm:$0xf]  ;;  %1974 = vmatpush.bf16.msra.mxu1 %v9192_v17  ;;  %v9444_v34 = vor.u32 %v12004_v30, %v9443_v28  ;;  %v8831_v35 = vld [vmem:[#allocation7 + $0x120] sm:$0xf]  ;;  %v11851_v36 = vld [vmem:[#allocation7 + $0x140] sm:$0xf0] }
  0x32   :  { %2003 = vmatpush.bf16.msra.mxu2 %v9480_v21  ;;  %v9119_v37 = vld [vmem:[#allocation7 + $0x360] sm:$0xf]  ;;  %v8872_v38 = vor.u32 %v11856_v31, %v8869_v32  ;;  %v11923_v39 = vld [vmem:[#allocation7 + $0x380] sm:$0xf0]  ;;  %v8833_v43 = vld [vmem:[#allocation7 + $0x144] sm:$0xf0]  ;;  %v8832_v44 = vor.u32 %v11851_v36, %v8831_v35 }
  0x33   :  { %2032 = vmatpush.bf16.msra.mxu3 %v8908_v25  ;;  %v9407_v40 = vld [vmem:[#allocation7 + $0x5a0] sm:$0xf]  ;;  %v11995_v41 = vld [vmem:[#allocation7 + $0x5c0] sm:$0xf0]  ;;  %v9120_v45 = vor.u32 %v11923_v39, %v9119_v37  ;;  %v8795_v47 = vld [vmem:[#allocation7 + $0xd8] sm:$0xf] }
  0x34   :  { %v11847_v42 = vld [vmem:[#allocation7 + $0x124] sm:$0xf]  ;;  %1946 = vmatpush.bf16.msra.mxu0 %v8868_v29  ;;  %v9408_v46 = vor.u32 %v11995_v41, %v9407_v40  ;;  %v11842_v48 = vld [vmem:[#allocation7 + $0xf8] sm:$0xf0]  ;;  %v9083_v49 = vld [vmem:[#allocation7 + $0x318] sm:$0xf] }
  0x35   :  { %1975 = vmatpush.bf16.msra.mxu1 %v9156_v33  ;;  %v8836_v50 = vor.u32 %v11847_v42, %v8833_v43  ;;  %v11914_v51 = vld [vmem:[#allocation7 + $0x338] sm:$0xf0]  ;;  %v9371_v52 = vld [vmem:[#allocation7 + $0x558] sm:$0xf]  ;;  %v8797_v55 = vld [vmem:[#allocation7 + $0xfc] sm:$0xf0]  ;;  %v8796_v56 = vor.u32 %v11842_v48, %v8795_v47 }
  0x36   :  { %2004 = vmatpush.bf16.msra.mxu2 %v9444_v34  ;;  %v11986_v53 = vld [vmem:[#allocation7 + $0x578] sm:$0xf0]  ;;  %v8759_v57 = vld [vmem:[#allocation7 + $0x90] sm:$0xf]  ;;  %v11833_v58 = vld [vmem:[#allocation7 + $0xb0] sm:$0xf0]  ;;  %v9084_v59 = vor.u32 %v11914_v51, %v9083_v49 }
  0x37   :  { %2033 = vmatpush.bf16.msra.mxu3 %v8872_v38  ;;  %v11838_v54 = vld [vmem:[#allocation7 + $0xdc] sm:$0xf]  ;;  %v9372_v60 = vor.u32 %v11986_v53, %v9371_v52  ;;  %v9047_v61 = vld [vmem:[#allocation7 + $0x2d0] sm:$0xf]  ;;  %v11905_v62 = vld [vmem:[#allocation7 + $0x2f0] sm:$0xf0]  ;;  %v8760_v9 = vor.u32 %v11833_v58, %v8759_v57 }
  0x38   :  { %1947 = vmatpush.bf16.msra.mxu0 %v8832_v44  ;;  %v9335_v63 = vld [vmem:[#allocation7 + $0x510] sm:$0xf]  ;;  %v8800_v0 = vor.u32 %v11838_v54, %v8797_v55  ;;  %v11977_v1 = vld [vmem:[#allocation7 + $0x530] sm:$0xf0]  ;;  %v8761_v3 = vld [vmem:[#allocation7 + $0xb4] sm:$0xf0]  ;;  %v9048_v13 = vor.u32 %v11905_v62, %v9047_v61 }
  0x39   :  { %1976 = vmatpush.bf16.msra.mxu1 %v9120_v45  ;;  %v11829_v2 = vld [vmem:[#allocation7 + $0x94] sm:$0xf]  ;;  %v8723_v4 = vld [vmem:[#allocation7 + $0x48] sm:$0xf]  ;;  %v11824_v5 = vld [vmem:[#allocation7 + $0x68] sm:$0xf0]  ;;  %v9336_v14 = vor.u32 %v11977_v1, %v9335_v63 }
  0x3a   :  { %2005 = vmatpush.bf16.msra.mxu2 %v9408_v46  ;;  %v12711_v6 = vld [vmem:[#allocation7 + $0x288] sm:$0xf]  ;;  %v11896_v7 = vld [vmem:[#allocation7 + $0x2a8] sm:$0xf0]  ;;  %v8725_v12 = vld [vmem:[#allocation7 + $0x6c] sm:$0xf0]  ;;  %v8764_v18 = vor.u32 %v11829_v2, %v8761_v3  ;;  %v8724_v27 = vor.u32 %v11824_v5, %v8723_v4 }
  0x3b   :  { %2034 = vmatpush.bf16.msra.mxu3 %v8836_v50  ;;  %v9299_v8 = vld [vmem:[#allocation7 + $0x4c8] sm:$0xf]  ;;  %v11968_v10 = vld [vmem:[#allocation7 + $0x4e8] sm:$0xf0]  ;;  %v12715_v15 = vld [vmem:[#allocation7] sm:$0xf]  ;;  %v9012_v28 = vor.u32 %v11896_v7, %v12711_v6 }
  0x3c   :  { %1948 = vmatpush.bf16.msra.mxu0 %v8796_v56  ;;  %v12713_v11 = vld [vmem:[#allocation7 + $0x4c] sm:$0xf]  ;;  %v12717_v16 = vld [vmem:[#allocation7 + $0x20] sm:$0xf0]  ;;  %v12719_v17 = vld [vmem:[#allocation7 + $0x240] sm:$0xf]  ;;  %v9300_v29 = vor.u32 %v11968_v10, %v9299_v8 }
  0x3d   :  { %1977 = vmatpush.bf16.msra.mxu1 %v9084_v59  ;;  %v12721_v19 = vld [vmem:[#allocation7 + $0x260] sm:$0xf0]  ;;  %v8639_v20 = vld [vmem:[#allocation2] sm:$0xf]  ;;  %v11584_v21 = vld [vmem:[#allocation2 + $0x8] sm:$0xf0]  ;;  %v8728_v34 = vor.u32 %v12713_v11, %v8725_v12  ;;  %v8688_v42 = vor.u32 %v12717_v16, %v12715_v15 }
  0x3e   :  { %2006 = vmatpush.bf16.msra.mxu2 %v9372_v60  ;;  %v12723_v22 = vld [vmem:[#allocation7 + $0x480] sm:$0xf]  ;;  %v12725_v23 = vld [vmem:[#allocation7 + $0x4a0] sm:$0xf0]  ;;  %v8651_v24 = vld [vmem:[#allocation2 + $0x18] sm:$0xf]  ;;  %v12727_v26 = vor.u32 %v11584_v21, %v8639_v20  ;;  %v8976_v43 = vor.u32 %v12721_v19, %v12719_v17 }
  0x3f   :  { %2035 = vmatpush.bf16.msra.mxu3 %v8800_v0  ;;  %v11587_v25 = vld [vmem:[#allocation2 + $0x20] sm:$0xf0]  ;;  %vm489_vm0 = vsmask.f32 7424  ;;  %v8641_v32 = vld [vmem:[#allocation2 + $0xc] sm:$0xf0]  ;;  %v9264_v53 = vor.u32 %v12725_v23, %v12723_v22 }
  0x40   :  { %14653 = vst [vmem:[#allocation24_spill] sm:$0xff] %v12727_v26  ;;  %1949 = vmatpush.bf16.msra.mxu0 %v8760_v9  ;;  %v12730_v30 = vor.u32 %v11587_v25, %v8651_v24  ;;  %v11583_v31 = vld [vmem:[#allocation2 + $0x4] sm:$0xf]  ;;  %v11586_v33 = vld [vmem:[#allocation2 + $0x1c] sm:$0xf]  ;;  %v14618_v37 = vshrl.u32 %v12727_v26, 16 }
  0x41   :  { %1978 = vmatpush.bf16.msra.mxu1 %v9048_v13  ;;  %v11811_v35 = vld [vmem:[#allocation7 + $0x4] sm:$0xf]  ;;  %v8689_v36 = vld [vmem:[#allocation7 + $0x24] sm:$0xf0]  ;;  %v14617_v38 = vshll.u32 %v12727_v26, 16  ;;  %v12735_v40 = vor.u32 %v11583_v31, %v8641_v32  ;;  %vm595_vm1 = vcmask 1047552  }
  0x42   :  { %14654 = vst [vmem:[#allocation25_spill] sm:$0xff] %v12730_v30  ;;  %2007 = vmatpush.bf16.msra.mxu2 %v9336_v14  ;;  %v8653_v39 = vld [vmem:[#allocation2 + $0x24] sm:$0xf0]  ;;  %v14615_v44 = vshll.u32 %v12730_v30, 16  ;;  %v11585_v46 = vld [vmem:[#allocation2 + $0x10] sm:$0xf0]  ;;  %v8692_v63 = vor.u32 %v11811_v35, %v8689_v36  ;;  %vm596_vm2 = vmand %vm595_vm1, %vm489_vm0 }
  0x43   :  { %14655 = vst [vmem:[#allocation26_spill] sm:$0xff] %v12735_v40  ;;  %v8647_v41 = vld [vmem:[#allocation2 + $0x8] sm:$0xf]  ;;  %2036 = vmatpush.bf16.msra.mxu3 %v8764_v18  ;;  %v12742_v45 = vor.u32 %v11586_v33, %v8653_v39  ;;  %v8659_v47 = vld [vmem:[#allocation2 + $0x20] sm:$0xf]  ;;  %v495_v48 = vrot.slane %v14617_v38, 1 }
  0x44   :  { %v14614_v49 = vshrl.u32 %v12735_v40, 16  ;;  %v14613_v50 = vshll.u32 %v12735_v40, 16  ;;  %v11588_v51 = vld [vmem:[#allocation2 + $0x28] sm:$0xf0]  ;;  %v12748_v52 = vor.u32 %v11585_v46, %v8647_v41  ;;  %1950 = vmatpush.bf16.msra.mxu0 %v8724_v27  ;;  %v12754_v54 = vrot.slane %v14615_v44, 1  ;;  %s12603_s14 = smov [#allocation17]  }
  0x45   :  { %14656 = vst [vmem:[#allocation27_spill] sm:$0xff] %v12742_v45  ;;  %v14611_v55 = vshll.u32 %v12742_v45, 16  ;;  %v12757_v56 = vor.u32 %v11588_v51, %v8659_v47  ;;  %v11946_v57 = vld [vmem:[#allocation7 + $0x43c] sm:$0xf]  ;;  %v9229_v58 = vld [vmem:[#allocation7 + $0x45c] sm:$0xf0]  ;;  %1979 = vmatpush.bf16.msra.mxu1 %v9012_v28  ;;  %v496_v59 = vor.u32 %v495_v48, %v14618_v37 }
  0x46   :  { %14657 = vst [vmem:[#allocation28_spill] sm:$0xff] %v12748_v52  ;;  %2008 = vmatpush.bf16.msra.mxu2 %v9300_v29  ;;  %v507_v60 = vrot.slane %v14613_v50, 1  ;;  %v14610_v61 = vshrl.u32 %v12748_v52, 16  ;;  %v14609_v62 = vshll.u32 %v12748_v52, 16  ;;  %v9232_v2 = vor.u32 %v11946_v57, %v9229_v58  ;;  %v11937_v3 = vld [vmem:[#allocation7 + $0x3f4] sm:$0xf] }
  0x47   :  { %14658 = vst [vmem:[#allocation29_spill] sm:$0xff] %v12757_v56  ;;  %2037 = vmatpush.bf16.msra.mxu3 %v8728_v34  ;;  %v512_v0 = vrot.slane %v14611_v55, 1  ;;  %v14607_v1 = vshll.u32 %v12757_v56, 16  ;;  %v8663_v4 = vld [vmem:[#allocation2 + $0x30] sm:$0xf]  ;;  %v12774_v9 = vsel %vm489_vm0, %v496_v59, %v12754_v54  ;;  %v14616_v25 = vshrl.u32 %v12730_v30, 16 }
  0x48   :  { %v508_v5 = vor.u32 %v507_v60, %v14614_v49  ;;  %v519_v6 = vrot.slane %v14609_v62, 1  ;;  %v9193_v7 = vld [vmem:[#allocation7 + $0x414] sm:$0xf0]  ;;  %v11590_v8 = vld [vmem:[#allocation2 + $0x38] sm:$0xf0]  ;;  %1951 = vmatpush.bf16.msra.mxu0 %v8688_v42  ;;  %v14612_v27 = vshrl.u32 %v12742_v45, 16 }
  0x49   :  { %v524_v10 = vrot.slane %v14607_v1, 1  ;;  %1980 = vmatpush.bf16.msra.mxu1 %v8976_v43  ;;  %v12783_v13 = vor.u32 %v11590_v8, %v8663_v4  ;;  %v11589_v14 = vld [vmem:[#allocation2 + $0x34] sm:$0xf]  ;;  %v8665_v15 = vld [vmem:[#allocation2 + $0x3c] sm:$0xf0]  ;;  %v9196_v16 = vor.u32 %v11937_v3, %v9193_v7  ;;  %v14608_v34 = vshrl.u32 %v12757_v56, 16 }
  0x4a   :  { %2009 = vmatpush.bf16.msra.mxu2 %v9264_v53  ;;  %v12779_v11 = vsel %vm489_vm0, %v508_v5, %v512_v0  ;;  %v520_v12 = vor.u32 %v519_v6, %v14610_v61  ;;  %v8671_v17 = vld [vmem:[#allocation2 + $0x38] sm:$0xf]  ;;  %v11591_v18 = vld [vmem:[#allocation2 + $0x40] sm:$0xf0]  ;;  %v11928_v20 = vld [vmem:[#allocation7 + $0x3ac] sm:$0xf]  ;;  %v12791_v22 = vor.u32 %v11589_v14, %v8665_v15  ;;  %v536_v3 = vor.u32 %v14612_v27, %v512_v0 }
  0x4b   :  { %14659 = vst [vmem:[#allocation30_spill] sm:$0xff] %v12783_v13  ;;  %2038 = vmatpush.bf16.msra.mxu3 %v8692_v63  ;;  %1952 = vmatmul.bf16.vlgmr.msra.gmra.mxu0 %v12774_v9  ;;  %v9157_v21 = vld [vmem:[#allocation7 + $0x3cc] sm:$0xf0]  ;;  %v14605_v23 = vshll.u32 %v12783_v13, 16  ;;  %v12795_v24 = vor.u32 %v11591_v18, %v8671_v17  ;;  %v11919_v29 = vld [vmem:[#allocation7 + $0x364] sm:$0xf]  ;;  %v544_v4 = vor.u32 %v14608_v34, %v524_v10 }
  0x4c   :  { %2060 = vmatpush.bf16.msrb.mxu0 %v9232_v2  ;;  %v12787_v19 = vsel %vm489_vm0, %v520_v12, %v524_v10  ;;  %1981 = vmatmul.bf16.vlgmr.msra.gmra.mxu1 %v12779_v11  ;;  %14660 = vst [vmem:[#allocation31_spill] sm:$0xff] %v12791_v22  ;;  %v9160_v28 = vor.u32 %v11928_v20, %v9157_v21  ;;  %v9121_v31 = vld [vmem:[#allocation7 + $0x384] sm:$0xf0]  ;;  %v12018_v32 = vld [vmem:[#allocation7 + $0x67c] sm:$0xf]  ;;  %v14603_v33 = vshll.u32 %v12791_v22, 16 }
  0x4d   :  { %2010 = vmatmul.bf16.vlgmr.msra.gmra.mxu2 %v12787_v19  ;;  %14661 = vst [vmem:[#allocation32_spill] sm:$0xff] %v12795_v24  ;;  %v9517_v35 = vld [vmem:[#allocation7 + $0x69c] sm:$0xf0]  ;;  %v12803_v39 = vrot.slane %v14605_v23, 1  ;;  %v14601_v41 = vshll.u32 %v12795_v24, 16  ;;  %v9124_v47 = vor.u32 %v11919_v29, %v9121_v31  ;;  %v528_v2 = vor.u32 %v14616_v25, %v12754_v54  ;;  %s8621_s1 = sshll.u32 %s12603_s14, 4  ;;  %s8622_s1 = int_to_ptr.vmem [resolvable:$true] %s8621_s1 }
  0x4e   :  { %2039 = vmatmul.bf16.vlgmr.msra.gmra.mxu3 %v12774_v9  ;;  %v8947_v36 = vld [vmem:[#allocation7 + $0x200] sm:$0xf]  ;;  %v9520_v42 = vor.u32 %v12018_v32, %v9517_v35  ;;  %v11879_v43 = vld [vmem:[#allocation7 + $0x220] sm:$0xf0]  ;;  %v11910_v48 = vld [vmem:[#allocation7 + $0x31c] sm:$0xf] }
  0x4f   :  { %v9235_v46 = vld [vmem:[#allocation7 + $0x440] sm:$0xf]  ;;  %v8948_v51 = vor.u32 %v11879_v43, %v8947_v36  ;;  %v11951_v53 = vld [vmem:[#allocation7 + $0x460] sm:$0xf0]  ;;  %v12009_v57 = vld [vmem:[#allocation7 + $0x634] sm:$0xf]  ;;  %v12823_v36 = vsel %vm489_vm0, %v528_v2, %v12803_v39 }
  0x50   :  { %2061 = vmatpush.bf16.msrb.mxu0 %v9196_v16  ;;  %v9085_v58 = vld [vmem:[#allocation7 + $0x33c] sm:$0xf0]  ;;  %2089 = vmatpush.bf16.msrb.mxu1 %v9520_v42  ;;  %v9236_v59 = vor.u32 %v11951_v53, %v9235_v46  ;;  %v9481_v60 = vld [vmem:[#allocation7 + $0x654] sm:$0xf0]  ;;  %v11870_v6 = vld [vmem:[#allocation7 + $0x1d8] sm:$0xf0] }
  0x51   :  { %v8911_v63 = vld [vmem:[#allocation7 + $0x1b8] sm:$0xf]  ;;  %2118 = vmatpush.bf16.msrb.mxu2 %v8948_v51  ;;  %v9484_v5 = vor.u32 %v12009_v57, %v9481_v60  ;;  %v11942_v8 = vld [vmem:[#allocation7 + $0x418] sm:$0xf0]  ;;  %v12815_v12 = vrot.slane %v14603_v33, 1  ;;  %v12819_v14 = vrot.slane %v14601_v41, 1  ;;  %v9088_v18 = vor.u32 %v11910_v48, %v9085_v58 }
  0x52   :  { %v9199_v7 = vld [vmem:[#allocation7 + $0x3f8] sm:$0xf]  ;;  %v8675_v54 = vld [vmem:[#allocation2 + $0x48] sm:$0xf]  ;;  %v11593_v15 = vld [vmem:[#allocation2 + $0x50] sm:$0xf0]  ;;  %2147 = vmatpush.bf16.msrb.mxu3 %v9236_v59  ;;  %v8912_v0 = vor.u32 %v11870_v6, %v8911_v63 }
  0x53   :  { %v9200_v16 = vor.u32 %v11942_v8, %v9199_v7  ;;  %v11901_v17 = vld [vmem:[#allocation7 + $0x2d4] sm:$0xf]  ;;  %v12000_v10 = vld [vmem:[#allocation7 + $0x5ec] sm:$0xf]  ;;  %v9445_v20 = vld [vmem:[#allocation7 + $0x60c] sm:$0xf0]  ;;  %v12831_v48 = vsel %vm489_vm0, %v544_v4, %v12819_v14  ;;  %v12833_v59 = vor.u32 %v11593_v15, %v8675_v54 }
  0x54   :  { %2062 = vmatpush.bf16.msrb.mxu0 %v9160_v28  ;;  %v8875_v21 = vld [vmem:[#allocation7 + $0x170] sm:$0xf]  ;;  %v11861_v28 = vld [vmem:[#allocation7 + $0x190] sm:$0xf0]  ;;  %2090 = vmatpush.bf16.msrb.mxu1 %v9484_v5  ;;  %v9049_v29 = vld [vmem:[#allocation7 + $0x2f4] sm:$0xf0]  ;;  %v9448_v31 = vor.u32 %v12000_v10, %v9445_v20 }
  0x55   :  { %v9163_v32 = vld [vmem:[#allocation7 + $0x3b0] sm:$0xf]  ;;  %v11933_v35 = vld [vmem:[#allocation7 + $0x3d0] sm:$0xf0]  ;;  %v11592_v42 = vld [vmem:[#allocation2 + $0x4c] sm:$0xf]  ;;  %2119 = vmatpush.bf16.msrb.mxu2 %v8912_v0  ;;  %v8876_v58 = vor.u32 %v11861_v28, %v8875_v21  ;;  %v9052_v60 = vor.u32 %v11901_v17, %v9049_v29 }
  0x56   :  { %v11991_v43 = vld [vmem:[#allocation7 + $0x5a4] sm:$0xf]  ;;  %v9409_v46 = vld [vmem:[#allocation7 + $0x5c4] sm:$0xf0]  ;;  %v8677_v51 = vld [vmem:[#allocation2 + $0x54] sm:$0xf0]  ;;  %2148 = vmatpush.bf16.msrb.mxu3 %v9200_v16  ;;  %v9164_v63 = vor.u32 %v11933_v35, %v9163_v32 }
  0x57   :  { %v8683_v53 = vld [vmem:[#allocation2 + $0x50] sm:$0xf]  ;;  %v11594_v57 = vld [vmem:[#allocation2 + $0x58] sm:$0xf0]  ;;  %14662 = vst [vmem:[#allocation33_spill] sm:$0xff] %v12833_v59  ;;  %v14606_v54 = vshrl.u32 %v12783_v13, 16  ;;  %v12840_v15 = vor.u32 %v11592_v42, %v8677_v51 }
  0x58   :  { %2063 = vmatpush.bf16.msrb.mxu0 %v9124_v47  ;;  %v12827_v47 = vsel %vm489_vm0, %v536_v3, %v12815_v12  ;;  %v8839_v2 = vld [vmem:[#allocation7 + $0x128] sm:$0xf]  ;;  %v11852_v5 = vld [vmem:[#allocation7 + $0x148] sm:$0xf0]  ;;  %2091 = vmatpush.bf16.msrb.mxu1 %v9448_v31  ;;  %v9412_v3 = vor.u32 %v11991_v43, %v9409_v46  ;;  %v11982_v4 = vld [vmem:[#allocation7 + $0x55c] sm:$0xf]  ;;  %v12842_v0 = vor.u32 %v11594_v57, %v8683_v53 }
  0x59   :  { %v9127_v6 = vld [vmem:[#allocation7 + $0x368] sm:$0xf]  ;;  %v11924_v7 = vld [vmem:[#allocation7 + $0x388] sm:$0xf0]  ;;  %v9373_v8 = vld [vmem:[#allocation7 + $0x57c] sm:$0xf0]  ;;  %2120 = vmatpush.bf16.msrb.mxu2 %v8876_v58  ;;  %v8840_v16 = vor.u32 %v11852_v5, %v8839_v2 }
  0x5a   :  { %14663 = vst [vmem:[#allocation34_spill] sm:$0xff] %v12840_v15  ;;  %v11892_v17 = vld [vmem:[#allocation7 + $0x28c] sm:$0xf]  ;;  %v9013_v10 = vld [vmem:[#allocation7 + $0x2ac] sm:$0xf0]  ;;  %v14604_v20 = vshrl.u32 %v12791_v22, 16  ;;  %2149 = vmatpush.bf16.msrb.mxu3 %v9164_v63  ;;  %v9128_v21 = vor.u32 %v11924_v7, %v9127_v6  ;;  %v9376_v32 = vor.u32 %v11982_v4, %v9373_v8 }
  0x5b   :  { %1957 = vmatmul.bf16.gmra.mxu0 %v12823_v36  ;;  %14664 = vst [vmem:[#allocation35_spill] sm:$0xff] %v12842_v0  ;;  %v9016_v28 = vor.u32 %v11892_v17, %v9013_v10  ;;  %v8803_v29 = vld [vmem:[#allocation7 + $0xe0] sm:$0xf]  ;;  %v11843_v31 = vld [vmem:[#allocation7 + $0x100] sm:$0xf0]  ;;  %v14595_v57 = vshll.u32 %v12840_v15, 16  ;;  %v552_v17 = vor.u32 %v14606_v54, %v12803_v39 }
  0x5c   :  { %2064 = vmatpush.bf16.msrb.mxu0 %v9088_v18  ;;  %1986 = vmatmul.bf16.gmra.mxu1 %v12827_v47  ;;  %v14596_v18 = vshll.u32 %v12833_v59, 16  ;;  %v9091_v35 = vld [vmem:[#allocation7 + $0x320] sm:$0xf]  ;;  %v11915_v42 = vld [vmem:[#allocation7 + $0x340] sm:$0xf0]  ;;  %v14602_v58 = vshrl.u32 %v12795_v24, 16 }
  0x5d   :  { %2015 = vmatmul.bf16.gmra.mxu2 %v12831_v48  ;;  %2092 = vmatpush.bf16.msrb.mxu1 %v9412_v3  ;;  %v11973_v43 = vld [vmem:[#allocation7 + $0x514] sm:$0xf]  ;;  %v9337_v46 = vld [vmem:[#allocation7 + $0x534] sm:$0xf0]  ;;  %v11883_v51 = vld [vmem:[#allocation7 + $0x244] sm:$0xf]  ;;  %v9092_v63 = vor.u32 %v11915_v42, %v9091_v35 }
  0x5e   :  { %2044 = vmatmul.bf16.gmra.mxu3 %v12823_v36  ;;  %v8977_v53 = vld [vmem:[#allocation7 + $0x264] sm:$0xf0]  ;;  %v14597_v2 = vshll.u32 %v12842_v0, 16  ;;  %2121 = vmatpush.bf16.msrb.mxu2 %v8840_v16  ;;  %v8767_v5 = vld [vmem:[#allocation7 + $0x98] sm:$0xf]  ;;  %v9340_v7 = vor.u32 %v11973_v43, %v9337_v46  ;;  %v556_v10 = vrot.slane %v14596_v18, 1  ;;  %v560_v16 = vor.u32 %v14604_v20, %v12815_v12 }
  0x5f   :  { %2150 = vmatpush.bf16.msrb.mxu3 %v9128_v21  ;;  %v11834_v3 = vld [vmem:[#allocation7 + $0xb8] sm:$0xf0]  ;;  %v8980_v6 = vor.u32 %v11883_v51, %v8977_v53  ;;  %v9055_v4 = vld [vmem:[#allocation7 + $0x2d8] sm:$0xf]  ;;  %v11964_v21 = vld [vmem:[#allocation7 + $0x4cc] sm:$0xf] }
  0x60   :  { %2065 = vmatpush.bf16.msrb.mxu0 %v9052_v60  ;;  %v8804_v60 = vor.u32 %v11843_v31, %v8803_v29  ;;  %v11906_v8 = vld [vmem:[#allocation7 + $0x2f8] sm:$0xf0]  ;;  %v564_v29 = vrot.slane %v14595_v57, 1  ;;  %v568_v31 = vor.u32 %v14602_v58, %v12819_v14  ;;  %v8768_v39 = vor.u32 %v11834_v3, %v8767_v5  ;;  %v8731_v42 = vld [vmem:[#allocation7 + $0x50] sm:$0xf]  ;;  %s8623_s16 = sshll.u32 %s14594_s12, 4  ;;  %s8624_s16 = int_to_ptr.hbm [resolvable:$true] %s8623_s16 }
  0x61   :  { %2093 = vmatpush.bf16.msrb.mxu1 %v9376_v32  ;;  %v572_v32 = vrot.slane %v14597_v2, 1  ;;  %v9056_v35 = vor.u32 %v11906_v8, %v9055_v4  ;;  %v11825_v43 = vld [vmem:[#allocation7 + $0x70] sm:$0xf0]  ;;  %v9019_v46 = vld [vmem:[#allocation7 + $0x290] sm:$0xf]  ;;  %v12865_v53 = vsel %vm489_vm0, %v552_v17, %v556_v10  ;;  %vm7828_vm4 = vcmask 1041409  }
  0x62   :  { %2122 = vmatpush.bf16.msrb.mxu2 %v8804_v60  ;;  %v11897_v51 = vld [vmem:[#allocation7 + $0x2b0] sm:$0xf0]  ;;  %v11955_v57 = vld [vmem:[#allocation7 + $0x484] sm:$0xf]  ;;  %v9265_v18 = vld [vmem:[#allocation7 + $0x4a4] sm:$0xf0]  ;;  %v12868_v14 = vsel %vm489_vm0, %v560_v16, %v564_v29 }
  0x63   :  { %2151 = vmatpush.bf16.msrb.mxu3 %v9092_v63  ;;  %v12871_v60 = vsel %vm489_vm0, %v568_v31, %v572_v32  ;;  %v8732_v63 = vor.u32 %v11825_v43, %v8731_v42  ;;  %v9020_v5 = vor.u32 %v11897_v51, %v9019_v46  ;;  %v8695_v3 = vld [vmem:[#allocation7 + $0x8] sm:$0xf]  ;;  %v11888_v8 = vld [vmem:[#allocation7 + $0x268] sm:$0xf0]  ;;  %v9523_v16 = vld [vmem:[#allocation7 + $0x680] sm:$0xf] }
  0x64   :  { %2066 = vmatpush.bf16.msrb.mxu0 %v9016_v28  ;;  %v9301_v28 = vld [vmem:[#allocation7 + $0x4ec] sm:$0xf0]  ;;  %v8983_v4 = vld [vmem:[#allocation7 + $0x248] sm:$0xf]  ;;  %v14599_v42 = vshrl.u32 %v12840_v15, 16  ;;  %v14598_v43 = vshrl.u32 %v12842_v0, 16 }
  0x65   :  { %2094 = vmatpush.bf16.msrb.mxu1 %v9340_v7  ;;  %v9304_v12 = vor.u32 %v11964_v21, %v9301_v28  ;;  %v9268_v7 = vor.u32 %v11955_v57, %v9265_v18  ;;  %v12023_v21 = vld [vmem:[#allocation7 + $0x6a0] sm:$0xf0]  ;;  %v9487_v28 = vld [vmem:[#allocation7 + $0x638] sm:$0xf]  ;;  %v8984_v31 = vor.u32 %v11888_v8, %v8983_v4  ;;  %v14600_v18 = vshrl.u32 %v12833_v59, 16 }
  0x66   :  { %2123 = vmatpush.bf16.msrb.mxu2 %v8768_v39  ;;  %v9524_v39 = vor.u32 %v12023_v21, %v9523_v16  ;;  %v579_v46 = vor.u32 %v14599_v42, %v564_v29  ;;  %v582_v51 = vor.u32 %v14598_v43, %v572_v32  ;;  %v9415_v29 = vld [vmem:[#allocation7 + $0x5a8] sm:$0xf]  ;;  %v11996_v4 = vld [vmem:[#allocation7 + $0x5c8] sm:$0xf0]  ;;  %v11875_v8 = vld [vmem:[#allocation7 + $0x204] sm:$0xf] }
  0x67   :  { %2152 = vmatpush.bf16.msrb.mxu3 %v9056_v35  ;;  %v12014_v35 = vld [vmem:[#allocation7 + $0x658] sm:$0xf0]  ;;  %v9416_v32 = vor.u32 %v11996_v4, %v9415_v29  ;;  %v11947_v16 = vld [vmem:[#allocation7 + $0x444] sm:$0xf]  ;;  %v9343_v2 = vld [vmem:[#allocation7 + $0x518] sm:$0xf] }
  0x68   :  { %2067 = vmatpush.bf16.msrb.mxu0 %v8980_v6  ;;  %v11816_v6 = vld [vmem:[#allocation7 + $0x28] sm:$0xf0]  ;;  %v9488_v57 = vor.u32 %v12014_v35, %v9487_v28  ;;  %v9237_v28 = vld [vmem:[#allocation7 + $0x464] sm:$0xf0]  ;;  %v9379_v35 = vld [vmem:[#allocation7 + $0x560] sm:$0xf] }
  0x69   :  { %2095 = vmatpush.bf16.msrb.mxu1 %v9304_v12  ;;  %v8696_v17 = vor.u32 %v11816_v6, %v8695_v3  ;;  %v576_v12 = vor.u32 %v14600_v18, %v556_v10  ;;  %v12891_v3 = vsel %vm596_vm2, %v582_v51, 0  ;;  %v9451_v10 = vld [vmem:[#allocation7 + $0x5f0] sm:$0xf]  ;;  %v12005_v6 = vld [vmem:[#allocation7 + $0x610] sm:$0xf0]  ;;  %vm7830_vm5 = vcmask 1042434  }
  0x6a   :  { %2124 = vmatpush.bf16.msrb.mxu2 %v8732_v63  ;;  %v11866_v51 = vld [vmem:[#allocation7 + $0x1bc] sm:$0xf]  ;;  %v11857_v18 = vld [vmem:[#allocation7 + $0x174] sm:$0xf]  ;;  %v8877_v41 = vld [vmem:[#allocation7 + $0x194] sm:$0xf0] }
  0x6b   :  { %1962 = vmatmul.bf16.gmra.mxu0 %v12865_v53  ;;  %2153 = vmatpush.bf16.msrb.mxu3 %v9020_v5  ;;  %v12887_v63 = vsel %vm596_vm2, %v576_v12, 0  ;;  %v12889_v5 = vsel %vm596_vm2, %v579_v46, 0  ;;  %v9240_v12 = vor.u32 %v11947_v16, %v9237_v28  ;;  %v11938_v29 = vld [vmem:[#allocation7 + $0x3fc] sm:$0xf]  ;;  %v11929_v28 = vld [vmem:[#allocation7 + $0x3b4] sm:$0xf] }
  0x6c   :  { %1991 = vmatmul.bf16.gmra.mxu1 %v12868_v14  ;;  %2176 = vmatpush.bf16.msra.mxu0 %v9524_v39  ;;  %v9525_v39 = vld [vmem:[#allocation7 + $0x6a4] sm:$0xf0]  ;;  %v11978_v42 = vld [vmem:[#allocation7 + $0x538] sm:$0xf0]  ;;  %v11979_v33 = vld [vmem:[#allocation7 + $0x540] sm:$0xf0] }
  0x6d   :  { %2020 = vmatmul.bf16.gmra.mxu2 %v12871_v60  ;;  %2096 = vmatpush.bf16.msrb.mxu1 %v9268_v7  ;;  %v9452_v7 = vor.u32 %v12005_v6, %v9451_v10  ;;  %v8913_v6 = vld [vmem:[#allocation7 + $0x1dc] sm:$0xf0]  ;;  %v9344_v16 = vor.u32 %v11978_v42, %v9343_v2  ;;  %v11992_v42 = vld [vmem:[#allocation7 + $0x5ac] sm:$0xf]  ;;  %v11831_v20 = vld [vmem:[#allocation7 + $0xa4] sm:$0xf] }
  0x6e   :  { %2049 = vmatmul.bf16.gmra.mxu3 %v12865_v53  ;;  %2125 = vmatpush.bf16.msrb.mxu2 %v8696_v17  ;;  %v8949_v17 = vld [vmem:[#allocation7 + $0x224] sm:$0xf0]  ;;  %v8916_v4 = vor.u32 %v11866_v51, %v8913_v6  ;;  %v8841_v51 = vld [vmem:[#allocation7 + $0x14c] sm:$0xf0]  ;;  %v11920_v6 = vld [vmem:[#allocation7 + $0x36c] sm:$0xf] }
  0x6f   :  { %2154 = vmatpush.bf16.msrb.mxu3 %v8984_v31  ;;  %v8952_v21 = vor.u32 %v11875_v8, %v8949_v17  ;;  %v12019_v31 = vld [vmem:[#allocation7 + $0x684] sm:$0xf]  ;;  %v12010_v8 = vld [vmem:[#allocation7 + $0x63c] sm:$0xf]  ;;  %v9489_v17 = vld [vmem:[#allocation7 + $0x65c] sm:$0xf0] }
  0x70   :  { %2177 = vmatpush.bf16.msra.mxu0 %v9488_v57  ;;  %v11987_v57 = vld [vmem:[#allocation7 + $0x580] sm:$0xf0]  ;;  %v9528_v46 = vor.u32 %v12019_v31, %v9525_v39  ;;  %v9492_v43 = vor.u32 %v12010_v8, %v9489_v17  ;;  %v9165_v31 = vld [vmem:[#allocation7 + $0x3d4] sm:$0xf0]  ;;  %v12001_v39 = vld [vmem:[#allocation7 + $0x5f4] sm:$0xf] }
  0x71   :  { %v9380_v10 = vor.u32 %v11987_v57, %v9379_v35  ;;  %2205 = vmatpush.bf16.msra.mxu1 %v8952_v21  ;;  %v8880_v21 = vor.u32 %v11857_v18, %v8877_v41  ;;  %v9453_v35 = vld [vmem:[#allocation7 + $0x614] sm:$0xf0]  ;;  %v9168_v57 = vor.u32 %v11929_v28, %v9165_v31  ;;  %v11839_v41 = vld [vmem:[#allocation7 + $0xe4] sm:$0xf]  ;;  %v8805_v18 = vld [vmem:[#allocation7 + $0x104] sm:$0xf0] }
  0x72   :  { %2234 = vmatpush.bf16.msra.mxu2 %v9240_v12  ;;  %v9456_v12 = vor.u32 %v12001_v39, %v9453_v35  ;;  %v9093_v8 = vld [vmem:[#allocation7 + $0x344] sm:$0xf0]  ;;  %v11983_v17 = vld [vmem:[#allocation7 + $0x564] sm:$0xf]  ;;  %v9307_v28 = vld [vmem:[#allocation7 + $0x4d0] sm:$0xf] }
  0x73   :  { %2263 = vmatpush.bf16.msra.mxu3 %v9528_v46  ;;  %v11848_v46 = vld [vmem:[#allocation7 + $0x12c] sm:$0xf]  ;;  %v11969_v31 = vld [vmem:[#allocation7 + $0x4f0] sm:$0xf0]  ;;  %v8777_v23 = vld [vmem:[#allocation7 + $0xc4] sm:$0xf0] }
  0x74   :  { %2178 = vmatpush.bf16.msra.mxu0 %v9452_v7  ;;  %v9201_v7 = vld [vmem:[#allocation7 + $0x41c] sm:$0xf0]  ;;  %v9308_v35 = vor.u32 %v11969_v31, %v9307_v28  ;;  %v9309_v28 = vld [vmem:[#allocation7 + $0x4f4] sm:$0xf0]  ;;  %v12011_v34 = vld [vmem:[#allocation7 + $0x644] sm:$0xf] }
  0x75   :  { %2206 = vmatpush.bf16.msra.mxu1 %v8916_v4  ;;  %v9497_v62 = vld [vmem:[#allocation7 + $0x664] sm:$0xf0]  ;;  %v11944_v49 = vld [vmem:[#allocation7 + $0x428] sm:$0xf0]  ;;  %v11935_v38 = vld [vmem:[#allocation7 + $0x3e0] sm:$0xf0] }
  0x76   :  { %v8927_v61 = vld [vmem:[#allocation7 + $0x1c8] sm:$0xf]  ;;  %v11908_v37 = vld [vmem:[#allocation7 + $0x308] sm:$0xf0]  ;;  %vm7832_vm6 = vcmask 1043459   ;;  %vm7834_vm7 = vcmask 1044484  }
  0x77   :  { %2264 = vmatpush.bf16.msra.mxu3 %v9492_v43  ;;  %v11911_v43 = vld [vmem:[#allocation7 + $0x324] sm:$0xf]  ;;  %v9215_v50 = vld [vmem:[#allocation7 + $0x408] sm:$0xf]  ;;  %vm7836_vm8 = vcmask 1045509   ;;  %vm7838_vm9 = vcmask 1046534  }
  0x78   :  { %2179 = vmatpush.bf16.msra.mxu0 %v9416_v32  ;;  %v9204_v32 = vor.u32 %v11938_v29, %v9201_v7  ;;  %v8844_v29 = vor.u32 %v11848_v46, %v8841_v51  ;;  %v9417_v7 = vld [vmem:[#allocation7 + $0x5cc] sm:$0xf0]  ;;  %v9096_v39 = vor.u32 %v11911_v43, %v9093_v8  ;;  %v11902_v46 = vld [vmem:[#allocation7 + $0x2dc] sm:$0xf]  ;;  %v9057_v51 = vld [vmem:[#allocation7 + $0x2fc] sm:$0xf0] }
  0x79   :  { %2207 = vmatpush.bf16.msra.mxu1 %v8880_v21  ;;  %v9420_v4 = vor.u32 %v11992_v42, %v9417_v7  ;;  %v11830_v21 = vld [vmem:[#allocation7 + $0x9c] sm:$0xf]  ;;  %v9271_v42 = vld [vmem:[#allocation7 + $0x488] sm:$0xf]  ;;  %v11960_v7 = vld [vmem:[#allocation7 + $0x4a8] sm:$0xf0] }
  0x7a   :  { %2235 = vmatpush.bf16.msra.mxu2 %v9204_v32  ;;  %v8808_v32 = vor.u32 %v11839_v41, %v8805_v18  ;;  %v11821_v41 = vld [vmem:[#allocation7 + $0x54] sm:$0xf]  ;;  %v8733_v18 = vld [vmem:[#allocation7 + $0x74] sm:$0xf0]  ;;  %v9272_v58 = vor.u32 %v11960_v7, %v9271_v42  ;;  %v9273_v42 = vld [vmem:[#allocation7 + $0x4ac] sm:$0xf0] }
  0x7b   :  { %1967 = vmatmul.bf16.gmra.mxu0 %v12887_v63  ;;  %2265 = vmatpush.bf16.msra.mxu3 %v9456_v12  ;;  %v8769_v12 = vld [vmem:[#allocation7 + $0xbc] sm:$0xf0]  ;;  %v11893_v43 = vld [vmem:[#allocation7 + $0x294] sm:$0xf]  ;;  %v9021_v8 = vld [vmem:[#allocation7 + $0x2b4] sm:$0xf0] }
  0x7c   :  { %1996 = vmatmul.bf16.gmra.mxu1 %v12889_v5  ;;  %2180 = vmatpush.bf16.msra.mxu0 %v9380_v10  ;;  %v9129_v10 = vld [vmem:[#allocation7 + $0x38c] sm:$0xf0]  ;;  %v11871_v7 = vld [vmem:[#allocation7 + $0x1e0] sm:$0xf0]  ;;  %vm7840_vm10 = vcmask 1047559   ;;  %vm4626_vm11 = vcmask 1046528  }
  0x7d   :  { %2025 = vmatmul.bf16.gmra.mxu2 %v12891_v3  ;;  %v9132_v2 = vor.u32 %v11920_v6, %v9129_v10  ;;  %2208 = vmatpush.bf16.msra.mxu1 %v8844_v29  ;;  %v8772_v6 = vor.u32 %v11830_v21, %v8769_v12  ;;  %v9060_v10 = vor.u32 %v11902_v46, %v9057_v51  ;;  %v11974_v29 = vld [vmem:[#allocation7 + $0x51c] sm:$0xf]  ;;  %v8697_v21 = vld [vmem:[#allocation7 + $0x2c] sm:$0xf0]  ;;  %v11956_v51 = vld [vmem:[#allocation7 + $0x48c] sm:$0xf] }
  0x7e   :  { %2054 = vmatmul.bf16.gmra.mxu3 %v12887_v63  ;;  %2236 = vmatpush.bf16.msra.mxu2 %v9168_v57  ;;  %v8985_v46 = vld [vmem:[#allocation7 + $0x26c] sm:$0xf0]  ;;  %vm6054_vm13 = vsmask.f32 6400 }
  0x7f   :  { %2266 = vmatpush.bf16.msra.mxu3 %v9420_v4  ;;  %vm6112_vm14 = vmand %vm4626_vm11, %vm6054_vm13 }
  0x80   :  { %2181 = vmatpush.bf16.msra.mxu0 %v9344_v16  ;;  %v9381_v16 = vld [vmem:[#allocation7 + $0x584] sm:$0xf0] }
  0x81   :  { %2209 = vmatpush.bf16.msra.mxu1 %v8808_v32  ;;  %v9384_v57 = vor.u32 %v11983_v17, %v9381_v16  ;;  %v8736_v32 = vor.u32 %v11821_v41, %v8733_v18  ;;  %v9024_v17 = vor.u32 %v11893_v43, %v9021_v8  ;;  %v11965_v16 = vld [vmem:[#allocation7 + $0x4d4] sm:$0xf]  ;;  %v8883_v18 = vld [vmem:[#allocation7 + $0x178] sm:$0xf]  ;;  %v11862_v43 = vld [vmem:[#allocation7 + $0x198] sm:$0xf0] }
  0x82   :  { %2237 = vmatpush.bf16.msra.mxu2 %v9132_v2  ;;  %v9345_v2 = vld [vmem:[#allocation7 + $0x53c] sm:$0xf0]  ;;  %v9312_v31 = vor.u32 %v11965_v16, %v9309_v28  ;;  %v8884_v8 = vor.u32 %v11862_v43, %v8883_v18 }
  0x83   :  { %2267 = vmatpush.bf16.msra.mxu3 %v9384_v57  ;;  %v9348_v4 = vor.u32 %v11974_v29, %v9345_v2  ;;  %v8919_v2 = vld [vmem:[#allocation7 + $0x1c0] sm:$0xf] }
  0x84   :  { %2182 = vmatpush.bf16.msra.mxu0 %v9308_v35  ;;  %v11884_v35 = vld [vmem:[#allocation7 + $0x24c] sm:$0xf]  ;;  %v8920_v41 = vor.u32 %v11871_v7, %v8919_v2  ;;  %v9207_v7 = vld [vmem:[#allocation7 + $0x400] sm:$0xf] }
  0x85   :  { %2210 = vmatpush.bf16.msra.mxu1 %v8772_v6  ;;  %v8988_v57 = vor.u32 %v11884_v35, %v8985_v46  ;;  %v9276_v6 = vor.u32 %v11956_v51, %v9273_v42  ;;  %v9531_v35 = vld [vmem:[#allocation7 + $0x688] sm:$0xf]  ;;  %v12024_v46 = vld [vmem:[#allocation7 + $0x6a8] sm:$0xf0]  ;;  %v8957_v42 = vld [vmem:[#allocation7 + $0x22c] sm:$0xf0] }
  0x86   :  { %2238 = vmatpush.bf16.msra.mxu2 %v9096_v39  ;;  %v11812_v39 = vld [vmem:[#allocation7 + $0xc] sm:$0xf]  ;;  %v9495_v18 = vld [vmem:[#allocation7 + $0x640] sm:$0xf] }
  0x87   :  { %2268 = vmatpush.bf16.msra.mxu3 %v9348_v4  ;;  %v8700_v12 = vor.u32 %v11812_v39, %v8697_v21  ;;  %v8847_v4 = vld [vmem:[#allocation7 + $0x130] sm:$0xf]  ;;  %v9243_v39 = vld [vmem:[#allocation7 + $0x448] sm:$0xf]  ;;  %v11952_v21 = vld [vmem:[#allocation7 + $0x468] sm:$0xf0] }
  0x88   :  { %2183 = vmatpush.bf16.msra.mxu0 %v9272_v58  ;;  %v8955_v58 = vld [vmem:[#allocation7 + $0x208] sm:$0xf]  ;;  %v11876_v51 = vld [vmem:[#allocation7 + $0x20c] sm:$0xf] }
  0x89   :  { %2211 = vmatpush.bf16.msra.mxu1 %v8736_v32  ;;  %v11853_v32 = vld [vmem:[#allocation7 + $0x150] sm:$0xf0] }
  0x8a   :  { %2239 = vmatpush.bf16.msra.mxu2 %v9060_v10  ;;  %v11880_v10 = vld [vmem:[#allocation7 + $0x228] sm:$0xf0] }
  0x8b   :  { %2068 = vmatmul.bf16.vlgmr.msrb.gmra.mxu0 %v12779_v11  ;;  %2269 = vmatpush.bf16.msra.mxu3 %v9312_v31  ;;  %v8956_v29 = vor.u32 %v11880_v10, %v8955_v58  ;;  %v9532_v58 = vor.u32 %v12024_v46, %v9531_v35  ;;  %v8960_v10 = vor.u32 %v11876_v51, %v8957_v42  ;;  %v8775_v46 = vld [vmem:[#allocation7 + $0xa0] sm:$0xf]  ;;  %v11835_v51 = vld [vmem:[#allocation7 + $0xc0] sm:$0xf0]  ;;  %v9171_v42 = vld [vmem:[#allocation7 + $0x3b8] sm:$0xf] }
  0x8c   :  { %2097 = vmatmul.bf16.vlgmr.msrb.gmra.mxu1 %v12787_v19 }
  0x8d   :  { %2126 = vmatmul.bf16.vlgmr.msrb.gmra.mxu2 %v12774_v9  ;;  %2212 = vmatpush.bf16.msra.mxu1 %v8700_v12  ;;  %v9244_v12 = vor.u32 %v11952_v21, %v9243_v39 }
  0x8e   :  { %2155 = vmatmul.bf16.vlgmr.msrb.gmra.mxu3 %v12779_v11  ;;  %2240 = vmatpush.bf16.msra.mxu2 %v9024_v17  ;;  %v8848_v17 = vor.u32 %v11853_v32, %v8847_v4 }
  0x8f   :  { %2270 = vmatpush.bf16.msra.mxu3 %v9276_v6  ;;  %2292 = vmatpush.bf16.msrb.mxu0 %v8956_v29  ;;  %v11844_v6 = vld [vmem:[#allocation7 + $0x108] sm:$0xf0] }
  0x91   :  { %2321 = vmatpush.bf16.msrb.mxu1 %v9244_v12 }
  0x92   :  { %2241 = vmatpush.bf16.msra.mxu2 %v8988_v57  ;;  %v8811_v57 = vld [vmem:[#allocation7 + $0xe8] sm:$0xf] }
  0x93   :  { %2293 = vmatpush.bf16.msrb.mxu0 %v8920_v41  ;;  %v8812_v29 = vor.u32 %v11844_v6, %v8811_v57  ;;  %2379 = vmatpush.bf16.msrb.mxu3 %v8960_v10  ;;  %v11943_v41 = vld [vmem:[#allocation7 + $0x420] sm:$0xf0]  ;;  %v11934_v57 = vld [vmem:[#allocation7 + $0x3d8] sm:$0xf0]  ;;  %v9459_v6 = vld [vmem:[#allocation7 + $0x5f8] sm:$0xf] }
  0x94   :  { %v9208_v32 = vor.u32 %v11943_v41, %v9207_v7  ;;  %v9172_v10 = vor.u32 %v11934_v57, %v9171_v42  ;;  %v8885_v7 = vld [vmem:[#allocation7 + $0x19c] sm:$0xf0] }
  0x96   :  { %2350 = vmatpush.bf16.msrb.mxu2 %v9532_v58  ;;  %2322 = vmatpush.bf16.msrb.mxu1 %v9208_v32  ;;  %v12006_v58 = vld [vmem:[#allocation7 + $0x618] sm:$0xf0]  ;;  %v11925_v32 = vld [vmem:[#allocation7 + $0x390] sm:$0xf0] }
  0x97   :  { %2294 = vmatpush.bf16.msrb.mxu0 %v8884_v8 }
  0x9a   :  { %2323 = vmatpush.bf16.msrb.mxu1 %v9172_v10  ;;  %v11916_v10 = vld [vmem:[#allocation7 + $0x348] sm:$0xf0] }
  0x9b   :  { %2073 = vmatmul.bf16.gmra.mxu0 %v12827_v47 }
  0x9c   :  { %2102 = vmatmul.bf16.gmra.mxu1 %v12831_v48  ;;  %2295 = vmatpush.bf16.msrb.mxu0 %v8848_v17  ;;  %v12015_v17 = vld [vmem:[#allocation7 + $0x660] sm:$0xf0] }
  0x9d   :  { %2131 = vmatmul.bf16.gmra.mxu2 %v12823_v36  ;;  %v9496_v21 = vor.u32 %v12015_v17, %v9495_v18  ;;  %v9423_v17 = vld [vmem:[#allocation7 + $0x5b0] sm:$0xf] }
  0x9e   :  { %2160 = vmatmul.bf16.gmra.mxu3 %v12827_v47 }
  0x9f   :  { %2351 = vmatpush.bf16.msrb.mxu2 %v9496_v21 }
  0xa0   :  { %2296 = vmatpush.bf16.msrb.mxu0 %v8812_v29  ;;  %v9460_v29 = vor.u32 %v12006_v58, %v9459_v6  ;;  %v9099_v58 = vld [vmem:[#allocation7 + $0x328] sm:$0xf] }
  0xa3   :  { %2352 = vmatpush.bf16.msrb.mxu2 %v9460_v29  ;;  %v9387_v29 = vld [vmem:[#allocation7 + $0x568] sm:$0xf] }
  0xab   :  { %2078 = vmatmul.bf16.gmra.mxu0 %v12868_v14 }
  0xac   :  { %2107 = vmatmul.bf16.gmra.mxu1 %v12871_v60 }
  0xad   :  { %2136 = vmatmul.bf16.gmra.mxu2 %v12865_v53 }
  0xae   :  { %2165 = vmatmul.bf16.gmra.mxu3 %v12868_v14 }
  0xbb   :  { %2083 = vmatmul.bf16.gmra.mxu0 %v12889_v5 }
  0xbc   :  { %2112 = vmatmul.bf16.gmra.mxu1 %v12891_v3 }
  0xbd   :  { %2141 = vmatmul.bf16.gmra.mxu2 %v12887_v63 }
  0xbe   :  { %2170 = vmatmul.bf16.gmra.mxu3 %v12889_v5 }
  0xc8   :  { %v1953_v16 = vpop.f32.mrf.mxu0 }
  0xc9   :  { %v1982_v28 = vpop.f32.mrf.mxu1 }
  0xca   :  { %v1983_v31 = vadd.f32 %v1982_v28, %v1953_v16  ;;  %v11867_v16 = vld [vmem:[#allocation7 + $0x1c4] sm:$0xf]  ;;  %v8921_v28 = vld [vmem:[#allocation7 + $0x1e4] sm:$0xf0] }
  0xcb   :  { %2184 = vmatmul.bf16.vlgmr.msra.gmra.mxu0 %v12787_v19  ;;  %v8924_v35 = vor.u32 %v11867_v16, %v8921_v28 }
  0xcc   :  { %2213 = vmatmul.bf16.vlgmr.msra.gmra.mxu1 %v12774_v9 }
  0xcd   :  { %2242 = vmatmul.bf16.vlgmr.msra.gmra.mxu2 %v12779_v11  ;;  %2380 = vmatpush.bf16.msrb.mxu3 %v8924_v35  ;;  %v11997_v35 = vld [vmem:[#allocation7 + $0x5d0] sm:$0xf0] }
  0xce   :  { %2271 = vmatmul.bf16.vlgmr.msra.gmra.mxu3 %v12787_v19  ;;  %v9424_v57 = vor.u32 %v11997_v35, %v9423_v17  ;;  %v9063_v35 = vld [vmem:[#allocation7 + $0x2e0] sm:$0xf] }
  0xd0   :  { %v2011_v2 = vpop.f32.mrf.mxu2  ;;  %v1955_v4 = vpop.f32.mrf.mxu0  ;;  %2353 = vmatpush.bf16.msrb.mxu2 %v9424_v57 }
  0xd1   :  { %v12917_v43 = vadd.f32 %v2011_v2, %v1983_v31  ;;  %v12919_v8 = vpop.f32.mrf.mxu3  ;;  %v1984_v39 = vpop.f32.mrf.mxu1  ;;  %v8776_v31 = vor.u32 %v11835_v51, %v8775_v46  ;;  %v11858_v2 = vld [vmem:[#allocation7 + $0x17c] sm:$0xf]  ;;  %v11849_v46 = vld [vmem:[#allocation7 + $0x134] sm:$0xf]  ;;  %v8849_v51 = vld [vmem:[#allocation7 + $0x154] sm:$0xf0] }
  0xd2   :  { %v1985_v12 = vadd.f32 %v1984_v39, %v1955_v4  ;;  %v8888_v41 = vor.u32 %v11858_v2, %v8885_v7  ;;  %v9135_v4 = vld [vmem:[#allocation7 + $0x370] sm:$0xf]  ;;  %v8852_v6 = vor.u32 %v11849_v46, %v8849_v51  ;;  %v11988_v2 = vld [vmem:[#allocation7 + $0x588] sm:$0xf0]  ;;  %v11907_v46 = vld [vmem:[#allocation7 + $0x300] sm:$0xf0] }
  0xd3   :  { %2297 = vmatpush.bf16.msrb.mxu0 %v8776_v31  ;;  %v9136_v21 = vor.u32 %v11925_v32, %v9135_v4  ;;  %v11840_v7 = vld [vmem:[#allocation7 + $0xec] sm:$0xf]  ;;  %v11826_v4 = vld [vmem:[#allocation7 + $0x78] sm:$0xf0]  ;;  %v9388_v32 = vor.u32 %v11988_v2, %v9387_v29  ;;  %v9351_v51 = vld [vmem:[#allocation7 + $0x520] sm:$0xf] }
  0xd4   :  { %2381 = vmatpush.bf16.msrb.mxu3 %v8888_v41  ;;  %v8813_v41 = vld [vmem:[#allocation7 + $0x10c] sm:$0xf0] }
  0xd5   :  { %2324 = vmatpush.bf16.msrb.mxu1 %v9136_v21  ;;  %2354 = vmatpush.bf16.msrb.mxu2 %v9388_v32  ;;  %v9315_v32 = vld [vmem:[#allocation7 + $0x4d8] sm:$0xf] }
  0xd8   :  { %v2013_v18 = vpop.f32.mrf.mxu2  ;;  %v1958_v39 = vpop.f32.mrf.mxu0  ;;  %2382 = vmatpush.bf16.msrb.mxu3 %v8852_v6  ;;  %v9352_v6 = vor.u32 %v11979_v33, %v9351_v51 }
  0xd9   :  { %v12921_v16 = vadd.f32 %v2013_v18, %v1985_v12  ;;  %v12923_v28 = vpop.f32.mrf.mxu3  ;;  %v1987_v42 = vpop.f32.mrf.mxu1  ;;  %v9100_v12 = vor.u32 %v11916_v10, %v9099_v58  ;;  %v8739_v18 = vld [vmem:[#allocation7 + $0x58] sm:$0xf]  ;;  %v9064_v10 = vor.u32 %v11907_v46, %v9063_v35  ;;  %v11822_v35 = vld [vmem:[#allocation7 + $0x5c] sm:$0xf]  ;;  %v8741_v46 = vld [vmem:[#allocation7 + $0x7c] sm:$0xf0] }
  0xda   :  { %v1988_v31 = vadd.f32 %v1987_v42, %v1958_v39  ;;  %v8740_v17 = vor.u32 %v11826_v4, %v8739_v18  ;;  %v8816_v39 = vor.u32 %v11840_v7, %v8813_v41  ;;  %v8703_v7 = vld [vmem:[#allocation7 + $0x10] sm:$0xf]  ;;  %v11817_v41 = vld [vmem:[#allocation7 + $0x30] sm:$0xf0]  ;;  %v9027_v18 = vld [vmem:[#allocation7 + $0x298] sm:$0xf]  ;;  %2355 = vmatpush.bf16.msrb.mxu2 %v9352_v6  ;;  %v8744_v33 = vor.u32 %v11822_v35, %v8741_v46 }
  0xdb   :  { %2189 = vmatmul.bf16.gmra.mxu0 %v12831_v48  ;;  %2325 = vmatpush.bf16.msrb.mxu1 %v9100_v12  ;;  %v8780_v12 = vor.u32 %v11831_v20, %v8777_v23  ;;  %v11898_v4 = vld [vmem:[#allocation7 + $0x2b8] sm:$0xf0]  ;;  %v11889_v23 = vld [vmem:[#allocation7 + $0x270] sm:$0xf0]  ;;  %v9279_v20 = vld [vmem:[#allocation7 + $0x490] sm:$0xf] }
  0xdc   :  { %2218 = vmatmul.bf16.gmra.mxu1 %v12823_v36  ;;  %2298 = vmatpush.bf16.msrb.mxu0 %v8740_v17  ;;  %v9028_v54 = vor.u32 %v11898_v4, %v9027_v18  ;;  %v8705_v18 = vld [vmem:[#allocation7 + $0x34] sm:$0xf0] }
  0xdd   :  { %2247 = vmatmul.bf16.gmra.mxu2 %v12827_v47  ;;  %2383 = vmatpush.bf16.msrb.mxu3 %v8816_v39  ;;  %v8991_v39 = vld [vmem:[#allocation7 + $0x250] sm:$0xf] }
  0xde   :  { %2276 = vmatmul.bf16.gmra.mxu3 %v12831_v48  ;;  %v8992_v6 = vor.u32 %v11889_v23, %v8991_v39  ;;  %v11939_v23 = vld [vmem:[#allocation7 + $0x404] sm:$0xf] }
  0xdf   :  { %2326 = vmatpush.bf16.msrb.mxu1 %v9064_v10 }
  0xe0   :  { %v2016_v21 = vpop.f32.mrf.mxu2  ;;  %v1960_v58 = vpop.f32.mrf.mxu0 }
  0xe1   :  { %v12929_v42 = vadd.f32 %v2016_v21, %v1988_v31  ;;  %v12931_v57 = vpop.f32.mrf.mxu3  ;;  %v1989_v29 = vpop.f32.mrf.mxu1  ;;  %v8704_v31 = vor.u32 %v11817_v41, %v8703_v7  ;;  %v11970_v21 = vld [vmem:[#allocation7 + $0x4f8] sm:$0xf0]  ;;  %2384 = vmatpush.bf16.msrb.mxu3 %v8780_v12  ;;  %v11961_v7 = vld [vmem:[#allocation7 + $0x4b0] sm:$0xf0]  ;;  %v9245_v12 = vld [vmem:[#allocation7 + $0x46c] sm:$0xf0] }
  0xe2   :  { %v1990_v2 = vadd.f32 %v1989_v29, %v1960_v58  ;;  %v9316_v17 = vor.u32 %v11970_v21, %v9315_v32  ;;  %v11813_v41 = vld [vmem:[#allocation7 + $0x14] sm:$0xf]  ;;  %v9280_v32 = vor.u32 %v11961_v7, %v9279_v20  ;;  %v9209_v20 = vld [vmem:[#allocation7 + $0x424] sm:$0xf0] }
  0xe3   :  { %2299 = vmatpush.bf16.msrb.mxu0 %v8704_v31  ;;  %2327 = vmatpush.bf16.msrb.mxu1 %v9028_v54  ;;  %v8708_v54 = vor.u32 %v11813_v41, %v8705_v18 }
  0xe4   :  { %2356 = vmatpush.bf16.msrb.mxu2 %v9316_v17 }
  0xe5   :  { %2385 = vmatpush.bf16.msrb.mxu3 %v8744_v33 }
  0xe7   :  { %2328 = vmatpush.bf16.msrb.mxu1 %v8992_v6 }
  0xe8   :  { %v2018_v51 = vpop.f32.mrf.mxu2  ;;  %v1963_v29 = vpop.f32.mrf.mxu0  ;;  %2357 = vmatpush.bf16.msrb.mxu2 %v9280_v32 }
  0xe9   :  { %v12933_v58 = vadd.f32 %v2018_v51, %v1990_v2  ;;  %v12935_v10 = vpop.f32.mrf.mxu3  ;;  %v1992_v4 = vpop.f32.mrf.mxu1  ;;  %v11948_v2 = vld [vmem:[#allocation7 + $0x44c] sm:$0xf]  ;;  %2386 = vmatpush.bf16.msrb.mxu3 %v8708_v54  ;;  %v9173_v54 = vld [vmem:[#allocation7 + $0x3dc] sm:$0xf0] }
  0xea   :  { %v1993_v31 = vadd.f32 %v1992_v4, %v1963_v29  ;;  %v9248_v21 = vor.u32 %v11948_v2, %v9245_v12  ;;  %v9212_v29 = vor.u32 %v11939_v23, %v9209_v20  ;;  %v11921_v23 = vld [vmem:[#allocation7 + $0x374] sm:$0xf]  ;;  %v9137_v20 = vld [vmem:[#allocation7 + $0x394] sm:$0xf0] }
  0xeb   :  { %2194 = vmatmul.bf16.gmra.mxu0 %v12871_v60 }
  0xec   :  { %2223 = vmatmul.bf16.gmra.mxu1 %v12865_v53  ;;  %2408 = vmatpush.bf16.msra.mxu0 %v9248_v21 }
  0xed   :  { %2252 = vmatmul.bf16.gmra.mxu2 %v12868_v14 }
  0xee   :  { %2281 = vmatmul.bf16.gmra.mxu3 %v12871_v60 }
  0xf0   :  { %v2021_v17 = vpop.f32.mrf.mxu2  ;;  %v1965_v33 = vpop.f32.mrf.mxu0  ;;  %2409 = vmatpush.bf16.msra.mxu0 %v9212_v29  ;;  %v9140_v29 = vor.u32 %v11921_v23, %v9137_v20  ;;  %v9251_v23 = vld [vmem:[#allocation7 + $0x450] sm:$0xf]  ;;  %v11953_v20 = vld [vmem:[#allocation7 + $0x470] sm:$0xf0] }
  0xf1   :  { %v12941_v35 = vadd.f32 %v2021_v17, %v1993_v31  ;;  %v12943_v46 = vpop.f32.mrf.mxu3  ;;  %v1994_v51 = vpop.f32.mrf.mxu1  ;;  %v11930_v31 = vld [vmem:[#allocation7 + $0x3bc] sm:$0xf] }
  0xf2   :  { %v1995_v39 = vadd.f32 %v1994_v51, %v1965_v33  ;;  %v9176_v2 = vor.u32 %v11930_v31, %v9173_v54 }
  0xf4   :  { %2410 = vmatpush.bf16.msra.mxu0 %v9176_v2  ;;  %v12020_v2 = vld [vmem:[#allocation7 + $0x68c] sm:$0xf] }
  0xf8   :  { %v2023_v6 = vpop.f32.mrf.mxu2  ;;  %v1968_v18 = vpop.f32.mrf.mxu0  ;;  %2411 = vmatpush.bf16.msra.mxu0 %v9140_v29  ;;  %v11912_v29 = vld [vmem:[#allocation7 + $0x32c] sm:$0xf] }
  0xf9   :  { %v12945_v7 = vadd.f32 %v2023_v6, %v1995_v39  ;;  %v12947_v41 = vpop.f32.mrf.mxu3  ;;  %v1997_v4 = vpop.f32.mrf.mxu1 }
  0xfa   :  { %v1998_v32 = vadd.f32 %v1997_v4, %v1968_v18 }
  0xfb   :  { %2199 = vmatmul.bf16.gmra.mxu0 %v12891_v3 }
  0xfc   :  { %2228 = vmatmul.bf16.gmra.mxu1 %v12887_v63 }
  0xfd   :  { %2257 = vmatmul.bf16.gmra.mxu2 %v12889_v5 }
  0xfe   :  { %2286 = vmatmul.bf16.gmra.mxu3 %v12891_v3 }
 0x100   :  { %v2026_v12 = vpop.f32.mrf.mxu2  ;;  %v1970_v33 = vpop.f32.mrf.mxu0 }
 0x101   :  { %v12953_v21 = vadd.f32 %v2026_v12, %v1998_v32  ;;  %v12955_v17 = vpop.f32.mrf.mxu3  ;;  %v1999_v51 = vpop.f32.mrf.mxu1  ;;  %v9533_v12 = vld [vmem:[#allocation7 + $0x6ac] sm:$0xf0] }
 0x102   :  { %v2000_v39 = vadd.f32 %v1999_v51, %v1970_v33  ;;  %v8963_v33 = vld [vmem:[#allocation7 + $0x210] sm:$0xf]  ;;  %v9536_v51 = vor.u32 %v12020_v2, %v9533_v12  ;;  %v9500_v2 = vor.u32 %v12011_v34, %v9497_v62  ;;  %v11872_v12 = vld [vmem:[#allocation7 + $0x1e8] sm:$0xf0]  ;;  %v9461_v62 = vld [vmem:[#allocation7 + $0x61c] sm:$0xf0] }
 0x103   :  { %v8891_v34 = vld [vmem:[#allocation7 + $0x180] sm:$0xf] }
 0x104   :  { %2437 = vmatpush.bf16.msra.mxu1 %v9536_v51  ;;  %v9216_v51 = vor.u32 %v11944_v49, %v9215_v50  ;;  %v11993_v49 = vld [vmem:[#allocation7 + $0x5b4] sm:$0xf]  ;;  %v9425_v50 = vld [vmem:[#allocation7 + $0x5d4] sm:$0xf0] }
 0x108   :  { %v2028_v6 = vpop.f32.mrf.mxu2  ;;  %v2069_v1 = vpop.f32.mrf.mxu0  ;;  %2438 = vmatpush.bf16.msra.mxu1 %v9500_v2 }
 0x109   :  { %v12957_v18 = vadd.f32 %v2028_v6, %v2000_v39  ;;  %v12959_v4 = vpop.f32.mrf.mxu3  ;;  %v2070_v31 = vadd.f32 %v2069_v1, %v12919_v8  ;;  %v2098_v32 = vpop.f32.mrf.mxu1  ;;  %v11881_v39 = vld [vmem:[#allocation7 + $0x230] sm:$0xf0]  ;;  %v9101_v1 = vld [vmem:[#allocation7 + $0x34c] sm:$0xf0]  ;;  %v9252_v6 = vor.u32 %v11953_v20, %v9251_v23  ;;  %v8928_v23 = vor.u32 %v11872_v12, %v8927_v61 }
 0x10a   :  { %v8964_v8 = vor.u32 %v11881_v39, %v8963_v33 }
 0x10b   :  { %v12962_v54 = vadd.f32 %v2098_v32, %v2070_v31  ;;  %2300 = vmatmul.bf16.vlgmr.msrb.gmra.mxu0 %v12774_v9  ;;  %v9104_v31 = vor.u32 %v11912_v29, %v9101_v1  ;;  %2495 = vmatpush.bf16.msra.mxu3 %v9252_v6  ;;  %v11903_v29 = vld [vmem:[#allocation7 + $0x2e4] sm:$0xf]  ;;  %v9065_v1 = vld [vmem:[#allocation7 + $0x304] sm:$0xf0] }
 0x10c   :  { %2329 = vmatmul.bf16.vlgmr.msrb.gmra.mxu1 %v12779_v11  ;;  %2466 = vmatpush.bf16.msra.mxu2 %v8964_v8  ;;  %v12002_v8 = vld [vmem:[#allocation7 + $0x5fc] sm:$0xf]  ;;  %v9068_v6 = vor.u32 %v11903_v29, %v9065_v1 }
 0x10d   :  { %2358 = vmatmul.bf16.vlgmr.msrb.gmra.mxu2 %v12787_v19  ;;  %2412 = vmatpush.bf16.msra.mxu0 %v9104_v31  ;;  %v11863_v31 = vld [vmem:[#allocation7 + $0x1a0] sm:$0xf0]  ;;  %v9464_v25 = vor.u32 %v12002_v8, %v9461_v62 }
 0x10e   :  { %2387 = vmatmul.bf16.vlgmr.msrb.gmra.mxu3 %v12774_v9 }
 0x10f   :  { %2496 = vmatpush.bf16.msra.mxu3 %v9216_v51  ;;  %2439 = vmatpush.bf16.msra.mxu1 %v9464_v25  ;;  %v11926_v51 = vld [vmem:[#allocation7 + $0x398] sm:$0xf0]  ;;  %v11984_v25 = vld [vmem:[#allocation7 + $0x56c] sm:$0xf] }
 0x110   :  { %v2127_v32 = vpop.f32.mrf.mxu2  ;;  %v2071_v27 = vpop.f32.mrf.mxu0  ;;  %2467 = vmatpush.bf16.msra.mxu2 %v8928_v23  ;;  %v9143_v23 = vld [vmem:[#allocation7 + $0x378] sm:$0xf] }
 0x111   :  { %v2156_v55 = vpop.f32.mrf.mxu3  ;;  %v2072_v33 = vadd.f32 %v2071_v27, %v12923_v28  ;;  %v2100_v39 = vpop.f32.mrf.mxu1  ;;  %2413 = vmatpush.bf16.msra.mxu0 %v9068_v6  ;;  %v8855_v28 = vld [vmem:[#allocation7 + $0x138] sm:$0xf] }
 0x112   :  { %v12968_v44 = vadd.f32 %v2156_v55, %v2127_v32  ;;  %v8892_v55 = vor.u32 %v11863_v31, %v8891_v34  ;;  %v9179_v32 = vld [vmem:[#allocation7 + $0x3c0] sm:$0xf]  ;;  %v9389_v34 = vld [vmem:[#allocation7 + $0x58c] sm:$0xf0] }
 0x113   :  { %v12971_v20 = vadd.f32 %v2100_v39, %v2072_v33  ;;  %v9180_v27 = vor.u32 %v11935_v38, %v9179_v32  ;;  %v9428_v33 = vor.u32 %v11993_v49, %v9425_v50  ;;  %v11854_v39 = vld [vmem:[#allocation7 + $0x158] sm:$0xf0]  ;;  %v9144_v38 = vor.u32 %v11926_v51, %v9143_v23  ;;  %v8819_v31 = vld [vmem:[#allocation7 + $0xf0] sm:$0xf]  ;;  %v11845_v32 = vld [vmem:[#allocation7 + $0x110] sm:$0xf0] }
 0x114   :  { %2468 = vmatpush.bf16.msra.mxu2 %v8892_v55  ;;  %v8856_v6 = vor.u32 %v11854_v39, %v8855_v28  ;;  %v9392_v55 = vor.u32 %v11984_v25, %v9389_v34  ;;  %v9029_v49 = vld [vmem:[#allocation7 + $0x2bc] sm:$0xf0]  ;;  %v8820_v50 = vor.u32 %v11845_v32, %v8819_v31  ;;  %v9353_v39 = vld [vmem:[#allocation7 + $0x544] sm:$0xf0]  ;;  %v11836_v25 = vld [vmem:[#allocation7 + $0xc8] sm:$0xf0] }
 0x115   :  { %14665 = vst [vmem:[#allocation36_spill] sm:$0xff] %v12971_v20  ;;  %2497 = vmatpush.bf16.msra.mxu3 %v9180_v27  ;;  %2440 = vmatpush.bf16.msra.mxu1 %v9428_v33  ;;  %v9107_v27 = vld [vmem:[#allocation7 + $0x330] sm:$0xf]  ;;  %v11975_v33 = vld [vmem:[#allocation7 + $0x524] sm:$0xf] }
 0x116   :  { %v8783_v23 = vld [vmem:[#allocation7 + $0xa8] sm:$0xf]  ;;  %v9035_v20 = vld [vmem:[#allocation7 + $0x2a0] sm:$0xf] }
 0x117   :  { %v9071_v34 = vld [vmem:[#allocation7 + $0x2e8] sm:$0xf] }
 0x118   :  { %v2129_v61 = vpop.f32.mrf.mxu2  ;;  %v2074_v12 = vpop.f32.mrf.mxu0  ;;  %2469 = vmatpush.bf16.msra.mxu2 %v8856_v6  ;;  %v9072_v32 = vor.u32 %v11908_v37, %v9071_v34  ;;  %v11957_v37 = vld [vmem:[#allocation7 + $0x494] sm:$0xf] }
 0x119   :  { %v2158_v2 = vpop.f32.mrf.mxu3  ;;  %v2075_v1 = vadd.f32 %v2074_v12, %v12931_v57  ;;  %v2103_v8 = vpop.f32.mrf.mxu1  ;;  %v11894_v57 = vld [vmem:[#allocation7 + $0x29c] sm:$0xf]  ;;  %2498 = vmatpush.bf16.msra.mxu3 %v9144_v38  ;;  %2441 = vmatpush.bf16.msra.mxu1 %v9392_v55  ;;  %v8784_v38 = vor.u32 %v11836_v25, %v8783_v23  ;;  %v9281_v23 = vld [vmem:[#allocation7 + $0x4b4] sm:$0xf0] }
 0x11a   :  { %v12973_v29 = vadd.f32 %v2158_v2, %v2129_v61  ;;  %v11917_v61 = vld [vmem:[#allocation7 + $0x350] sm:$0xf0]  ;;  %v9032_v28 = vor.u32 %v11894_v57, %v9029_v49  ;;  %v11966_v57 = vld [vmem:[#allocation7 + $0x4dc] sm:$0xf]  ;;  %v9284_v34 = vor.u32 %v11957_v37, %v9281_v23  ;;  %v9503_v37 = vld [vmem:[#allocation7 + $0x648] sm:$0xf] }
 0x11b   :  { %v12976_v62 = vadd.f32 %v2103_v8, %v2075_v1  ;;  %2305 = vmatmul.bf16.gmra.mxu0 %v12823_v36  ;;  %v9108_v2 = vor.u32 %v11917_v61, %v9107_v27  ;;  %v9356_v8 = vor.u32 %v11975_v33, %v9353_v39  ;;  %v11885_v27 = vld [vmem:[#allocation7 + $0x254] sm:$0xf]  ;;  %v8993_v61 = vld [vmem:[#allocation7 + $0x274] sm:$0xf0]  ;;  %v8747_v33 = vld [vmem:[#allocation7 + $0x60] sm:$0xf] }
 0x11c   :  { %2334 = vmatmul.bf16.gmra.mxu1 %v12827_v47  ;;  %2414 = vmatpush.bf16.msra.mxu0 %v9032_v28  ;;  %v8996_v49 = vor.u32 %v11885_v27, %v8993_v61  ;;  %v9317_v28 = vld [vmem:[#allocation7 + $0x4fc] sm:$0xf0]  ;;  %v11827_v39 = vld [vmem:[#allocation7 + $0x80] sm:$0xf0]  ;;  %v11890_v27 = vld [vmem:[#allocation7 + $0x278] sm:$0xf0] }
 0x11d   :  { %14666 = vst [vmem:[#allocation37_spill] sm:$0xff] %v12976_v62  ;;  %2363 = vmatmul.bf16.gmra.mxu2 %v12831_v48  ;;  %2499 = vmatpush.bf16.msra.mxu3 %v9108_v2  ;;  %v12016_v23 = vld [vmem:[#allocation7 + $0x668] sm:$0xf0] }
 0x11e   :  { %2392 = vmatmul.bf16.gmra.mxu3 %v12823_v36  ;;  %2470 = vmatpush.bf16.msra.mxu2 %v8820_v50 }
 0x11f   :  { %2442 = vmatpush.bf16.msra.mxu1 %v9356_v8 }
 0x120   :  { %v2132_v12 = vpop.f32.mrf.mxu2  ;;  %v2076_v1 = vpop.f32.mrf.mxu0  ;;  %2415 = vmatpush.bf16.msra.mxu0 %v8996_v49 }
 0x121   :  { %v2161_v51 = vpop.f32.mrf.mxu3  ;;  %v2077_v6 = vadd.f32 %v2076_v1, %v12935_v10  ;;  %v2105_v31 = vpop.f32.mrf.mxu1  ;;  %v11899_v10 = vld [vmem:[#allocation7 + $0x2c0] sm:$0xf0]  ;;  %2500 = vmatpush.bf16.msra.mxu3 %v9072_v32  ;;  %v8711_v1 = vld [vmem:[#allocation7 + $0x18] sm:$0xf] }
 0x122   :  { %v12982_v62 = vadd.f32 %v2161_v51, %v2132_v12  ;;  %2471 = vmatpush.bf16.msra.mxu2 %v8784_v38  ;;  %v9320_v12 = vor.u32 %v11966_v57, %v9317_v28  ;;  %v8748_v51 = vor.u32 %v11827_v39, %v8747_v33  ;;  %v9036_v50 = vor.u32 %v11899_v10, %v9035_v20  ;;  %v9539_v28 = vld [vmem:[#allocation7 + $0x690] sm:$0xf]  ;;  %v12025_v33 = vld [vmem:[#allocation7 + $0x6b0] sm:$0xf0] }
 0x123   :  { %v12985_v55 = vadd.f32 %v2105_v31, %v2077_v6  ;;  %v11818_v6 = vld [vmem:[#allocation7 + $0x38] sm:$0xf0]  ;;  %v8999_v31 = vld [vmem:[#allocation7 + $0x258] sm:$0xf] }
 0x124   :  { %2443 = vmatpush.bf16.msra.mxu1 %v9320_v12  ;;  %v8712_v32 = vor.u32 %v11818_v6, %v8711_v1  ;;  %v9000_v20 = vor.u32 %v11890_v27, %v8999_v31 }
 0x125   :  { %2501 = vmatpush.bf16.msra.mxu3 %v9036_v50 }
 0x126   :  { %2472 = vmatpush.bf16.msra.mxu2 %v8748_v51 }
 0x128   :  { %v2134_v2 = vpop.f32.mrf.mxu2  ;;  %v2079_v25 = vpop.f32.mrf.mxu0  ;;  %2444 = vmatpush.bf16.msra.mxu1 %v9284_v34 }
 0x129   :  { %v2163_v8 = vpop.f32.mrf.mxu3  ;;  %v2080_v38 = vadd.f32 %v2079_v25, %v12943_v46  ;;  %v2108_v57 = vpop.f32.mrf.mxu1  ;;  %2502 = vmatpush.bf16.msra.mxu3 %v9000_v20  ;;  %v9540_v46 = vor.u32 %v12025_v33, %v9539_v28 }
 0x12a   :  { %v12987_v61 = vadd.f32 %v2163_v8, %v2134_v2  ;;  %2473 = vmatpush.bf16.msra.mxu2 %v8712_v32  ;;  %v9504_v8 = vor.u32 %v12016_v23, %v9503_v37  ;;  %v12007_v32 = vld [vmem:[#allocation7 + $0x620] sm:$0xf0] }
 0x12b   :  { %v12990_v49 = vadd.f32 %v2108_v57, %v2080_v38  ;;  %2310 = vmatmul.bf16.gmra.mxu0 %v12865_v53 }
 0x12c   :  { %2339 = vmatmul.bf16.gmra.mxu1 %v12868_v14  ;;  %2524 = vmatpush.bf16.msrb.mxu0 %v9540_v46 }
 0x12d   :  { %14667 = vst [vmem:[#allocation38_spill] sm:$0xff] %v12990_v49  ;;  %2368 = vmatmul.bf16.gmra.mxu2 %v12871_v60 }
 0x12e   :  { %2397 = vmatmul.bf16.gmra.mxu3 %v12865_v53 }
 0x130   :  { %v2137_v39 = vpop.f32.mrf.mxu2  ;;  %v2081_v51 = vpop.f32.mrf.mxu0  ;;  %2525 = vmatpush.bf16.msrb.mxu0 %v9504_v8 }
 0x131   :  { %v2166_v12 = vpop.f32.mrf.mxu3  ;;  %v2082_v50 = vadd.f32 %v2081_v51, %v12947_v41  ;;  %v2110_v2 = vpop.f32.mrf.mxu1  ;;  %v9467_v41 = vld [vmem:[#allocation7 + $0x600] sm:$0xf]  ;;  %v9431_v51 = vld [vmem:[#allocation7 + $0x5b8] sm:$0xf] }
 0x132   :  { %v12996_v10 = vadd.f32 %v2166_v12, %v2137_v39  ;;  %v9468_v20 = vor.u32 %v12007_v32, %v9467_v41  ;;  %v11949_v41 = vld [vmem:[#allocation7 + $0x454] sm:$0xf] }
 0x133   :  { %v12999_v1 = vadd.f32 %v2110_v2, %v2082_v50  ;;  %v11998_v50 = vld [vmem:[#allocation7 + $0x5d8] sm:$0xf0] }
 0x134   :  { %2526 = vmatpush.bf16.msrb.mxu0 %v9468_v20  ;;  %v9432_v37 = vor.u32 %v11998_v50, %v9431_v51  ;;  %v9253_v20 = vld [vmem:[#allocation7 + $0x474] sm:$0xf0] }
 0x135   :  { %14668 = vst [vmem:[#allocation39_spill] sm:$0xff] %v12999_v1  ;;  %v9505_v1 = vld [vmem:[#allocation7 + $0x66c] sm:$0xf0] }
 0x138   :  { %v2139_v25 = vpop.f32.mrf.mxu2  ;;  %v2084_v6 = vpop.f32.mrf.mxu0  ;;  %2527 = vmatpush.bf16.msrb.mxu0 %v9432_v37  ;;  %v11868_v37 = vld [vmem:[#allocation7 + $0x1cc] sm:$0xf] }
 0x139   :  { %v2168_v34 = vpop.f32.mrf.mxu3  ;;  %v2085_v27 = vadd.f32 %v2084_v6, %v12955_v17  ;;  %v2113_v38 = vpop.f32.mrf.mxu1 }
 0x13a   :  { %v13001_v31 = vadd.f32 %v2168_v34, %v2139_v25 }
 0x13b   :  { %v13004_v57 = vadd.f32 %v2113_v38, %v2085_v27  ;;  %2315 = vmatmul.bf16.gmra.mxu0 %v12887_v63  ;;  %v11877_v38 = vld [vmem:[#allocation7 + $0x214] sm:$0xf] }
 0x13c   :  { %2344 = vmatmul.bf16.gmra.mxu1 %v12889_v5 }
 0x13d   :  { %14669 = vst [vmem:[#allocation40_spill] sm:$0xff] %v13004_v57  ;;  %2373 = vmatmul.bf16.gmra.mxu2 %v12891_v3  ;;  %v12012_v57 = vld [vmem:[#allocation7 + $0x64c] sm:$0xf] }
 0x13e   :  { %2402 = vmatmul.bf16.gmra.mxu3 %v12887_v63 }
 0x140   :  { %v2142_v28 = vpop.f32.mrf.mxu2  ;;  %v2086_v46 = vpop.f32.mrf.mxu0 }
 0x141   :  { %v2171_v33 = vpop.f32.mrf.mxu3  ;;  %v2087_v17 = vadd.f32 %v2086_v46, %v12959_v4  ;;  %v2115_v12 = vpop.f32.mrf.mxu1  ;;  %v8965_v4 = vld [vmem:[#allocation7 + $0x234] sm:$0xf0]  ;;  %v9395_v46 = vld [vmem:[#allocation7 + $0x570] sm:$0xf] }
 0x142   :  { %v13010_v39 = vadd.f32 %v2171_v33, %v2142_v28  ;;  %v8968_v32 = vor.u32 %v11877_v38, %v8965_v4  ;;  %v12021_v28 = vld [vmem:[#allocation7 + $0x694] sm:$0xf]  ;;  %v9541_v33 = vld [vmem:[#allocation7 + $0x6b4] sm:$0xf0] }
 0x143   :  { %v13013_v2 = vadd.f32 %v2115_v12, %v2087_v17  ;;  %v11989_v17 = vld [vmem:[#allocation7 + $0x590] sm:$0xf0]  ;;  %v9544_v12 = vor.u32 %v12021_v28, %v9541_v33  ;;  %v9359_v33 = vld [vmem:[#allocation7 + $0x528] sm:$0xf] }
 0x144   :  { %v9396_v51 = vor.u32 %v11989_v17, %v9395_v46  ;;  %2553 = vmatpush.bf16.msrb.mxu1 %v8968_v32  ;;  %v9508_v32 = vor.u32 %v12012_v57, %v9505_v1  ;;  %v11980_v46 = vld [vmem:[#allocation7 + $0x548] sm:$0xf0]  ;;  %v11859_v17 = vld [vmem:[#allocation7 + $0x184] sm:$0xf]  ;;  %v11850_v57 = vld [vmem:[#allocation7 + $0x13c] sm:$0xf] }
 0x145   :  { %14670 = vst [vmem:[#allocation41_spill] sm:$0xff] %v13013_v2  ;;  %2611 = vmatpush.bf16.msrb.mxu3 %v9544_v12  ;;  %v9217_v2 = vld [vmem:[#allocation7 + $0x42c] sm:$0xf0]  ;;  %v11931_v12 = vld [vmem:[#allocation7 + $0x3c4] sm:$0xf] }
 0x146   :  { %2528 = vmatpush.bf16.msrb.mxu0 %v9396_v51  ;;  %v9181_v51 = vld [vmem:[#allocation7 + $0x3e4] sm:$0xf0] }
 0x148   :  { %v2144_v23 = vpop.f32.mrf.mxu2  ;;  %v2185_v25 = vpop.f32.mrf.mxu0 }
 0x149   :  { %v2173_v8 = vpop.f32.mrf.mxu3  ;;  %v13018_v6 = vadd.f32 %v2185_v25, %v12968_v44  ;;  %v2214_v27 = vpop.f32.mrf.mxu1  ;;  %v9256_v44 = vor.u32 %v11949_v41, %v9253_v20  ;;  %2612 = vmatpush.bf16.msrb.mxu3 %v9508_v32  ;;  %v9145_v32 = vld [vmem:[#allocation7 + $0x39c] sm:$0xf0] }
 0x14a   :  { %v13015_v34 = vadd.f32 %v2173_v8, %v2144_v23  ;;  %v8929_v23 = vld [vmem:[#allocation7 + $0x1ec] sm:$0xf0]  ;;  %v11940_v8 = vld [vmem:[#allocation7 + $0x40c] sm:$0xf] }
 0x14b   :  { %14671 = vst [vmem:[#allocation42_spill] sm:$0xff] %v13018_v6  ;;  %2416 = vmatmul.bf16.vlgmr.msra.gmra.mxu0 %v12779_v11  ;;  %2582 = vmatpush.bf16.msrb.mxu2 %v9256_v44  ;;  %v8932_v4 = vor.u32 %v11868_v37, %v8929_v23  ;;  %v9220_v20 = vor.u32 %v11940_v8, %v9217_v2  ;;  %v8893_v44 = vld [vmem:[#allocation7 + $0x1a4] sm:$0xf0]  ;;  %v12003_v23 = vld [vmem:[#allocation7 + $0x604] sm:$0xf] }
 0x14c   :  { %2445 = vmatmul.bf16.vlgmr.msra.gmra.mxu1 %v12787_v19  ;;  %v9184_v37 = vor.u32 %v11931_v12, %v9181_v51  ;;  %v8857_v2 = vld [vmem:[#allocation7 + $0x15c] sm:$0xf0] }
 0x14d   :  { %2474 = vmatmul.bf16.vlgmr.msra.gmra.mxu2 %v12774_v9  ;;  %2554 = vmatpush.bf16.msrb.mxu1 %v8932_v4 }
 0x14e   :  { %2503 = vmatmul.bf16.vlgmr.msra.gmra.mxu3 %v12779_v11 }
 0x14f   :  { %2583 = vmatpush.bf16.msrb.mxu2 %v9220_v20  ;;  %v8860_v20 = vor.u32 %v11850_v57, %v8857_v2  ;;  %v11971_v57 = vld [vmem:[#allocation7 + $0x500] sm:$0xf0] }
 0x150   :  { %v2243_v50 = vpop.f32.mrf.mxu2  ;;  %v2187_v38 = vpop.f32.mrf.mxu0 }
 0x151   :  { %v2244_v25 = vadd.f32 %v2243_v50, %v2214_v27  ;;  %v2272_v6 = vpop.f32.mrf.mxu3  ;;  %v13025_v49 = vadd.f32 %v2187_v38, %v12973_v29  ;;  %v2216_v41 = vpop.f32.mrf.mxu1  ;;  %v9360_v27 = vor.u32 %v11980_v46, %v9359_v33  ;;  %v8896_v50 = vor.u32 %v11859_v17, %v8893_v44  ;;  %v9469_v29 = vld [vmem:[#allocation7 + $0x624] sm:$0xf0]  ;;  %v11994_v33 = vld [vmem:[#allocation7 + $0x5bc] sm:$0xf]  ;;  %v9433_v46 = vld [vmem:[#allocation7 + $0x5dc] sm:$0xf0] }
 0x152   :  { %v9472_v38 = vor.u32 %v12003_v23, %v9469_v29  ;;  %v9436_v51 = vor.u32 %v11994_v33, %v9433_v46  ;;  %v9109_v29 = vld [vmem:[#allocation7 + $0x354] sm:$0xf0] }
 0x153   :  { %v13027_v28 = vadd.f32 %v2272_v6, %v2244_v25  ;;  %2529 = vmatpush.bf16.msrb.mxu0 %v9360_v27  ;;  %2555 = vmatpush.bf16.msrb.mxu1 %v8896_v50  ;;  %v11922_v6 = vld [vmem:[#allocation7 + $0x37c] sm:$0xf]  ;;  %v11841_v50 = vld [vmem:[#allocation7 + $0xf4] sm:$0xf] }
 0x154   :  { %2584 = vmatpush.bf16.msrb.mxu2 %v9184_v37  ;;  %2613 = vmatpush.bf16.msrb.mxu3 %v9472_v38  ;;  %v9148_v27 = vor.u32 %v11922_v6, %v9145_v32  ;;  %v11913_v37 = vld [vmem:[#allocation7 + $0x334] sm:$0xf]  ;;  %v9397_v38 = vld [vmem:[#allocation7 + $0x594] sm:$0xf0]  ;;  %v11904_v32 = vld [vmem:[#allocation7 + $0x2ec] sm:$0xf] }
 0x155   :  { %14672 = vst [vmem:[#allocation43_spill] sm:$0xff] %v13027_v28  ;;  %v9112_v2 = vor.u32 %v11913_v37, %v9109_v29  ;;  %v9361_v28 = vld [vmem:[#allocation7 + $0x54c] sm:$0xf0] }
 0x157   :  { %2556 = vmatpush.bf16.msrb.mxu1 %v8860_v20  ;;  %v8785_v20 = vld [vmem:[#allocation7 + $0xcc] sm:$0xf0] }
 0x158   :  { %v2245_v1 = vpop.f32.mrf.mxu2  ;;  %v2190_v4 = vpop.f32.mrf.mxu0  ;;  %2585 = vmatpush.bf16.msrb.mxu2 %v9148_v27  ;;  %2614 = vmatpush.bf16.msrb.mxu3 %v9436_v51 }
 0x159   :  { %v2246_v8 = vadd.f32 %v2245_v1, %v2216_v41  ;;  %v2274_v25 = vpop.f32.mrf.mxu3  ;;  %v13030_v17 = vadd.f32 %v2190_v4, %v12982_v62  ;;  %v2219_v44 = vpop.f32.mrf.mxu1  ;;  %v8821_v41 = vld [vmem:[#allocation7 + $0x114] sm:$0xf0]  ;;  %v11985_v62 = vld [vmem:[#allocation7 + $0x574] sm:$0xf]  ;;  %v9323_v1 = vld [vmem:[#allocation7 + $0x4e0] sm:$0xf] }
 0x15a   :  { %v8824_v23 = vor.u32 %v11841_v50, %v8821_v41  ;;  %v9324_v6 = vor.u32 %v11971_v57, %v9323_v1  ;;  %v11832_v4 = vld [vmem:[#allocation7 + $0xac] sm:$0xf]  ;;  %v9073_v41 = vld [vmem:[#allocation7 + $0x30c] sm:$0xf0]  ;;  %v8749_v57 = vld [vmem:[#allocation7 + $0x84] sm:$0xf0] }
 0x15b   :  { %14673 = vst [vmem:[#allocation44_spill] sm:$0xff] %v13030_v17  ;;  %v13032_v12 = vadd.f32 %v2274_v25, %v2246_v8  ;;  %2421 = vmatmul.bf16.gmra.mxu0 %v12827_v47  ;;  %v9400_v8 = vor.u32 %v11985_v62, %v9397_v38  ;;  %v8788_v50 = vor.u32 %v11832_v4, %v8785_v20  ;;  %v9287_v62 = vld [vmem:[#allocation7 + $0x498] sm:$0xf]  ;;  %v11962_v38 = vld [vmem:[#allocation7 + $0x4b8] sm:$0xf0] }
 0x15c   :  { %2450 = vmatmul.bf16.gmra.mxu1 %v12831_v48  ;;  %2586 = vmatpush.bf16.msrb.mxu2 %v9112_v2  ;;  %v9076_v37 = vor.u32 %v11904_v32, %v9073_v41  ;;  %v9288_v1 = vor.u32 %v11962_v38, %v9287_v62  ;;  %v11895_v2 = vld [vmem:[#allocation7 + $0x2a4] sm:$0xf]  ;;  %v11958_v62 = vld [vmem:[#allocation7 + $0x49c] sm:$0xf]  ;;  %v9289_v38 = vld [vmem:[#allocation7 + $0x4bc] sm:$0xf0] }
 0x15d   :  { %14674 = vst [vmem:[#allocation45_spill] sm:$0xff] %v13032_v12  ;;  %2479 = vmatmul.bf16.gmra.mxu2 %v12823_v36  ;;  %2557 = vmatpush.bf16.msrb.mxu1 %v8824_v23  ;;  %v11976_v12 = vld [vmem:[#allocation7 + $0x52c] sm:$0xf]  ;;  %v11967_v20 = vld [vmem:[#allocation7 + $0x4e4] sm:$0xf] }
 0x15e   :  { %2508 = vmatmul.bf16.gmra.mxu3 %v12827_v47  ;;  %2530 = vmatpush.bf16.msrb.mxu0 %v9324_v6  ;;  %v9364_v29 = vor.u32 %v11976_v12, %v9361_v28  ;;  %v9037_v6 = vld [vmem:[#allocation7 + $0x2c4] sm:$0xf0]  ;;  %v8713_v28 = vld [vmem:[#allocation7 + $0x3c] sm:$0xf0]  ;;  %v11886_v12 = vld [vmem:[#allocation7 + $0x25c] sm:$0xf] }
 0x15f   :  { %2615 = vmatpush.bf16.msrb.mxu3 %v9400_v8  ;;  %v9040_v4 = vor.u32 %v11895_v2, %v9037_v6  ;;  %v11814_v8 = vld [vmem:[#allocation7 + $0x1c] sm:$0xf]  ;;  %v9292_v2 = vor.u32 %v11958_v62, %v9289_v38 }
 0x160   :  { %v2248_v25 = vpop.f32.mrf.mxu2  ;;  %v2192_v27 = vpop.f32.mrf.mxu0  ;;  %2587 = vmatpush.bf16.msrb.mxu2 %v9076_v37  ;;  %v8716_v41 = vor.u32 %v11814_v8, %v8713_v28  ;;  %v9001_v37 = vld [vmem:[#allocation7 + $0x27c] sm:$0xf0]  ;;  %v11882_v6 = vld [vmem:[#allocation7 + $0x238] sm:$0xf0]  ;;  %v8935_v28 = vld [vmem:[#allocation7 + $0x1d0] sm:$0xf] }
 0x161   :  { %v2249_v33 = vadd.f32 %v2248_v25, %v2219_v44  ;;  %v2277_v46 = vpop.f32.mrf.mxu3  ;;  %v13039_v17 = vadd.f32 %v2192_v27, %v12987_v61  ;;  %v2221_v51 = vpop.f32.mrf.mxu1  ;;  %2558 = vmatpush.bf16.msrb.mxu1 %v8788_v50  ;;  %v11823_v44 = vld [vmem:[#allocation7 + $0x64] sm:$0xf]  ;;  %v9325_v61 = vld [vmem:[#allocation7 + $0x504] sm:$0xf0] }
 0x162   :  { %v8752_v25 = vor.u32 %v11823_v44, %v8749_v57  ;;  %2531 = vmatpush.bf16.msrb.mxu0 %v9288_v1  ;;  %v9328_v32 = vor.u32 %v11967_v20, %v9325_v61  ;;  %v9004_v1 = vor.u32 %v11886_v12, %v9001_v37  ;;  %v11873_v12 = vld [vmem:[#allocation7 + $0x1f0] sm:$0xf0] }
 0x163   :  { %v13041_v23 = vadd.f32 %v2277_v46, %v2249_v33  ;;  %2616 = vmatpush.bf16.msrb.mxu3 %v9364_v29 }
 0x164   :  { %2588 = vmatpush.bf16.msrb.mxu2 %v9040_v4 }
 0x165   :  { %14675 = vst [vmem:[#allocation46_spill] sm:$0xff] %v13041_v23  ;;  %2559 = vmatpush.bf16.msrb.mxu1 %v8752_v25 }
 0x167   :  { %2617 = vmatpush.bf16.msrb.mxu3 %v9328_v32 }
 0x168   :  { %v2250_v33 = vpop.f32.mrf.mxu2  ;;  %v2195_v50 = vpop.f32.mrf.mxu0  ;;  %2589 = vmatpush.bf16.msrb.mxu2 %v9004_v1  ;;  %v11864_v1 = vld [vmem:[#allocation7 + $0x1a8] sm:$0xf0] }
 0x169   :  { %v2251_v46 = vadd.f32 %v2250_v33, %v2221_v51  ;;  %v2279_v27 = vpop.f32.mrf.mxu3  ;;  %v13044_v44 = vadd.f32 %v2195_v50, %v12996_v10  ;;  %v2224_v57 = vpop.f32.mrf.mxu1  ;;  %2560 = vmatpush.bf16.msrb.mxu1 %v8716_v41  ;;  %v8971_v51 = vld [vmem:[#allocation7 + $0x218] sm:$0xf] }
 0x16a   :  { %v8972_v10 = vor.u32 %v11882_v6, %v8971_v51 }
 0x16b   :  { %v13046_v29 = vadd.f32 %v2279_v27, %v2251_v46  ;;  %2426 = vmatmul.bf16.gmra.mxu0 %v12868_v14  ;;  %2618 = vmatpush.bf16.msrb.mxu3 %v9292_v2  ;;  %v8936_v46 = vor.u32 %v11873_v12, %v8935_v28 }
 0x16c   :  { %2455 = vmatmul.bf16.gmra.mxu1 %v12871_v60  ;;  %2640 = vmatpush.bf16.msra.mxu0 %v8972_v10 }
 0x16d   :  { %14676 = vst [vmem:[#allocation47_spill] sm:$0xff] %v13046_v29  ;;  %2484 = vmatmul.bf16.gmra.mxu2 %v12865_v53 }
 0x16e   :  { %2513 = vmatmul.bf16.gmra.mxu3 %v12868_v14 }
 0x170   :  { %v2253_v25 = vpop.f32.mrf.mxu2  ;;  %v2197_v61 = vpop.f32.mrf.mxu0  ;;  %2641 = vmatpush.bf16.msra.mxu0 %v8936_v46 }
 0x171   :  { %v2254_v4 = vadd.f32 %v2253_v25, %v2224_v57  ;;  %v2282_v20 = vpop.f32.mrf.mxu3  ;;  %v13053_v32 = vadd.f32 %v2197_v61, %v13001_v31  ;;  %v2226_v33 = vpop.f32.mrf.mxu1  ;;  %v8899_v31 = vld [vmem:[#allocation7 + $0x188] sm:$0xf]  ;;  %v8863_v61 = vld [vmem:[#allocation7 + $0x140] sm:$0xf] }
 0x172   :  { %v8900_v2 = vor.u32 %v11864_v1, %v8899_v31  ;;  %v9259_v31 = vld [vmem:[#allocation7 + $0x458] sm:$0xf] }
 0x173   :  { %14677 = vst [vmem:[#allocation48_spill] sm:$0xff] %v13053_v32  ;;  %v13055_v8 = vadd.f32 %v2282_v20, %v2254_v4  ;;  %v9547_v1 = vld [vmem:[#allocation7 + $0x698] sm:$0xf]  ;;  %v10021_v32 = vld [vmem:[#allocation5 + $0x3cc] sm:$0xf0] }
 0x174   :  { %2642 = vmatpush.bf16.msra.mxu0 %v8900_v2 }
 0x175   :  { %14678 = vst [vmem:[#allocation49_spill] sm:$0xff] %v13055_v8  ;;  %v11653_v8 = vld [vmem:[#allocation5 + $0x1d0] sm:$0xf0] }
 0x178   :  { %v2255_v27 = vpop.f32.mrf.mxu2  ;;  %v2200_v37 = vpop.f32.mrf.mxu0 }
 0x179   :  { %v2256_v50 = vadd.f32 %v2255_v27, %v2226_v33  ;;  %v2284_v41 = vpop.f32.mrf.mxu3  ;;  %v13058_v62 = vadd.f32 %v2200_v37, %v13010_v39  ;;  %v2229_v38 = vpop.f32.mrf.mxu1  ;;  %v11855_v33 = vld [vmem:[#allocation7 + $0x160] sm:$0xf0] }
 0x17a   :  { %v8864_v28 = vor.u32 %v11855_v33, %v8863_v61 }
 0x17b   :  { %14679 = vst [vmem:[#allocation50_spill] sm:$0xff] %v13058_v62  ;;  %v13060_v57 = vadd.f32 %v2284_v41, %v2256_v50  ;;  %2431 = vmatmul.bf16.gmra.mxu0 %v12889_v5 }
 0x17c   :  { %2460 = vmatmul.bf16.gmra.mxu1 %v12891_v3  ;;  %2643 = vmatpush.bf16.msra.mxu0 %v8864_v28 }
 0x17d   :  { %14680 = vst [vmem:[#allocation51_spill] sm:$0xff] %v13060_v57  ;;  %2489 = vmatmul.bf16.gmra.mxu2 %v12887_v63  ;;  %v9767_v57 = vld [vmem:[#allocation5 + $0x1b0] sm:$0xf] }
 0x17e   :  { %2518 = vmatmul.bf16.gmra.mxu3 %v12889_v5 }
 0x180   :  { %v2258_v51 = vpop.f32.mrf.mxu2  ;;  %v2202_v25 = vpop.f32.mrf.mxu0 }
 0x181   :  { %v2259_v6 = vadd.f32 %v2258_v51, %v2229_v38  ;;  %v2287_v10 = vpop.f32.mrf.mxu3  ;;  %v13067_v39 = vadd.f32 %v2202_v25, %v13015_v34  ;;  %v2231_v4 = vpop.f32.mrf.mxu1  ;;  %v11954_v34 = vld [vmem:[#allocation7 + $0x478] sm:$0xf0]  ;;  %v8827_v25 = vld [vmem:[#allocation7 + $0xf8] sm:$0xf] }
 0x182   :  { %v9260_v2 = vor.u32 %v11954_v34, %v9259_v31  ;;  %v12026_v51 = vld [vmem:[#allocation7 + $0x6b8] sm:$0xf0] }
 0x183   :  { %14681 = vst [vmem:[#allocation52_spill] sm:$0xff] %v13067_v39  ;;  %v13069_v20 = vadd.f32 %v2287_v10, %v2259_v6  ;;  %v9803_v6 = vld [vmem:[#allocation5 + $0x1f8] sm:$0xf]  ;;  %v11662_v10 = vld [vmem:[#allocation5 + $0x218] sm:$0xf0]  ;;  %v9548_v61 = vor.u32 %v12026_v51, %v9547_v1 }
 0x184   :  { %v9804_v33 = vor.u32 %v11662_v10, %v9803_v6  ;;  %2669 = vmatpush.bf16.msra.mxu1 %v9260_v2  ;;  %v9768_v6 = vor.u32 %v11653_v8, %v9767_v57  ;;  %v8791_v10 = vld [vmem:[#allocation7 + $0xb0] sm:$0xf]  ;;  %v9151_v8 = vld [vmem:[#allocation7 + $0x380] sm:$0xf]  ;;  %v11927_v57 = vld [vmem:[#allocation7 + $0x3a0] sm:$0xf0] }
 0x185   :  { %14682 = vst [vmem:[#allocation53_spill] sm:$0xff] %v13069_v20  ;;  %2698 = vmatpush.bf16.msra.mxu2 %v9548_v61  ;;  %v12017_v20 = vld [vmem:[#allocation7 + $0x670] sm:$0xf0]  ;;  %v11936_v61 = vld [vmem:[#allocation7 + $0x3e8] sm:$0xf0] }
 0x186   :  { %3843 = vmatpush.bf16.msra.mxu3 %v9804_v33  ;;  %v9475_v33 = vld [vmem:[#allocation7 + $0x608] sm:$0xf]  ;;  %v11617_v39 = vld [vmem:[#allocation5 + $0xb0] sm:$0xf0] }
 0x188   :  { %v2260_v12 = vpop.f32.mrf.mxu2  ;;  %v2301_v50 = vpop.f32.mrf.mxu0 }
 0x189   :  { %v2261_v46 = vadd.f32 %v2260_v12, %v2231_v4  ;;  %v2289_v27 = vpop.f32.mrf.mxu3  ;;  %v2330_v41 = vpop.f32.mrf.mxu1  ;;  %v11846_v4 = vld [vmem:[#allocation7 + $0x118] sm:$0xf0] }
 0x18a   :  { %v2331_v38 = vadd.f32 %v2330_v41, %v2301_v50  ;;  %v8828_v28 = vor.u32 %v11846_v4, %v8827_v25  ;;  %v9511_v50 = vld [vmem:[#allocation7 + $0x650] sm:$0xf]  ;;  %v11837_v25 = vld [vmem:[#allocation7 + $0xd0] sm:$0xf0]  ;;  %v9187_v4 = vld [vmem:[#allocation7 + $0x3c8] sm:$0xf]  ;;  %3844 = vmatpush.bf16.msra.mxu3 %v9768_v6 }
 0x18b   :  { %v13071_v37 = vadd.f32 %v2289_v27, %v2261_v46  ;;  %2532 = vmatmul.bf16.vlgmr.msrb.gmra.mxu0 %v12787_v19  ;;  %v9223_v46 = vld [vmem:[#allocation7 + $0x410] sm:$0xf]  ;;  %v11945_v27 = vld [vmem:[#allocation7 + $0x430] sm:$0xf0]  ;;  %v9512_v51 = vor.u32 %v12017_v20, %v9511_v50  ;;  %v9188_v29 = vor.u32 %v11936_v61, %v9187_v4  ;;  %v11999_v6 = vld [vmem:[#allocation7 + $0x5e0] sm:$0xf0] }
 0x18c   :  { %2561 = vmatmul.bf16.vlgmr.msrb.gmra.mxu1 %v12774_v9  ;;  %2644 = vmatpush.bf16.msra.mxu0 %v8828_v28 }
 0x18d   :  { %14683 = vst [vmem:[#allocation54_spill] sm:$0xff] %v13071_v37  ;;  %2590 = vmatmul.bf16.vlgmr.msrb.gmra.mxu2 %v12779_v11  ;;  %v9224_v37 = vor.u32 %v11945_v27, %v9223_v46  ;;  %v9731_v46 = vld [vmem:[#allocation5 + $0x168] sm:$0xf]  ;;  %v11644_v27 = vld [vmem:[#allocation5 + $0x188] sm:$0xf0] }
 0x18e   :  { %2619 = vmatmul.bf16.vlgmr.msrb.gmra.mxu3 %v12787_v19  ;;  %2699 = vmatpush.bf16.msra.mxu2 %v9512_v51  ;;  %v9732_v23 = vor.u32 %v11644_v27, %v9731_v46  ;;  %v9152_v51 = vor.u32 %v11927_v57, %v9151_v8  ;;  %v9659_v46 = vld [vmem:[#allocation5 + $0xd8] sm:$0xf]  ;;  %v11626_v27 = vld [vmem:[#allocation5 + $0xf8] sm:$0xf0]  ;;  %v11828_v8 = vld [vmem:[#allocation7 + $0x88] sm:$0xf0] }
 0x18f   :  { %2670 = vmatpush.bf16.msra.mxu1 %v9224_v37  ;;  %v9439_v37 = vld [vmem:[#allocation7 + $0x5c0] sm:$0xf] }
 0x190   :  { %v2359_v12 = vpop.f32.mrf.mxu2  ;;  %v2303_v34 = vpop.f32.mrf.mxu0  ;;  %3845 = vmatpush.bf16.msra.mxu3 %v9732_v23  ;;  %v9440_v61 = vor.u32 %v11999_v6, %v9439_v37  ;;  %v9115_v23 = vld [vmem:[#allocation7 + $0x338] sm:$0xf]  ;;  %v9079_v6 = vld [vmem:[#allocation7 + $0x2f0] sm:$0xf] }
 0x191   :  { %v13077_v41 = vadd.f32 %v2359_v12, %v2331_v38  ;;  %v13079_v31 = vpop.f32.mrf.mxu3  ;;  %v2332_v1 = vpop.f32.mrf.mxu1  ;;  %v8792_v38 = vor.u32 %v11837_v25, %v8791_v10  ;;  %v12008_v12 = vld [vmem:[#allocation7 + $0x628] sm:$0xf0]  ;;  %v9695_v10 = vld [vmem:[#allocation5 + $0x120] sm:$0xf]  ;;  %v11635_v25 = vld [vmem:[#allocation5 + $0x140] sm:$0xf0] }
 0x192   :  { %v2333_v2 = vadd.f32 %v2332_v1, %v2303_v34  ;;  %v9476_v28 = vor.u32 %v12008_v12, %v9475_v33  ;;  %v11918_v33 = vld [vmem:[#allocation7 + $0x358] sm:$0xf0]  ;;  %v9403_v12 = vld [vmem:[#allocation7 + $0x578] sm:$0xf] }
 0x193   :  { %14684 = vst [vmem:[#allocation55_spill] sm:$0xff] %v13077_v41  ;;  %2645 = vmatpush.bf16.msra.mxu0 %v8792_v38  ;;  %2671 = vmatpush.bf16.msra.mxu1 %v9188_v29  ;;  %v9696_v29 = vor.u32 %v11635_v25, %v9695_v10  ;;  %v11909_v10 = vld [vmem:[#allocation7 + $0x310] sm:$0xf0]  ;;  %v9367_v25 = vld [vmem:[#allocation7 + $0x530] sm:$0xf] }
 0x194   :  { %2700 = vmatpush.bf16.msra.mxu2 %v9476_v28  ;;  %v11990_v28 = vld [vmem:[#allocation7 + $0x598] sm:$0xf0]  ;;  %v9623_v41 = vld [vmem:[#allocation5 + $0x90] sm:$0xf] }
 0x195   :  { %v9404_v57 = vor.u32 %v11990_v28, %v9403_v12  ;;  %3846 = vmatpush.bf16.msra.mxu3 %v9696_v29 }
 0x197   :  { %2672 = vmatpush.bf16.msra.mxu1 %v9152_v51 }
 0x198   :  { %v2361_v20 = vpop.f32.mrf.mxu2  ;;  %v2306_v1 = vpop.f32.mrf.mxu0  ;;  %2701 = vmatpush.bf16.msra.mxu2 %v9440_v61 }
 0x199   :  { %v13081_v50 = vadd.f32 %v2361_v20, %v2333_v2  ;;  %v13083_v34 = vpop.f32.mrf.mxu3  ;;  %v2335_v4 = vpop.f32.mrf.mxu1  ;;  %v9116_v2 = vor.u32 %v11918_v33, %v9115_v23  ;;  %v8755_v20 = vld [vmem:[#allocation7 + $0x68] sm:$0xf]  ;;  %v9080_v33 = vor.u32 %v11909_v10, %v9079_v6  ;;  %v11608_v10 = vld [vmem:[#allocation5 + $0x68] sm:$0xf0] }
 0x19a   :  { %v2336_v38 = vadd.f32 %v2335_v4, %v2306_v1  ;;  %v8756_v37 = vor.u32 %v11828_v8, %v8755_v20  ;;  %v9660_v1 = vor.u32 %v11626_v27, %v9659_v46  ;;  %v8719_v46 = vld [vmem:[#allocation7 + $0x20] sm:$0xf]  ;;  %v11819_v27 = vld [vmem:[#allocation7 + $0x40] sm:$0xf0]  ;;  %v9043_v20 = vld [vmem:[#allocation7 + $0x2a8] sm:$0xf] }
 0x19b   :  { %14685 = vst [vmem:[#allocation56_spill] sm:$0xff] %v13081_v50  ;;  %2537 = vmatmul.bf16.gmra.mxu0 %v12831_v48  ;;  %2673 = vmatpush.bf16.msra.mxu1 %v9116_v2  ;;  %v11981_v50 = vld [vmem:[#allocation7 + $0x550] sm:$0xf0]  ;;  %v9624_v2 = vor.u32 %v11617_v39, %v9623_v41  ;;  %v11900_v8 = vld [vmem:[#allocation7 + $0x2c8] sm:$0xf0] }
 0x19c   :  { %2566 = vmatmul.bf16.gmra.mxu1 %v12823_v36  ;;  %2702 = vmatpush.bf16.msra.mxu2 %v9404_v57  ;;  %v9368_v29 = vor.u32 %v11981_v50, %v9367_v25  ;;  %v9331_v57 = vld [vmem:[#allocation7 + $0x4e8] sm:$0xf]  ;;  %v11891_v39 = vld [vmem:[#allocation7 + $0x280] sm:$0xf0]  ;;  %v9295_v41 = vld [vmem:[#allocation7 + $0x4a0] sm:$0xf] }
 0x19d   :  { %2595 = vmatmul.bf16.gmra.mxu2 %v12827_v47  ;;  %2646 = vmatpush.bf16.msra.mxu0 %v8756_v37  ;;  %v9587_v6 = vld [vmem:[#allocation5 + $0x48] sm:$0xf] }
 0x19e   :  { %2624 = vmatmul.bf16.gmra.mxu3 %v12831_v48  ;;  %v9588_v50 = vor.u32 %v11608_v10, %v9587_v6 }
 0x19f   :  { %3847 = vmatpush.bf16.msra.mxu3 %v9660_v1  ;;  %2674 = vmatpush.bf16.msra.mxu1 %v9080_v33  ;;  %v9007_v1 = vld [vmem:[#allocation7 + $0x260] sm:$0xf] }
 0x1a0   :  { %v2364_v51 = vpop.f32.mrf.mxu2  ;;  %v2308_v23 = vpop.f32.mrf.mxu0  ;;  %2703 = vmatpush.bf16.msra.mxu2 %v9368_v29  ;;  %v9008_v29 = vor.u32 %v11891_v39, %v9007_v1  ;;  %v10055_v39 = vld [vmem:[#allocation5 + $0x3f0] sm:$0xf] }
 0x1a1   :  { %v13089_v4 = vadd.f32 %v2364_v51, %v2336_v38  ;;  %v13091_v61 = vpop.f32.mrf.mxu3  ;;  %v2337_v12 = vpop.f32.mrf.mxu1  ;;  %v8720_v38 = vor.u32 %v11819_v27, %v8719_v46  ;;  %v11972_v51 = vld [vmem:[#allocation7 + $0x508] sm:$0xf0]  ;;  %v11963_v46 = vld [vmem:[#allocation7 + $0x4c0] sm:$0xf0]  ;;  %v9551_v27 = vld [vmem:[#allocation5] sm:$0xf] }
 0x1a2   :  { %v2338_v28 = vadd.f32 %v2337_v12, %v2308_v23  ;;  %v9332_v37 = vor.u32 %v11972_v51, %v9331_v57  ;;  %v9296_v57 = vor.u32 %v11963_v46, %v9295_v41  ;;  %v11725_v41 = vld [vmem:[#allocation5 + $0x410] sm:$0xf0] }
 0x1a3   :  { %14686 = vst [vmem:[#allocation57_spill] sm:$0xff] %v13089_v4  ;;  %v9044_v4 = vor.u32 %v11900_v8, %v9043_v20  ;;  %2647 = vmatpush.bf16.msra.mxu0 %v8720_v38  ;;  %3848 = vmatpush.bf16.msra.mxu3 %v9624_v2  ;;  %v11599_v20 = vld [vmem:[#allocation5 + $0x20] sm:$0xf0]  ;;  %v11734_v2 = vld [vmem:[#allocation5 + $0x458] sm:$0xf0] }
 0x1a4   :  { %2704 = vmatpush.bf16.msra.mxu2 %v9332_v37 }
 0x1a5   :  { %2675 = vmatpush.bf16.msra.mxu1 %v9044_v4  ;;  %v9552_v4 = vor.u32 %v11599_v20, %v9551_v27 }
 0x1a7   :  { %3849 = vmatpush.bf16.msra.mxu3 %v9588_v50 }
 0x1a8   :  { %v2366_v25 = vpop.f32.mrf.mxu2  ;;  %v2311_v12 = vpop.f32.mrf.mxu0  ;;  %2705 = vmatpush.bf16.msra.mxu2 %v9296_v57 }
 0x1a9   :  { %v13093_v23 = vadd.f32 %v2366_v25, %v2338_v28  ;;  %v13095_v33 = vpop.f32.mrf.mxu3  ;;  %v2340_v8 = vpop.f32.mrf.mxu1  ;;  %2676 = vmatpush.bf16.msra.mxu1 %v9008_v29  ;;  %v10091_v28 = vld [vmem:[#allocation5 + $0x438] sm:$0xf] }
 0x1aa   :  { %v2341_v38 = vadd.f32 %v2340_v8, %v2311_v12  ;;  %v10092_v51 = vor.u32 %v11734_v2, %v10091_v28  ;;  %v10056_v12 = vor.u32 %v11725_v41, %v10055_v39  ;;  %v9983_v39 = vld [vmem:[#allocation5 + $0x360] sm:$0xf]  ;;  %v11707_v41 = vld [vmem:[#allocation5 + $0x380] sm:$0xf0] }
 0x1ab   :  { %14687 = vst [vmem:[#allocation58_spill] sm:$0xff] %v13093_v23  ;;  %2542 = vmatmul.bf16.gmra.mxu0 %v12871_v60  ;;  %3850 = vmatpush.bf16.msra.mxu3 %v9552_v4  ;;  %v11716_v4 = vld [vmem:[#allocation5 + $0x3c8] sm:$0xf0] }
 0x1ac   :  { %2571 = vmatmul.bf16.gmra.mxu1 %v12865_v53  ;;  %3872 = vmatpush.bf16.msrb.mxu0 %v10092_v51 }
 0x1ad   :  { %2600 = vmatmul.bf16.gmra.mxu2 %v12868_v14 }
 0x1ae   :  { %2629 = vmatmul.bf16.gmra.mxu3 %v12871_v60 }
 0x1b0   :  { %v2369_v37 = vpop.f32.mrf.mxu2  ;;  %v2313_v50 = vpop.f32.mrf.mxu0  ;;  %3873 = vmatpush.bf16.msrb.mxu0 %v10056_v12  ;;  %v9984_v12 = vor.u32 %v11707_v41, %v9983_v39  ;;  %v11730_v39 = vld [vmem:[#allocation5 + $0x43c] sm:$0xf]  ;;  %v10093_v41 = vld [vmem:[#allocation5 + $0x45c] sm:$0xf0] }
 0x1b1   :  { %v13101_v6 = vadd.f32 %v2369_v37, %v2341_v38  ;;  %v13103_v10 = vpop.f32.mrf.mxu3  ;;  %v2342_v25 = vpop.f32.mrf.mxu1  ;;  %v10019_v38 = vld [vmem:[#allocation5 + $0x3a8] sm:$0xf] }
 0x1b2   :  { %v2343_v1 = vadd.f32 %v2342_v25, %v2313_v50  ;;  %v10020_v28 = vor.u32 %v11716_v4, %v10019_v38 }
 0x1b3   :  { %14688 = vst [vmem:[#allocation59_spill] sm:$0xff] %v13101_v6  ;;  %v10057_v6 = vld [vmem:[#allocation5 + $0x414] sm:$0xf0] }
 0x1b4   :  { %3874 = vmatpush.bf16.msrb.mxu0 %v10020_v28  ;;  %v10379_v28 = vld [vmem:[#allocation5 + $0x678] sm:$0xf] }
 0x1b8   :  { %v2371_v29 = vpop.f32.mrf.mxu2  ;;  %v2316_v20 = vpop.f32.mrf.mxu0  ;;  %3875 = vmatpush.bf16.msrb.mxu0 %v9984_v12  ;;  %v9947_v12 = vld [vmem:[#allocation5 + $0x318] sm:$0xf] }
 0x1b9   :  { %v13105_v46 = vadd.f32 %v2371_v29, %v2343_v1  ;;  %v13107_v27 = vpop.f32.mrf.mxu3  ;;  %v2345_v8 = vpop.f32.mrf.mxu1 }
 0x1ba   :  { %v2346_v57 = vadd.f32 %v2345_v8, %v2316_v20 }
 0x1bb   :  { %14689 = vst [vmem:[#allocation60_spill] sm:$0xff] %v13105_v46  ;;  %2547 = vmatmul.bf16.gmra.mxu0 %v12891_v3 }
 0x1bc   :  { %2576 = vmatmul.bf16.gmra.mxu1 %v12887_v63 }
 0x1bd   :  { %2605 = vmatmul.bf16.gmra.mxu2 %v12889_v5 }
 0x1be   :  { %2634 = vmatmul.bf16.gmra.mxu3 %v12891_v3 }
 0x1c0   :  { %v2374_v2 = vpop.f32.mrf.mxu2  ;;  %v2318_v50 = vpop.f32.mrf.mxu0 }
 0x1c1   :  { %v13113_v51 = vadd.f32 %v2374_v2, %v2346_v57  ;;  %v13115_v37 = vpop.f32.mrf.mxu3  ;;  %v2347_v25 = vpop.f32.mrf.mxu1  ;;  %v11806_v2 = vld [vmem:[#allocation5 + $0x698] sm:$0xf0] }
 0x1c2   :  { %v2348_v1 = vadd.f32 %v2347_v25, %v2318_v50  ;;  %v11658_v50 = vld [vmem:[#allocation5 + $0x1fc] sm:$0xf]  ;;  %v10380_v25 = vor.u32 %v11806_v2, %v10379_v28  ;;  %v9769_v2 = vld [vmem:[#allocation5 + $0x1d4] sm:$0xf0] }
 0x1c3   :  { %14690 = vst [vmem:[#allocation61_spill] sm:$0xff] %v13113_v51  ;;  %v11721_v51 = vld [vmem:[#allocation5 + $0x3f4] sm:$0xf] }
 0x1c4   :  { %3901 = vmatpush.bf16.msrb.mxu1 %v10380_v25  ;;  %v10060_v25 = vor.u32 %v11721_v51, %v10057_v6  ;;  %v10271_v6 = vld [vmem:[#allocation5 + $0x5a0] sm:$0xf]  ;;  %v11779_v51 = vld [vmem:[#allocation5 + $0x5c0] sm:$0xf0] }
 0x1c8   :  { %v2376_v29 = vpop.f32.mrf.mxu2  ;;  %v2417_v46 = vpop.f32.mrf.mxu0 }
 0x1c9   :  { %v13117_v20 = vadd.f32 %v2376_v29, %v2348_v1  ;;  %v13119_v8 = vpop.f32.mrf.mxu3  ;;  %v2418_v38 = vadd.f32 %v2417_v46, %v13079_v31  ;;  %v2446_v57 = vpop.f32.mrf.mxu1  ;;  %v9805_v1 = vld [vmem:[#allocation5 + $0x21c] sm:$0xf0]  ;;  %v11698_v31 = vld [vmem:[#allocation5 + $0x338] sm:$0xf0]  ;;  %v10096_v29 = vor.u32 %v11730_v39, %v10093_v41 }
 0x1ca   :  { %v9808_v46 = vor.u32 %v11658_v50, %v9805_v1 }
 0x1cb   :  { %14691 = vst [vmem:[#allocation62_spill] sm:$0xff] %v13117_v20  ;;  %v13122_v4 = vadd.f32 %v2446_v57, %v2418_v38  ;;  %2648 = vmatmul.bf16.vlgmr.msra.gmra.mxu0 %v12774_v9  ;;  %v9948_v38 = vor.u32 %v11698_v31, %v9947_v12  ;;  %3959 = vmatpush.bf16.msrb.mxu3 %v10096_v29  ;;  %v10343_v57 = vld [vmem:[#allocation5 + $0x630] sm:$0xf]  ;;  %v11689_v31 = vld [vmem:[#allocation5 + $0x2f0] sm:$0xf0] }
 0x1cc   :  { %2677 = vmatmul.bf16.vlgmr.msra.gmra.mxu1 %v12779_v11  ;;  %3930 = vmatpush.bf16.msrb.mxu2 %v9808_v46  ;;  %v11649_v11 = vld [vmem:[#allocation5 + $0x1b4] sm:$0xf]  ;;  %v9911_v12 = vld [vmem:[#allocation5 + $0x2d0] sm:$0xf]  ;;  %v10307_v46 = vld [vmem:[#allocation5 + $0x5e8] sm:$0xf] }
 0x1cd   :  { %14692 = vst [vmem:[#allocation63_spill] sm:$0xff] %v13122_v4  ;;  %2706 = vmatmul.bf16.vlgmr.msra.gmra.mxu2 %v12787_v19  ;;  %v11797_v4 = vld [vmem:[#allocation5 + $0x650] sm:$0xf0]  ;;  %3876 = vmatpush.bf16.msrb.mxu0 %v9948_v38  ;;  %v9772_v39 = vor.u32 %v11649_v11, %v9769_v2  ;;  %v9912_v29 = vor.u32 %v11689_v31, %v9911_v12  ;;  %v11640_v38 = vld [vmem:[#allocation5 + $0x16c] sm:$0xf] }
 0x1ce   :  { %3851 = vmatmul.bf16.vlgmr.msra.gmra.mxu3 %v12727_v26  ;;  %v10344_v28 = vor.u32 %v11797_v4, %v10343_v57  ;;  %v11788_v4 = vld [vmem:[#allocation5 + $0x608] sm:$0xf0]  ;;  %v9733_v57 = vld [vmem:[#allocation5 + $0x18c] sm:$0xf0] }
 0x1cf   :  { %3960 = vmatpush.bf16.msrb.mxu3 %v10060_v25  ;;  %v10308_v62 = vor.u32 %v11788_v4, %v10307_v46  ;;  %v9985_v25 = vld [vmem:[#allocation5 + $0x384] sm:$0xf0] }
 0x1d0   :  { %v2475_v9 = vpop.f32.mrf.mxu2  ;;  %v2419_v19 = vpop.f32.mrf.mxu0  ;;  %3902 = vmatpush.bf16.msrb.mxu1 %v10344_v28  ;;  %3931 = vmatpush.bf16.msrb.mxu2 %v9772_v39  ;;  %v11703_v39 = vld [vmem:[#allocation5 + $0x364] sm:$0xf] }
 0x1d1   :  { %v2504_v20 = vpop.f32.mrf.mxu3  ;;  %v2420_v50 = vadd.f32 %v2419_v19, %v13083_v34  ;;  %v2448_v1 = vpop.f32.mrf.mxu1  ;;  %3877 = vmatpush.bf16.msrb.mxu0 %v9912_v29  ;;  %v11631_v19 = vld [vmem:[#allocation5 + $0x124] sm:$0xf] }
 0x1d2   :  { %v13128_v23 = vadd.f32 %v2504_v20, %v2475_v9  ;;  %v9736_v20 = vor.u32 %v11640_v38, %v9733_v57  ;;  %v11712_v9 = vld [vmem:[#allocation5 + $0x3ac] sm:$0xf]  ;;  %v11770_v38 = vld [vmem:[#allocation5 + $0x578] sm:$0xf0] }
 0x1d3   :  { %v13131_v41 = vadd.f32 %v2448_v1, %v2420_v50  ;;  %v10024_v34 = vor.u32 %v11712_v9, %v10021_v32  ;;  %v10272_v50 = vor.u32 %v11779_v51, %v10271_v6  ;;  %v9697_v1 = vld [vmem:[#allocation5 + $0x144] sm:$0xf0]  ;;  %v9988_v32 = vor.u32 %v11703_v39, %v9985_v25  ;;  %v11622_v57 = vld [vmem:[#allocation5 + $0xdc] sm:$0xf]  ;;  %v9661_v9 = vld [vmem:[#allocation5 + $0xfc] sm:$0xf0] }
 0x1d4   :  { %3903 = vmatpush.bf16.msrb.mxu1 %v10308_v62  ;;  %3932 = vmatpush.bf16.msrb.mxu2 %v9736_v20  ;;  %v9700_v29 = vor.u32 %v11631_v19, %v9697_v1  ;;  %v10235_v62 = vld [vmem:[#allocation5 + $0x558] sm:$0xf]  ;;  %v11680_v6 = vld [vmem:[#allocation5 + $0x2a8] sm:$0xf0]  ;;  %v9664_v51 = vor.u32 %v11622_v57, %v9661_v9  ;;  %v9839_v9 = vld [vmem:[#allocation5 + $0x240] sm:$0xf] }
 0x1d5   :  { %3961 = vmatpush.bf16.msrb.mxu3 %v10024_v34  ;;  %v10236_v20 = vor.u32 %v11770_v38, %v10235_v62  ;;  %v11694_v34 = vld [vmem:[#allocation5 + $0x31c] sm:$0xf]  ;;  %v9625_v25 = vld [vmem:[#allocation5 + $0xb4] sm:$0xf0] }
 0x1d8   :  { %v2477_v11 = vpop.f32.mrf.mxu2  ;;  %v2422_v2 = vpop.f32.mrf.mxu0  ;;  %3904 = vmatpush.bf16.msrb.mxu1 %v10272_v50  ;;  %3933 = vmatpush.bf16.msrb.mxu2 %v9700_v29  ;;  %v11761_v50 = vld [vmem:[#allocation5 + $0x530] sm:$0xf0] }
 0x1d9   :  { %v2506_v28 = vpop.f32.mrf.mxu3  ;;  %v2423_v31 = vadd.f32 %v2422_v2, %v13091_v61  ;;  %v2451_v46 = vpop.f32.mrf.mxu1  ;;  %v9875_v61 = vld [vmem:[#allocation5 + $0x288] sm:$0xf]  ;;  %3962 = vmatpush.bf16.msrb.mxu3 %v9988_v32  ;;  %v10199_v2 = vld [vmem:[#allocation5 + $0x510] sm:$0xf] }
 0x1da   :  { %v13133_v12 = vadd.f32 %v2506_v28, %v2477_v11  ;;  %v9949_v11 = vld [vmem:[#allocation5 + $0x33c] sm:$0xf0]  ;;  %v10200_v39 = vor.u32 %v11761_v50, %v10199_v2  ;;  %v9589_v2 = vld [vmem:[#allocation5 + $0x6c] sm:$0xf0] }
 0x1db   :  { %v13136_v4 = vadd.f32 %v2451_v46, %v2423_v31  ;;  %2653 = vmatmul.bf16.gmra.mxu0 %v12823_v36  ;;  %v9876_v36 = vor.u32 %v11680_v6, %v9875_v61  ;;  %v9952_v19 = vor.u32 %v11694_v34, %v9949_v11  ;;  %v11685_v31 = vld [vmem:[#allocation5 + $0x2d4] sm:$0xf]  ;;  %v9913_v46 = vld [vmem:[#allocation5 + $0x2f4] sm:$0xf0]  ;;  %v11671_v34 = vld [vmem:[#allocation5 + $0x260] sm:$0xf0] }
 0x1dc   :  { %2682 = vmatmul.bf16.gmra.mxu1 %v12827_v47  ;;  %v11613_v47 = vld [vmem:[#allocation5 + $0x94] sm:$0xf]  ;;  %3934 = vmatpush.bf16.msrb.mxu2 %v9664_v51  ;;  %v9916_v57 = vor.u32 %v11685_v31, %v9913_v46  ;;  %v10163_v11 = vld [vmem:[#allocation5 + $0x4c8] sm:$0xf]  ;;  %v9840_v61 = vor.u32 %v11671_v34, %v9839_v9  ;;  %v11752_v6 = vld [vmem:[#allocation5 + $0x4e8] sm:$0xf0] }
 0x1dd   :  { %2711 = vmatmul.bf16.gmra.mxu2 %v12831_v48  ;;  %3905 = vmatpush.bf16.msrb.mxu1 %v10236_v20  ;;  %v9628_v32 = vor.u32 %v11613_v47, %v9625_v25  ;;  %v10127_v47 = vld [vmem:[#allocation5 + $0x480] sm:$0xf]  ;;  %v9841_v9 = vld [vmem:[#allocation5 + $0x264] sm:$0xf0] }
 0x1de   :  { %3856 = vmatmul.bf16.gmra.mxu3 %v12730_v30  ;;  %3878 = vmatpush.bf16.msrb.mxu0 %v9876_v36  ;;  %v11604_v36 = vld [vmem:[#allocation5 + $0x4c] sm:$0xf] }
 0x1df   :  { %3963 = vmatpush.bf16.msrb.mxu3 %v9952_v19  ;;  %v9592_v50 = vor.u32 %v11604_v36, %v9589_v2  ;;  %v11802_v36 = vld [vmem:[#allocation5 + $0x67c] sm:$0xf]  ;;  %v10381_v2 = vld [vmem:[#allocation5 + $0x69c] sm:$0xf0] }
 0x1e0   :  { %v2480_v28 = vpop.f32.mrf.mxu2  ;;  %v2424_v48 = vpop.f32.mrf.mxu0  ;;  %3935 = vmatpush.bf16.msrb.mxu2 %v9628_v32 }
 0x1e1   :  { %v2509_v1 = vpop.f32.mrf.mxu3  ;;  %v2425_v29 = vadd.f32 %v2424_v48, %v13095_v33  ;;  %v2453_v38 = vpop.f32.mrf.mxu1  ;;  %3906 = vmatpush.bf16.msrb.mxu1 %v10200_v39  ;;  %v9877_v33 = vld [vmem:[#allocation5 + $0x2ac] sm:$0xf0]  ;;  %v11743_v48 = vld [vmem:[#allocation5 + $0x4a0] sm:$0xf0] }
 0x1e2   :  { %v13142_v62 = vadd.f32 %v2509_v1, %v2480_v28  ;;  %v10164_v28 = vor.u32 %v11752_v6, %v10163_v11  ;;  %v11676_v1 = vld [vmem:[#allocation5 + $0x28c] sm:$0xf]  ;;  %3879 = vmatpush.bf16.msrb.mxu0 %v9840_v61  ;;  %v11595_v39 = vld [vmem:[#allocation5 + $0x4] sm:$0xf]  ;;  %v10128_v46 = vor.u32 %v11743_v48, %v10127_v47 }
 0x1e3   :  { %v13145_v20 = vadd.f32 %v2453_v38, %v2425_v29  ;;  %3964 = vmatpush.bf16.msrb.mxu3 %v9916_v57  ;;  %v9880_v51 = vor.u32 %v11676_v1, %v9877_v33  ;;  %v9553_v29 = vld [vmem:[#allocation5 + $0x24] sm:$0xf0]  ;;  %v11667_v38 = vld [vmem:[#allocation5 + $0x244] sm:$0xf] }
 0x1e4   :  { %3936 = vmatpush.bf16.msrb.mxu2 %v9592_v50  ;;  %v9556_v57 = vor.u32 %v11595_v39, %v9553_v29  ;;  %v9844_v61 = vor.u32 %v11667_v38, %v9841_v9  ;;  %v10309_v9 = vld [vmem:[#allocation5 + $0x60c] sm:$0xf0] }
 0x1e5   :  { %3907 = vmatpush.bf16.msrb.mxu1 %v10164_v28 }
 0x1e7   :  { %3965 = vmatpush.bf16.msrb.mxu3 %v9880_v51 }
 0x1e8   :  { %v2482_v19 = vpop.f32.mrf.mxu2  ;;  %v2427_v31 = vpop.f32.mrf.mxu0  ;;  %3937 = vmatpush.bf16.msrb.mxu2 %v9556_v57 }
 0x1e9   :  { %v2511_v25 = vpop.f32.mrf.mxu3  ;;  %v2428_v32 = vadd.f32 %v2427_v31, %v13103_v10  ;;  %v2456_v11 = vpop.f32.mrf.mxu1  ;;  %3908 = vmatpush.bf16.msrb.mxu1 %v10128_v46  ;;  %v10384_v10 = vor.u32 %v11802_v36, %v10381_v2 }
 0x1ea   :  { %v13147_v34 = vadd.f32 %v2511_v25, %v2482_v19  ;;  %v11793_v19 = vld [vmem:[#allocation5 + $0x634] sm:$0xf] }
 0x1eb   :  { %v13150_v6 = vadd.f32 %v2456_v11, %v2428_v32  ;;  %2658 = vmatmul.bf16.gmra.mxu0 %v12865_v53  ;;  %3966 = vmatpush.bf16.msrb.mxu3 %v9844_v61 }
 0x1ec   :  { %2687 = vmatmul.bf16.gmra.mxu1 %v12868_v14  ;;  %3988 = vmatpush.bf16.msra.mxu0 %v10384_v10  ;;  %v10345_v14 = vld [vmem:[#allocation5 + $0x654] sm:$0xf0]  ;;  %v11775_v10 = vld [vmem:[#allocation5 + $0x5a4] sm:$0xf] }
 0x1ed   :  { %2716 = vmatmul.bf16.gmra.mxu2 %v12871_v60  ;;  %v10348_v60 = vor.u32 %v11793_v19, %v10345_v14  ;;  %v9811_v14 = vld [vmem:[#allocation5 + $0x200] sm:$0xf] }
 0x1ee   :  { %3861 = vmatmul.bf16.gmra.mxu3 %v12783_v13 }
 0x1f0   :  { %v2485_v28 = vpop.f32.mrf.mxu2  ;;  %v2429_v1 = vpop.f32.mrf.mxu0  ;;  %3989 = vmatpush.bf16.msra.mxu0 %v10348_v60  ;;  %v10099_v60 = vld [vmem:[#allocation5 + $0x440] sm:$0xf] }
 0x1f1   :  { %v2514_v50 = vpop.f32.mrf.mxu3  ;;  %v2430_v53 = vadd.f32 %v2429_v1, %v13107_v27  ;;  %v2458_v51 = vpop.f32.mrf.mxu1  ;;  %v11784_v27 = vld [vmem:[#allocation5 + $0x5ec] sm:$0xf] }
 0x1f2   :  { %v13156_v33 = vadd.f32 %v2514_v50, %v2485_v28  ;;  %v10312_v32 = vor.u32 %v11784_v27, %v10309_v9  ;;  %v10237_v27 = vld [vmem:[#allocation5 + $0x57c] sm:$0xf0] }
 0x1f3   :  { %v13159_v47 = vadd.f32 %v2458_v51, %v2430_v53 }
 0x1f4   :  { %3990 = vmatpush.bf16.msra.mxu0 %v10312_v32 }
 0x1f8   :  { %v2487_v48 = vpop.f32.mrf.mxu2  ;;  %v2432_v25 = vpop.f32.mrf.mxu0 }
 0x1f9   :  { %v2516_v39 = vpop.f32.mrf.mxu3  ;;  %v2433_v46 = vadd.f32 %v2432_v25, %v13115_v37  ;;  %v2461_v29 = vpop.f32.mrf.mxu1  ;;  %v10387_v25 = vld [vmem:[#allocation5 + $0x680] sm:$0xf] }
 0x1fa   :  { %v13161_v31 = vadd.f32 %v2516_v39, %v2487_v48  ;;  %v11735_v39 = vld [vmem:[#allocation5 + $0x460] sm:$0xf0] }
 0x1fb   :  { %v13164_v38 = vadd.f32 %v2461_v29, %v2433_v46  ;;  %2663 = vmatmul.bf16.gmra.mxu0 %v12887_v63  ;;  %v10273_v63 = vld [vmem:[#allocation5 + $0x5c4] sm:$0xf0]  ;;  %v11807_v46 = vld [vmem:[#allocation5 + $0x6a0] sm:$0xf0]  ;;  %v11766_v29 = vld [vmem:[#allocation5 + $0x55c] sm:$0xf] }
 0x1fc   :  { %2692 = vmatmul.bf16.gmra.mxu1 %v12889_v5  ;;  %v10276_v5 = vor.u32 %v11775_v10, %v10273_v63  ;;  %v10388_v9 = vor.u32 %v11807_v46, %v10387_v25  ;;  %v10240_v32 = vor.u32 %v11766_v29, %v10237_v27  ;;  %v11757_v25 = vld [vmem:[#allocation5 + $0x514] sm:$0xf]  ;;  %v10201_v46 = vld [vmem:[#allocation5 + $0x534] sm:$0xf0]  ;;  %v9739_v29 = vld [vmem:[#allocation5 + $0x170] sm:$0xf] }
 0x1fd   :  { %2721 = vmatmul.bf16.gmra.mxu2 %v12891_v3  ;;  %v11645_v27 = vld [vmem:[#allocation5 + $0x190] sm:$0xf0] }
 0x1fe   :  { %3866 = vmatmul.bf16.gmra.mxu3 %v12833_v59  ;;  %3991 = vmatpush.bf16.msra.mxu0 %v10276_v5 }
 0x1ff   :  { %4075 = vmatpush.bf16.msra.mxu3 %v10388_v9  ;;  %v11717_v9 = vld [vmem:[#allocation5 + $0x3d0] sm:$0xf0] }
 0x200   :  { %v2490_v11 = vpop.f32.mrf.mxu2  ;;  %v2434_v61 = vpop.f32.mrf.mxu0 }
 0x201   :  { %v2519_v57 = vpop.f32.mrf.mxu3  ;;  %v2435_v37 = vadd.f32 %v2434_v61, %v13119_v8  ;;  %v2463_v2 = vpop.f32.mrf.mxu1  ;;  %v11663_v8 = vld [vmem:[#allocation5 + $0x220] sm:$0xf0]  ;;  %v11654_v61 = vld [vmem:[#allocation5 + $0x1d8] sm:$0xf0] }
 0x202   :  { %v13170_v36 = vadd.f32 %v2519_v57, %v2490_v11  ;;  %v9812_v48 = vor.u32 %v11663_v8, %v9811_v14  ;;  %v9775_v57 = vld [vmem:[#allocation5 + $0x1b8] sm:$0xf]  ;;  %3992 = vmatpush.bf16.msra.mxu0 %v10240_v32  ;;  %v9740_v32 = vor.u32 %v11645_v27, %v9739_v29 }
 0x203   :  { %v13173_v28 = vadd.f32 %v2463_v2, %v2435_v37  ;;  %v10063_v37 = vld [vmem:[#allocation5 + $0x3f8] sm:$0xf]  ;;  %v9776_v5 = vor.u32 %v11654_v61, %v9775_v57  ;;  %v10315_v57 = vld [vmem:[#allocation5 + $0x5f0] sm:$0xf] }
 0x204   :  { %4017 = vmatpush.bf16.msra.mxu1 %v9812_v48 }
 0x208   :  { %v2492_v3 = vpop.f32.mrf.mxu2  ;;  %v2533_v1 = vpop.f32.mrf.mxu0  ;;  %4018 = vmatpush.bf16.msra.mxu1 %v9776_v5 }
 0x209   :  { %v2521_v50 = vpop.f32.mrf.mxu3  ;;  %v13178_v51 = vadd.f32 %v2533_v1, %v13128_v23  ;;  %v2562_v19 = vpop.f32.mrf.mxu1  ;;  %v10100_v23 = vor.u32 %v11735_v39, %v10099_v60  ;;  %v11798_v1 = vld [vmem:[#allocation5 + $0x658] sm:$0xf0] }
 0x20a   :  { %v13175_v53 = vadd.f32 %v2521_v50, %v2492_v3  ;;  %v11726_v3 = vld [vmem:[#allocation5 + $0x418] sm:$0xf0]  ;;  %v10351_v50 = vld [vmem:[#allocation5 + $0x638] sm:$0xf] }
 0x20b   :  { %3880 = vmatmul.bf16.vlgmr.msrb.gmra.mxu0 %v12735_v40  ;;  %4046 = vmatpush.bf16.msra.mxu2 %v10100_v23  ;;  %v10064_v60 = vor.u32 %v11726_v3, %v10063_v37  ;;  %v10352_v48 = vor.u32 %v11798_v1, %v10351_v50  ;;  %v10027_v23 = vld [vmem:[#allocation5 + $0x3b0] sm:$0xf] }
 0x20c   :  { %3909 = vmatmul.bf16.vlgmr.msrb.gmra.mxu1 %v12748_v52 }
 0x20d   :  { %3938 = vmatmul.bf16.vlgmr.msrb.gmra.mxu2 %v12727_v26  ;;  %4076 = vmatpush.bf16.msra.mxu3 %v10352_v48  ;;  %v10279_v48 = vld [vmem:[#allocation5 + $0x5a8] sm:$0xf] }
 0x20e   :  { %3967 = vmatmul.bf16.vlgmr.msrb.gmra.mxu3 %v12735_v40  ;;  %4019 = vmatpush.bf16.msra.mxu1 %v9740_v32  ;;  %v9955_v32 = vld [vmem:[#allocation5 + $0x320] sm:$0xf] }
 0x20f   :  { %4047 = vmatpush.bf16.msra.mxu2 %v10064_v60  ;;  %v11708_v60 = vld [vmem:[#allocation5 + $0x388] sm:$0xf0] }
 0x210   :  { %v2591_v11 = vpop.f32.mrf.mxu2  ;;  %v2535_v63 = vpop.f32.mrf.mxu0 }
 0x211   :  { %v2592_v2 = vadd.f32 %v2591_v11, %v2562_v19  ;;  %v2620_v10 = vpop.f32.mrf.mxu3  ;;  %v13185_v14 = vadd.f32 %v2535_v63, %v13133_v12  ;;  %v2564_v8 = vpop.f32.mrf.mxu1  ;;  %v10204_v19 = vor.u32 %v11757_v25, %v10201_v46  ;;  %v10028_v11 = vor.u32 %v11717_v9, %v10027_v23  ;;  %v11789_v12 = vld [vmem:[#allocation5 + $0x610] sm:$0xf0]  ;;  %v9991_v63 = vld [vmem:[#allocation5 + $0x368] sm:$0xf]  ;;  %v11780_v25 = vld [vmem:[#allocation5 + $0x5c8] sm:$0xf0] }
 0x212   :  { %v10316_v61 = vor.u32 %v11789_v12, %v10315_v57  ;;  %v10280_v23 = vor.u32 %v11780_v25, %v10279_v48  ;;  %v9667_v9 = vld [vmem:[#allocation5 + $0xe0] sm:$0xf]  ;;  %v11699_v57 = vld [vmem:[#allocation5 + $0x340] sm:$0xf0] }
 0x213   :  { %v13187_v39 = vadd.f32 %v2620_v10, %v2592_v2  ;;  %3993 = vmatpush.bf16.msra.mxu0 %v10204_v19  ;;  %4048 = vmatpush.bf16.msra.mxu2 %v10028_v11  ;;  %v9703_v2 = vld [vmem:[#allocation5 + $0x128] sm:$0xf]  ;;  %v11636_v10 = vld [vmem:[#allocation5 + $0x148] sm:$0xf0]  ;;  %v9992_v19 = vor.u32 %v11708_v60, %v9991_v63  ;;  %v11771_v12 = vld [vmem:[#allocation5 + $0x580] sm:$0xf0] }
 0x214   :  { %4077 = vmatpush.bf16.msra.mxu3 %v10316_v61  ;;  %v9704_v1 = vor.u32 %v11636_v10, %v9703_v2  ;;  %v11748_v61 = vld [vmem:[#allocation5 + $0x4cc] sm:$0xf]  ;;  %v9956_v2 = vor.u32 %v11699_v57, %v9955_v32 }
 0x215   :  { %14693 = vst [vmem:[#allocation64_spill] sm:$0xff] %v13187_v39 }
 0x216   :  { %4020 = vmatpush.bf16.msra.mxu1 %v9704_v1  ;;  %v9919_v1 = vld [vmem:[#allocation5 + $0x2d8] sm:$0xf] }
 0x217   :  { %4049 = vmatpush.bf16.msra.mxu2 %v9992_v19 }
 0x218   :  { %v2593_v37 = vpop.f32.mrf.mxu2  ;;  %v2538_v50 = vpop.f32.mrf.mxu0  ;;  %4078 = vmatpush.bf16.msra.mxu3 %v10280_v23 }
 0x219   :  { %v2594_v5 = vadd.f32 %v2593_v37, %v2564_v8  ;;  %v2622_v3 = vpop.f32.mrf.mxu3  ;;  %v13190_v46 = vadd.f32 %v2538_v50, %v13142_v62  ;;  %v2567_v29 = vpop.f32.mrf.mxu1  ;;  %v11627_v8 = vld [vmem:[#allocation5 + $0x100] sm:$0xf0]  ;;  %v10243_v62 = vld [vmem:[#allocation5 + $0x560] sm:$0xf]  ;;  %v10165_v37 = vld [vmem:[#allocation5 + $0x4ec] sm:$0xf0] }
 0x21a   :  { %v9668_v11 = vor.u32 %v11627_v8, %v9667_v9  ;;  %v10168_v10 = vor.u32 %v11748_v61, %v10165_v37  ;;  %v10244_v63 = vor.u32 %v11771_v12, %v10243_v62  ;;  %v11618_v50 = vld [vmem:[#allocation5 + $0xb8] sm:$0xf0]  ;;  %v10207_v8 = vld [vmem:[#allocation5 + $0x518] sm:$0xf]  ;;  %v11739_v62 = vld [vmem:[#allocation5 + $0x484] sm:$0xf] }
 0x21b   :  { %14694 = vst [vmem:[#allocation65_spill] sm:$0xff] %v13190_v46  ;;  %v13192_v27 = vadd.f32 %v2622_v3, %v2594_v5  ;;  %3885 = vmatmul.bf16.gmra.mxu0 %v12742_v45  ;;  %4050 = vmatpush.bf16.msra.mxu2 %v9956_v2  ;;  %v9631_v3 = vld [vmem:[#allocation5 + $0x98] sm:$0xf]  ;;  %v11690_v9 = vld [vmem:[#allocation5 + $0x2f8] sm:$0xf0] }
 0x21c   :  { %3914 = vmatmul.bf16.gmra.mxu1 %v12757_v56  ;;  %3994 = vmatpush.bf16.msra.mxu0 %v10168_v10  ;;  %v9632_v19 = vor.u32 %v11618_v50, %v9631_v3  ;;  %v9920_v32 = vor.u32 %v11690_v9, %v9919_v1  ;;  %v10129_v12 = vld [vmem:[#allocation5 + $0x4a4] sm:$0xf0]  ;;  %v11609_v37 = vld [vmem:[#allocation5 + $0x70] sm:$0xf0]  ;;  %v9883_v2 = vld [vmem:[#allocation5 + $0x290] sm:$0xf] }
 0x21d   :  { %14695 = vst [vmem:[#allocation66_spill] sm:$0xff] %v13192_v27  ;;  %3943 = vmatmul.bf16.gmra.mxu2 %v12730_v30  ;;  %4021 = vmatpush.bf16.msra.mxu1 %v9668_v11  ;;  %v11762_v27 = vld [vmem:[#allocation5 + $0x538] sm:$0xf0]  ;;  %v10132_v61 = vor.u32 %v11739_v62, %v10129_v12  ;;  %v11681_v10 = vld [vmem:[#allocation5 + $0x2b0] sm:$0xf0] }
 0x21e   :  { %3972 = vmatmul.bf16.gmra.mxu3 %v12742_v45  ;;  %v10208_v57 = vor.u32 %v11762_v27, %v10207_v8  ;;  %v9884_v3 = vor.u32 %v11681_v10, %v9883_v2  ;;  %v10171_v50 = vld [vmem:[#allocation5 + $0x4d0] sm:$0xf]  ;;  %v11600_v27 = vld [vmem:[#allocation5 + $0x28] sm:$0xf0]  ;;  %v10135_v62 = vld [vmem:[#allocation5 + $0x488] sm:$0xf] }
 0x21f   :  { %4079 = vmatpush.bf16.msra.mxu3 %v10244_v63  ;;  %4051 = vmatpush.bf16.msra.mxu2 %v9920_v32  ;;  %v9559_v63 = vld [vmem:[#allocation5 + $0x8] sm:$0xf]  ;;  %v11672_v32 = vld [vmem:[#allocation5 + $0x268] sm:$0xf0]  ;;  %v9605_v46 = vld [vmem:[#allocation5 + $0x7c] sm:$0xf0] }
 0x220   :  { %v2596_v5 = vpop.f32.mrf.mxu2  ;;  %v2540_v25 = vpop.f32.mrf.mxu0  ;;  %3995 = vmatpush.bf16.msra.mxu0 %v10132_v61  ;;  %v9560_v8 = vor.u32 %v11600_v27, %v9559_v63  ;;  %v11744_v12 = vld [vmem:[#allocation5 + $0x4a8] sm:$0xf0]  ;;  %v9813_v10 = vld [vmem:[#allocation5 + $0x224] sm:$0xf0]  ;;  %v11650_v27 = vld [vmem:[#allocation5 + $0x1bc] sm:$0xf] }
 0x221   :  { %v2597_v60 = vadd.f32 %v2596_v5, %v2567_v29  ;;  %v2625_v48 = vpop.f32.mrf.mxu3  ;;  %v13199_v39 = vadd.f32 %v2540_v25, %v13147_v34  ;;  %v2569_v23 = vpop.f32.mrf.mxu1  ;;  %4022 = vmatpush.bf16.msra.mxu1 %v9632_v19  ;;  %v9595_v29 = vld [vmem:[#allocation5 + $0x50] sm:$0xf]  ;;  %v11753_v34 = vld [vmem:[#allocation5 + $0x4f0] sm:$0xf0]  ;;  %v10136_v2 = vor.u32 %v11744_v12, %v10135_v62 }
 0x222   :  { %v9596_v5 = vor.u32 %v11609_v37, %v9595_v29  ;;  %v10172_v1 = vor.u32 %v11753_v34, %v10171_v50 }
 0x223   :  { %14696 = vst [vmem:[#allocation67_spill] sm:$0xff] %v13199_v39  ;;  %v13201_v11 = vadd.f32 %v2625_v48, %v2597_v60  ;;  %4080 = vmatpush.bf16.msra.mxu3 %v10208_v57  ;;  %4052 = vmatpush.bf16.msra.mxu2 %v9884_v3  ;;  %v9847_v48 = vld [vmem:[#allocation5 + $0x248] sm:$0xf]  ;;  %v11606_v39 = vld [vmem:[#allocation5 + $0x5c] sm:$0xf] }
 0x224   :  { %v9848_v61 = vor.u32 %v11672_v32, %v9847_v48  ;;  %v9777_v48 = vld [vmem:[#allocation5 + $0x1dc] sm:$0xf0] }
 0x225   :  { %14697 = vst [vmem:[#allocation68_spill] sm:$0xff] %v13201_v11  ;;  %4023 = vmatpush.bf16.msra.mxu1 %v9596_v5  ;;  %v11646_v11 = vld [vmem:[#allocation5 + $0x198] sm:$0xf0] }
 0x227   :  { %4081 = vmatpush.bf16.msra.mxu3 %v10172_v1  ;;  %4053 = vmatpush.bf16.msra.mxu2 %v9848_v61  ;;  %v9741_v61 = vld [vmem:[#allocation5 + $0x194] sm:$0xf0] }
 0x228   :  { %v2598_v60 = vpop.f32.mrf.mxu2  ;;  %v2543_v9 = vpop.f32.mrf.mxu0 }
 0x229   :  { %v2599_v25 = vadd.f32 %v2598_v60, %v2569_v23  ;;  %v2627_v19 = vpop.f32.mrf.mxu3  ;;  %v13204_v29 = vadd.f32 %v2543_v9, %v13156_v33  ;;  %v2572_v37 = vpop.f32.mrf.mxu1  ;;  %4024 = vmatpush.bf16.msra.mxu1 %v9560_v8  ;;  %v11659_v23 = vld [vmem:[#allocation5 + $0x204] sm:$0xf] }
 0x22a   :  { %v9816_v33 = vor.u32 %v11659_v23, %v9813_v10 }
 0x22b   :  { %14698 = vst [vmem:[#allocation69_spill] sm:$0xff] %v13204_v29  ;;  %v13206_v57 = vadd.f32 %v2627_v19, %v2599_v25  ;;  %3890 = vmatmul.bf16.gmra.mxu0 %v12791_v22  ;;  %4082 = vmatpush.bf16.msra.mxu3 %v10136_v2  ;;  %v9780_v25 = vor.u32 %v11650_v27, %v9777_v48 }
 0x22c   :  { %3919 = vmatmul.bf16.gmra.mxu1 %v12795_v24  ;;  %4104 = vmatpush.bf16.msrb.mxu0 %v9816_v33 }
 0x22d   :  { %14699 = vst [vmem:[#allocation70_spill] sm:$0xff] %v13206_v57  ;;  %3948 = vmatmul.bf16.gmra.mxu2 %v12783_v13  ;;  %v9747_v57 = vld [vmem:[#allocation5 + $0x178] sm:$0xf] }
 0x22e   :  { %3977 = vmatmul.bf16.gmra.mxu3 %v12791_v22 }
 0x230   :  { %v2601_v5 = vpop.f32.mrf.mxu2  ;;  %v2545_v34 = vpop.f32.mrf.mxu0  ;;  %4105 = vmatpush.bf16.msrb.mxu0 %v9780_v25 }
 0x231   :  { %v2602_v3 = vadd.f32 %v2601_v5, %v2572_v37  ;;  %v2630_v50 = vpop.f32.mrf.mxu3  ;;  %v13213_v1 = vadd.f32 %v2545_v34, %v13161_v31  ;;  %v2574_v60 = vpop.f32.mrf.mxu1  ;;  %v11641_v31 = vld [vmem:[#allocation5 + $0x174] sm:$0xf]  ;;  %v11632_v34 = vld [vmem:[#allocation5 + $0x12c] sm:$0xf] }
 0x232   :  { %v9744_v2 = vor.u32 %v11641_v31, %v9741_v61  ;;  %v11731_v31 = vld [vmem:[#allocation5 + $0x444] sm:$0xf] }
 0x233   :  { %14700 = vst [vmem:[#allocation71_spill] sm:$0xff] %v13213_v1  ;;  %v13215_v63 = vadd.f32 %v2630_v50, %v2602_v3  ;;  %v11803_v61 = vld [vmem:[#allocation5 + $0x684] sm:$0xf] }
 0x234   :  { %4106 = vmatpush.bf16.msrb.mxu0 %v9744_v2 }
 0x235   :  { %14701 = vst [vmem:[#allocation72_spill] sm:$0xff] %v13215_v63  ;;  %v11655_v63 = vld [vmem:[#allocation5 + $0x1e0] sm:$0xf0] }
 0x238   :  { %v2603_v19 = vpop.f32.mrf.mxu2  ;;  %v2548_v32 = vpop.f32.mrf.mxu0 }
 0x239   :  { %v2604_v9 = vadd.f32 %v2603_v19, %v2574_v60  ;;  %v2632_v8 = vpop.f32.mrf.mxu3  ;;  %v13218_v62 = vadd.f32 %v2548_v32, %v13170_v36  ;;  %v2577_v12 = vpop.f32.mrf.mxu1  ;;  %v9705_v60 = vld [vmem:[#allocation5 + $0x14c] sm:$0xf0] }
 0x23a   :  { %v9708_v27 = vor.u32 %v11632_v34, %v9705_v60 }
 0x23b   :  { %14702 = vst [vmem:[#allocation73_spill] sm:$0xff] %v13218_v62  ;;  %v13220_v37 = vadd.f32 %v2632_v8, %v2604_v9  ;;  %3895 = vmatmul.bf16.gmra.mxu0 %v12840_v15 }
 0x23c   :  { %3924 = vmatmul.bf16.gmra.mxu1 %v12842_v0  ;;  %4107 = vmatpush.bf16.msrb.mxu0 %v9708_v27 }
 0x23d   :  { %14703 = vst [vmem:[#allocation74_spill] sm:$0xff] %v13220_v37  ;;  %3953 = vmatmul.bf16.gmra.mxu2 %v12833_v59  ;;  %v9783_v37 = vld [vmem:[#allocation5 + $0x1c0] sm:$0xf] }
 0x23e   :  { %3982 = vmatmul.bf16.gmra.mxu3 %v12840_v15 }
 0x240   :  { %v2606_v23 = vpop.f32.mrf.mxu2  ;;  %v2550_v5 = vpop.f32.mrf.mxu0 }
 0x241   :  { %v2607_v10 = vadd.f32 %v2606_v23, %v2577_v12  ;;  %v2635_v33 = vpop.f32.mrf.mxu3  ;;  %v13227_v36 = vadd.f32 %v2550_v5, %v13175_v53  ;;  %v2579_v3 = vpop.f32.mrf.mxu1  ;;  %v10101_v53 = vld [vmem:[#allocation5 + $0x464] sm:$0xf0]  ;;  %v11623_v5 = vld [vmem:[#allocation5 + $0xe4] sm:$0xf] }
 0x242   :  { %v10104_v2 = vor.u32 %v11731_v31, %v10101_v53  ;;  %v10389_v23 = vld [vmem:[#allocation5 + $0x6a4] sm:$0xf0] }
 0x243   :  { %14704 = vst [vmem:[#allocation75_spill] sm:$0xff] %v13227_v36  ;;  %v13229_v50 = vadd.f32 %v2635_v33, %v2607_v10  ;;  %v9819_v10 = vld [vmem:[#allocation5 + $0x208] sm:$0xf]  ;;  %v11664_v33 = vld [vmem:[#allocation5 + $0x228] sm:$0xf0]  ;;  %v10392_v34 = vor.u32 %v11803_v61, %v10389_v23 }
 0x244   :  { %v9820_v60 = vor.u32 %v11664_v33, %v9819_v10  ;;  %4133 = vmatpush.bf16.msrb.mxu1 %v10104_v2  ;;  %v9784_v10 = vor.u32 %v11655_v63, %v9783_v37  ;;  %v11704_v63 = vld [vmem:[#allocation5 + $0x36c] sm:$0xf]  ;;  %v9993_v37 = vld [vmem:[#allocation5 + $0x38c] sm:$0xf0] }
 0x245   :  { %14705 = vst [vmem:[#allocation76_spill] sm:$0xff] %v13229_v50  ;;  %4162 = vmatpush.bf16.msrb.mxu2 %v10392_v34  ;;  %v10353_v50 = vld [vmem:[#allocation5 + $0x65c] sm:$0xf0]  ;;  %v11713_v34 = vld [vmem:[#allocation5 + $0x3b4] sm:$0xf] }
 0x246   :  { %4191 = vmatpush.bf16.msrb.mxu3 %v9820_v60  ;;  %v10029_v60 = vld [vmem:[#allocation5 + $0x3d4] sm:$0xf0] }
 0x248   :  { %v2608_v48 = vpop.f32.mrf.mxu2  ;;  %v2649_v9 = vpop.f32.mrf.mxu0 }
 0x249   :  { %v2609_v25 = vadd.f32 %v2608_v48, %v2579_v3  ;;  %v2637_v19 = vpop.f32.mrf.mxu3  ;;  %v2678_v8 = vpop.f32.mrf.mxu1  ;;  %v9669_v3 = vld [vmem:[#allocation5 + $0x104] sm:$0xf0] }
 0x24a   :  { %v2679_v12 = vadd.f32 %v2678_v8, %v2649_v9  ;;  %v9672_v27 = vor.u32 %v11623_v5, %v9669_v3  ;;  %v11794_v9 = vld [vmem:[#allocation5 + $0x63c] sm:$0xf]  ;;  %v9633_v3 = vld [vmem:[#allocation5 + $0xbc] sm:$0xf0]  ;;  %4192 = vmatpush.bf16.msrb.mxu3 %v9784_v10  ;;  %v9711_v10 = vld [vmem:[#allocation5 + $0x130] sm:$0xf] }
 0x24b   :  { %v13231_v32 = vadd.f32 %v2637_v19, %v2609_v25  ;;  %3996 = vmatmul.bf16.vlgmr.msra.gmra.mxu0 %v12748_v52  ;;  %v11722_v25 = vld [vmem:[#allocation5 + $0x3fc] sm:$0xf]  ;;  %v10065_v19 = vld [vmem:[#allocation5 + $0x41c] sm:$0xf0]  ;;  %v10356_v2 = vor.u32 %v11794_v9, %v10353_v50 }
 0x24c   :  { %4025 = vmatmul.bf16.vlgmr.msra.gmra.mxu1 %v12727_v26  ;;  %4108 = vmatpush.bf16.msrb.mxu0 %v9672_v27  ;;  %v11614_v5 = vld [vmem:[#allocation5 + $0x9c] sm:$0xf]  ;;  %v11785_v27 = vld [vmem:[#allocation5 + $0x5f4] sm:$0xf] }
 0x24d   :  { %14706 = vst [vmem:[#allocation77_spill] sm:$0xff] %v13231_v32  ;;  %4054 = vmatmul.bf16.vlgmr.msra.gmra.mxu2 %v12735_v40  ;;  %v10068_v32 = vor.u32 %v11722_v25, %v10065_v19  ;;  %v10032_v25 = vor.u32 %v11713_v34, %v10029_v60  ;;  %v11695_v60 = vld [vmem:[#allocation5 + $0x324] sm:$0xf] }
 0x24e   :  { %4083 = vmatmul.bf16.vlgmr.msra.gmra.mxu3 %v12748_v52  ;;  %4163 = vmatpush.bf16.msrb.mxu2 %v10356_v2  ;;  %v10281_v2 = vld [vmem:[#allocation5 + $0x5cc] sm:$0xf0] }
 0x24f   :  { %4134 = vmatpush.bf16.msrb.mxu1 %v10068_v32  ;;  %v11776_v32 = vld [vmem:[#allocation5 + $0x5ac] sm:$0xf] }
 0x250   :  { %v2707_v48 = vpop.f32.mrf.mxu2  ;;  %v2651_v53 = vpop.f32.mrf.mxu0 }
 0x251   :  { %v13237_v8 = vadd.f32 %v2707_v48, %v2679_v12  ;;  %v3852_v31 = vpop.f32.mrf.mxu3  ;;  %v2680_v23 = vpop.f32.mrf.mxu1  ;;  %v9636_v12 = vor.u32 %v11614_v5, %v9633_v3  ;;  %v10317_v48 = vld [vmem:[#allocation5 + $0x614] sm:$0xf0]  ;;  %v11637_v5 = vld [vmem:[#allocation5 + $0x150] sm:$0xf0] }
 0x252   :  { %v13240_v61 = vadd.f32 %v3852_v31, %v12917_v43  ;;  %v2681_v33 = vadd.f32 %v2680_v23, %v2651_v53  ;;  %v10320_v19 = vor.u32 %v11785_v27, %v10317_v48  ;;  %v9748_v43 = vor.u32 %v11646_v11, %v9747_v57  ;;  %v11767_v27 = vld [vmem:[#allocation5 + $0x564] sm:$0xf] }
 0x253   :  { %14707 = vst [vmem:[#allocation78_spill] sm:$0xff] %v13237_v8  ;;  %4109 = vmatpush.bf16.msrb.mxu0 %v9636_v12  ;;  %4135 = vmatpush.bf16.msrb.mxu1 %v10032_v25  ;;  %v9996_v23 = vor.u32 %v11704_v63, %v9993_v37  ;;  %v10284_v11 = vor.u32 %v11776_v32, %v10281_v2  ;;  %v10245_v25 = vld [vmem:[#allocation5 + $0x584] sm:$0xf0]  ;;  %v11758_v2 = vld [vmem:[#allocation5 + $0x51c] sm:$0xf] }
 0x254   :  { %4164 = vmatpush.bf16.msrb.mxu2 %v10320_v19  ;;  %4193 = vmatpush.bf16.msrb.mxu3 %v9748_v43  ;;  %v9712_v12 = vor.u32 %v11637_v5, %v9711_v10  ;;  %v9675_v19 = vld [vmem:[#allocation5 + $0xe8] sm:$0xf]  ;;  %v11605_v43 = vld [vmem:[#allocation5 + $0x54] sm:$0xf]  ;;  %v10248_v63 = vor.u32 %v11767_v27, %v10245_v25  ;;  %v11610_v8 = vld [vmem:[#allocation5 + $0x78] sm:$0xf0] }
 0x257   :  { %4136 = vmatpush.bf16.msrb.mxu1 %v9996_v23  ;;  %v9921_v23 = vld [vmem:[#allocation5 + $0x2fc] sm:$0xf0] }
 0x258   :  { %v2709_v50 = vpop.f32.mrf.mxu2  ;;  %v2654_v53 = vpop.f32.mrf.mxu0  ;;  %4165 = vmatpush.bf16.msrb.mxu2 %v10284_v11  ;;  %4194 = vmatpush.bf16.msrb.mxu3 %v9712_v12 }
 0x259   :  { %v13242_v9 = vadd.f32 %v2709_v50, %v2681_v33  ;;  %v3854_v31 = vpop.f32.mrf.mxu3  ;;  %v2683_v34 = vpop.f32.mrf.mxu1  ;;  %v9957_v33 = vld [vmem:[#allocation5 + $0x344] sm:$0xf0]  ;;  %v9597_v50 = vld [vmem:[#allocation5 + $0x74] sm:$0xf0] }
 0x25a   :  { %v13245_v3 = vadd.f32 %v3854_v31, %v12921_v16  ;;  %v2684_v57 = vadd.f32 %v2683_v34, %v2654_v53  ;;  %v9960_v48 = vor.u32 %v11695_v60, %v9957_v33  ;;  %v11628_v16 = vld [vmem:[#allocation5 + $0x108] sm:$0xf0]  ;;  %v9600_v37 = vor.u32 %v11605_v43, %v9597_v50  ;;  %v11686_v53 = vld [vmem:[#allocation5 + $0x2dc] sm:$0xf]  ;;  %v10209_v60 = vld [vmem:[#allocation5 + $0x53c] sm:$0xf0] }
 0x25b   :  { %14708 = vst [vmem:[#allocation79_spill] sm:$0xff] %v13242_v9  ;;  %4001 = vmatmul.bf16.gmra.mxu0 %v12757_v56  ;;  %v9676_v32 = vor.u32 %v11628_v16, %v9675_v19  ;;  %v9924_v11 = vor.u32 %v11686_v53, %v9921_v23  ;;  %v9639_v33 = vld [vmem:[#allocation5 + $0xa0] sm:$0xf]  ;;  %v11619_v9 = vld [vmem:[#allocation5 + $0xc0] sm:$0xf0] }
 0x25c   :  { %4030 = vmatmul.bf16.gmra.mxu1 %v12730_v30  ;;  %4166 = vmatpush.bf16.msrb.mxu2 %v10248_v63  ;;  %v9640_v19 = vor.u32 %v11619_v9, %v9639_v33  ;;  %v11596_v16 = vld [vmem:[#allocation5 + $0xc] sm:$0xf]  ;;  %v9561_v43 = vld [vmem:[#allocation5 + $0x2c] sm:$0xf0]  ;;  %v9885_v63 = vld [vmem:[#allocation5 + $0x2b4] sm:$0xf0] }
 0x25d   :  { %4059 = vmatmul.bf16.gmra.mxu2 %v12742_v45  ;;  %4137 = vmatpush.bf16.msrb.mxu1 %v9960_v48  ;;  %v10212_v48 = vor.u32 %v11758_v2, %v10209_v60  ;;  %v9564_v50 = vor.u32 %v11596_v16, %v9561_v43  ;;  %v9849_v9 = vld [vmem:[#allocation5 + $0x26c] sm:$0xf0]  ;;  %v11601_v16 = vld [vmem:[#allocation5 + $0x30] sm:$0xf0] }
 0x25e   :  { %4088 = vmatmul.bf16.gmra.mxu3 %v12757_v56  ;;  %4110 = vmatpush.bf16.msrb.mxu0 %v9600_v37  ;;  %v11749_v37 = vld [vmem:[#allocation5 + $0x4d4] sm:$0xf] }
 0x25f   :  { %4195 = vmatpush.bf16.msrb.mxu3 %v9676_v32  ;;  %v11668_v32 = vld [vmem:[#allocation5 + $0x24c] sm:$0xf] }
 0x260   :  { %v2712_v31 = vpop.f32.mrf.mxu2  ;;  %v2656_v34 = vpop.f32.mrf.mxu0  ;;  %4167 = vmatpush.bf16.msrb.mxu2 %v10212_v48  ;;  %v9852_v33 = vor.u32 %v11668_v32, %v9849_v9  ;;  %v9567_v48 = vld [vmem:[#allocation5 + $0x10] sm:$0xf] }
 0x261   :  { %v13251_v10 = vadd.f32 %v2712_v31, %v2684_v57  ;;  %v3857_v5 = vpop.f32.mrf.mxu3  ;;  %v2685_v12 = vpop.f32.mrf.mxu1  ;;  %4138 = vmatpush.bf16.msrb.mxu1 %v9924_v11  ;;  %v11677_v57 = vld [vmem:[#allocation5 + $0x294] sm:$0xf]  ;;  %v10173_v31 = vld [vmem:[#allocation5 + $0x4f4] sm:$0xf0] }
 0x262   :  { %v13254_v27 = vadd.f32 %v3857_v5, %v12929_v42  ;;  %v2686_v25 = vadd.f32 %v2685_v12, %v2656_v34  ;;  %v9888_v53 = vor.u32 %v11677_v57, %v9885_v63  ;;  %v10176_v23 = vor.u32 %v11749_v37, %v10173_v31  ;;  %4111 = vmatpush.bf16.msrb.mxu0 %v9564_v50  ;;  %v11740_v5 = vld [vmem:[#allocation5 + $0x48c] sm:$0xf]  ;;  %v10137_v12 = vld [vmem:[#allocation5 + $0x4ac] sm:$0xf0] }
 0x263   :  { %14709 = vst [vmem:[#allocation80_spill] sm:$0xff] %v13251_v10  ;;  %v9603_v10 = vld [vmem:[#allocation5 + $0x58] sm:$0xf]  ;;  %4196 = vmatpush.bf16.msrb.mxu3 %v9640_v19  ;;  %v10140_v19 = vor.u32 %v11740_v5, %v10137_v12 }
 0x264   :  { %v9604_v42 = vor.u32 %v11610_v8, %v9603_v10  ;;  %4168 = vmatpush.bf16.msrb.mxu2 %v10176_v23  ;;  %v9568_v8 = vor.u32 %v11601_v16, %v9567_v48  ;;  %v10107_v48 = vld [vmem:[#allocation5 + $0x448] sm:$0xf]  ;;  %v11736_v16 = vld [vmem:[#allocation5 + $0x468] sm:$0xf0] }
 0x265   :  { %4139 = vmatpush.bf16.msrb.mxu1 %v9888_v53 }
 0x267   :  { %4197 = vmatpush.bf16.msrb.mxu3 %v9604_v42 }
 0x268   :  { %v2714_v2 = vpop.f32.mrf.mxu2  ;;  %v2659_v60 = vpop.f32.mrf.mxu0  ;;  %4169 = vmatpush.bf16.msrb.mxu2 %v10140_v19  ;;  %v10108_v19 = vor.u32 %v11736_v16, %v10107_v48  ;;  %v10395_v48 = vld [vmem:[#allocation5 + $0x688] sm:$0xf]  ;;  %v11808_v16 = vld [vmem:[#allocation5 + $0x6a8] sm:$0xf0] }
 0x269   :  { %v13256_v34 = vadd.f32 %v2714_v2, %v2686_v25  ;;  %v3859_v11 = vpop.f32.mrf.mxu3  ;;  %v2688_v57 = vpop.f32.mrf.mxu1  ;;  %4140 = vmatpush.bf16.msrb.mxu1 %v9852_v33 }
 0x26a   :  { %v13259_v43 = vadd.f32 %v3859_v11, %v12933_v58  ;;  %v2689_v50 = vadd.f32 %v2688_v57, %v2659_v60  ;;  %4220 = vmatpush.bf16.msra.mxu0 %v10108_v19  ;;  %v11732_v19 = vld [vmem:[#allocation5 + $0x44c] sm:$0xf] }
 0x26b   :  { %14710 = vst [vmem:[#allocation81_spill] sm:$0xff] %v13256_v34  ;;  %4006 = vmatmul.bf16.gmra.mxu0 %v12795_v24  ;;  %4198 = vmatpush.bf16.msrb.mxu3 %v9568_v8  ;;  %v6929_v8 = vlaneseq  ;;  %v11642_v34 = vld [vmem:[#allocation5 + $0x17c] sm:$0xf] }
 0x26c   :  { %4035 = vmatmul.bf16.gmra.mxu1 %v12783_v13 }
 0x26d   :  { %4064 = vmatmul.bf16.gmra.mxu2 %v12791_v22 }
 0x26e   :  { %4093 = vmatmul.bf16.gmra.mxu3 %v12795_v24 }
 0x270   :  { %v2717_v10 = vpop.f32.mrf.mxu2  ;;  %v2661_v63 = vpop.f32.mrf.mxu0 }
 0x271   :  { %v13265_v25 = vadd.f32 %v2717_v10, %v2689_v50  ;;  %v3862_v58 = vpop.f32.mrf.mxu3  ;;  %v2690_v31 = vpop.f32.mrf.mxu1  ;;  %v13287_v10 = vld [vmem:[%s14587_s5] sm:$0x7] }
 0x272   :  { %v13268_v37 = vadd.f32 %v3862_v58, %v12941_v35  ;;  %v2691_v53 = vadd.f32 %v2690_v31, %v2661_v63 }
 0x273   :  { %14711 = vst [vmem:[#allocation82_spill] sm:$0xff] %v13265_v25  ;;  %v11790_v25 = vld [vmem:[#allocation5 + $0x618] sm:$0xf0] }
 0x278   :  { %v2719_v23 = vpop.f32.mrf.mxu2  ;;  %v2664_v32 = vpop.f32.mrf.mxu0 }
 0x279   :  { %v13270_v42 = vadd.f32 %v2719_v23, %v2691_v53  ;;  %v3864_v2 = vpop.f32.mrf.mxu3  ;;  %v2693_v5 = vpop.f32.mrf.mxu1 }
 0x27a   :  { %v13273_v9 = vadd.f32 %v3864_v2, %v12945_v7  ;;  %v2694_v11 = vadd.f32 %v2693_v5, %v2664_v32  ;;  %v13296_v32 = vperm.slane %v13287_v10, 0  ;;  %v13298_v5 = vshrl.u32 %v6929_v8, 7 }
 0x27b   :  { %14712 = vst [vmem:[#allocation83_spill] sm:$0xff] %v13270_v42  ;;  %4011 = vmatmul.bf16.gmra.mxu0 %v12842_v0  ;;  %v11723_v42 = vld [vmem:[#allocation5 + $0x404] sm:$0xf] }
 0x27c   :  { %4040 = vmatmul.bf16.gmra.mxu1 %v12833_v59  ;;  %vm6987_vm3 = vcmp.lt.s32.totalorder %v13298_v5, 7  ;;  %vm7238_vm12 = vcmp.lt.s32.totalorder %v13298_v5, 6  ;;  %vm7489_vm15 = vcmp.lt.s32.totalorder %v13298_v5, 5 }
 0x27d   :  { %4069 = vmatmul.bf16.gmra.mxu2 %v12840_v15 }
 0x27e   :  { %4098 = vmatmul.bf16.gmra.mxu3 %v12842_v0 }
 0x280   :  { %v2722_v35 = vpop.f32.mrf.mxu2  ;;  %v2666_v12 = vpop.f32.mrf.mxu0 }
 0x281   :  { %v13279_v60 = vadd.f32 %v2722_v35, %v2694_v11  ;;  %v3867_v33 = vpop.f32.mrf.mxu3  ;;  %v2695_v57 = vpop.f32.mrf.mxu1  ;;  %v10071_v11 = vld [vmem:[#allocation5 + $0x400] sm:$0xf]  ;;  %v11727_v35 = vld [vmem:[#allocation5 + $0x420] sm:$0xf0] }
 0x282   :  { %v13282_v7 = vadd.f32 %v3867_v33, %v12953_v21  ;;  %v2696_v50 = vadd.f32 %v2695_v57, %v2666_v12  ;;  %v10072_v12 = vor.u32 %v11727_v35, %v10071_v11  ;;  %v11660_v57 = vld [vmem:[#allocation5 + $0x20c] sm:$0xf]  ;;  %v11799_v11 = vld [vmem:[#allocation5 + $0x660] sm:$0xf0] }
 0x283   :  { %14713 = vst [vmem:[#allocation84_spill] sm:$0xff] %v13279_v60  ;;  %v9785_v60 = vld [vmem:[#allocation5 + $0x1e4] sm:$0xf0] }
 0x284   :  { %4221 = vmatpush.bf16.msra.mxu0 %v10072_v12 }
 0x288   :  { %v2724_v58 = vpop.f32.mrf.mxu2  ;;  %v3881_v53 = vpop.f32.mrf.mxu0 }
 0x289   :  { %v13289_v63 = vadd.f32 %v2724_v58, %v2696_v50  ;;  %v3869_v31 = vpop.f32.mrf.mxu3  ;;  %v3882_v21 = vadd.f32 %v3881_v53, %v13240_v61  ;;  %v3910_v2 = vpop.f32.mrf.mxu1  ;;  %v9821_v61 = vld [vmem:[#allocation5 + $0x22c] sm:$0xf0] }
 0x28a   :  { %v13292_v23 = vadd.f32 %v3869_v31, %v12957_v18  ;;  %v10396_v18 = vor.u32 %v11808_v16, %v10395_v48  ;;  %v10109_v50 = vld [vmem:[#allocation5 + $0x46c] sm:$0xf0]  ;;  %v9824_v58 = vor.u32 %v11660_v57, %v9821_v61 }
 0x28b   :  { %14714 = vst [vmem:[#allocation85_spill] sm:$0xff] %v13289_v63  ;;  %v3911_v33 = vadd.f32 %v3910_v2, %v3882_v21  ;;  %4112 = vmatmul.bf16.vlgmr.msrb.gmra.mxu0 %v12727_v26  ;;  %v10112_v31 = vor.u32 %v11732_v19, %v10109_v50  ;;  %v10359_v2 = vld [vmem:[#allocation5 + $0x640] sm:$0xf]  ;;  %v10073_v19 = vld [vmem:[#allocation5 + $0x424] sm:$0xf0] }
 0x28c   :  { %4141 = vmatmul.bf16.vlgmr.msrb.gmra.mxu1 %v12735_v40  ;;  %4278 = vmatpush.bf16.msra.mxu2 %v9824_v58  ;;  %v10360_v63 = vor.u32 %v11799_v11, %v10359_v2  ;;  %v10035_v58 = vld [vmem:[#allocation5 + $0x3b8] sm:$0xf] }
 0x28d   :  { %4170 = vmatmul.bf16.vlgmr.msrb.gmra.mxu2 %v12748_v52  ;;  %v6939_v8 = vadd.f32 %v13296_v32, %v3911_v33  ;;  %4249 = vmatpush.bf16.msra.mxu1 %v10396_v18  ;;  %v11651_v33 = vld [vmem:[#allocation5 + $0x1c4] sm:$0xf]  ;;  %v10323_v11 = vld [vmem:[#allocation5 + $0x5f8] sm:$0xf] }
 0x28e   :  { %4199 = vmatmul.bf16.vlgmr.msrb.gmra.mxu3 %v12727_v26  ;;  %v9788_v61 = vor.u32 %v11651_v33, %v9785_v60  ;;  %v10037_v60 = vld [vmem:[#allocation5 + $0x3dc] sm:$0xf0] }
 0x28f   :  { %v6963_v53 = vmax.f32 %v6939_v8, 0.0  ;;  %4307 = vmatpush.bf16.msra.mxu3 %v10112_v31  ;;  %v11718_v31 = vld [vmem:[#allocation5 + $0x3d8] sm:$0xf0] }
 0x290   :  { %v3939_v21 = vpop.f32.mrf.mxu2  ;;  %v3883_v16 = vpop.f32.mrf.mxu0  ;;  %v10036_v2 = vor.u32 %v11718_v31, %v10035_v58  ;;  %4279 = vmatpush.bf16.msra.mxu2 %v9788_v61  ;;  %v10287_v31 = vld [vmem:[#allocation5 + $0x5b0] sm:$0xf] }
 0x291   :  { %v3940_v35 = vadd.f32 %v3939_v21, %v12962_v54  ;;  %v3968_v48 = vpop.f32.mrf.mxu3  ;;  %v6990_v12 = vsel %vm6987_vm3, %v6963_v53, 0.0  ;;  %v3884_v57 = vadd.f32 %v3883_v16, %v13245_v3  ;;  %v3912_v18 = vpop.f32.mrf.mxu1  ;;  %4250 = vmatpush.bf16.msra.mxu1 %v10360_v63  ;;  %v10076_v54 = vor.u32 %v11723_v42, %v10073_v19  ;;  %v9749_v3 = vld [vmem:[#allocation5 + $0x19c] sm:$0xf0]  ;;  %v11714_v16 = vld [vmem:[#allocation5 + $0x3bc] sm:$0xf]  ;;  %v14715_v19 = vld [vmem:[#allocation36_spill] sm:$0xff] }
 0x292   :  { %v7014_v50 = vrot.slane %v6990_v12, 4  ;;  %v10324_v53 = vor.u32 %v11790_v25, %v10323_v11  ;;  %4222 = vmatpush.bf16.msra.mxu0 %v10036_v2 }
 0x293   :  { %v13310_v8 = vadd.f32 %v3968_v48, %v3940_v35  ;;  %v3913_v21 = vadd.f32 %v3912_v18, %v3884_v57  ;;  %4308 = vmatpush.bf16.msra.mxu3 %v10076_v54  ;;  %v9752_v35 = vor.u32 %v11642_v34, %v9749_v3  ;;  %v10040_v48 = vor.u32 %v11714_v16, %v10037_v60  ;;  %v9999_v57 = vld [vmem:[#allocation5 + $0x370] sm:$0xf]  ;;  %v11709_v18 = vld [vmem:[#allocation5 + $0x390] sm:$0xf0]  ;;  %v9713_v3 = vld [vmem:[#allocation5 + $0x154] sm:$0xf0] }
 0x294   :  { %v7015_v36 = vmax.f32 %v6990_v12, %v7014_v50  ;;  %v10000_v58 = vor.u32 %v11709_v18, %v9999_v57  ;;  %v11781_v54 = vld [vmem:[#allocation5 + $0x5d0] sm:$0xf0]  ;;  %v11700_v57 = vld [vmem:[#allocation5 + $0x348] sm:$0xf0]  ;;  %v10251_v18 = vld [vmem:[#allocation5 + $0x568] sm:$0xf] }
 0x295   :  { %v6942_v33 = vadd.f32 %v13296_v32, %v3913_v21  ;;  %4251 = vmatpush.bf16.msra.mxu1 %v10324_v53  ;;  %4280 = vmatpush.bf16.msra.mxu2 %v9752_v35  ;;  %v11633_v21 = vld [vmem:[#allocation5 + $0x134] sm:$0xf]  ;;  %v10288_v53 = vor.u32 %v11781_v54, %v10287_v31  ;;  %v10001_v35 = vld [vmem:[#allocation5 + $0x394] sm:$0xf0] }
 0x296   :  { %v7016_v62 = vrot.slane %v7015_v36, 2  ;;  %v11705_v16 = vld [vmem:[#allocation5 + $0x374] sm:$0xf]  ;;  %4223 = vmatpush.bf16.msra.mxu0 %v10000_v58 }
 0x297   :  { %v6966_v42 = vmax.f32 %v6942_v33, 0.0  ;;  %4309 = vmatpush.bf16.msra.mxu3 %v10040_v48  ;;  %v9716_v33 = vor.u32 %v11633_v21, %v9713_v3  ;;  %v11696_v21 = vld [vmem:[#allocation5 + $0x32c] sm:$0xf] }
 0x298   :  { %v3941_v63 = vpop.f32.mrf.mxu2  ;;  %v7017_v61 = vmax.f32 %v7015_v36, %v7016_v62  ;;  %v3886_v25 = vpop.f32.mrf.mxu0 }
 0x299   :  { %v3942_v12 = vadd.f32 %v3941_v63, %v14715_v19  ;;  %v3970_v50 = vpop.f32.mrf.mxu3  ;;  %v6993_v34 = vsel %vm6987_vm3, %v6966_v42, 0.0  ;;  %v3887_v2 = vadd.f32 %v3886_v25, %v13254_v27  ;;  %v3915_v11 = vpop.f32.mrf.mxu1  ;;  %v9963_v63 = vld [vmem:[#allocation5 + $0x328] sm:$0xf]  ;;  %4252 = vmatpush.bf16.msra.mxu1 %v10288_v53  ;;  %v10004_v42 = vor.u32 %v11705_v16, %v10001_v35  ;;  %v11772_v25 = vld [vmem:[#allocation5 + $0x588] sm:$0xf0]  ;;  %4281 = vmatpush.bf16.msra.mxu2 %v9716_v33 }
 0x29a   :  { %v7018_v60 = vrot.slane %v7017_v61, 1  ;;  %v7032_v62 = vrot.slane %v6993_v34, 4  ;;  %v9964_v19 = vor.u32 %v11700_v57, %v9963_v63  ;;  %v10252_v31 = vor.u32 %v11772_v25, %v10251_v18  ;;  %v11691_v35 = vld [vmem:[#allocation5 + $0x300] sm:$0xf0]  ;;  %v14716_v57 = vld [vmem:[#allocation37_spill] sm:$0xff] }
 0x29b   :  { %v13317_v36 = vadd.f32 %v3970_v50, %v3942_v12  ;;  %v3916_v48 = vadd.f32 %v3915_v11, %v3887_v2  ;;  %4117 = vmatmul.bf16.gmra.mxu0 %v12730_v30  ;;  %v11624_v12 = vld [vmem:[#allocation5 + $0xec] sm:$0xf]  ;;  %v9677_v50 = vld [vmem:[#allocation5 + $0x10c] sm:$0xf0]  ;;  %4310 = vmatpush.bf16.msra.mxu3 %v10004_v42  ;;  %v10215_v18 = vld [vmem:[#allocation5 + $0x520] sm:$0xf] }
 0x29c   :  { %v7033_v27 = vmax.f32 %v6993_v34, %v7032_v62  ;;  %4146 = vmatmul.bf16.gmra.mxu1 %v12742_v45  ;;  %v9680_v54 = vor.u32 %v11624_v12, %v9677_v50  ;;  %v9965_v2 = vld [vmem:[#allocation5 + $0x34c] sm:$0xf0]  ;;  %4224 = vmatpush.bf16.msra.mxu0 %v9964_v19  ;;  %v7019_v53 = vmax.f32 %v7017_v61, %v7018_v60  ;;  %v9927_v62 = vld [vmem:[#allocation5 + $0x2e0] sm:$0xf]  ;;  %v11763_v25 = vld [vmem:[#allocation5 + $0x540] sm:$0xf0] }
 0x29d   :  { %4175 = vmatmul.bf16.gmra.mxu2 %v12757_v56  ;;  %v6945_v58 = vadd.f32 %v13296_v32, %v3916_v48  ;;  %v9968_v34 = vor.u32 %v11696_v21, %v9965_v2  ;;  %4253 = vmatpush.bf16.msra.mxu1 %v10252_v31  ;;  %v9928_v33 = vor.u32 %v11691_v35, %v9927_v62  ;;  %v11615_v12 = vld [vmem:[#allocation5 + $0xa4] sm:$0xf]  ;;  %v9641_v50 = vld [vmem:[#allocation5 + $0xc4] sm:$0xf0]  ;;  %v9891_v35 = vld [vmem:[#allocation5 + $0x298] sm:$0xf] }
 0x29e   :  { %4204 = vmatmul.bf16.gmra.mxu3 %v12730_v30  ;;  %v7034_v11 = vrot.slane %v7033_v27, 2  ;;  %4282 = vmatpush.bf16.msra.mxu2 %v9680_v54  ;;  %v10216_v60 = vor.u32 %v11763_v25, %v10215_v18  ;;  %v9644_v2 = vor.u32 %v11615_v12, %v9641_v50  ;;  %v11754_v25 = vld [vmem:[#allocation5 + $0x4f8] sm:$0xf0]  ;;  %v9893_v12 = vld [vmem:[#allocation5 + $0x2bc] sm:$0xf0] }
 0x29f   :  { %v6969_v3 = vmax.f32 %v6945_v58, 0.0  ;;  %v11687_v58 = vld [vmem:[#allocation5 + $0x2e4] sm:$0xf]  ;;  %4311 = vmatpush.bf16.msra.mxu3 %v9968_v34  ;;  %v9608_v34 = vor.u32 %v11606_v39, %v9605_v46  ;;  %v9855_v50 = vld [vmem:[#allocation5 + $0x250] sm:$0xf] }
 0x2a0   :  { %v3944_v16 = vpop.f32.mrf.mxu2  ;;  %v7035_v63 = vmax.f32 %v7033_v27, %v7034_v11  ;;  %v3888_v29 = vpop.f32.mrf.mxu0  ;;  %4225 = vmatpush.bf16.msra.mxu0 %v9928_v33  ;;  %v9929_v11 = vld [vmem:[#allocation5 + $0x304] sm:$0xf0]  ;;  %v11678_v33 = vld [vmem:[#allocation5 + $0x29c] sm:$0xf] }
 0x2a1   :  { %v3945_v48 = vadd.f32 %v3944_v16, %v14716_v57  ;;  %v3973_v1 = vpop.f32.mrf.mxu3  ;;  %v6996_v19 = vsel %vm6987_vm3, %v6969_v3, 0.0  ;;  %v3889_v42 = vadd.f32 %v3888_v29, %v13259_v43  ;;  %v3917_v61 = vpop.f32.mrf.mxu1  ;;  %v7158_v16 = vpack.c.bf16 %v7019_v53, %v7019_v53  ;;  %v11682_v57 = vld [vmem:[#allocation5 + $0x2b8] sm:$0xf0]  ;;  %4254 = vmatpush.bf16.msra.mxu1 %v10216_v60  ;;  %v10179_v29 = vld [vmem:[#allocation5 + $0x4d8] sm:$0xf] }
 0x2a2   :  { %v7036_v31 = vrot.slane %v7035_v63, 1  ;;  %v7050_v27 = vrot.slane %v6996_v19, 4  ;;  %v9932_v3 = vor.u32 %v11687_v58, %v9929_v11  ;;  %v9892_v18 = vor.u32 %v11682_v57, %v9891_v35  ;;  %4283 = vmatpush.bf16.msra.mxu2 %v9644_v2  ;;  %v11673_v58 = vld [vmem:[#allocation5 + $0x270] sm:$0xf0] }
 0x2a3   :  { %v13328_v21 = vadd.f32 %v3973_v1, %v3945_v48  ;;  %v3918_v62 = vadd.f32 %v3917_v61, %v3889_v42  ;;  %v10180_v48 = vor.u32 %v11754_v25, %v10179_v29  ;;  %v9896_v61 = vor.u32 %v11678_v33, %v9893_v12  ;;  %v11745_v35 = vld [vmem:[#allocation5 + $0x4b0] sm:$0xf0]  ;;  %v9857_v33 = vld [vmem:[#allocation5 + $0x274] sm:$0xf0] }
 0x2a4   :  { %v7037_v43 = vmax.f32 %v7035_v63, %v7036_v31  ;;  %v7051_v54 = vmax.f32 %v6996_v19, %v7050_v27  ;;  %4226 = vmatpush.bf16.msra.mxu0 %v9892_v18  ;;  %4312 = vmatpush.bf16.msra.mxu3 %v9932_v3  ;;  %v8069_v60 = vunpack.c.l.b16 %v7158_v16  ;;  %v9856_v46 = vor.u32 %v11673_v58, %v9855_v50  ;;  %v11597_v57 = vld [vmem:[#allocation5 + $0x14] sm:$0xf]  ;;  %v9569_v18 = vld [vmem:[#allocation5 + $0x34] sm:$0xf0] }
 0x2a5   :  { %v6948_v1 = vadd.f32 %v13296_v32, %v3918_v62  ;;  %4255 = vmatpush.bf16.msra.mxu1 %v10180_v48  ;;  %v10143_v62 = vld [vmem:[#allocation5 + $0x490] sm:$0xf]  ;;  %v11669_v25 = vld [vmem:[#allocation5 + $0x254] sm:$0xf] }
 0x2a6   :  { %v7161_v53 = vpack.c.bf16 %v7037_v43, %v7037_v43  ;;  %v7052_v42 = vrot.slane %v7051_v54, 2  ;;  %4284 = vmatpush.bf16.msra.mxu2 %v9608_v34  ;;  %v10144_v43 = vor.u32 %v11745_v35, %v10143_v62 }
 0x2a7   :  { %v6972_v63 = vmax.f32 %v6948_v1, 0.0 }
 0x2a8   :  { %v3946_v19 = vpop.f32.mrf.mxu2  ;;  %v8072_v31 = vunpack.c.l.b16 %v7161_v53  ;;  %v7053_v27 = vmax.f32 %v7051_v54, %v7052_v42  ;;  %v3891_v39 = vpop.f32.mrf.mxu0  ;;  %4227 = vmatpush.bf16.msra.mxu0 %v9856_v46  ;;  %4313 = vmatpush.bf16.msra.mxu3 %v9896_v61  ;;  %v9572_v53 = vor.u32 %v11597_v57, %v9569_v18 }
 0x2a9   :  { %v3947_v2 = vadd.f32 %v3946_v19, %v12985_v55  ;;  %v3975_v11 = vpop.f32.mrf.mxu3  ;;  %v6999_v3 = vsel %vm6987_vm3, %v6972_v63, 0.0  ;;  %v3892_v16 = vadd.f32 %v3891_v39, %v13268_v37  ;;  %v3920_v29 = vpop.f32.mrf.mxu1  ;;  %4256 = vmatpush.bf16.msra.mxu1 %v10144_v43  ;;  %v9860_v37 = vor.u32 %v11669_v25, %v9857_v33 }
 0x2aa   :  { %v8093_v54 = vsel %vm7828_vm4, %v8072_v31, %v8069_v60  ;;  %v7054_v1 = vrot.slane %v7053_v27, 1  ;;  %v7068_v55 = vrot.slane %v6999_v3, 4  ;;  %4285 = vmatpush.bf16.msra.mxu2 %v9572_v53 }
 0x2ab   :  { %v13336_v48 = vadd.f32 %v3975_v11, %v3947_v2  ;;  %v3921_v12 = vadd.f32 %v3920_v29, %v3892_v16  ;;  %4122 = vmatmul.bf16.gmra.mxu0 %v12783_v13  ;;  %v14717_v2 = vld [vmem:[#allocation38_spill] sm:$0xff] }
 0x2ac   :  { %v7055_v42 = vmax.f32 %v7053_v27, %v7054_v1  ;;  %v7069_v34 = vmax.f32 %v6999_v3, %v7068_v55  ;;  %4151 = vmatmul.bf16.gmra.mxu1 %v12791_v22  ;;  %4314 = vmatpush.bf16.msra.mxu3 %v9860_v37 }
 0x2ad   :  { %4180 = vmatmul.bf16.gmra.mxu2 %v12795_v24  ;;  %v6951_v60 = vadd.f32 %v13296_v32, %v3921_v12 }
 0x2ae   :  { %4209 = vmatmul.bf16.gmra.mxu3 %v12783_v13  ;;  %v7164_v63 = vpack.c.bf16 %v7055_v42, %v7055_v42  ;;  %v7070_v61 = vrot.slane %v7069_v34, 2 }
 0x2af   :  { %v6975_v19 = vmax.f32 %v6951_v60, 0.0 }
 0x2b0   :  { %v3949_v50 = vpop.f32.mrf.mxu2  ;;  %v8075_v58 = vunpack.c.l.b16 %v7164_v63  ;;  %v7071_v31 = vmax.f32 %v7069_v34, %v7070_v61  ;;  %v3893_v39 = vpop.f32.mrf.mxu0 }
 0x2b1   :  { %v3950_v27 = vadd.f32 %v3949_v50, %v14717_v2  ;;  %v3978_v11 = vpop.f32.mrf.mxu3  ;;  %v7002_v46 = vsel %vm6987_vm3, %v6975_v19, 0.0  ;;  %v3894_v62 = vadd.f32 %v3893_v39, %v13273_v9  ;;  %v3922_v35 = vpop.f32.mrf.mxu1  ;;  %v14718_v9 = vld [vmem:[#allocation39_spill] sm:$0xff] }
 0x2b2   :  { %v8094_v57 = vsel %vm7830_vm5, %v8075_v58, %v8093_v54  ;;  %v7072_v3 = vrot.slane %v7071_v31, 1  ;;  %v7086_v16 = vrot.slane %v7002_v46, 4 }
 0x2b3   :  { %v13348_v29 = vadd.f32 %v3978_v11, %v3950_v27  ;;  %v3923_v43 = vadd.f32 %v3922_v35, %v3894_v62  ;;  %v11804_v35 = vld [vmem:[#allocation5 + $0x68c] sm:$0xf] }
 0x2b4   :  { %v7073_v18 = vmax.f32 %v7071_v31, %v7072_v3  ;;  %v7087_v25 = vmax.f32 %v7002_v46, %v7086_v16 }
 0x2b5   :  { %v6954_v1 = vadd.f32 %v13296_v32, %v3923_v43 }
 0x2b6   :  { %v7167_v55 = vpack.c.bf16 %v7073_v18, %v7073_v18  ;;  %v7088_v33 = vrot.slane %v7087_v25, 2 }
 0x2b7   :  { %v6978_v12 = vmax.f32 %v6954_v1, 0.0  ;;  %v14719_v1 = vld [vmem:[#allocation40_spill] sm:$0xff] }
 0x2b8   :  { %v3951_v53 = vpop.f32.mrf.mxu2  ;;  %v8078_v37 = vunpack.c.l.b16 %v7167_v55  ;;  %v7089_v42 = vmax.f32 %v7087_v25, %v7088_v33  ;;  %v3896_v54 = vpop.f32.mrf.mxu0 }
 0x2b9   :  { %v3952_v34 = vadd.f32 %v3951_v53, %v14718_v9  ;;  %v3980_v60 = vpop.f32.mrf.mxu3  ;;  %v7005_v63 = vsel %vm6987_vm3, %v6978_v12, 0.0  ;;  %v3897_v61 = vadd.f32 %v3896_v54, %v13282_v7  ;;  %v3925_v19 = vpop.f32.mrf.mxu1 }
 0x2ba   :  { %v8095_v50 = vsel %vm7832_vm6, %v8078_v37, %v8094_v57  ;;  %v7090_v58 = vrot.slane %v7089_v42, 1  ;;  %v7104_v31 = vrot.slane %v7005_v63, 4  ;;  %v10397_v57 = vld [vmem:[#allocation5 + $0x6ac] sm:$0xf0] }
 0x2bb   :  { %v13356_v2 = vadd.f32 %v3980_v60, %v3952_v34  ;;  %v3926_v27 = vadd.f32 %v3925_v19, %v3897_v61  ;;  %4127 = vmatmul.bf16.gmra.mxu0 %v12833_v59  ;;  %v10400_v43 = vor.u32 %v11804_v35, %v10397_v57 }
 0x2bc   :  { %v7091_v11 = vmax.f32 %v7089_v42, %v7090_v58  ;;  %v7105_v39 = vmax.f32 %v7005_v63, %v7104_v31  ;;  %4156 = vmatmul.bf16.gmra.mxu1 %v12840_v15 }
 0x2bd   :  { %4185 = vmatmul.bf16.gmra.mxu2 %v12842_v0  ;;  %v6957_v46 = vadd.f32 %v13296_v32, %v3926_v27  ;;  %4336 = vmatpush.bf16.msrb.mxu0 %v10400_v43 }
 0x2be   :  { %4214 = vmatmul.bf16.gmra.mxu3 %v12833_v59  ;;  %v7170_v7 = vpack.c.bf16 %v7091_v11, %v7091_v11  ;;  %v7106_v62 = vrot.slane %v7105_v39, 2 }
 0x2bf   :  { %v6981_v3 = vmax.f32 %v6957_v46, 0.0  ;;  %v13372_v46 = vperm.slane %v13287_v10, 1 }
 0x2c0   :  { %v3954_v16 = vpop.f32.mrf.mxu2  ;;  %v8081_v18 = vunpack.c.l.b16 %v7170_v7  ;;  %v7107_v25 = vmax.f32 %v7105_v39, %v7106_v62  ;;  %v3898_v12 = vpop.f32.mrf.mxu0  ;;  %v14720_v62 = vld [vmem:[#allocation41_spill] sm:$0xff] }
 0x2c1   :  { %v3955_v55 = vadd.f32 %v3954_v16, %v14719_v1  ;;  %v3983_v33 = vpop.f32.mrf.mxu3  ;;  %v7008_v53 = vsel %vm6987_vm3, %v6981_v3, 0.0  ;;  %v3899_v37 = vadd.f32 %v3898_v12, %v13292_v23  ;;  %v3927_v42 = vpop.f32.mrf.mxu1  ;;  %v11795_v3 = vld [vmem:[#allocation5 + $0x644] sm:$0xf]  ;;  %v10361_v16 = vld [vmem:[#allocation5 + $0x664] sm:$0xf0]  ;;  %v14721_v12 = vld [vmem:[#allocation42_spill] sm:$0xff] }
 0x2c2   :  { %v8096_v9 = vsel %vm7834_vm7, %v8081_v18, %v8095_v50  ;;  %v7108_v34 = vrot.slane %v7107_v25, 1  ;;  %v7122_v60 = vrot.slane %v7008_v53, 4 }
 0x2c3   :  { %v13368_v54 = vadd.f32 %v3983_v33, %v3955_v55  ;;  %v3928_v63 = vadd.f32 %v3927_v42, %v3899_v37  ;;  %v9827_v42 = vld [vmem:[#allocation5 + $0x210] sm:$0xf] }
 0x2c4   :  { %v7109_v61 = vmax.f32 %v7107_v25, %v7108_v34  ;;  %v7123_v19 = vmax.f32 %v7008_v53, %v7122_v60  ;;  %v10364_v25 = vor.u32 %v11795_v3, %v10361_v16  ;;  %v11665_v34 = vld [vmem:[#allocation5 + $0x230] sm:$0xf0]  ;;  %v10115_v60 = vld [vmem:[#allocation5 + $0x450] sm:$0xf]  ;;  %v11656_v3 = vld [vmem:[#allocation5 + $0x1e8] sm:$0xf0] }
 0x2c5   :  { %v6960_v58 = vadd.f32 %v13296_v32, %v3928_v63 }
 0x2c6   :  { %v7173_v31 = vpack.c.bf16 %v7109_v61, %v7109_v61  ;;  %v7124_v27 = vrot.slane %v7123_v19, 2  ;;  %4337 = vmatpush.bf16.msrb.mxu0 %v10364_v25 }
 0x2c7   :  { %v6984_v11 = vmax.f32 %v6960_v58, 0.0  ;;  %v11737_v58 = vld [vmem:[#allocation5 + $0x470] sm:$0xf0] }
 0x2c8   :  { %v3956_v39 = vpop.f32.mrf.mxu2  ;;  %v8084_v23 = vunpack.c.l.b16 %v7173_v31  ;;  %v7125_v7 = vmax.f32 %v7123_v19, %v7124_v27  ;;  %v3997_v57 = vpop.f32.mrf.mxu0  ;;  %v9828_v19 = vor.u32 %v11665_v34, %v9827_v42  ;;  %v10403_v31 = vld [vmem:[#allocation5 + $0x690] sm:$0xf]  ;;  %v11809_v27 = vld [vmem:[#allocation5 + $0x6b0] sm:$0xf0] }
 0x2c9   :  { %v3957_v50 = vadd.f32 %v3956_v39, %v14720_v62  ;;  %v3985_v35 = vpop.f32.mrf.mxu3  ;;  %v7011_v43 = vsel %vm6987_vm3, %v6984_v11, 0.0  ;;  %v3998_v32 = vadd.f32 %v3997_v57, %v13310_v8  ;;  %v4026_v18 = vpop.f32.mrf.mxu1  ;;  %v10116_v39 = vor.u32 %v11737_v58, %v10115_v60  ;;  %v9791_v57 = vld [vmem:[#allocation5 + $0x1c8] sm:$0xf] }
 0x2ca   :  { %v7126_v1 = vrot.slane %v7125_v7, 1  ;;  %v7140_v55 = vrot.slane %v7011_v43, 4  ;;  %v4027_v53 = vadd.f32 %v4026_v18, %v14721_v12  ;;  %v13384_v63 = vsel %vm7836_vm8, %v8084_v23, %v8096_v9  ;;  %4365 = vmatpush.bf16.msrb.mxu1 %v9828_v19 }
 0x2cb   :  { %v13378_v33 = vadd.f32 %v3985_v35, %v3957_v50  ;;  %v6940_v37 = vadd.f32 %v13372_v46, %v3998_v32  ;;  %4228 = vmatmul.bf16.vlgmr.msra.gmra.mxu0 %v12735_v40  ;;  %v10404_v62 = vor.u32 %v11809_v27, %v10403_v31  ;;  %4394 = vmatpush.bf16.msrb.mxu2 %v10116_v39  ;;  %v11786_v27 = vld [vmem:[#allocation5 + $0x5fc] sm:$0xf] }
 0x2cc   :  { %v7127_v61 = vmax.f32 %v7125_v7, %v7126_v1  ;;  %v7141_v8 = vmax.f32 %v7011_v43, %v7140_v55  ;;  %4257 = vmatmul.bf16.vlgmr.msra.gmra.mxu1 %v12748_v52  ;;  %v13392_v7 = vperm.slane %v13287_v10, 2  ;;  %v10079_v1 = vld [vmem:[#allocation5 + $0x408] sm:$0xf]  ;;  %v11728_v55 = vld [vmem:[#allocation5 + $0x428] sm:$0xf0]  ;;  %v9792_v34 = vor.u32 %v11656_v3, %v9791_v57 }
 0x2cd   :  { %4286 = vmatmul.bf16.vlgmr.msra.gmra.mxu2 %v12727_v26  ;;  %v6964_v11 = vmax.f32 %v6940_v37, 0.0  ;;  %4423 = vmatpush.bf16.msrb.mxu3 %v10404_v62  ;;  %v10080_v60 = vor.u32 %v11728_v55, %v10079_v1  ;;  %v10367_v10 = vld [vmem:[#allocation5 + $0x648] sm:$0xf] }
 0x2ce   :  { %4315 = vmatmul.bf16.vlgmr.msra.gmra.mxu3 %v12735_v40  ;;  %v7176_v50 = vpack.c.bf16 %v7127_v61, %v7127_v61  ;;  %v7142_v35 = vrot.slane %v7141_v8, 2  ;;  %v11800_v61 = vld [vmem:[#allocation5 + $0x668] sm:$0xf0]  ;;  %4366 = vmatpush.bf16.msrb.mxu1 %v9792_v34 }
 0x2cf   :  { %v6991_v9 = vsel %vm6987_vm3, %v6964_v11, 0.0  ;;  %4395 = vmatpush.bf16.msrb.mxu2 %v10080_v60  ;;  %v10368_v62 = vor.u32 %v11800_v61, %v10367_v10  ;;  %v11777_v10 = vld [vmem:[#allocation5 + $0x5b4] sm:$0xf]  ;;  %v10289_v61 = vld [vmem:[#allocation5 + $0x5d4] sm:$0xf0] }
 0x2d0   :  { %v4055_v23 = vpop.f32.mrf.mxu2  ;;  %v7143_v16 = vmax.f32 %v7141_v8, %v7142_v35  ;;  %v7020_v43 = vrot.slane %v6991_v9, 4  ;;  %v3999_v25 = vpop.f32.mrf.mxu0  ;;  %v8087_v12 = vunpack.c.l.b16 %v7176_v50  ;;  %v9755_v50 = vld [vmem:[#allocation5 + $0x180] sm:$0xf] }
 0x2d1   :  { %v4056_v32 = vadd.f32 %v4055_v23, %v4027_v53  ;;  %v4084_v18 = vpop.f32.mrf.mxu3  ;;  %v4000_v37 = vadd.f32 %v3999_v25, %v13317_v36  ;;  %v4028_v42 = vpop.f32.mrf.mxu1  ;;  %v10325_v53 = vld [vmem:[#allocation5 + $0x61c] sm:$0xf0]  ;;  %v11647_v36 = vld [vmem:[#allocation5 + $0x1a0] sm:$0xf0]  ;;  %4424 = vmatpush.bf16.msrb.mxu3 %v10368_v62 }
 0x2d2   :  { %v7144_v19 = vrot.slane %v7143_v16, 1  ;;  %v7021_v58 = vmax.f32 %v6991_v9, %v7020_v43  ;;  %v4029_v8 = vadd.f32 %v4028_v42, %v13025_v49  ;;  %v10328_v39 = vor.u32 %v11786_v27, %v10325_v53  ;;  %v10043_v35 = vld [vmem:[#allocation5 + $0x3c0] sm:$0xf]  ;;  %v11719_v9 = vld [vmem:[#allocation5 + $0x3e0] sm:$0xf0] }
 0x2d3   :  { %v4085_v31 = vadd.f32 %v4084_v18, %v4056_v32  ;;  %v6943_v11 = vadd.f32 %v13372_v46, %v4000_v37  ;;  %v9756_v25 = vor.u32 %v11647_v36, %v9755_v50  ;;  %v10331_v43 = vld [vmem:[#allocation5 + $0x600] sm:$0xf]  ;;  %v10044_v49 = vor.u32 %v11719_v9, %v10043_v35  ;;  %v11791_v18 = vld [vmem:[#allocation5 + $0x620] sm:$0xf0]  ;;  %v11638_v35 = vld [vmem:[#allocation5 + $0x158] sm:$0xf0] }
 0x2d4   :  { %v7145_v23 = vmax.f32 %v7143_v16, %v7144_v19  ;;  %v7022_v57 = vrot.slane %v7021_v58, 2  ;;  %4338 = vmatpush.bf16.msrb.mxu0 %v10328_v39  ;;  %v13400_v1 = vsel %vm7838_vm9, %v8087_v12, %v13384_v63  ;;  %v10332_v34 = vor.u32 %v11791_v18, %v10331_v43  ;;  %v11782_v18 = vld [vmem:[#allocation5 + $0x5d8] sm:$0xf0] }
 0x2d5   :  { %v6941_v3 = vadd.f32 %v13392_v7, %v4085_v31  ;;  %v6967_v32 = vmax.f32 %v6943_v11, 0.0  ;;  %4367 = vmatpush.bf16.msrb.mxu1 %v9756_v25  ;;  %4396 = vmatpush.bf16.msrb.mxu2 %v10044_v49  ;;  %v10292_v36 = vor.u32 %v11777_v10, %v10289_v61  ;;  %v14722_v25 = vld [vmem:[#allocation44_spill] sm:$0xff]  ;;  %v10295_v49 = vld [vmem:[#allocation5 + $0x5b8] sm:$0xf] }
 0x2d6   :  { %v7179_v55 = vpack.c.bf16 %v7145_v23, %v7145_v23  ;;  %v7023_v37 = vmax.f32 %v7021_v58, %v7022_v57  ;;  %v9719_v58 = vld [vmem:[#allocation5 + $0x138] sm:$0xf]  ;;  %4425 = vmatpush.bf16.msrb.mxu3 %v10332_v34  ;;  %v9683_v10 = vld [vmem:[#allocation5 + $0xf0] sm:$0xf] }
 0x2d7   :  { %v6965_v42 = vmax.f32 %v6941_v3, 0.0  ;;  %v6994_v16 = vsel %vm6987_vm3, %v6967_v32, 0.0  ;;  %v10007_v23 = vld [vmem:[#allocation5 + $0x378] sm:$0xf]  ;;  %v9720_v43 = vor.u32 %v11638_v35, %v9719_v58  ;;  %v11710_v32 = vld [vmem:[#allocation5 + $0x398] sm:$0xf0] }
 0x2d8   :  { %v4057_v60 = vpop.f32.mrf.mxu2  ;;  %v8090_v19 = vunpack.c.l.b16 %v7179_v55  ;;  %v7024_v31 = vrot.slane %v7023_v37, 1  ;;  %v7038_v63 = vrot.slane %v6994_v16, 4  ;;  %v4002_v53 = vpop.f32.mrf.mxu0  ;;  %v10008_v34 = vor.u32 %v11710_v32, %v10007_v23  ;;  %4339 = vmatpush.bf16.msrb.mxu0 %v10292_v36  ;;  %v11773_v23 = vld [vmem:[#allocation5 + $0x590] sm:$0xf0]  ;;  %v10217_v36 = vld [vmem:[#allocation5 + $0x544] sm:$0xf0] }
 0x2d9   :  { %v6992_v27 = vsel %vm6987_vm3, %v6965_v42, 0.0  ;;  %v4086_v12 = vpop.f32.mrf.mxu3  ;;  %v4058_v39 = vadd.f32 %v4057_v60, %v4029_v8  ;;  %v4003_v62 = vadd.f32 %v4002_v53, %v13328_v21  ;;  %v4031_v50 = vpop.f32.mrf.mxu1  ;;  %v11768_v21 = vld [vmem:[#allocation5 + $0x56c] sm:$0xf]  ;;  %v10253_v60 = vld [vmem:[#allocation5 + $0x58c] sm:$0xf0]  ;;  %4368 = vmatpush.bf16.msrb.mxu1 %v9720_v43 }
 0x2da   :  { %v7026_v11 = vrot.slane %v6992_v27, 4  ;;  %v13407_v57 = vmax.f32 %v7023_v37, %v7024_v31  ;;  %v7039_v3 = vmax.f32 %v6994_v16, %v7038_v63  ;;  %v4032_v9 = vadd.f32 %v4031_v50, %v14722_v25  ;;  %v9971_v63 = vld [vmem:[#allocation5 + $0x330] sm:$0xf]  ;;  %4397 = vmatpush.bf16.msrb.mxu2 %v10008_v34 }
 0x2db   :  { %v4087_v42 = vadd.f32 %v4086_v12, %v4058_v39  ;;  %v6946_v8 = vadd.f32 %v13372_v46, %v4003_v62  ;;  %4233 = vmatmul.bf16.gmra.mxu0 %v12742_v45  ;;  %v10256_v61 = vor.u32 %v11768_v21, %v10253_v60  ;;  %v10296_v31 = vor.u32 %v11782_v18, %v10295_v49  ;;  %v11701_v39 = vld [vmem:[#allocation5 + $0x350] sm:$0xf0]  ;;  %v10259_v62 = vld [vmem:[#allocation5 + $0x570] sm:$0xf] }
 0x2dc   :  { %v7027_v55 = vmax.f32 %v6992_v27, %v7026_v11  ;;  %v7040_v16 = vrot.slane %v7039_v3, 2  ;;  %4262 = vmatmul.bf16.gmra.mxu1 %v12757_v56  ;;  %v11629_v27 = vld [vmem:[#allocation5 + $0x110] sm:$0xf0]  ;;  %v9972_v35 = vor.u32 %v11701_v39, %v9971_v63  ;;  %v13420_v25 = vsel %vm7840_vm10, %v8090_v19, %v13400_v1  ;;  %v11620_v63 = vld [vmem:[#allocation5 + $0xc8] sm:$0xf0] }
 0x2dd   :  { %4291 = vmatmul.bf16.gmra.mxu2 %v12730_v30  ;;  %v6944_v53 = vadd.f32 %v13392_v7, %v4087_v42  ;;  %v6970_v58 = vmax.f32 %v6946_v8, 0.0  ;;  %v9684_v11 = vor.u32 %v11629_v27, %v9683_v10  ;;  %14723 = vst [vmem:[#allocation36_spill] sm:$0xff] %v13420_v25  ;;  %v11759_v8 = vld [vmem:[#allocation5 + $0x524] sm:$0xf]  ;;  %4426 = vmatpush.bf16.msrb.mxu3 %v10296_v31  ;;  %v9647_v27 = vld [vmem:[#allocation5 + $0xa8] sm:$0xf] }
 0x2de   :  { %v7028_v12 = vrot.slane %v7027_v55, 2  ;;  %4320 = vmatmul.bf16.gmra.mxu3 %v12742_v45  ;;  %v7041_v50 = vmax.f32 %v7039_v3, %v7040_v16  ;;  %v10260_v21 = vor.u32 %v11773_v23, %v10259_v62  ;;  %v10220_v16 = vor.u32 %v11759_v8, %v10217_v36  ;;  %4340 = vmatpush.bf16.msrb.mxu0 %v10256_v61  ;;  %v11692_v31 = vld [vmem:[#allocation5 + $0x308] sm:$0xf0] }
 0x2df   :  { %v6968_v49 = vmax.f32 %v6944_v53, 0.0  ;;  %v6997_v18 = vsel %vm6987_vm3, %v6970_v58, 0.0  ;;  %v9648_v53 = vor.u32 %v11620_v63, %v9647_v27  ;;  %v9935_v58 = vld [vmem:[#allocation5 + $0x2e8] sm:$0xf]  ;;  %4369 = vmatpush.bf16.msrb.mxu1 %v9684_v11  ;;  %4398 = vmatpush.bf16.msrb.mxu2 %v9972_v35  ;;  %v11764_v8 = vld [vmem:[#allocation5 + $0x548] sm:$0xf0] }
 0x2e0   :  { %v7029_v32 = vmax.f32 %v7027_v55, %v7028_v12  ;;  %v4060_v42 = vpop.f32.mrf.mxu2  ;;  %v7042_v60 = vrot.slane %v7041_v50, 1  ;;  %v7056_v3 = vrot.slane %v6997_v18, 4  ;;  %v4004_v10 = vpop.f32.mrf.mxu0  ;;  %v9936_v61 = vor.u32 %v11692_v31, %v9935_v58  ;;  %v9611_v27 = vld [vmem:[#allocation5 + $0x60] sm:$0xf]  ;;  %v11611_v11 = vld [vmem:[#allocation5 + $0x80] sm:$0xf0] }
 0x2e1   :  { %v4061_v43 = vadd.f32 %v4060_v42, %v4032_v9  ;;  %v4089_v34 = vpop.f32.mrf.mxu3  ;;  %v6995_v19 = vsel %vm6987_vm3, %v6968_v49, 0.0  ;;  %v4005_v55 = vadd.f32 %v4004_v10, %v13336_v48  ;;  %v4033_v12 = vpop.f32.mrf.mxu1  ;;  %v10223_v42 = vld [vmem:[#allocation5 + $0x528] sm:$0xf]  ;;  %v11750_v48 = vld [vmem:[#allocation5 + $0x4dc] sm:$0xf]  ;;  %4427 = vmatpush.bf16.msrb.mxu3 %v10260_v21 }
 0x2e2   :  { %v7030_v1 = vrot.slane %v7029_v32, 1  ;;  %v7043_v39 = vmax.f32 %v7041_v50, %v7042_v60  ;;  %v7044_v62 = vrot.slane %v6995_v19, 4  ;;  %v7057_v23 = vmax.f32 %v6997_v18, %v7056_v3  ;;  %v10181_v10 = vld [vmem:[#allocation5 + $0x4fc] sm:$0xf0]  ;;  %4341 = vmatpush.bf16.msrb.mxu0 %v10220_v16 }
 0x2e3   :  { %v4090_v9 = vadd.f32 %v4089_v34, %v4061_v43  ;;  %v6949_v37 = vadd.f32 %v13372_v46, %v4005_v55  ;;  %v4034_v49 = vadd.f32 %v4033_v12, %v13039_v17  ;;  %v9899_v35 = vld [vmem:[#allocation5 + $0x2a0] sm:$0xf]  ;;  %v10184_v34 = vor.u32 %v11750_v48, %v10181_v10  ;;  %4370 = vmatpush.bf16.msrb.mxu1 %v9648_v53 }
 0x2e4   :  { %v13427_v36 = vmax.f32 %v7029_v32, %v7030_v1  ;;  %v7162_v63 = vpack.c.bf16 %v7043_v39, %v7043_v39  ;;  %v7045_v50 = vmax.f32 %v6995_v19, %v7044_v62  ;;  %v7058_v60 = vrot.slane %v7057_v23, 2  ;;  %v11683_v1 = vld [vmem:[#allocation5 + $0x2c0] sm:$0xf0]  ;;  %4399 = vmatpush.bf16.msrb.mxu2 %v9936_v61 }
 0x2e5   :  { %v6947_v18 = vadd.f32 %v13392_v7, %v4090_v9  ;;  %v14724_v32 = vpack.c.bf16 %v13407_v57, %v13407_v57  ;;  %v6973_v43 = vmax.f32 %v6949_v37, 0.0  ;;  %v10224_v17 = vor.u32 %v11764_v8, %v10223_v42  ;;  %v11741_v57 = vld [vmem:[#allocation5 + $0x494] sm:$0xf]  ;;  %v10145_v37 = vld [vmem:[#allocation5 + $0x4b4] sm:$0xf0] }
 0x2e6   :  { %v8073_v55 = vunpack.c.l.b16 %v7162_v63  ;;  %v7046_v21 = vrot.slane %v7045_v50, 2  ;;  %v7059_v12 = vmax.f32 %v7057_v23, %v7058_v60  ;;  %v7160_v19 = vpack.c.bf16 %v13427_v36, %v13427_v36  ;;  %4342 = vmatpush.bf16.msrb.mxu0 %v10184_v34  ;;  %v11674_v34 = vld [vmem:[#allocation5 + $0x278] sm:$0xf0] }
 0x2e7   :  { %v8070_v3 = vunpack.c.l.b16 %v14724_v32  ;;  %v6971_v58 = vmax.f32 %v6947_v18, 0.0  ;;  %v7000_v31 = vsel %vm6987_vm3, %v6973_v43, 0.0  ;;  %4428 = vmatpush.bf16.msrb.mxu3 %v10224_v17  ;;  %v9612_v16 = vor.u32 %v11611_v11, %v9611_v27  ;;  %v10187_v18 = vld [vmem:[#allocation5 + $0x4e0] sm:$0xf]  ;;  %v11755_v32 = vld [vmem:[#allocation5 + $0x500] sm:$0xf0] }
 0x2e8   :  { %v4062_v39 = vpop.f32.mrf.mxu2  ;;  %v9900_v62 = vor.u32 %v11683_v1, %v9899_v35  ;;  %v7047_v42 = vmax.f32 %v7045_v50, %v7046_v21  ;;  %v7060_v8 = vrot.slane %v7059_v12, 1  ;;  %v4007_v48 = vpop.f32.mrf.mxu0  ;;  %v7074_v36 = vrot.slane %v7000_v31, 4 }
 0x2e9   :  { %v8100_v9 = vsel %vm7828_vm4, %v8073_v55, %v8070_v3  ;;  %v6998_v53 = vsel %vm6987_vm3, %v6971_v58, 0.0  ;;  %v4091_v23 = vpop.f32.mrf.mxu3  ;;  %v4063_v61 = vadd.f32 %v4062_v39, %v4034_v49  ;;  %v4008_v63 = vadd.f32 %v4007_v48, %v13348_v29  ;;  %v4036_v60 = vpop.f32.mrf.mxu1  ;;  %4371 = vmatpush.bf16.msrb.mxu1 %v9612_v16  ;;  %v9575_v3 = vld [vmem:[#allocation5 + $0x18] sm:$0xf]  ;;  %v11602_v29 = vld [vmem:[#allocation5 + $0x38] sm:$0xf0] }
 0x2ea   :  { %v7062_v10 = vrot.slane %v6998_v53, 4  ;;  %v7048_v27 = vrot.slane %v7047_v42, 1  ;;  %v7061_v11 = vmax.f32 %v7059_v12, %v7060_v8  ;;  %v4037_v35 = vadd.f32 %v4036_v60, %v13044_v44  ;;  %4400 = vmatpush.bf16.msrb.mxu2 %v9900_v62  ;;  %v9863_v49 = vld [vmem:[#allocation5 + $0x258] sm:$0xf] }
 0x2eb   :  { %v10148_v50 = vor.u32 %v11741_v57, %v10145_v37  ;;  %v7075_v17 = vmax.f32 %v7000_v31, %v7074_v36  ;;  %v4092_v1 = vadd.f32 %v4091_v23, %v4063_v61  ;;  %v6952_v55 = vadd.f32 %v13372_v46, %v4008_v63  ;;  %4238 = vmatmul.bf16.gmra.mxu0 %v12791_v22 }
 0x2ec   :  { %v7063_v43 = vmax.f32 %v6998_v53, %v7062_v10  ;;  %v8071_v21 = vunpack.c.l.b16 %v7160_v19  ;;  %v7049_v58 = vmax.f32 %v7047_v42, %v7048_v27  ;;  %v7165_v39 = vpack.c.bf16 %v7061_v11, %v7061_v11  ;;  %4267 = vmatmul.bf16.gmra.mxu1 %v12795_v24  ;;  %v10151_v27 = vld [vmem:[#allocation5 + $0x498] sm:$0xf] }
 0x2ed   :  { %4296 = vmatmul.bf16.gmra.mxu2 %v12783_v13  ;;  %v10188_v44 = vor.u32 %v11755_v32, %v10187_v18  ;;  %v7076_v57 = vrot.slane %v7075_v17, 2  ;;  %v6950_v31 = vadd.f32 %v13392_v7, %v4092_v1  ;;  %v6976_v37 = vmax.f32 %v6952_v55, 0.0  ;;  %4343 = vmatpush.bf16.msrb.mxu0 %v10148_v50  ;;  %v11746_v1 = vld [vmem:[#allocation5 + $0x4b8] sm:$0xf0] }
 0x2ee   :  { %v7064_v12 = vrot.slane %v7063_v43, 2  ;;  %4325 = vmatmul.bf16.gmra.mxu3 %v12791_v22  ;;  %v7163_v16 = vpack.c.bf16 %v7049_v58, %v7049_v58  ;;  %v8076_v62 = vunpack.c.l.b16 %v7165_v39  ;;  %v9576_v8 = vor.u32 %v11602_v29, %v9575_v3  ;;  %v14725_v39 = vld [vmem:[#allocation48_spill] sm:$0xff] }
 0x2ef   :  { %4429 = vmatpush.bf16.msrb.mxu3 %v10188_v44  ;;  %v9864_v19 = vor.u32 %v11674_v34, %v9863_v49  ;;  %v7077_v53 = vmax.f32 %v7075_v17, %v7076_v57  ;;  %v6974_v23 = vmax.f32 %v6950_v31, 0.0  ;;  %v7003_v48 = vsel %vm6987_vm3, %v6976_v37, 0.0 }
 0x2f0   :  { %v7065_v42 = vmax.f32 %v7063_v43, %v7064_v12  ;;  %v4065_v10 = vpop.f32.mrf.mxu2  ;;  %v8074_v36 = vunpack.c.l.b16 %v7163_v16  ;;  %v8101_v61 = vsel %vm7830_vm5, %v8076_v62, %v8100_v9  ;;  %v7092_v63 = vrot.slane %v7003_v48, 4  ;;  %v4009_v32 = vpop.f32.mrf.mxu0  ;;  %4372 = vmatpush.bf16.msrb.mxu1 %v9576_v8 }
 0x2f1   :  { %v4066_v60 = vadd.f32 %v4065_v10, %v4037_v35  ;;  %v4094_v18 = vpop.f32.mrf.mxu3  ;;  %4401 = vmatpush.bf16.msrb.mxu2 %v9864_v19  ;;  %v7078_v50 = vrot.slane %v7077_v53, 1  ;;  %v7001_v3 = vsel %vm6987_vm3, %v6974_v23, 0.0  ;;  %v4010_v43 = vadd.f32 %v4009_v32, %v13356_v2  ;;  %v4038_v17 = vpop.f32.mrf.mxu1 }
 0x2f2   :  { %v7066_v11 = vrot.slane %v7065_v42, 1  ;;  %v8107_v55 = vsel %vm7828_vm4, %v8074_v36, %v8071_v21  ;;  %v7080_v29 = vrot.slane %v7001_v3, 4  ;;  %v7093_v9 = vmax.f32 %v7003_v48, %v7092_v63 }
 0x2f3   :  { %v4095_v49 = vadd.f32 %v4094_v18, %v4066_v60  ;;  %v7079_v34 = vmax.f32 %v7077_v53, %v7078_v50  ;;  %v6955_v58 = vadd.f32 %v13372_v46, %v4010_v43  ;;  %v4039_v44 = vadd.f32 %v4038_v17, %v14725_v39 }
 0x2f4   :  { %v7067_v35 = vmax.f32 %v7065_v42, %v7066_v11  ;;  %v7081_v12 = vmax.f32 %v7001_v3, %v7080_v29  ;;  %v7094_v57 = vrot.slane %v7093_v9, 2  ;;  %v10152_v37 = vor.u32 %v11746_v1, %v10151_v27 }
 0x2f5   :  { %v6953_v31 = vadd.f32 %v13392_v7, %v4095_v49  ;;  %v7168_v2 = vpack.c.bf16 %v7079_v34, %v7079_v34  ;;  %v6979_v62 = vmax.f32 %v6955_v58, 0.0  ;;  %v14726_v34 = vld [vmem:[#allocation50_spill] sm:$0xff] }
 0x2f6   :  { %v7166_v16 = vpack.c.bf16 %v7067_v35, %v7067_v35  ;;  %v7082_v8 = vrot.slane %v7081_v12, 2  ;;  %v7095_v19 = vmax.f32 %v7093_v9, %v7094_v57  ;;  %4430 = vmatpush.bf16.msrb.mxu3 %v10152_v37 }
 0x2f7   :  { %v6977_v21 = vmax.f32 %v6953_v31, 0.0  ;;  %v8079_v48 = vunpack.c.l.b16 %v7168_v2  ;;  %v7006_v42 = vsel %vm6987_vm3, %v6979_v62, 0.0 }
 0x2f8   :  { %v8077_v23 = vunpack.c.l.b16 %v7166_v16  ;;  %v4067_v53 = vpop.f32.mrf.mxu2  ;;  %v7083_v10 = vmax.f32 %v7081_v12, %v7082_v8  ;;  %v7096_v36 = vrot.slane %v7095_v19, 1  ;;  %v7110_v60 = vrot.slane %v7006_v42, 4  ;;  %v4012_v32 = vpop.f32.mrf.mxu0 }
 0x2f9   :  { %v7004_v63 = vsel %vm6987_vm3, %v6977_v21, 0.0  ;;  %v4096_v18 = vpop.f32.mrf.mxu3  ;;  %v8102_v11 = vsel %vm7832_vm6, %v8079_v48, %v8101_v61  ;;  %v4068_v3 = vadd.f32 %v4067_v53, %v4039_v44  ;;  %v4041_v43 = vpop.f32.mrf.mxu1  ;;  %v4013_v9 = vadd.f32 %v4012_v32, %v13368_v54 }
 0x2fa   :  { %v8108_v27 = vsel %vm7830_vm5, %v8077_v23, %v8107_v55  ;;  %v7098_v50 = vrot.slane %v7004_v63, 4  ;;  %v7084_v17 = vrot.slane %v7083_v10, 1  ;;  %v7097_v1 = vmax.f32 %v7095_v19, %v7096_v36 }
 0x2fb   :  { %v7111_v29 = vmax.f32 %v7006_v42, %v7110_v60  ;;  %v4097_v35 = vadd.f32 %v4096_v18, %v4068_v3  ;;  %v4042_v58 = vadd.f32 %v4041_v43, %v14726_v34  ;;  %4243 = vmatmul.bf16.gmra.mxu0 %v12840_v15  ;;  %v6958_v55 = vadd.f32 %v13372_v46, %v4013_v9  ;;  %v11652_v34 = vld [vmem:[#allocation5 + $0x1cc] sm:$0xf] }
 0x2fc   :  { %v7099_v49 = vmax.f32 %v7004_v63, %v7098_v50  ;;  %v7085_v39 = vmax.f32 %v7083_v10, %v7084_v17  ;;  %v7171_v12 = vpack.c.bf16 %v7097_v1, %v7097_v1  ;;  %4272 = vmatmul.bf16.gmra.mxu1 %v12842_v0  ;;  %v11661_v10 = vld [vmem:[#allocation5 + $0x214] sm:$0xf]  ;;  %v9829_v50 = vld [vmem:[#allocation5 + $0x234] sm:$0xf0] }
 0x2fd   :  { %v7112_v57 = vrot.slane %v7111_v29, 2  ;;  %4301 = vmatmul.bf16.gmra.mxu2 %v12833_v59  ;;  %v6956_v44 = vadd.f32 %v13392_v7, %v4097_v35  ;;  %v6982_v16 = vmax.f32 %v6958_v55, 0.0 }
 0x2fe   :  { %v7100_v61 = vrot.slane %v7099_v49, 2  ;;  %4330 = vmatmul.bf16.gmra.mxu3 %v12840_v15  ;;  %v7169_v54 = vpack.c.bf16 %v7085_v39, %v7085_v39  ;;  %v8082_v31 = vunpack.c.l.b16 %v7171_v12  ;;  %v9793_v39 = vld [vmem:[#allocation5 + $0x1ec] sm:$0xf0] }
 0x2ff   :  { %v7113_v37 = vmax.f32 %v7111_v29, %v7112_v57  ;;  %v6980_v62 = vmax.f32 %v6956_v44, 0.0  ;;  %v7009_v48 = vsel %vm6987_vm3, %v6982_v16, 0.0  ;;  %v9757_v44 = vld [vmem:[#allocation5 + $0x1a4] sm:$0xf0] }
 0x300   :  { %v7101_v2 = vmax.f32 %v7099_v49, %v7100_v61  ;;  %v4070_v8 = vpop.f32.mrf.mxu2  ;;  %v8080_v19 = vunpack.c.l.b16 %v7169_v54  ;;  %v8103_v21 = vsel %vm7834_vm7, %v8082_v31, %v8102_v11  ;;  %v4014_v53 = vpop.f32.mrf.mxu0  ;;  %v7128_v60 = vrot.slane %v7009_v48, 4  ;;  %v14727_v49 = vld [vmem:[#allocation52_spill] sm:$0xff]  ;;  %v11643_v61 = vld [vmem:[#allocation5 + $0x184] sm:$0xf] }
 0x301   :  { %v7114_v23 = vrot.slane %v7113_v37, 1  ;;  %v4099_v42 = vpop.f32.mrf.mxu3  ;;  %v7007_v63 = vsel %vm6987_vm3, %v6980_v62, 0.0  ;;  %v4071_v18 = vadd.f32 %v4070_v8, %v4042_v58  ;;  %v4043_v32 = vpop.f32.mrf.mxu1  ;;  %v4015_v11 = vadd.f32 %v4014_v53, %v13378_v33 }
 0x302   :  { %v7102_v36 = vrot.slane %v7101_v2, 1  ;;  %v8109_v3 = vsel %vm7832_vm6, %v8080_v19, %v8108_v27  ;;  %v7116_v17 = vrot.slane %v7007_v63, 4  ;;  %v7129_v29 = vmax.f32 %v7009_v48, %v7128_v60 }
 0x303   :  { %v7115_v43 = vmax.f32 %v7113_v37, %v7114_v23  ;;  %v4100_v9 = vadd.f32 %v4099_v42, %v4071_v18  ;;  %v4044_v35 = vadd.f32 %v4043_v32, %v14727_v49  ;;  %v6961_v55 = vadd.f32 %v13372_v46, %v4015_v11  ;;  %v11634_v49 = vld [vmem:[#allocation5 + $0x13c] sm:$0xf] }
 0x304   :  { %v7103_v1 = vmax.f32 %v7101_v2, %v7102_v36  ;;  %v7117_v57 = vmax.f32 %v7007_v63, %v7116_v17  ;;  %v9832_v58 = vor.u32 %v11661_v10, %v9829_v50  ;;  %v7130_v27 = vrot.slane %v7129_v29, 2 }
 0x305   :  { %v7174_v12 = vpack.c.bf16 %v7115_v43, %v7115_v43  ;;  %v6959_v31 = vadd.f32 %v13392_v7, %v4100_v9  ;;  %v6985_v16 = vmax.f32 %v6961_v55, 0.0  ;;  %v9796_v2 = vor.u32 %v11652_v34, %v9793_v39  ;;  %v10117_v39 = vld [vmem:[#allocation5 + $0x474] sm:$0xf0] }
 0x306   :  { %v7172_v54 = vpack.c.bf16 %v7103_v1, %v7103_v1  ;;  %v7118_v33 = vrot.slane %v7117_v57, 2  ;;  %4452 = vmatpush.bf16.msra.mxu0 %v9832_v58  ;;  %v7131_v8 = vmax.f32 %v7129_v29, %v7130_v27  ;;  %v9760_v48 = vor.u32 %v11643_v61, %v9757_v44  ;;  %v14728_v29 = vld [vmem:[#allocation43_spill] sm:$0xff]  ;;  %v10405_v44 = vld [vmem:[#allocation5 + $0x6b4] sm:$0xf0]  ;;  %v11666_v27 = vld [vmem:[#allocation5 + $0x238] sm:$0xf0] }
 0x307   :  { %v8085_v37 = vunpack.c.l.b16 %v7174_v12  ;;  %v6983_v19 = vmax.f32 %v6959_v31, 0.0  ;;  %v7012_v46 = vsel %vm6987_vm3, %v6985_v16, 0.0  ;;  %v11805_v12 = vld [vmem:[#allocation5 + $0x694] sm:$0xf]  ;;  %v9685_v16 = vld [vmem:[#allocation5 + $0x114] sm:$0xf0] }
 0x308   :  { %v8083_v62 = vunpack.c.l.b16 %v7172_v54  ;;  %v4072_v23 = vpop.f32.mrf.mxu2  ;;  %v7119_v42 = vmax.f32 %v7117_v57, %v7118_v33  ;;  %v4113_v36 = vpop.f32.mrf.mxu0  ;;  %v7132_v18 = vrot.slane %v7131_v8, 1  ;;  %v7146_v50 = vrot.slane %v7012_v46, 4  ;;  %v9835_v54 = vld [vmem:[#allocation5 + $0x218] sm:$0xf]  ;;  %v11625_v33 = vld [vmem:[#allocation5 + $0xf4] sm:$0xf] }
 0x309   :  { %v4073_v53 = vadd.f32 %v4072_v23, %v4044_v35  ;;  %v4101_v10 = vpop.f32.mrf.mxu3  ;;  %v13487_v63 = vsel %vm7836_vm8, %v8085_v37, %v8103_v21  ;;  %v7010_v32 = vsel %vm6987_vm3, %v6983_v19, 0.0  ;;  %v4142_v43 = vpop.f32.mrf.mxu1  ;;  %v4114_v9 = vadd.f32 %v4113_v36, %v14728_v29  ;;  %v9721_v35 = vld [vmem:[#allocation5 + $0x15c] sm:$0xf0] }
 0x30a   :  { %v13490_v60 = vsel %vm7834_vm7, %v8083_v62, %v8109_v3  ;;  %v7120_v17 = vrot.slane %v7119_v42, 1  ;;  %v7134_v11 = vrot.slane %v7010_v32, 4  ;;  %4453 = vmatpush.bf16.msra.mxu0 %v9796_v2  ;;  %v7133_v34 = vmax.f32 %v7131_v8, %v7132_v18  ;;  %v11733_v3 = vld [vmem:[#allocation5 + $0x454] sm:$0xf]  ;;  %v11724_v18 = vld [vmem:[#allocation5 + $0x40c] sm:$0xf] }
 0x30b   :  { %v4102_v1 = vadd.f32 %v4101_v10, %v4073_v53  ;;  %v7147_v21 = vmax.f32 %v7012_v46, %v7146_v50  ;;  %4344 = vmatmul.bf16.vlgmr.msrb.gmra.mxu0 %v12748_v52  ;;  %v4143_v61 = vadd.f32 %v4142_v43, %v4114_v9  ;;  %v10120_v2 = vor.u32 %v11733_v3, %v10117_v39  ;;  %v11796_v50 = vld [vmem:[#allocation5 + $0x64c] sm:$0xf]  ;;  %v10369_v9 = vld [vmem:[#allocation5 + $0x66c] sm:$0xf0]  ;;  %v14730_v39 = vld [vmem:[#allocation45_spill] sm:$0xff] }
 0x30c   :  { %v7121_v57 = vmax.f32 %v7119_v42, %v7120_v17  ;;  %v7135_v55 = vmax.f32 %v7010_v32, %v7134_v11  ;;  %4373 = vmatmul.bf16.vlgmr.msrb.gmra.mxu1 %v12727_v26  ;;  %v7177_v31 = vpack.c.bf16 %v7133_v34, %v7133_v34  ;;  %v10408_v62 = vor.u32 %v11805_v12, %v10405_v44  ;;  %v10081_v32 = vld [vmem:[#allocation5 + $0x42c] sm:$0xf0] }
 0x30d   :  { %v6962_v58 = vadd.f32 %v13392_v7, %v4102_v1  ;;  %v7148_v37 = vrot.slane %v7147_v21, 2  ;;  %4402 = vmatmul.bf16.vlgmr.msrb.gmra.mxu2 %v12735_v40  ;;  %v9724_v7 = vor.u32 %v11634_v49, %v9721_v35  ;;  %v9688_v10 = vor.u32 %v11625_v33, %v9685_v16  ;;  %4481 = vmatpush.bf16.msra.mxu1 %v10120_v2  ;;  %v9799_v49 = vld [vmem:[#allocation5 + $0x1d0] sm:$0xf]  ;;  %v11616_v33 = vld [vmem:[#allocation5 + $0xac] sm:$0xf] }
 0x30e   :  { %4431 = vmatmul.bf16.vlgmr.msrb.gmra.mxu3 %v12748_v52  ;;  %v7175_v8 = vpack.c.bf16 %v7121_v57, %v7121_v57  ;;  %v7136_v19 = vrot.slane %v7135_v55, 2  ;;  %4454 = vmatpush.bf16.msra.mxu0 %v9760_v48  ;;  %v8088_v42 = vunpack.c.l.b16 %v7177_v31  ;;  %v9836_v36 = vor.u32 %v11666_v27, %v9835_v54  ;;  %v9649_v16 = vld [vmem:[#allocation5 + $0xcc] sm:$0xf0]  ;;  %v11715_v2 = vld [vmem:[#allocation5 + $0x3c4] sm:$0xf] }
 0x30f   :  { %v6986_v23 = vmax.f32 %v6962_v58, 0.0  ;;  %v7149_v46 = vmax.f32 %v7147_v21, %v7148_v37  ;;  %4510 = vmatpush.bf16.msra.mxu2 %v10408_v62  ;;  %v14729_v21 = vld [vmem:[#allocation55_spill] sm:$0xff]  ;;  %v11657_v58 = vld [vmem:[#allocation5 + $0x1f0] sm:$0xf0]  ;;  %v10084_v44 = vor.u32 %v11724_v18, %v10081_v32  ;;  %v10372_v54 = vor.u32 %v11796_v50, %v10369_v9 }
 0x310   :  { %v4171_v53 = vpop.f32.mrf.mxu2  ;;  %v8086_v43 = vunpack.c.l.b16 %v7175_v8  ;;  %v7137_v17 = vmax.f32 %v7135_v55, %v7136_v19  ;;  %v4115_v48 = vpop.f32.mrf.mxu0  ;;  %4539 = vmatpush.bf16.msra.mxu3 %v9836_v36  ;;  %v8105_v62 = vsel %vm7838_vm9, %v8088_v42, %v13487_v63  ;;  %v10045_v19 = vld [vmem:[#allocation5 + $0x3e4] sm:$0xf0] }
 0x311   :  { %v7013_v11 = vsel %vm6987_vm3, %v6986_v23, 0.0  ;;  %v13502_v1 = vadd.f32 %v4171_v53, %v4143_v61  ;;  %v4200_v29 = vpop.f32.mrf.mxu3  ;;  %v7150_v35 = vrot.slane %v7149_v46, 1  ;;  %v4116_v12 = vadd.f32 %v4115_v48, %v14730_v39  ;;  %v4144_v57 = vpop.f32.mrf.mxu1  ;;  %4482 = vmatpush.bf16.msra.mxu1 %v10084_v44  ;;  %v11787_v23 = vld [vmem:[#allocation5 + $0x604] sm:$0xf]  ;;  %v10333_v53 = vld [vmem:[#allocation5 + $0x624] sm:$0xf0] }
 0x312   :  { %v7152_v34 = vrot.slane %v7013_v11, 4  ;;  %v13505_v3 = vadd.f32 %v4200_v29, %v14729_v21  ;;  %v7138_v55 = vrot.slane %v7137_v17, 1  ;;  %4455 = vmatpush.bf16.msra.mxu0 %v9724_v7  ;;  %v9800_v61 = vor.u32 %v11657_v58, %v9799_v49  ;;  %v9763_v50 = vld [vmem:[#allocation5 + $0x188] sm:$0xf]  ;;  %v11706_v49 = vld [vmem:[#allocation5 + $0x37c] sm:$0xf] }
 0x313   :  { %v7151_v27 = vmax.f32 %v7149_v46, %v7150_v35  ;;  %v4145_v37 = vadd.f32 %v4144_v57, %v4116_v12  ;;  %4511 = vmatpush.bf16.msra.mxu2 %v10372_v54  ;;  %v8111_v7 = vsel %vm7836_vm8, %v8086_v43, %v13490_v60  ;;  %v10048_v46 = vor.u32 %v11715_v2, %v10045_v19  ;;  %v10009_v35 = vld [vmem:[#allocation5 + $0x39c] sm:$0xf0]  ;;  %v11639_v58 = vld [vmem:[#allocation5 + $0x160] sm:$0xf0] }
 0x314   :  { %v7153_v31 = vmax.f32 %v7013_v11, %v7152_v34  ;;  %v7139_v8 = vmax.f32 %v7137_v17, %v7138_v55  ;;  %4540 = vmatpush.bf16.msra.mxu3 %v9800_v61  ;;  %v10336_v32 = vor.u32 %v11787_v23, %v10333_v53  ;;  %v11648_v11 = vld [vmem:[#allocation5 + $0x1a8] sm:$0xf0]  ;;  %v9652_v48 = vor.u32 %v11616_v33, %v9649_v16  ;;  %v11778_v34 = vld [vmem:[#allocation5 + $0x5bc] sm:$0xf]  ;;  %v10297_v12 = vld [vmem:[#allocation5 + $0x5dc] sm:$0xf0] }
 0x315   :  { %v7180_v36 = vpack.c.bf16 %v7151_v27, %v7151_v27  ;;  %v9764_v63 = vor.u32 %v11648_v11, %v9763_v50  ;;  %4483 = vmatpush.bf16.msra.mxu1 %v10048_v46  ;;  %v9727_v57 = vld [vmem:[#allocation5 + $0x140] sm:$0xf]  ;;  %v10012_v33 = vor.u32 %v11706_v49, %v10009_v35  ;;  %v11697_v23 = vld [vmem:[#allocation5 + $0x334] sm:$0xf]  ;;  %v9973_v53 = vld [vmem:[#allocation5 + $0x354] sm:$0xf0] }
 0x316   :  { %v7154_v18 = vrot.slane %v7153_v31, 2  ;;  %v7178_v29 = vpack.c.bf16 %v7139_v8, %v7139_v8  ;;  %4456 = vmatpush.bf16.msra.mxu0 %v9688_v10  ;;  %v14731_v10 = vld [vmem:[#allocation56_spill] sm:$0xff]  ;;  %v14732_v54 = vld [vmem:[#allocation46_spill] sm:$0xff]  ;;  %v9691_v46 = vld [vmem:[#allocation5 + $0xf8] sm:$0xf] }
 0x317   :  { %v8091_v42 = vunpack.c.l.b16 %v7180_v36  ;;  %4512 = vmatpush.bf16.msra.mxu2 %v10336_v32  ;;  %v11769_v36 = vld [vmem:[#allocation5 + $0x574] sm:$0xf]  ;;  %v11630_v32 = vld [vmem:[#allocation5 + $0x118] sm:$0xf0]  ;;  %v9937_v49 = vld [vmem:[#allocation5 + $0x30c] sm:$0xf0] }
 0x318   :  { %v7155_v17 = vmax.f32 %v7153_v31, %v7154_v18  ;;  %v4173_v9 = vpop.f32.mrf.mxu2  ;;  %v8089_v21 = vunpack.c.l.b16 %v7178_v29  ;;  %v4118_v43 = vpop.f32.mrf.mxu0  ;;  %4541 = vmatpush.bf16.msra.mxu3 %v9764_v63  ;;  %v10300_v31 = vor.u32 %v11778_v34, %v10297_v12  ;;  %v10261_v18 = vld [vmem:[#allocation5 + $0x594] sm:$0xf0]  ;;  %v9692_v63 = vor.u32 %v11630_v32, %v9691_v46  ;;  %v11760_v35 = vld [vmem:[#allocation5 + $0x52c] sm:$0xf]  ;;  %v9655_v12 = vld [vmem:[#allocation5 + $0xb0] sm:$0xf] }
 0x319   :  { %v13512_v39 = vadd.f32 %v4173_v9, %v4145_v37  ;;  %v4202_v60 = vpop.f32.mrf.mxu3  ;;  %v4119_v61 = vadd.f32 %v4118_v43, %v14732_v54  ;;  %v4147_v27 = vpop.f32.mrf.mxu1  ;;  %v9728_v37 = vor.u32 %v11639_v58, %v9727_v57  ;;  %v13519_v16 = vsel %vm7840_vm10, %v8091_v42, %v8105_v62  ;;  %v11607_v62 = vld [vmem:[#allocation5 + $0x64] sm:$0xf]  ;;  %4484 = vmatpush.bf16.msra.mxu1 %v10012_v33  ;;  %v11688_v9 = vld [vmem:[#allocation5 + $0x2ec] sm:$0xf]  ;;  %v10225_v43 = vld [vmem:[#allocation5 + $0x54c] sm:$0xf0] }
 0x31a   :  { %v7156_v55 = vrot.slane %v7155_v17, 1  ;;  %v13515_v44 = vadd.f32 %v4202_v60, %v14731_v10  ;;  %4457 = vmatpush.bf16.msra.mxu0 %v9652_v48  ;;  %14733 = vst [vmem:[#allocation37_spill] sm:$0xff] %v13519_v16  ;;  %v8112_v2 = vsel %vm7838_vm9, %v8089_v21, %v8111_v7  ;;  %v9613_v7 = vld [vmem:[#allocation5 + $0x84] sm:$0xf0]  ;;  %v10264_v11 = vor.u32 %v11769_v36, %v10261_v18  ;;  %v11621_v57 = vld [vmem:[#allocation5 + $0xd0] sm:$0xf0] }
 0x31b   :  { %v4148_v19 = vadd.f32 %v4147_v27, %v4119_v61  ;;  %4349 = vmatmul.bf16.gmra.mxu0 %v12757_v56  ;;  %4513 = vmatpush.bf16.msra.mxu2 %v10300_v31  ;;  %v9616_v29 = vor.u32 %v11607_v62, %v9613_v7  ;;  %v9976_v48 = vor.u32 %v11697_v23, %v9973_v53  ;;  %v14734_v58 = vld [vmem:[#allocation57_spill] sm:$0xff]  ;;  %v14735_v10 = vld [vmem:[#allocation47_spill] sm:$0xff]  ;;  %v9577_v23 = vld [vmem:[#allocation5 + $0x3c] sm:$0xf0] }
 0x31c   :  { %v7157_v8 = vmax.f32 %v7155_v17, %v7156_v55  ;;  %4378 = vmatmul.bf16.gmra.mxu1 %v12730_v30  ;;  %4542 = vmatpush.bf16.msra.mxu3 %v9728_v37  ;;  %v10228_v27 = vor.u32 %v11760_v35, %v10225_v43  ;;  %v9940_v31 = vor.u32 %v11688_v9, %v9937_v49  ;;  %v11679_v53 = vld [vmem:[#allocation5 + $0x2a4] sm:$0xf]  ;;  %v9901_v18 = vld [vmem:[#allocation5 + $0x2c4] sm:$0xf0]  ;;  %v11612_v7 = vld [vmem:[#allocation5 + $0x88] sm:$0xf0] }
 0x31d   :  { %4407 = vmatmul.bf16.gmra.mxu2 %v12742_v45  ;;  %4485 = vmatpush.bf16.msra.mxu1 %v9976_v48  ;;  %v9656_v33 = vor.u32 %v11621_v57, %v9655_v12  ;;  %v11751_v46 = vld [vmem:[#allocation5 + $0x4e4] sm:$0xf]  ;;  %v10189_v32 = vld [vmem:[#allocation5 + $0x504] sm:$0xf0]  ;;  %v10153_v35 = vld [vmem:[#allocation5 + $0x4bc] sm:$0xf0] }
 0x31e   :  { %v7181_v50 = vpack.c.bf16 %v7157_v8, %v7157_v8  ;;  %4436 = vmatmul.bf16.gmra.mxu3 %v12757_v56  ;;  %4458 = vmatpush.bf16.msra.mxu0 %v9616_v29  ;;  %v9619_v62 = vld [vmem:[#allocation5 + $0x68] sm:$0xf]  ;;  %v14737_v43 = vld [vmem:[#allocation58_spill] sm:$0xff]  ;;  %v14738_v57 = vld [vmem:[#allocation49_spill] sm:$0xff] }
 0x31f   :  { %4514 = vmatpush.bf16.msra.mxu2 %v10264_v11  ;;  %v9904_v11 = vor.u32 %v11679_v53, %v9901_v18  ;;  %v9620_v29 = vor.u32 %v11612_v7, %v9619_v62 }
 0x320   :  { %v8092_v42 = vunpack.c.l.b16 %v7181_v50  ;;  %v4176_v17 = vpop.f32.mrf.mxu2  ;;  %v4120_v60 = vpop.f32.mrf.mxu0  ;;  %4543 = vmatpush.bf16.msra.mxu3 %v9692_v63  ;;  %v10192_v50 = vor.u32 %v11751_v46, %v10189_v32  ;;  %v9865_v63 = vld [vmem:[#allocation5 + $0x27c] sm:$0xf0]  ;;  %v14739_v46 = vld [vmem:[#allocation59_spill] sm:$0xff] }
 0x321   :  { %v13526_v34 = vadd.f32 %v4176_v17, %v4148_v19  ;;  %v4205_v21 = vpop.f32.mrf.mxu3  ;;  %v4121_v54 = vadd.f32 %v4120_v60, %v14735_v10  ;;  %v4149_v61 = vpop.f32.mrf.mxu1  ;;  %v11598_v19 = vld [vmem:[#allocation5 + $0x1c] sm:$0xf]  ;;  %4486 = vmatpush.bf16.msra.mxu1 %v9940_v31  ;;  %v11603_v60 = vld [vmem:[#allocation5 + $0x40] sm:$0xf0] }
 0x322   :  { %v13529_v55 = vadd.f32 %v4205_v21, %v14734_v58  ;;  %v13533_v37 = vsel %vm7840_vm10, %v8092_v42, %v8112_v2  ;;  %v9580_v36 = vor.u32 %v11598_v19, %v9577_v23  ;;  %v11670_v2 = vld [vmem:[#allocation5 + $0x25c] sm:$0xf]  ;;  %v9583_v21 = vld [vmem:[#allocation5 + $0x20] sm:$0xf] }
 0x323   :  { %14736 = vst [vmem:[#allocation38_spill] sm:$0xff] %v13533_v37  ;;  %v4150_v8 = vadd.f32 %v4149_v61, %v4121_v54  ;;  %4515 = vmatpush.bf16.msra.mxu2 %v10228_v27  ;;  %v11742_v42 = vld [vmem:[#allocation5 + $0x49c] sm:$0xf]  ;;  %v9868_v61 = vor.u32 %v11670_v2, %v9865_v63  ;;  %v9584_v27 = vor.u32 %v11603_v60, %v9583_v21  ;;  %v14742_v60 = vld [vmem:[#allocation53_spill] sm:$0xff] }
 0x324   :  { %4544 = vmatpush.bf16.msra.mxu3 %v9656_v33  ;;  %4459 = vmatpush.bf16.msra.mxu0 %v9580_v36  ;;  %v10156_v54 = vor.u32 %v11742_v42, %v10153_v35  ;;  %v10123_v33 = vld [vmem:[#allocation5 + $0x458] sm:$0xf]  ;;  %v14741_v35 = vld [vmem:[#allocation60_spill] sm:$0xff] }
 0x325   :  { %4487 = vmatpush.bf16.msra.mxu1 %v9904_v11 }
 0x327   :  { %4516 = vmatpush.bf16.msra.mxu2 %v10192_v50  ;;  %v14740_v50 = vld [vmem:[#allocation51_spill] sm:$0xff] }
 0x328   :  { %v4178_v48 = vpop.f32.mrf.mxu2  ;;  %v4123_v49 = vpop.f32.mrf.mxu0  ;;  %4545 = vmatpush.bf16.msra.mxu3 %v9620_v29  ;;  %v10087_v29 = vld [vmem:[#allocation5 + $0x410] sm:$0xf] }
 0x329   :  { %v13535_v17 = vadd.f32 %v4178_v48, %v4150_v8  ;;  %v4207_v9 = vpop.f32.mrf.mxu3  ;;  %v4124_v58 = vadd.f32 %v4123_v49, %v14738_v57  ;;  %v4152_v10 = vpop.f32.mrf.mxu1  ;;  %v11738_v8 = vld [vmem:[#allocation5 + $0x478] sm:$0xf0]  ;;  %4488 = vmatpush.bf16.msra.mxu1 %v9868_v61  ;;  %v11729_v48 = vld [vmem:[#allocation5 + $0x430] sm:$0xf0] }
 0x32a   :  { %v13538_v12 = vadd.f32 %v4207_v9, %v14737_v43  ;;  %v10124_v19 = vor.u32 %v11738_v8, %v10123_v33  ;;  %v10088_v2 = vor.u32 %v11729_v48, %v10087_v29 }
 0x32b   :  { %v4153_v31 = vadd.f32 %v4152_v10, %v4124_v58  ;;  %4354 = vmatmul.bf16.gmra.mxu0 %v12795_v24  ;;  %4517 = vmatpush.bf16.msra.mxu2 %v10156_v54  ;;  %v10051_v10 = vld [vmem:[#allocation5 + $0x3c8] sm:$0xf]  ;;  %v11720_v54 = vld [vmem:[#allocation5 + $0x3e8] sm:$0xf0] }
 0x32c   :  { %4383 = vmatmul.bf16.gmra.mxu1 %v12783_v13  ;;  %4546 = vmatpush.bf16.msra.mxu3 %v9584_v27  ;;  %v10052_v61 = vor.u32 %v11720_v54, %v10051_v10  ;;  %v10583_v10 = vld [vmem:[#allocation8 + $0x150] sm:$0xf] }
 0x32d   :  { %4412 = vmatmul.bf16.gmra.mxu2 %v12791_v22  ;;  %4568 = vmatpush.bf16.msrb.mxu0 %v10124_v19  ;;  %v14743_v19 = vld [vmem:[#allocation61_spill] sm:$0xff] }
 0x32e   :  { %4441 = vmatmul.bf16.gmra.mxu3 %v12795_v24 }
 0x330   :  { %v4181_v23 = vpop.f32.mrf.mxu2  ;;  %v4125_v18 = vpop.f32.mrf.mxu0 }
 0x331   :  { %v13545_v53 = vadd.f32 %v4181_v23, %v4153_v31  ;;  %v4210_v36 = vpop.f32.mrf.mxu3  ;;  %v4126_v62 = vadd.f32 %v4125_v18, %v14740_v50  ;;  %v4154_v7 = vpop.f32.mrf.mxu1  ;;  %4569 = vmatpush.bf16.msrb.mxu0 %v10088_v2 }
 0x332   :  { %v13548_v32 = vadd.f32 %v4210_v36, %v14739_v46  ;;  %v14744_v36 = vld [vmem:[#allocation54_spill] sm:$0xff] }
 0x333   :  { %v4155_v11 = vadd.f32 %v4154_v7, %v4126_v62  ;;  %v10015_v62 = vld [vmem:[#allocation5 + $0x380] sm:$0xf]  ;;  %v11711_v7 = vld [vmem:[#allocation5 + $0x3a0] sm:$0xf0] }
 0x335   :  { %4570 = vmatpush.bf16.msrb.mxu0 %v10052_v61  ;;  %v12072_v61 = vld [vmem:[#allocation8 + $0x164] sm:$0xf0] }
 0x338   :  { %v4183_v63 = vpop.f32.mrf.mxu2  ;;  %v4128_v49 = vpop.f32.mrf.mxu0 }
 0x339   :  { %v13551_v42 = vadd.f32 %v4183_v63, %v4155_v11  ;;  %v4212_v9 = vpop.f32.mrf.mxu3  ;;  %v4129_v43 = vadd.f32 %v4128_v49, %v14742_v60  ;;  %v4157_v57 = vpop.f32.mrf.mxu1  ;;  %v10016_v11 = vor.u32 %v11711_v7, %v10015_v62  ;;  %v11801_v62 = vld [vmem:[#allocation5 + $0x670] sm:$0xf0]  ;;  %v10559_v7 = vld [vmem:[#allocation8 + $0x120] sm:$0xf] }
 0x33a   :  { %v13554_v21 = vadd.f32 %v4212_v9, %v14741_v35  ;;  %v14745_v9 = vld [vmem:[#allocation62_spill] sm:$0xff] }
 0x33b   :  { %v4158_v58 = vadd.f32 %v4157_v57, %v4129_v43  ;;  %4359 = vmatmul.bf16.gmra.mxu0 %v12842_v0  ;;  %v10411_v57 = vld [vmem:[#allocation5 + $0x698] sm:$0xf] }
 0x33c   :  { %4388 = vmatmul.bf16.gmra.mxu1 %v12833_v59  ;;  %4571 = vmatpush.bf16.msrb.mxu0 %v10016_v11  ;;  %v14746_v11 = vld [vmem:[#allocation63_spill] sm:$0xff] }
 0x33d   :  { %4417 = vmatmul.bf16.gmra.mxu2 %v12840_v15 }
 0x33e   :  { %4446 = vmatmul.bf16.gmra.mxu3 %v12842_v0 }
 0x340   :  { %v4186_v27 = vpop.f32.mrf.mxu2  ;;  %v4130_v8 = vpop.f32.mrf.mxu0 }
 0x341   :  { %v13561_v31 = vadd.f32 %v4186_v27, %v4158_v58  ;;  %v4215_v33 = vpop.f32.mrf.mxu3  ;;  %v4131_v18 = vadd.f32 %v4130_v8, %v14744_v36  ;;  %v4159_v46 = vpop.f32.mrf.mxu1  ;;  %v11810_v58 = vld [vmem:[#allocation5 + $0x6b8] sm:$0xf0]  ;;  %v10775_v27 = vld [vmem:[#allocation8 + $0x2d0] sm:$0xf]  ;;  %v9979_v8 = vld [vmem:[#allocation5 + $0x338] sm:$0xf] }
 0x342   :  { %v13564_v23 = vadd.f32 %v4215_v33, %v14743_v19  ;;  %v10412_v54 = vor.u32 %v11810_v58, %v10411_v57  ;;  %v12120_v33 = vld [vmem:[#allocation8 + $0x2e4] sm:$0xf0]  ;;  %v10584_v19 = vor.u32 %v12072_v61, %v10583_v10  ;;  %v12114_v57 = vld [vmem:[#allocation8 + $0x2b4] sm:$0xf0] }
 0x343   :  { %v4160_v50 = vadd.f32 %v4159_v46, %v4131_v18  ;;  %v10776_v36 = vor.u32 %v12120_v33, %v10775_v27 }
 0x344   :  { %4597 = vmatpush.bf16.msrb.mxu1 %v10412_v54  ;;  %5532 = vmatpush.bf16.msrb.mxu2 %v10584_v19  ;;  %v10339_v19 = vld [vmem:[#allocation5 + $0x608] sm:$0xf] }
 0x345   :  { %5561 = vmatpush.bf16.msrb.mxu3 %v10776_v36 }
 0x348   :  { %v4188_v29 = vpop.f32.mrf.mxu2  ;;  %v4229_v63 = vpop.f32.mrf.mxu0 }
 0x349   :  { %v13567_v48 = vadd.f32 %v4188_v29, %v4160_v50  ;;  %v4217_v2 = vpop.f32.mrf.mxu3  ;;  %v4230_v35 = vadd.f32 %v4229_v63, %v13505_v3  ;;  %v4258_v60 = vpop.f32.mrf.mxu1  ;;  %v11702_v3 = vld [vmem:[#allocation5 + $0x358] sm:$0xf0]  ;;  %v10375_v50 = vld [vmem:[#allocation5 + $0x650] sm:$0xf] }
 0x34a   :  { %v13570_v49 = vadd.f32 %v4217_v2, %v14745_v9  ;;  %v9980_v18 = vor.u32 %v11702_v3, %v9979_v8  ;;  %v10376_v9 = vor.u32 %v11801_v62, %v10375_v50  ;;  %v9943_v8 = vld [vmem:[#allocation5 + $0x2f0] sm:$0xf]  ;;  %v11693_v3 = vld [vmem:[#allocation5 + $0x310] sm:$0xf0]  ;;  %v12060_v50 = vld [vmem:[#allocation8 + $0x104] sm:$0xf0] }
 0x34b   :  { %v13573_v43 = vadd.f32 %v4258_v60, %v4230_v35  ;;  %4460 = vmatmul.bf16.vlgmr.msra.gmra.mxu0 %v12727_v26  ;;  %v12066_v35 = vld [vmem:[#allocation8 + $0x134] sm:$0xf0]  ;;  %v10751_v60 = vld [vmem:[#allocation8 + $0x2a0] sm:$0xf]  ;;  %v9944_v36 = vor.u32 %v11693_v3, %v9943_v8 }
 0x34c   :  { %4489 = vmatmul.bf16.vlgmr.msra.gmra.mxu1 %v12735_v40  ;;  %4572 = vmatpush.bf16.msrb.mxu0 %v9980_v18  ;;  %v10560_v61 = vor.u32 %v12066_v35, %v10559_v7  ;;  %v10752_v54 = vor.u32 %v12114_v57, %v10751_v60  ;;  %v11792_v18 = vld [vmem:[#allocation5 + $0x628] sm:$0xf0]  ;;  %v10511_v35 = vld [vmem:[#allocation8 + $0xc0] sm:$0xf]  ;;  %v12102_v8 = vld [vmem:[#allocation8 + $0x254] sm:$0xf0] }
 0x34d   :  { %4518 = vmatmul.bf16.vlgmr.msra.gmra.mxu2 %v12748_v52  ;;  %4598 = vmatpush.bf16.msrb.mxu1 %v10376_v9  ;;  %v10340_v62 = vor.u32 %v11792_v18, %v10339_v19  ;;  %v11783_v9 = vld [vmem:[#allocation5 + $0x5e0] sm:$0xf0] }
 0x34e   :  { %4547 = vmatmul.bf16.vlgmr.msra.gmra.mxu3 %v12727_v26  ;;  %5533 = vmatpush.bf16.msrb.mxu2 %v10560_v61  ;;  %v12054_v61 = vld [vmem:[#allocation8 + $0xd4] sm:$0xf0] }
 0x34f   :  { %5562 = vmatpush.bf16.msrb.mxu3 %v10752_v54  ;;  %v10703_v54 = vld [vmem:[#allocation8 + $0x240] sm:$0xf] }
 0x350   :  { %v4287_v46 = vpop.f32.mrf.mxu2  ;;  %v4231_v63 = vpop.f32.mrf.mxu0  ;;  %4573 = vmatpush.bf16.msrb.mxu0 %v9944_v36  ;;  %v10512_v36 = vor.u32 %v12054_v61, %v10511_v35  ;;  %v10463_v61 = vld [vmem:[#allocation8 + $0x60] sm:$0xf] }
 0x351   :  { %v4288_v29 = vadd.f32 %v4287_v46, %v14746_v11  ;;  %v4316_v2 = vpop.f32.mrf.mxu3  ;;  %v4232_v58 = vadd.f32 %v4231_v63, %v13515_v44  ;;  %v4260_v10 = vpop.f32.mrf.mxu1  ;;  %v10535_v46 = vld [vmem:[#allocation8 + $0xf0] sm:$0xf]  ;;  %v12108_v63 = vld [vmem:[#allocation8 + $0x284] sm:$0xf0]  ;;  %4599 = vmatpush.bf16.msrb.mxu1 %v10340_v62  ;;  %v11774_v62 = vld [vmem:[#allocation5 + $0x598] sm:$0xf0] }
 0x352   :  { %v10536_v11 = vor.u32 %v12060_v50, %v10535_v46  ;;  %v10727_v44 = vld [vmem:[#allocation8 + $0x270] sm:$0xf]  ;;  %v10704_v46 = vor.u32 %v12102_v8, %v10703_v54 }
 0x353   :  { %v13581_v27 = vadd.f32 %v4316_v2, %v4288_v29  ;;  %v13583_v33 = vadd.f32 %v4260_v10, %v4232_v58  ;;  %v10728_v7 = vor.u32 %v12108_v63, %v10727_v44  ;;  %v10303_v2 = vld [vmem:[#allocation5 + $0x5c0] sm:$0xf]  ;;  %v12048_v63 = vld [vmem:[#allocation8 + $0xa4] sm:$0xf0] }
 0x354   :  { %5534 = vmatpush.bf16.msrb.mxu2 %v10536_v11  ;;  %v10304_v10 = vor.u32 %v11783_v9, %v10303_v2  ;;  %v10487_v11 = vld [vmem:[#allocation8 + $0x90] sm:$0xf]  ;;  %v11684_v2 = vld [vmem:[#allocation5 + $0x2c8] sm:$0xf0] }
 0x355   :  { %5563 = vmatpush.bf16.msrb.mxu3 %v10728_v7  ;;  %v10679_v7 = vld [vmem:[#allocation8 + $0x210] sm:$0xf]  ;;  %v10488_v9 = vor.u32 %v12048_v63, %v10487_v11 }
 0x356   :  { %4600 = vmatpush.bf16.msrb.mxu1 %v10304_v10  ;;  %v11765_v10 = vld [vmem:[#allocation5 + $0x550] sm:$0xf0] }
 0x358   :  { %v4289_v29 = vpop.f32.mrf.mxu2  ;;  %v4234_v58 = vpop.f32.mrf.mxu0  ;;  %5535 = vmatpush.bf16.msrb.mxu2 %v10512_v36  ;;  %v12042_v36 = vld [vmem:[#allocation8 + $0x74] sm:$0xf0] }
 0x359   :  { %v4290_v60 = vadd.f32 %v4289_v29, %v13131_v41  ;;  %v4318_v57 = vpop.f32.mrf.mxu3  ;;  %v4235_v3 = vadd.f32 %v4234_v58, %v13529_v55  ;;  %v4263_v19 = vpop.f32.mrf.mxu1  ;;  %v10267_v41 = vld [vmem:[#allocation5 + $0x578] sm:$0xf]  ;;  %v12096_v55 = vld [vmem:[#allocation8 + $0x224] sm:$0xf0]  ;;  %5564 = vmatpush.bf16.msrb.mxu3 %v10704_v46  ;;  %v10231_v58 = vld [vmem:[#allocation5 + $0x530] sm:$0xf]  ;;  %v10464_v63 = vor.u32 %v12042_v36, %v10463_v61 }
 0x35a   :  { %v10268_v44 = vor.u32 %v11774_v62, %v10267_v41  ;;  %v9907_v29 = vld [vmem:[#allocation5 + $0x2a8] sm:$0xf]  ;;  %v10655_v41 = vld [vmem:[#allocation8 + $0x1e0] sm:$0xf]  ;;  %v12090_v62 = vld [vmem:[#allocation8 + $0x1f4] sm:$0xf0] }
 0x35b   :  { %v13587_v18 = vadd.f32 %v4318_v57, %v4290_v60  ;;  %v13589_v50 = vadd.f32 %v4263_v19, %v4235_v3  ;;  %4465 = vmatmul.bf16.gmra.mxu0 %v12730_v30  ;;  %v9908_v35 = vor.u32 %v11684_v2, %v9907_v29  ;;  %v10680_v60 = vor.u32 %v12096_v55, %v10679_v7  ;;  %v11675_v29 = vld [vmem:[#allocation5 + $0x280] sm:$0xf0]  ;;  %v10195_v2 = vld [vmem:[#allocation5 + $0x4e8] sm:$0xf] }
 0x35c   :  { %4494 = vmatmul.bf16.gmra.mxu1 %v12742_v45  ;;  %5536 = vmatpush.bf16.msrb.mxu2 %v10488_v9  ;;  %v10232_v19 = vor.u32 %v11765_v10, %v10231_v58  ;;  %v12036_v58 = vld [vmem:[#allocation8 + $0x44] sm:$0xf0] }
 0x35d   :  { %4523 = vmatmul.bf16.gmra.mxu2 %v12757_v56  ;;  %4601 = vmatpush.bf16.msrb.mxu1 %v10268_v44  ;;  %v10656_v44 = vor.u32 %v12090_v62, %v10655_v41 }
 0x35e   :  { %4552 = vmatmul.bf16.gmra.mxu3 %v12730_v30  ;;  %4574 = vmatpush.bf16.msrb.mxu0 %v9908_v35  ;;  %v11756_v35 = vld [vmem:[#allocation5 + $0x508] sm:$0xf0] }
 0x35f   :  { %5565 = vmatpush.bf16.msrb.mxu3 %v10680_v60  ;;  %v10196_v10 = vor.u32 %v11756_v35, %v10195_v2 }
 0x360   :  { %v4292_v57 = vpop.f32.mrf.mxu2  ;;  %v4236_v3 = vpop.f32.mrf.mxu0  ;;  %5537 = vmatpush.bf16.msrb.mxu2 %v10464_v63  ;;  %v10607_v63 = vld [vmem:[#allocation8 + $0x180] sm:$0xf] }
 0x361   :  { %v4293_v54 = vadd.f32 %v4292_v57, %v13136_v4  ;;  %v4321_v8 = vpop.f32.mrf.mxu3  ;;  %v4237_v11 = vadd.f32 %v4236_v3, %v13538_v12  ;;  %v4265_v46 = vpop.f32.mrf.mxu1  ;;  %4602 = vmatpush.bf16.msrb.mxu1 %v10232_v19  ;;  %v9871_v4 = vld [vmem:[#allocation5 + $0x260] sm:$0xf]  ;;  %v10439_v57 = vld [vmem:[#allocation8 + $0x30] sm:$0xf]  ;;  %v12084_v3 = vld [vmem:[#allocation8 + $0x1c4] sm:$0xf0] }
 0x362   :  { %v9872_v9 = vor.u32 %v11675_v29, %v9871_v4  ;;  %v10440_v37 = vor.u32 %v12036_v58, %v10439_v57  ;;  %v10631_v12 = vld [vmem:[#allocation8 + $0x1b0] sm:$0xf]  ;;  %v10415_v19 = vld [vmem:[#allocation8] sm:$0xf]  ;;  %v12078_v4 = vld [vmem:[#allocation8 + $0x194] sm:$0xf0] }
 0x363   :  { %v13597_v7 = vadd.f32 %v4321_v8, %v4293_v54  ;;  %v13599_v55 = vadd.f32 %v4265_v46, %v4237_v11  ;;  %5566 = vmatpush.bf16.msrb.mxu3 %v10656_v44  ;;  %v10632_v61 = vor.u32 %v12084_v3, %v10631_v12  ;;  %v10159_v54 = vld [vmem:[#allocation5 + $0x4a0] sm:$0xf]  ;;  %v11747_v8 = vld [vmem:[#allocation5 + $0x4c0] sm:$0xf0]  ;;  %v12030_v46 = vld [vmem:[#allocation8 + $0x14] sm:$0xf0]  ;;  %v10608_v35 = vor.u32 %v12078_v4, %v10607_v63 }
 0x364   :  { %4575 = vmatpush.bf16.msrb.mxu0 %v9872_v9  ;;  %5538 = vmatpush.bf16.msrb.mxu2 %v10440_v37  ;;  %v10160_v11 = vor.u32 %v11747_v8, %v10159_v54  ;;  %v10416_v44 = vor.u32 %v12030_v46, %v10415_v19  ;;  %v12168_v37 = vld [vmem:[#allocation8 + $0x464] sm:$0xf0]  ;;  %v10943_v19 = vld [vmem:[#allocation8 + $0x420] sm:$0xf] }
 0x365   :  { %4603 = vmatpush.bf16.msrb.mxu1 %v10196_v10 }
 0x367   :  { %5567 = vmatpush.bf16.msrb.mxu3 %v10632_v61 }
 0x368   :  { %v4294_v60 = vpop.f32.mrf.mxu2  ;;  %v4239_v62 = vpop.f32.mrf.mxu0  ;;  %5539 = vmatpush.bf16.msrb.mxu2 %v10416_v44  ;;  %v12156_v44 = vld [vmem:[#allocation8 + $0x404] sm:$0xf0] }
 0x369   :  { %v4295_v36 = vadd.f32 %v4294_v60, %v13145_v20  ;;  %v4323_v41 = vpop.f32.mrf.mxu3  ;;  %v4240_v29 = vadd.f32 %v4239_v62, %v13548_v32  ;;  %v4268_v2 = vpop.f32.mrf.mxu1  ;;  %4604 = vmatpush.bf16.msrb.mxu1 %v10160_v11  ;;  %v10967_v20 = vld [vmem:[#allocation8 + $0x450] sm:$0xf] }
 0x36a   :  { %v10968_v32 = vor.u32 %v12168_v37, %v10967_v20 }
 0x36b   :  { %v13603_v9 = vadd.f32 %v4323_v41, %v4295_v36  ;;  %v13605_v57 = vadd.f32 %v4268_v2, %v4240_v29  ;;  %4470 = vmatmul.bf16.gmra.mxu0 %v12783_v13  ;;  %5568 = vmatpush.bf16.msrb.mxu3 %v10608_v35  ;;  %v12162_v36 = vld [vmem:[#allocation8 + $0x434] sm:$0xf0]  ;;  %v10919_v2 = vld [vmem:[#allocation8 + $0x3f0] sm:$0xf] }
 0x36c   :  { %4499 = vmatmul.bf16.gmra.mxu1 %v12791_v22  ;;  %5590 = vmatpush.bf16.msra.mxu0 %v10968_v32  ;;  %v10944_v41 = vor.u32 %v12162_v36, %v10943_v19  ;;  %v4627_v19 = vrot.slane %v12727_v26, 1  ;;  %v14620_v36 = vrot.slane %v12730_v30, 1 }
 0x36d   :  { %4528 = vmatmul.bf16.gmra.mxu2 %v12795_v24 }
 0x36e   :  { %4557 = vmatmul.bf16.gmra.mxu3 %v12783_v13 }
 0x370   :  { %v4297_v58 = vpop.f32.mrf.mxu2  ;;  %v4241_v3 = vpop.f32.mrf.mxu0  ;;  %5591 = vmatpush.bf16.msra.mxu0 %v10944_v41  ;;  %v4630_v41 = vrot.slane %v12735_v40, 1 }
 0x371   :  { %v4298_v10 = vadd.f32 %v4297_v58, %v13150_v6  ;;  %v4326_v12 = vpop.f32.mrf.mxu3  ;;  %v4242_v61 = vadd.f32 %v4241_v3, %v13554_v21  ;;  %v4270_v60 = vpop.f32.mrf.mxu1  ;;  %v10895_v3 = vld [vmem:[#allocation8 + $0x3c0] sm:$0xf] }
 0x373   :  { %v13613_v54 = vadd.f32 %v4326_v12, %v4298_v10  ;;  %v13615_v8 = vadd.f32 %v4270_v60, %v4242_v61  ;;  %v12150_v61 = vld [vmem:[#allocation8 + $0x3d4] sm:$0xf0] }
 0x374   :  { %v10896_v60 = vor.u32 %v12150_v61, %v10895_v3 }
 0x378   :  { %v4299_v62 = vpop.f32.mrf.mxu2  ;;  %v4244_v63 = vpop.f32.mrf.mxu0 }
 0x379   :  { %v4300_v11 = vadd.f32 %v4299_v62, %v13159_v47  ;;  %v4328_v46 = vpop.f32.mrf.mxu3  ;;  %v4245_v6 = vadd.f32 %v4244_v63, %v13564_v23  ;;  %v4273_v4 = vpop.f32.mrf.mxu1  ;;  %v10920_v47 = vor.u32 %v12156_v44, %v10919_v2  ;;  %v13647_v44 = vsel %vm4626_vm11, %v4627_v19, %v14620_v36  ;;  %v12063_v19 = vld [vmem:[#allocation8 + $0x124] sm:$0xf] }
 0x37b   :  { %v13619_v29 = vadd.f32 %v4328_v46, %v4300_v11  ;;  %v13621_v21 = vadd.f32 %v4273_v4, %v4245_v6  ;;  %4475 = vmatmul.bf16.gmra.mxu0 %v12833_v59 }
 0x37c   :  { %4504 = vmatmul.bf16.gmra.mxu1 %v12840_v15  ;;  %5592 = vmatpush.bf16.msra.mxu0 %v10920_v47 }
 0x37d   :  { %4533 = vmatmul.bf16.gmra.mxu2 %v12842_v0 }
 0x37e   :  { %4562 = vmatmul.bf16.gmra.mxu3 %v12833_v59 }
 0x380   :  { %v4302_v35 = vpop.f32.mrf.mxu2  ;;  %v4246_v37 = vpop.f32.mrf.mxu0  ;;  %5593 = vmatpush.bf16.msra.mxu0 %v10896_v60 }
 0x381   :  { %v4303_v20 = vadd.f32 %v4302_v35, %v13164_v38  ;;  %v4331_v23 = vpop.f32.mrf.mxu3  ;;  %v4247_v32 = vadd.f32 %v4246_v37, %v13570_v49  ;;  %v4275_v58 = vpop.f32.mrf.mxu1  ;;  %v14619_v38 = vrot.slane %v12742_v45, 1  ;;  %v12117_v35 = vld [vmem:[#allocation8 + $0x2d4] sm:$0xf]  ;;  %v10969_v37 = vld [vmem:[#allocation8 + $0x468] sm:$0xf0] }
 0x383   :  { %v13629_v10 = vadd.f32 %v4331_v23, %v4303_v20  ;;  %v13631_v12 = vadd.f32 %v4275_v58, %v4247_v32  ;;  %v13652_v47 = vsel %vm4626_vm11, %v4630_v41, %v14619_v38  ;;  %v10777_v23 = vld [vmem:[#allocation8 + $0x2e8] sm:$0xf0]  ;;  %v10871_v32 = vld [vmem:[#allocation8 + $0x390] sm:$0xf]  ;;  %v12144_v58 = vld [vmem:[#allocation8 + $0x3a4] sm:$0xf0] }
 0x384   :  { %v10780_v3 = vor.u32 %v12117_v35, %v10777_v23  ;;  %v10872_v60 = vor.u32 %v12144_v58, %v10871_v32  ;;  %v10561_v41 = vld [vmem:[#allocation8 + $0x138] sm:$0xf0]  ;;  %v12138_v32 = vld [vmem:[#allocation8 + $0x374] sm:$0xf0]  ;;  %v12057_v58 = vld [vmem:[#allocation8 + $0xf4] sm:$0xf] }
 0x386   :  { %5648 = vmatpush.bf16.msra.mxu2 %v10780_v3  ;;  %5594 = vmatpush.bf16.msra.mxu0 %v10872_v60  ;;  %v10729_v60 = vld [vmem:[#allocation8 + $0x288] sm:$0xf0] }
 0x388   :  { %v4304_v62 = vpop.f32.mrf.mxu2  ;;  %v4345_v46 = vpop.f32.mrf.mxu0 }
 0x389   :  { %v4305_v49 = vadd.f32 %v4304_v62, %v13173_v28  ;;  %v4333_v11 = vpop.f32.mrf.mxu3  ;;  %v13639_v63 = vadd.f32 %v4345_v46, %v13581_v27  ;;  %v4374_v6 = vpop.f32.mrf.mxu1  ;;  %v12069_v28 = vld [vmem:[#allocation8 + $0x154] sm:$0xf]  ;;  %v10585_v27 = vld [vmem:[#allocation8 + $0x168] sm:$0xf0]  ;;  %v12111_v62 = vld [vmem:[#allocation8 + $0x2a4] sm:$0xf]  ;;  %v10564_v46 = vor.u32 %v12063_v19, %v10561_v41 }
 0x38a   :  { %v4375_v2 = vadd.f32 %v4374_v6, %v13178_v51  ;;  %v10588_v20 = vor.u32 %v12069_v28, %v10585_v27  ;;  %v12165_v51 = vld [vmem:[#allocation8 + $0x454] sm:$0xf]  ;;  %v10753_v6 = vld [vmem:[#allocation8 + $0x2b8] sm:$0xf0]  ;;  %v12159_v28 = vld [vmem:[#allocation8 + $0x424] sm:$0xf] }
 0x38b   :  { %v13641_v4 = vadd.f32 %v4333_v11, %v4305_v49  ;;  %4576 = vmatmul.bf16.vlgmr.msrb.gmra.mxu0 %v12735_v40  ;;  %v10972_v61 = vor.u32 %v12165_v51, %v10969_v37  ;;  %v10945_v27 = vld [vmem:[#allocation8 + $0x438] sm:$0xf0]  ;;  %v10756_v25 = vor.u32 %v12111_v62, %v10753_v6  ;;  %v10847_v37 = vld [vmem:[#allocation8 + $0x360] sm:$0xf]  ;;  %v14622_v19 = vrot.slane %v12783_v13, 1 }
 0x38c   :  { %4605 = vmatmul.bf16.vlgmr.msrb.gmra.mxu1 %v12748_v52  ;;  %v10948_v35 = vor.u32 %v12159_v28, %v10945_v27  ;;  %v10848_v3 = vor.u32 %v12138_v32, %v10847_v37  ;;  %v10705_v28 = vld [vmem:[#allocation8 + $0x258] sm:$0xf0]  ;;  %v12147_v27 = vld [vmem:[#allocation8 + $0x3c4] sm:$0xf] }
 0x38d   :  { %5540 = vmatmul.bf16.vlgmr.msrb.gmra.mxu2 %v13647_v44  ;;  %5619 = vmatpush.bf16.msra.mxu1 %v10588_v20 }
 0x38e   :  { %5569 = vmatmul.bf16.vlgmr.msrb.gmra.mxu3 %v13652_v47  ;;  %5649 = vmatpush.bf16.msra.mxu2 %v10756_v25  ;;  %v12051_v25 = vld [vmem:[#allocation8 + $0xc4] sm:$0xf] }
 0x38f   :  { %5677 = vmatpush.bf16.msra.mxu3 %v10972_v61  ;;  %v10537_v61 = vld [vmem:[#allocation8 + $0x108] sm:$0xf0]  ;;  %5595 = vmatpush.bf16.msra.mxu0 %v10848_v3  ;;  %v14748_v3 = vrot.slane %v12730_v30, 1 }
 0x390   :  { %v4403_v49 = vpop.f32.mrf.mxu2  ;;  %v4347_v36 = vpop.f32.mrf.mxu0  ;;  %v10540_v41 = vor.u32 %v12057_v58, %v10537_v61 }
 0x391   :  { %v4432_v11 = vpop.f32.mrf.mxu3  ;;  %v4404_v38 = vadd.f32 %v4403_v49, %v4375_v2  ;;  %v4376_v16 = vpop.f32.mrf.mxu1  ;;  %v13659_v23 = vadd.f32 %v4347_v36, %v13587_v18  ;;  %5620 = vmatpush.bf16.msra.mxu1 %v10564_v46  ;;  %v12105_v2 = vld [vmem:[#allocation8 + $0x274] sm:$0xf]  ;;  %v10921_v36 = vld [vmem:[#allocation8 + $0x408] sm:$0xf0]  ;;  %v12099_v49 = vld [vmem:[#allocation8 + $0x244] sm:$0xf]  ;;  %v13671_v61 = vsel %vm4626_vm11, %v14748_v3, %v14622_v19 }
 0x392   :  { %v4377_v20 = vadd.f32 %v4376_v16, %v13185_v14  ;;  %v10732_v62 = vor.u32 %v12105_v2, %v10729_v60  ;;  %v12153_v18 = vld [vmem:[#allocation8 + $0x3f4] sm:$0xf]  ;;  %v14621_v14 = vrot.slane %v12791_v22, 1  ;;  %14749 = vst [vmem:[#allocation40_spill] sm:$0xff] %v13671_v61  ;;  %v10708_v2 = vor.u32 %v12099_v49, %v10705_v28  ;;  %v10465_v3 = vld [vmem:[#allocation8 + $0x78] sm:$0xf0] }
 0x393   :  { %v13662_v51 = vadd.f32 %v4432_v11, %v4404_v38  ;;  %5678 = vmatpush.bf16.msra.mxu3 %v10948_v35  ;;  %v10924_v16 = vor.u32 %v12153_v18, %v10921_v36  ;;  %v10513_v38 = vld [vmem:[#allocation8 + $0xd8] sm:$0xf0]  ;;  %v14752_v18 = vrot.slane %v12742_v45, 1  ;;  %v12093_v49 = vld [vmem:[#allocation8 + $0x214] sm:$0xf] }
 0x394   :  { %5650 = vmatpush.bf16.msra.mxu2 %v10732_v62  ;;  %v10516_v6 = vor.u32 %v12051_v25, %v10513_v38  ;;  %v10897_v35 = vld [vmem:[#allocation8 + $0x3d8] sm:$0xf0]  ;;  %v12045_v25 = vld [vmem:[#allocation8 + $0x94] sm:$0xf]  ;;  %v10489_v38 = vld [vmem:[#allocation8 + $0xa8] sm:$0xf0] }
 0x395   :  { %14747 = vst [vmem:[#allocation39_spill] sm:$0xff] %v13662_v51  ;;  %5621 = vmatpush.bf16.msra.mxu1 %v10540_v41  ;;  %v14751_v41 = vld [vmem:[#allocation65_spill] sm:$0xff]  ;;  %v10900_v36 = vor.u32 %v12147_v27, %v10897_v35  ;;  %v10823_v27 = vld [vmem:[#allocation8 + $0x330] sm:$0xf]  ;;  %v10849_v19 = vld [vmem:[#allocation8 + $0x378] sm:$0xf0] }
 0x396   :  { %v12141_v28 = vld [vmem:[#allocation8 + $0x394] sm:$0xf] }
 0x397   :  { %5679 = vmatpush.bf16.msra.mxu3 %v10924_v16 }
 0x398   :  { %v4405_v11 = vpop.f32.mrf.mxu2  ;;  %v4350_v32 = vpop.f32.mrf.mxu0  ;;  %5651 = vmatpush.bf16.msra.mxu2 %v10708_v2 }
 0x399   :  { %v4434_v46 = vpop.f32.mrf.mxu3  ;;  %v4406_v37 = vadd.f32 %v4405_v11, %v4377_v20  ;;  %v4379_v58 = vpop.f32.mrf.mxu1  ;;  %v13674_v60 = vadd.f32 %v4350_v32, %v13597_v7  ;;  %v13682_v20 = vsel %vm4626_vm11, %v14752_v18, %v14621_v14  ;;  %5622 = vmatpush.bf16.msra.mxu1 %v10516_v6  ;;  %v10492_v7 = vor.u32 %v12045_v25, %v10489_v38  ;;  %v10681_v11 = vld [vmem:[#allocation8 + $0x228] sm:$0xf0]  ;;  %v10657_v38 = vld [vmem:[#allocation8 + $0x1f8] sm:$0xf0]  ;;  %v12135_v14 = vld [vmem:[#allocation8 + $0x364] sm:$0xf] }
 0x39a   :  { %v4380_v62 = vadd.f32 %v4379_v58, %v14751_v41  ;;  %14753 = vst [vmem:[#allocation42_spill] sm:$0xff] %v13682_v20  ;;  %v10873_v32 = vld [vmem:[#allocation8 + $0x3a8] sm:$0xf0]  ;;  %v10684_v35 = vor.u32 %v12093_v49, %v10681_v11  ;;  %v12039_v58 = vld [vmem:[#allocation8 + $0x64] sm:$0xf]  ;;  %v10852_v11 = vor.u32 %v12135_v14, %v10849_v19  ;;  %v13700_v19 = vrot.slane %v12840_v15, 1 }
 0x39b   :  { %14750 = vst [vmem:[#allocation41_spill] sm:$0xff] %v13674_v60  ;;  %v13684_v16 = vadd.f32 %v4434_v46, %v4406_v37  ;;  %4581 = vmatmul.bf16.gmra.mxu0 %v12742_v45  ;;  %v12132_v46 = vld [vmem:[#allocation8 + $0x344] sm:$0xf0]  ;;  %5680 = vmatpush.bf16.msra.mxu3 %v10900_v36  ;;  %v10876_v6 = vor.u32 %v12141_v28, %v10873_v32  ;;  %v12087_v41 = vld [vmem:[#allocation8 + $0x1e4] sm:$0xf] }
 0x39c   :  { %4610 = vmatmul.bf16.gmra.mxu1 %v12757_v56  ;;  %v10824_v37 = vor.u32 %v12132_v46, %v10823_v27  ;;  %5652 = vmatpush.bf16.msra.mxu2 %v10684_v35  ;;  %v10468_v25 = vor.u32 %v12039_v58, %v10465_v3  ;;  %v10660_v40 = vor.u32 %v12087_v41, %v10657_v38  ;;  %v14756_v49 = vld [vmem:[#allocation67_spill] sm:$0xff]  ;;  %v10799_v32 = vld [vmem:[#allocation8 + $0x300] sm:$0xf]  ;;  %v12126_v27 = vld [vmem:[#allocation8 + $0x314] sm:$0xf0]  ;;  %v13697_v3 = vrot.slane %v12833_v59, 1 }
 0x39d   :  { %14754 = vst [vmem:[#allocation44_spill] sm:$0xff] %v13684_v16  ;;  %5545 = vmatmul.bf16.gmra.mxu2 %v13671_v61  ;;  %5623 = vmatpush.bf16.msra.mxu1 %v10492_v7  ;;  %v12033_v46 = vld [vmem:[#allocation8 + $0x34] sm:$0xf]  ;;  %v10800_v35 = vor.u32 %v12126_v27, %v10799_v32  ;;  %v10633_v58 = vld [vmem:[#allocation8 + $0x1c8] sm:$0xf0]  ;;  %v14775_v59 = vld [vmem:[#allocation78_spill] sm:$0xff] }
 0x39e   :  { %5574 = vmatmul.bf16.gmra.mxu3 %v13682_v20  ;;  %5596 = vmatpush.bf16.msra.mxu0 %v10824_v37  ;;  %v10441_v37 = vld [vmem:[#allocation8 + $0x48] sm:$0xf0]  ;;  %v12129_v41 = vld [vmem:[#allocation8 + $0x334] sm:$0xf]  ;;  %v10609_v38 = vld [vmem:[#allocation8 + $0x198] sm:$0xf0] }
 0x39f   :  { %5681 = vmatpush.bf16.msra.mxu3 %v10876_v6  ;;  %v12075_v6 = vld [vmem:[#allocation8 + $0x184] sm:$0xf]  ;;  %v10801_v32 = vld [vmem:[#allocation8 + $0x318] sm:$0xf0] }
 0x3a0   :  { %v4408_v18 = vpop.f32.mrf.mxu2  ;;  %v4352_v51 = vpop.f32.mrf.mxu0  ;;  %5653 = vmatpush.bf16.msra.mxu2 %v10660_v40  ;;  %v10417_v40 = vld [vmem:[#allocation8 + $0x18] sm:$0xf0]  ;;  %v12035_v60 = vld [vmem:[#allocation8 + $0x44] sm:$0xf] }
 0x3a1   :  { %v4437_v2 = vpop.f32.mrf.mxu3  ;;  %v4409_v16 = vadd.f32 %v4408_v18, %v4380_v62  ;;  %v4381_v45 = vpop.f32.mrf.mxu1  ;;  %v13691_v36 = vadd.f32 %v4352_v51, %v13603_v9  ;;  %5624 = vmatpush.bf16.msra.mxu1 %v10468_v25  ;;  %v12081_v62 = vld [vmem:[#allocation8 + $0x1b4] sm:$0xf]  ;;  %v10444_v9 = vor.u32 %v12033_v46, %v10441_v37 }
 0x3a2   :  { %v4382_v7 = vadd.f32 %v4381_v45, %v14756_v49  ;;  %v10636_v51 = vor.u32 %v12081_v62, %v10633_v58  ;;  %v10825_v45 = vld [vmem:[#allocation8 + $0x348] sm:$0xf0]  ;;  %5597 = vmatpush.bf16.msra.mxu0 %v10800_v35  ;;  %v12123_v49 = vld [vmem:[#allocation8 + $0x304] sm:$0xf]  ;;  %v14758_v62 = vrot.slane %v12783_v13, 1  ;;  %v10612_v35 = vor.u32 %v12075_v6, %v10609_v38 }
 0x3a3   :  { %14755 = vst [vmem:[#allocation48_spill] sm:$0xff] %v13691_v36  ;;  %v13694_v28 = vadd.f32 %v4437_v2, %v4409_v16  ;;  %5682 = vmatpush.bf16.msra.mxu3 %v10852_v11  ;;  %v10828_v14 = vor.u32 %v12129_v41, %v10825_v45  ;;  %v12027_v16 = vld [vmem:[#allocation8 + $0x4] sm:$0xf]  ;;  %v12058_v13 = vld [vmem:[#allocation8 + $0xfc] sm:$0xf] }
 0x3a4   :  { %5654 = vmatpush.bf16.msra.mxu2 %v10636_v51  ;;  %v10420_v25 = vor.u32 %v12027_v16, %v10417_v40  ;;  %v13706_v11 = vsel %vm4626_vm11, %v14758_v62, %v13697_v3  ;;  %v14761_v51 = vrot.slane %v12791_v22, 1  ;;  %v12073_v40 = vld [vmem:[#allocation8 + $0x16c] sm:$0xf0]  ;;  %v12067_v62 = vld [vmem:[#allocation8 + $0x13c] sm:$0xf0] }
 0x3a5   :  { %14757 = vst [vmem:[#allocation50_spill] sm:$0xff] %v13694_v28  ;;  %5625 = vmatpush.bf16.msra.mxu1 %v10444_v9  ;;  %v14760_v9 = vld [vmem:[#allocation69_spill] sm:$0xff]  ;;  %v10569_v28 = vld [vmem:[#allocation8 + $0x140] sm:$0xf0] }
 0x3a6   :  { %v13716_v45 = vsel %vm4626_vm11, %v14761_v51, %v13700_v19 }
 0x3a7   :  { %5683 = vmatpush.bf16.msra.mxu3 %v10828_v14 }
 0x3a8   :  { %v4410_v18 = vpop.f32.mrf.mxu2  ;;  %v4355_v46 = vpop.f32.mrf.mxu0  ;;  %5655 = vmatpush.bf16.msra.mxu2 %v10612_v35 }
 0x3a9   :  { %v4439_v2 = vpop.f32.mrf.mxu3  ;;  %v4411_v27 = vadd.f32 %v4410_v18, %v4382_v7  ;;  %v4384_v37 = vpop.f32.mrf.mxu1  ;;  %v13709_v58 = vadd.f32 %v4355_v46, %v13613_v54  ;;  %v10804_v7 = vor.u32 %v12123_v49, %v10801_v32  ;;  %5626 = vmatpush.bf16.msra.mxu1 %v10420_v25  ;;  %v10591_v54 = vld [vmem:[#allocation8 + $0x158] sm:$0xf]  ;;  %v14764_v25 = vld [vmem:[#allocation71_spill] sm:$0xff] }
 0x3aa   :  { %v4385_v41 = vadd.f32 %v4384_v37, %v14760_v9  ;;  %v10592_v6 = vor.u32 %v12073_v40, %v10591_v54  ;;  %v10567_v37 = vld [vmem:[#allocation8 + $0x128] sm:$0xf] }
 0x3ab   :  { %14759 = vst [vmem:[#allocation52_spill] sm:$0xff] %v13709_v58  ;;  %v13718_v16 = vadd.f32 %v4439_v2, %v4411_v27  ;;  %4586 = vmatmul.bf16.gmra.mxu0 %v12791_v22  ;;  %5684 = vmatpush.bf16.msra.mxu3 %v10804_v7  ;;  %v10568_v35 = vor.u32 %v12067_v62, %v10567_v37  ;;  %v10553_v58 = vld [vmem:[#allocation8 + $0x118] sm:$0xf0] }
 0x3ac   :  { %4615 = vmatmul.bf16.gmra.mxu1 %v12795_v24  ;;  %5706 = vmatpush.bf16.msrb.mxu0 %v10592_v6  ;;  %v14767_v6 = vld [vmem:[#allocation73_spill] sm:$0xff] }
 0x3ad   :  { %14762 = vst [vmem:[#allocation43_spill] sm:$0xff] %v13718_v16  ;;  %5550 = vmatmul.bf16.gmra.mxu2 %v13706_v11  ;;  %v12064_v16 = vld [vmem:[#allocation8 + $0x12c] sm:$0xf] }
 0x3ae   :  { %5579 = vmatmul.bf16.gmra.mxu3 %v13716_v45 }
 0x3b0   :  { %v4413_v18 = vpop.f32.mrf.mxu2  ;;  %v4357_v2 = vpop.f32.mrf.mxu0  ;;  %5707 = vmatpush.bf16.msrb.mxu0 %v10568_v35  ;;  %v14770_v35 = vld [vmem:[#allocation75_spill] sm:$0xff] }
 0x3b1   :  { %v4442_v38 = vpop.f32.mrf.mxu3  ;;  %v4414_v14 = vadd.f32 %v4413_v18, %v4385_v41  ;;  %v4386_v49 = vpop.f32.mrf.mxu1  ;;  %v13725_v32 = vadd.f32 %v4357_v2, %v13619_v29 }
 0x3b2   :  { %v4387_v27 = vadd.f32 %v4386_v49, %v14764_v25 }
 0x3b3   :  { %14763 = vst [vmem:[#allocation55_spill] sm:$0xff] %v13725_v32  ;;  %v13728_v46 = vadd.f32 %v4442_v38, %v4414_v14  ;;  %v10543_v38 = vld [vmem:[#allocation8 + $0xf8] sm:$0xf]  ;;  %v12061_v14 = vld [vmem:[#allocation8 + $0x10c] sm:$0xf0] }
 0x3b4   :  { %v10544_v2 = vor.u32 %v12061_v14, %v10543_v38  ;;  %v12110_v32 = vld [vmem:[#allocation8 + $0x294] sm:$0xf0] }
 0x3b5   :  { %14765 = vst [vmem:[#allocation45_spill] sm:$0xff] %v13728_v46  ;;  %v12070_v46 = vld [vmem:[#allocation8 + $0x15c] sm:$0xf] }
 0x3b6   :  { %5708 = vmatpush.bf16.msrb.mxu0 %v10544_v2 }
 0x3b8   :  { %v4415_v9 = vpop.f32.mrf.mxu2  ;;  %v4360_v54 = vpop.f32.mrf.mxu0 }
 0x3b9   :  { %v4444_v51 = vpop.f32.mrf.mxu3  ;;  %v4416_v7 = vadd.f32 %v4415_v9, %v4387_v27  ;;  %v4389_v40 = vpop.f32.mrf.mxu1  ;;  %v13731_v41 = vadd.f32 %v4360_v54, %v13629_v10  ;;  %v14627_v54 = vrot.slane %v12757_v56, 1 }
 0x3ba   :  { %v4390_v18 = vadd.f32 %v4389_v40, %v14767_v6  ;;  %v10519_v40 = vld [vmem:[#allocation8 + $0xc8] sm:$0xf]  ;;  %v12055_v6 = vld [vmem:[#allocation8 + $0xdc] sm:$0xf0] }
 0x3bb   :  { %14766 = vst [vmem:[#allocation56_spill] sm:$0xff] %v13731_v41  ;;  %v13734_v29 = vadd.f32 %v4444_v51, %v4416_v7  ;;  %4591 = vmatmul.bf16.gmra.mxu0 %v12840_v15  ;;  %v4633_v7 = vrot.slane %v12748_v52, 1  ;;  %v10520_v38 = vor.u32 %v12055_v6, %v10519_v40  ;;  %v10975_v40 = vld [vmem:[#allocation8 + $0x458] sm:$0xf] }
 0x3bc   :  { %4620 = vmatmul.bf16.gmra.mxu1 %v12842_v0 }
 0x3bd   :  { %14768 = vst [vmem:[#allocation46_spill] sm:$0xff] %v13734_v29  ;;  %10989 = vmatmul.msk.bf16.gmra.mxu2 %vm4626_vm11, %v13697_v3  ;;  %5709 = vmatpush.bf16.msrb.mxu0 %v10520_v38  ;;  %v12169_v29 = vld [vmem:[#allocation8 + $0x46c] sm:$0xf0] }
 0x3be   :  { %10990 = vmatmul.msk.bf16.gmra.mxu3 %vm4626_vm11, %v13700_v19 }
 0x3c0   :  { %v4418_v49 = vpop.f32.mrf.mxu2  ;;  %v4362_v27 = vpop.f32.mrf.mxu0 }
 0x3c1   :  { %v4447_v10 = vpop.f32.mrf.mxu3  ;;  %v4419_v25 = vadd.f32 %v4418_v49, %v4390_v18  ;;  %v4391_v37 = vpop.f32.mrf.mxu1  ;;  %v13743_v62 = vadd.f32 %v4362_v27, %v13641_v4  ;;  %v13753_v18 = vsel %vm4626_vm11, %v4633_v7, %v14627_v54  ;;  %v10593_v7 = vld [vmem:[#allocation8 + $0x170] sm:$0xf0] }
 0x3c2   :  { %v4392_v9 = vadd.f32 %v4391_v37, %v14770_v35  ;;  %v10783_v35 = vld [vmem:[#allocation8 + $0x2d8] sm:$0xf] }
 0x3c3   :  { %14769 = vst [vmem:[#allocation57_spill] sm:$0xff] %v13743_v62  ;;  %v13746_v51 = vadd.f32 %v4447_v10, %v4419_v25  ;;  %v14772_v10 = vld [vmem:[#allocation64_spill] sm:$0xff] }
 0x3c4   :  { %v14783_v62 = vld [vmem:[#allocation80_spill] sm:$0xff] }
 0x3c5   :  { %14771 = vst [vmem:[#allocation47_spill] sm:$0xff] %v13746_v51  ;;  %v12121_v51 = vld [vmem:[#allocation8 + $0x2ec] sm:$0xf0] }
 0x3c6   :  { %v10784_v38 = vor.u32 %v12121_v51, %v10783_v35 }
 0x3c8   :  { %v4420_v14 = vpop.f32.mrf.mxu2  ;;  %v4461_v49 = vpop.f32.mrf.mxu0  ;;  %5735 = vmatpush.bf16.msrb.mxu1 %v10784_v38  ;;  %v10572_v38 = vor.u32 %v12064_v16, %v10569_v28  ;;  %v10711_v16 = vld [vmem:[#allocation8 + $0x248] sm:$0xf] }
 0x3c9   :  { %v4449_v2 = vpop.f32.mrf.mxu3  ;;  %v4421_v4 = vadd.f32 %v4420_v14, %v4392_v9  ;;  %v4490_v27 = vpop.f32.mrf.mxu1  ;;  %v4462_v25 = vadd.f32 %v4461_v49, %v14772_v10  ;;  %v10495_v9 = vld [vmem:[#allocation8 + $0x98] sm:$0xf]  ;;  %v12049_v14 = vld [vmem:[#allocation8 + $0xac] sm:$0xf0]  ;;  %v10759_v10 = vld [vmem:[#allocation8 + $0x2a8] sm:$0xf] }
 0x3ca   :  { %v10496_v49 = vor.u32 %v12049_v14, %v10495_v9  ;;  %v14636_v14 = vrot.slane %v12795_v24, 1 }
 0x3cb   :  { %v13756_v37 = vadd.f32 %v4449_v2, %v4421_v4  ;;  %5598 = vmatmul.bf16.vlgmr.msra.gmra.mxu0 %v13753_v18  ;;  %v4491_v6 = vadd.f32 %v4490_v27, %v4462_v25  ;;  %v10976_v2 = vor.u32 %v12169_v29, %v10975_v40  ;;  %v10596_v4 = vor.u32 %v12070_v46, %v10593_v7  ;;  %v12115_v27 = vld [vmem:[#allocation8 + $0x2bc] sm:$0xf0]  ;;  %v10951_v25 = vld [vmem:[#allocation8 + $0x428] sm:$0xf] }
 0x3cc   :  { %5627 = vmatmul.bf16.vlgmr.msra.gmra.mxu1 %v13647_v44  ;;  %5710 = vmatpush.bf16.msrb.mxu0 %v10496_v49  ;;  %v10760_v35 = vor.u32 %v12115_v27, %v10759_v10  ;;  %v14776_v7 = vld [vmem:[#allocation66_spill] sm:$0xff]  ;;  %v10927_v49 = vld [vmem:[#allocation8 + $0x3f8] sm:$0xf] }
 0x3cd   :  { %14773 = vst [vmem:[#allocation58_spill] sm:$0xff] %v13756_v37  ;;  %5656 = vmatmul.bf16.vlgmr.msra.gmra.mxu2 %v13652_v47  ;;  %5793 = vmatpush.bf16.msrb.mxu3 %v10596_v4  ;;  %v12163_v37 = vld [vmem:[#allocation8 + $0x43c] sm:$0xf0]  ;;  %v12109_v4 = vld [vmem:[#allocation8 + $0x28c] sm:$0xf0] }
 0x3ce   :  { %5685 = vmatmul.bf16.vlgmr.msra.gmra.mxu3 %v13753_v18  ;;  %5764 = vmatpush.bf16.msrb.mxu2 %v10976_v2  ;;  %v10952_v40 = vor.u32 %v12163_v37, %v10951_v25  ;;  %v10735_v2 = vld [vmem:[#allocation8 + $0x278] sm:$0xf]  ;;  %v10545_v37 = vld [vmem:[#allocation8 + $0x110] sm:$0xf0]  ;;  %v12103_v25 = vld [vmem:[#allocation8 + $0x25c] sm:$0xf0] }
 0x3cf   :  { %5736 = vmatpush.bf16.msrb.mxu1 %v10760_v35  ;;  %v10736_v27 = vor.u32 %v12109_v4, %v10735_v2  ;;  %v10548_v28 = vor.u32 %v12058_v13, %v10545_v37  ;;  %v10903_v35 = vld [vmem:[#allocation8 + $0x3c8] sm:$0xf]  ;;  %v12052_v2 = vld [vmem:[#allocation8 + $0xcc] sm:$0xf]  ;;  %v10521_v4 = vld [vmem:[#allocation8 + $0xe0] sm:$0xf0] }
 0x3d0   :  { %v4519_v54 = vpop.f32.mrf.mxu2  ;;  %v4463_v46 = vpop.f32.mrf.mxu0 }
 0x3d1   :  { %v4548_v51 = vpop.f32.mrf.mxu3  ;;  %v13762_v15 = vadd.f32 %v4519_v54, %v4491_v6  ;;  %v4492_v29 = vpop.f32.mrf.mxu1  ;;  %v4464_v9 = vadd.f32 %v4463_v46, %v14776_v7  ;;  %5794 = vmatpush.bf16.msrb.mxu3 %v10572_v38  ;;  %v10471_v54 = vld [vmem:[#allocation8 + $0x68] sm:$0xf]  ;;  %v12043_v6 = vld [vmem:[#allocation8 + $0x7c] sm:$0xf0]  ;;  %v10712_v7 = vor.u32 %v12103_v25, %v10711_v16  ;;  %v12097_v16 = vld [vmem:[#allocation8 + $0x22c] sm:$0xf0] }
 0x3d2   :  { %v13765_v22 = vadd.f32 %v4548_v51, %v14775_v59  ;;  %5765 = vmatpush.bf16.msrb.mxu2 %v10952_v40  ;;  %v12157_v59 = vld [vmem:[#allocation8 + $0x40c] sm:$0xf0]  ;;  %v10472_v51 = vor.u32 %v12043_v6, %v10471_v54  ;;  %v10879_v25 = vld [vmem:[#allocation8 + $0x398] sm:$0xf] }
 0x3d3   :  { %14774 = vst [vmem:[#allocation49_spill] sm:$0xff] %v13762_v15  ;;  %v4493_v10 = vadd.f32 %v4492_v29, %v4464_v9  ;;  %v10928_v15 = vor.u32 %v12157_v59, %v10927_v49  ;;  %5737 = vmatpush.bf16.msrb.mxu1 %v10736_v27  ;;  %v14777_v29 = vrot.slane %v12757_v56, 1  ;;  %v12151_v9 = vld [vmem:[#allocation8 + $0x3dc] sm:$0xf0]  ;;  %v10524_v59 = vor.u32 %v12052_v2, %v10521_v4  ;;  %v12116_v56 = vld [vmem:[#allocation8 + $0x2c4] sm:$0xf0] }
 0x3d4   :  { %5711 = vmatpush.bf16.msrb.mxu0 %v10472_v51  ;;  %v10904_v27 = vor.u32 %v12151_v9, %v10903_v35  ;;  %v14781_v51 = vld [vmem:[#allocation68_spill] sm:$0xff]  ;;  %v10447_v35 = vld [vmem:[#allocation8 + $0x38] sm:$0xf] }
 0x3d5   :  { %v13774_v38 = vsel %vm4626_vm11, %v14777_v29, %v14636_v14  ;;  %5795 = vmatpush.bf16.msrb.mxu3 %v10548_v28  ;;  %v10687_v28 = vld [vmem:[#allocation8 + $0x218] sm:$0xf]  ;;  %v10473_v14 = vld [vmem:[#allocation8 + $0x80] sm:$0xf0] }
 0x3d6   :  { %5766 = vmatpush.bf16.msrb.mxu2 %v10928_v15  ;;  %14778 = vst [vmem:[#allocation59_spill] sm:$0xff] %v13774_v38  ;;  %v14780_v15 = vld [vmem:[#allocation79_spill] sm:$0xff] }
 0x3d7   :  { %5738 = vmatpush.bf16.msrb.mxu1 %v10712_v7  ;;  %v12037_v7 = vld [vmem:[#allocation8 + $0x4c] sm:$0xf0] }
 0x3d8   :  { %v4521_v46 = vpop.f32.mrf.mxu2  ;;  %v4466_v54 = vpop.f32.mrf.mxu0  ;;  %v10448_v4 = vor.u32 %v12037_v7, %v10447_v35  ;;  %v13793_v7 = vrot.slane %v12842_v0, 1 }
 0x3d9   :  { %v4550_v40 = vpop.f32.mrf.mxu3  ;;  %v13776_v13 = vadd.f32 %v4521_v46, %v4493_v10  ;;  %v4495_v6 = vpop.f32.mrf.mxu1  ;;  %v4467_v37 = vadd.f32 %v4466_v54, %v14781_v51  ;;  %5796 = vmatpush.bf16.msrb.mxu3 %v10524_v59  ;;  %v10688_v10 = vor.u32 %v12097_v16, %v10687_v28  ;;  %v12145_v46 = vld [vmem:[#allocation8 + $0x3ac] sm:$0xf0]  ;;  %v10663_v54 = vld [vmem:[#allocation8 + $0x1e8] sm:$0xf]  ;;  %v12139_v28 = vld [vmem:[#allocation8 + $0x37c] sm:$0xf0] }
 0x3da   :  { %v13779_v49 = vadd.f32 %v4550_v40, %v14780_v15  ;;  %5767 = vmatpush.bf16.msrb.mxu2 %v10904_v27  ;;  %v12046_v40 = vld [vmem:[#allocation8 + $0x9c] sm:$0xf]  ;;  %v10497_v15 = vld [vmem:[#allocation8 + $0xb0] sm:$0xf0]  ;;  %v10880_v9 = vor.u32 %v12145_v46, %v10879_v25  ;;  %v10855_v27 = vld [vmem:[#allocation8 + $0x368] sm:$0xf]  ;;  %5712 = vmatpush.bf16.msrb.mxu0 %v10448_v4 }
 0x3db   :  { %14779 = vst [vmem:[#allocation51_spill] sm:$0xff] %v13776_v13  ;;  %5603 = vmatmul.bf16.gmra.mxu0 %v13774_v38  ;;  %v4496_v29 = vadd.f32 %v4495_v6, %v4467_v37  ;;  %v10500_v2 = vor.u32 %v12046_v40, %v10497_v15  ;;  %5739 = vmatpush.bf16.msrb.mxu1 %v10688_v10  ;;  %v12091_v6 = vld [vmem:[#allocation8 + $0x1fc] sm:$0xf0]  ;;  %v12040_v16 = vld [vmem:[#allocation8 + $0x6c] sm:$0xf] }
 0x3dc   :  { %5632 = vmatmul.bf16.gmra.mxu1 %v13671_v61  ;;  %v10664_v37 = vor.u32 %v12091_v6, %v10663_v54  ;;  %v10856_v10 = vor.u32 %v12139_v28, %v10855_v27  ;;  %v10476_v40 = vor.u32 %v12040_v16, %v10473_v14  ;;  %v14784_v15 = vld [vmem:[#allocation70_spill] sm:$0xff]  ;;  %v10831_v4 = vld [vmem:[#allocation8 + $0x338] sm:$0xf]  ;;  %v10449_v14 = vld [vmem:[#allocation8 + $0x50] sm:$0xf0] }
 0x3dd   :  { %5661 = vmatmul.bf16.gmra.mxu2 %v13682_v20  ;;  %5797 = vmatpush.bf16.msrb.mxu3 %v10500_v2  ;;  %v12085_v2 = vld [vmem:[#allocation8 + $0x1cc] sm:$0xf0]  ;;  %v12031_v6 = vld [vmem:[#allocation8 + $0x1c] sm:$0xf0]  ;;  %v12034_v27 = vld [vmem:[#allocation8 + $0x3c] sm:$0xf] }
 0x3de   :  { %5690 = vmatmul.bf16.gmra.mxu3 %v13774_v38  ;;  %5768 = vmatpush.bf16.msrb.mxu2 %v10880_v9  ;;  %v10639_v9 = vld [vmem:[#allocation8 + $0x1b8] sm:$0xf]  ;;  %v10452_v28 = vor.u32 %v12034_v27, %v10449_v14  ;;  %v10615_v16 = vld [vmem:[#allocation8 + $0x188] sm:$0xf]  ;;  %v14788_v14 = vld [vmem:[#allocation72_spill] sm:$0xff] }
 0x3df   :  { %5740 = vmatpush.bf16.msrb.mxu1 %v10664_v37  ;;  %v12079_v37 = vld [vmem:[#allocation8 + $0x19c] sm:$0xf0] }
 0x3e0   :  { %v4524_v51 = vpop.f32.mrf.mxu2  ;;  %v4468_v25 = vpop.f32.mrf.mxu0 }
 0x3e1   :  { %v4553_v59 = vpop.f32.mrf.mxu3  ;;  %v13786_v13 = vadd.f32 %v4524_v51, %v4496_v29  ;;  %v4497_v46 = vpop.f32.mrf.mxu1  ;;  %v4469_v35 = vadd.f32 %v4468_v25, %v14784_v15  ;;  %5798 = vmatpush.bf16.msrb.mxu3 %v10476_v40  ;;  %v10423_v29 = vld [vmem:[#allocation8 + $0x8] sm:$0xf]  ;;  %v12133_v51 = vld [vmem:[#allocation8 + $0x34c] sm:$0xf0] }
 0x3e2   :  { %v13789_v41 = vadd.f32 %v4553_v59, %v14783_v62  ;;  %5769 = vmatpush.bf16.msrb.mxu2 %v10856_v10  ;;  %v10640_v62 = vor.u32 %v12085_v2, %v10639_v9  ;;  %v10424_v59 = vor.u32 %v12031_v6, %v10423_v29  ;;  %v10807_v25 = vld [vmem:[#allocation8 + $0x308] sm:$0xf]  ;;  %v12127_v9 = vld [vmem:[#allocation8 + $0x31c] sm:$0xf0]  ;;  %v12028_v2 = vld [vmem:[#allocation8 + $0xc] sm:$0xf] }
 0x3e3   :  { %14782 = vst [vmem:[#allocation60_spill] sm:$0xff] %v13786_v13  ;;  %v4498_v54 = vadd.f32 %v4497_v46, %v4469_v35  ;;  %v10832_v13 = vor.u32 %v12133_v51, %v10831_v4  ;;  %v14785_v46 = vrot.slane %v12795_v24, 1  ;;  %v10616_v35 = vor.u32 %v12079_v37, %v10615_v16  ;;  %v10425_v4 = vld [vmem:[#allocation8 + $0x20] sm:$0xf0]  ;;  %v14787_v6 = vld [vmem:[#allocation81_spill] sm:$0xff] }
 0x3e4   :  { %5741 = vmatpush.bf16.msrb.mxu1 %v10640_v62  ;;  %5713 = vmatpush.bf16.msrb.mxu0 %v10424_v59  ;;  %v10808_v59 = vor.u32 %v12127_v9, %v10807_v25  ;;  %v10428_v27 = vor.u32 %v12028_v2, %v10425_v4  ;;  %v10785_v16 = vld [vmem:[#allocation8 + $0x2f0] sm:$0xf0]  ;;  %v14791_v2 = vld [vmem:[#allocation74_spill] sm:$0xff] }
 0x3e5   :  { %v13799_v40 = vsel %vm4626_vm11, %v14785_v46, %v13793_v7  ;;  %5799 = vmatpush.bf16.msrb.mxu3 %v10452_v28  ;;  %v14790_v46 = vld [vmem:[#allocation82_spill] sm:$0xff] }
 0x3e6   :  { %5770 = vmatpush.bf16.msrb.mxu2 %v10832_v13 }
 0x3e8   :  { %v4526_v10 = vpop.f32.mrf.mxu2  ;;  %v4471_v62 = vpop.f32.mrf.mxu0  ;;  %5742 = vmatpush.bf16.msrb.mxu1 %v10616_v35 }
 0x3e9   :  { %v4555_v15 = vpop.f32.mrf.mxu3  ;;  %v13801_v29 = vadd.f32 %v4526_v10, %v4498_v54  ;;  %v4500_v51 = vpop.f32.mrf.mxu1  ;;  %v4472_v0 = vadd.f32 %v4471_v62, %v14788_v14  ;;  %5800 = vmatpush.bf16.msrb.mxu3 %v10428_v27  ;;  %v12118_v54 = vld [vmem:[#allocation8 + $0x2dc] sm:$0xf]  ;;  %v12112_v62 = vld [vmem:[#allocation8 + $0x2ac] sm:$0xf] }
 0x3ea   :  { %v13804_v13 = vadd.f32 %v4555_v15, %v14787_v6  ;;  %5771 = vmatpush.bf16.msrb.mxu2 %v10808_v59  ;;  %v10788_v37 = vor.u32 %v12118_v54, %v10785_v16  ;;  %v14793_v16 = vld [vmem:[#allocation83_spill] sm:$0xff] }
 0x3eb   :  { %14786 = vst [vmem:[#allocation53_spill] sm:$0xff] %v13801_v29  ;;  %5608 = vmatmul.bf16.gmra.mxu0 %v13799_v40  ;;  %v4501_v28 = vadd.f32 %v4500_v51, %v4472_v0  ;;  %v10761_v51 = vld [vmem:[#allocation8 + $0x2c0] sm:$0xf0] }
 0x3ec   :  { %5637 = vmatmul.bf16.gmra.mxu1 %v13706_v11  ;;  %5822 = vmatpush.bf16.msra.mxu0 %v10788_v37  ;;  %v10764_v59 = vor.u32 %v12112_v62, %v10761_v51 }
 0x3ed   :  { %5666 = vmatmul.bf16.gmra.mxu2 %v13716_v45 }
 0x3ee   :  { %5695 = vmatmul.bf16.gmra.mxu3 %v13799_v40 }
 0x3f0   :  { %v4529_v10 = vpop.f32.mrf.mxu2  ;;  %v4473_v9 = vpop.f32.mrf.mxu0  ;;  %5823 = vmatpush.bf16.msra.mxu0 %v10764_v59  ;;  %v14796_v59 = vld [vmem:[#allocation84_spill] sm:$0xff] }
 0x3f1   :  { %v4558_v25 = vpop.f32.mrf.mxu3  ;;  %v13811_v15 = vadd.f32 %v4529_v10, %v4501_v28  ;;  %v4502_v0 = vpop.f32.mrf.mxu1  ;;  %v4474_v4 = vadd.f32 %v4473_v9, %v14791_v2  ;;  %v10737_v2 = vld [vmem:[#allocation8 + $0x290] sm:$0xf0] }
 0x3f2   :  { %v13814_v35 = vadd.f32 %v4558_v25, %v14790_v46  ;;  %v14794_v25 = vld [vmem:[#allocation76_spill] sm:$0xff] }
 0x3f3   :  { %14789 = vst [vmem:[#allocation61_spill] sm:$0xff] %v13811_v15  ;;  %v4503_v6 = vadd.f32 %v4502_v0, %v4474_v4  ;;  %v12106_v0 = vld [vmem:[#allocation8 + $0x27c] sm:$0xf] }
 0x3f4   :  { %v10740_v4 = vor.u32 %v12106_v0, %v10737_v2  ;;  %v14799_v2 = vld [vmem:[#allocation85_spill] sm:$0xff] }
 0x3f6   :  { %5824 = vmatpush.bf16.msra.mxu0 %v10740_v4 }
 0x3f8   :  { %v4531_v27 = vpop.f32.mrf.mxu2  ;;  %v4476_v28 = vpop.f32.mrf.mxu0 }
 0x3f9   :  { %v4560_v14 = vpop.f32.mrf.mxu3  ;;  %v13817_v54 = vadd.f32 %v4531_v27, %v4503_v6  ;;  %v4505_v10 = vpop.f32.mrf.mxu1  ;;  %v4477_v46 = vadd.f32 %v4476_v28, %v14794_v25  ;;  %v14797_v28 = vld [vmem:[#allocation77_spill] sm:$0xff] }
 0x3fa   :  { %v13820_v37 = vadd.f32 %v4560_v14, %v14793_v16 }
 0x3fb   :  { %14792 = vst [vmem:[#allocation54_spill] sm:$0xff] %v13817_v54  ;;  %10991 = vmatmul.msk.bf16.gmra.mxu0 %vm4626_vm11, %v13793_v7  ;;  %v4506_v9 = vadd.f32 %v4505_v10, %v4477_v46  ;;  %v12100_v46 = vld [vmem:[#allocation8 + $0x24c] sm:$0xf]  ;;  %v10713_v54 = vld [vmem:[#allocation8 + $0x260] sm:$0xf0] }
 0x3fc   :  { %10992 = vmatmul.msk.bf16.gmra.mxu1 %vm4626_vm11, %v13697_v3  ;;  %v10716_v15 = vor.u32 %v12100_v46, %v10713_v54  ;;  %v12074_v54 = vld [vmem:[#allocation8 + $0x174] sm:$0xf0] }
 0x3fd   :  { %10993 = vmatmul.msk.bf16.gmra.mxu2 %vm4626_vm11, %v13700_v19 }
 0x3fe   :  { %10994 = vmatmul.msk.bf16.gmra.mxu3 %vm4626_vm11, %v13793_v7  ;;  %5825 = vmatpush.bf16.msra.mxu0 %v10716_v15 }
 0x400   :  { %v4534_v6 = vpop.f32.mrf.mxu2  ;;  %v4478_v14 = vpop.f32.mrf.mxu0 }
 0x401   :  { %v4563_v62 = vpop.f32.mrf.mxu3  ;;  %v13831_v51 = vadd.f32 %v4534_v6, %v4506_v9  ;;  %v4507_v16 = vpop.f32.mrf.mxu1  ;;  %v4479_v10 = vadd.f32 %v4478_v14, %v14797_v28  ;;  %v10977_v14 = vld [vmem:[#allocation8 + $0x470] sm:$0xf0] }
 0x402   :  { %v13834_v27 = vadd.f32 %v4563_v62, %v14796_v59  ;;  %v12166_v59 = vld [vmem:[#allocation8 + $0x45c] sm:$0xf] }
 0x403   :  { %14795 = vst [vmem:[#allocation62_spill] sm:$0xff] %v13831_v51  ;;  %v4508_v25 = vadd.f32 %v4507_v16, %v4479_v10  ;;  %v10599_v16 = vld [vmem:[#allocation8 + $0x160] sm:$0xf]  ;;  %v10980_v15 = vor.u32 %v12166_v59, %v10977_v14  ;;  %v12122_v10 = vld [vmem:[#allocation8 + $0x2f4] sm:$0xf0] }
 0x404   :  { %v12068_v51 = vld [vmem:[#allocation8 + $0x144] sm:$0xf0] }
 0x405   :  { %5851 = vmatpush.bf16.msra.mxu1 %v10980_v15 }
 0x408   :  { %v4536_v29 = vpop.f32.mrf.mxu2  ;;  %v4577_v9 = vpop.f32.mrf.mxu0 }
 0x409   :  { %v4565_v24 = vpop.f32.mrf.mxu3  ;;  %v13837_v0 = vadd.f32 %v4536_v29, %v4508_v25  ;;  %v4606_v6 = vpop.f32.mrf.mxu1  ;;  %v4578_v62 = vadd.f32 %v4577_v9, %v13765_v22  ;;  %v10791_v29 = vld [vmem:[#allocation8 + $0x2e0] sm:$0xf]  ;;  %v10689_v25 = vld [vmem:[#allocation8 + $0x230] sm:$0xf0]  ;;  %v10600_v22 = vor.u32 %v12074_v54, %v10599_v16  ;;  %v12160_v9 = vld [vmem:[#allocation8 + $0x42c] sm:$0xf] }
 0x40a   :  { %v13840_v4 = vadd.f32 %v4565_v24, %v14799_v2  ;;  %v12094_v24 = vld [vmem:[#allocation8 + $0x21c] sm:$0xf]  ;;  %v10792_v46 = vor.u32 %v12122_v10, %v10791_v29  ;;  %v10929_v10 = vld [vmem:[#allocation8 + $0x410] sm:$0xf0] }
 0x40b   :  { %14798 = vst [vmem:[#allocation63_spill] sm:$0xff] %v13837_v0  ;;  %5714 = vmatmul.bf16.vlgmr.msrb.gmra.mxu0 %v13647_v44  ;;  %v13844_v28 = vadd.f32 %v4606_v6, %v4578_v62  ;;  %v10692_v2 = vor.u32 %v12094_v24, %v10689_v25  ;;  %5880 = vmatpush.bf16.msra.mxu2 %v10600_v22  ;;  %v10953_v6 = vld [vmem:[#allocation8 + $0x440] sm:$0xf0]  ;;  %v10575_v62 = vld [vmem:[#allocation8 + $0x130] sm:$0xf] }
 0x40c   :  { %5743 = vmatmul.bf16.vlgmr.msrb.gmra.mxu1 %v13652_v47  ;;  %5909 = vmatpush.bf16.msra.mxu3 %v10792_v46  ;;  %v10956_v14 = vor.u32 %v12160_v9, %v10953_v6  ;;  %v10576_v16 = vor.u32 %v12068_v51, %v10575_v62  ;;  %v12154_v29 = vld [vmem:[#allocation8 + $0x3fc] sm:$0xf]  ;;  %v10551_v24 = vld [vmem:[#allocation8 + $0x100] sm:$0xf]  ;;  %v12088_v22 = vld [vmem:[#allocation8 + $0x1ec] sm:$0xf] }
 0x40d   :  { %14800 = vst [vmem:[#allocation65_spill] sm:$0xff] %v13844_v28  ;;  %5772 = vmatmul.bf16.vlgmr.msrb.gmra.mxu2 %v13753_v18  ;;  %5826 = vmatpush.bf16.msra.mxu0 %v10692_v2  ;;  %v10767_v28 = vld [vmem:[#allocation8 + $0x2b0] sm:$0xf]  ;;  %v10665_v46 = vld [vmem:[#allocation8 + $0x200] sm:$0xf0]  ;;  %v10932_v2 = vor.u32 %v12154_v29, %v10929_v10 }
 0x40e   :  { %5801 = vmatmul.bf16.vlgmr.msrb.gmra.mxu3 %v13647_v44  ;;  %v10768_v54 = vor.u32 %v12116_v56, %v10767_v28  ;;  %5852 = vmatpush.bf16.msra.mxu1 %v10956_v14  ;;  %v12062_v9 = vld [vmem:[#allocation8 + $0x114] sm:$0xf0]  ;;  %v10527_v51 = vld [vmem:[#allocation8 + $0xd0] sm:$0xf]  ;;  %v12056_v14 = vld [vmem:[#allocation8 + $0xe4] sm:$0xf0] }
 0x40f   :  { %5881 = vmatpush.bf16.msra.mxu2 %v10576_v16  ;;  %v10552_v6 = vor.u32 %v12062_v9, %v10551_v24  ;;  %v10719_v16 = vld [vmem:[#allocation8 + $0x250] sm:$0xf]  ;;  %v10528_v24 = vor.u32 %v12056_v14, %v10527_v51  ;;  %v10503_v9 = vld [vmem:[#allocation8 + $0xa0] sm:$0xf]  ;;  %v10857_v14 = vld [vmem:[#allocation8 + $0x380] sm:$0xf0] }
 0x410   :  { %v5541_v0 = vpop.f32.mrf.mxu2  ;;  %v4579_v30 = vpop.f32.mrf.mxu0  ;;  %5910 = vmatpush.bf16.msra.mxu3 %v10768_v54  ;;  %v12104_v54 = vld [vmem:[#allocation8 + $0x264] sm:$0xf0] }
 0x411   :  { %v5570_v59 = vpop.f32.mrf.mxu3  ;;  %v4608_v26 = vpop.f32.mrf.mxu1  ;;  %v4580_v15 = vadd.f32 %v4579_v30, %v13779_v49  ;;  %v12148_v30 = vld [vmem:[#allocation8 + $0x3cc] sm:$0xf]  ;;  %v10905_v49 = vld [vmem:[#allocation8 + $0x3e0] sm:$0xf0] }
 0x412   :  { %v13849_v52 = vadd.f32 %v5570_v59, %v5541_v0  ;;  %v10668_v0 = vor.u32 %v12088_v22, %v10665_v46  ;;  %v10743_v59 = vld [vmem:[#allocation8 + $0x280] sm:$0xf]  ;;  %5853 = vmatpush.bf16.msra.mxu1 %v10932_v2  ;;  %v10720_v22 = vor.u32 %v12104_v54, %v10719_v16  ;;  %v12142_v46 = vld [vmem:[#allocation8 + $0x39c] sm:$0xf]  ;;  %v10881_v2 = vld [vmem:[#allocation8 + $0x3b0] sm:$0xf0] }
 0x413   :  { %v13852_v25 = vadd.f32 %v4608_v26, %v4580_v15  ;;  %v10744_v56 = vor.u32 %v12110_v32, %v10743_v59  ;;  %5882 = vmatpush.bf16.msra.mxu2 %v10552_v6  ;;  %v10908_v26 = vor.u32 %v12148_v30, %v10905_v49  ;;  %v10884_v6 = vor.u32 %v12142_v46, %v10881_v2  ;;  %v12050_v59 = vld [vmem:[#allocation8 + $0xb4] sm:$0xf0]  ;;  %v10641_v49 = vld [vmem:[#allocation8 + $0x1d0] sm:$0xf0]  ;;  %v10479_v16 = vld [vmem:[#allocation8 + $0x70] sm:$0xf] }
 0x414   :  { %5827 = vmatpush.bf16.msra.mxu0 %v10668_v0  ;;  %v12098_v30 = vld [vmem:[#allocation8 + $0x234] sm:$0xf0]  ;;  %v10504_v51 = vor.u32 %v12050_v59, %v10503_v9 }
 0x415   :  { %14801 = vst [vmem:[#allocation67_spill] sm:$0xff] %v13852_v25  ;;  %5911 = vmatpush.bf16.msra.mxu3 %v10744_v56  ;;  %v10695_v56 = vld [vmem:[#allocation8 + $0x220] sm:$0xf]  ;;  %v12086_v25 = vld [vmem:[#allocation8 + $0x1d4] sm:$0xf0] }
 0x416   :  { %5854 = vmatpush.bf16.msra.mxu1 %v10908_v26  ;;  %v12136_v26 = vld [vmem:[#allocation8 + $0x36c] sm:$0xf] }
 0x417   :  { %5883 = vmatpush.bf16.msra.mxu2 %v10528_v24  ;;  %v12044_v24 = vld [vmem:[#allocation8 + $0x84] sm:$0xf0] }
 0x418   :  { %v5543_v28 = vpop.f32.mrf.mxu2  ;;  %v4582_v29 = vpop.f32.mrf.mxu0  ;;  %v10480_v9 = vor.u32 %v12044_v24, %v10479_v16  ;;  %v10431_v24 = vld [vmem:[#allocation8 + $0x10] sm:$0xf] }
 0x419   :  { %v5572_v62 = vpop.f32.mrf.mxu3  ;;  %v4611_v10 = vpop.f32.mrf.mxu1  ;;  %v4583_v32 = vadd.f32 %v4582_v29, %v13789_v41  ;;  %5912 = vmatpush.bf16.msra.mxu3 %v10720_v22  ;;  %v12082_v41 = vld [vmem:[#allocation8 + $0x1bc] sm:$0xf]  ;;  %v10671_v22 = vld [vmem:[#allocation8 + $0x1f0] sm:$0xf] }
 0x41a   :  { %v13854_v15 = vadd.f32 %v5572_v62, %v5543_v28  ;;  %v10696_v28 = vor.u32 %v12098_v30, %v10695_v56  ;;  %v10644_v62 = vor.u32 %v12082_v41, %v10641_v49  ;;  %5855 = vmatpush.bf16.msra.mxu1 %v10884_v6  ;;  %v12130_v56 = vld [vmem:[#allocation8 + $0x33c] sm:$0xf]  ;;  %v10833_v30 = vld [vmem:[#allocation8 + $0x350] sm:$0xf0]  ;;  %v10455_v41 = vld [vmem:[#allocation8 + $0x40] sm:$0xf] }
 0x41b   :  { %5719 = vmatmul.bf16.gmra.mxu0 %v13671_v61  ;;  %v13858_v0 = vadd.f32 %v4611_v10, %v4583_v32  ;;  %5884 = vmatpush.bf16.msra.mxu2 %v10504_v51  ;;  %v10860_v10 = vor.u32 %v12136_v26, %v10857_v14  ;;  %v12092_v32 = vld [vmem:[#allocation8 + $0x204] sm:$0xf0]  ;;  %v12076_v51 = vld [vmem:[#allocation8 + $0x18c] sm:$0xf]  ;;  %v12038_v26 = vld [vmem:[#allocation8 + $0x54] sm:$0xf0] }
 0x41c   :  { %5748 = vmatmul.bf16.gmra.mxu1 %v13682_v20  ;;  %5828 = vmatpush.bf16.msra.mxu0 %v10644_v62  ;;  %v10672_v59 = vor.u32 %v12092_v32, %v10671_v22  ;;  %v10836_v62 = vor.u32 %v12130_v56, %v10833_v30 }
 0x41d   :  { %14802 = vst [vmem:[#allocation69_spill] sm:$0xff] %v13858_v0  ;;  %5777 = vmatmul.bf16.gmra.mxu2 %v13774_v38  ;;  %5913 = vmatpush.bf16.msra.mxu3 %v10696_v28  ;;  %v10617_v28 = vld [vmem:[#allocation8 + $0x1a0] sm:$0xf0] }
 0x41e   :  { %5806 = vmatmul.bf16.gmra.mxu3 %v13671_v61  ;;  %5856 = vmatpush.bf16.msra.mxu1 %v10860_v10  ;;  %v10620_v14 = vor.u32 %v12076_v51, %v10617_v28  ;;  %v10809_v10 = vld [vmem:[#allocation8 + $0x320] sm:$0xf0] }
 0x41f   :  { %5885 = vmatpush.bf16.msra.mxu2 %v10480_v9  ;;  %v10623_v9 = vld [vmem:[#allocation8 + $0x190] sm:$0xf] }
 0x420   :  { %v5546_v54 = vpop.f32.mrf.mxu2  ;;  %v4584_v2 = vpop.f32.mrf.mxu0  ;;  %5829 = vmatpush.bf16.msra.mxu0 %v10620_v14 }
 0x421   :  { %v5575_v29 = vpop.f32.mrf.mxu3  ;;  %v4613_v0 = vpop.f32.mrf.mxu1  ;;  %v4585_v6 = vadd.f32 %v4584_v2, %v13804_v13  ;;  %5914 = vmatpush.bf16.msra.mxu3 %v10672_v59  ;;  %v12124_v13 = vld [vmem:[#allocation8 + $0x30c] sm:$0xf]  ;;  %v12032_v2 = vld [vmem:[#allocation8 + $0x24] sm:$0xf0] }
 0x422   :  { %v13863_v46 = vadd.f32 %v5575_v29, %v5546_v54  ;;  %v10456_v54 = vor.u32 %v12038_v26, %v10455_v41  ;;  %v10647_v29 = vld [vmem:[#allocation8 + $0x1c0] sm:$0xf]  ;;  %5857 = vmatpush.bf16.msra.mxu1 %v10836_v62  ;;  %v12080_v59 = vld [vmem:[#allocation8 + $0x1a4] sm:$0xf0]  ;;  %v10432_v41 = vor.u32 %v12032_v2, %v10431_v24 }
 0x423   :  { %v13866_v49 = vadd.f32 %v4613_v0, %v4585_v6  ;;  %v10648_v16 = vor.u32 %v12086_v25, %v10647_v29  ;;  %v10812_v0 = vor.u32 %v12124_v13, %v10809_v10  ;;  %v10624_v51 = vor.u32 %v12080_v59, %v10623_v9 }
 0x424   :  { %5886 = vmatpush.bf16.msra.mxu2 %v10456_v54 }
 0x425   :  { %14803 = vst [vmem:[#allocation71_spill] sm:$0xff] %v13866_v49  ;;  %5915 = vmatpush.bf16.msra.mxu3 %v10648_v16  ;;  %v10769_v49 = vld [vmem:[#allocation8 + $0x2c8] sm:$0xf0] }
 0x426   :  { %5858 = vmatpush.bf16.msra.mxu1 %v10812_v0 }
 0x428   :  { %v5548_v22 = vpop.f32.mrf.mxu2  ;;  %v4587_v56 = vpop.f32.mrf.mxu0  ;;  %5887 = vmatpush.bf16.msra.mxu2 %v10432_v41  ;;  %v12170_v41 = vld [vmem:[#allocation8 + $0x474] sm:$0xf0] }
 0x429   :  { %v5577_v32 = vpop.f32.mrf.mxu3  ;;  %v4616_v30 = vpop.f32.mrf.mxu1  ;;  %v4588_v25 = vadd.f32 %v4587_v56, %v13814_v35  ;;  %5916 = vmatpush.bf16.msra.mxu3 %v10624_v51 }
 0x42a   :  { %v13868_v6 = vadd.f32 %v5577_v32, %v5548_v22 }
 0x42b   :  { %5724 = vmatmul.bf16.gmra.mxu0 %v13706_v11  ;;  %v13872_v28 = vadd.f32 %v4616_v30, %v4588_v25  ;;  %v10983_v30 = vld [vmem:[#allocation8 + $0x460] sm:$0xf] }
 0x42c   :  { %5753 = vmatmul.bf16.gmra.mxu1 %v13716_v45  ;;  %v10984_v25 = vor.u32 %v12170_v41, %v10983_v30  ;;  %v12119_v30 = vld [vmem:[#allocation8 + $0x2e4] sm:$0xf]  ;;  %v10793_v41 = vld [vmem:[#allocation8 + $0x2f8] sm:$0xf0] }
 0x42d   :  { %14804 = vst [vmem:[#allocation73_spill] sm:$0xff] %v13872_v28  ;;  %5782 = vmatmul.bf16.gmra.mxu2 %v13799_v40  ;;  %v12113_v28 = vld [vmem:[#allocation8 + $0x2b4] sm:$0xf] }
 0x42e   :  { %5811 = vmatmul.bf16.gmra.mxu3 %v13706_v11  ;;  %5938 = vmatpush.bf16.msrb.mxu0 %v10984_v25  ;;  %v10985_v25 = vld [vmem:[#allocation8 + $0x478] sm:$0xf0] }
 0x430   :  { %v5551_v62 = vpop.f32.mrf.mxu2  ;;  %v4589_v54 = vpop.f32.mrf.mxu0 }
 0x431   :  { %v5580_v26 = vpop.f32.mrf.mxu3  ;;  %v4618_v29 = vpop.f32.mrf.mxu1  ;;  %v4590_v35 = vadd.f32 %v4589_v54, %v13820_v37 }
 0x432   :  { %v13877_v14 = vadd.f32 %v5580_v26, %v5551_v62  ;;  %v13900_v26 = vld [vmem:[#allocation11] sm:$0x7] }
 0x433   :  { %v13880_v16 = vadd.f32 %v4618_v29, %v4590_v35 }
 0x435   :  { %14805 = vst [vmem:[#allocation75_spill] sm:$0xff] %v13880_v16 }
 0x438   :  { %v5553_v13 = vpop.f32.mrf.mxu2  ;;  %v4592_v22 = vpop.f32.mrf.mxu0 }
 0x439   :  { %v5582_v10 = vpop.f32.mrf.mxu3  ;;  %v4621_v32 = vpop.f32.mrf.mxu1  ;;  %v4593_v0 = vadd.f32 %v4592_v22, %v13834_v27 }
 0x43a   :  { %v13882_v24 = vadd.f32 %v5582_v10, %v5553_v13 }
 0x43b   :  { %10995 = vmatmul.msk.bf16.gmra.mxu0 %vm4626_vm11, %v13697_v3  ;;  %v13887_v2 = vadd.f32 %v4621_v32, %v4593_v0  ;;  %v13906_v32 = vperm.slane %v13900_v26, 0  ;;  %v12164_v0 = vld [vmem:[#allocation8 + $0x444] sm:$0xf0] }
 0x43c   :  { %10996 = vmatmul.msk.bf16.gmra.mxu1 %vm4626_vm11, %v13700_v19 }
 0x43d   :  { %14806 = vst [vmem:[#allocation64_spill] sm:$0xff] %v13887_v2  ;;  %10997 = vmatmul.msk.bf16.gmra.mxu2 %vm4626_vm11, %v13793_v7 }
 0x43e   :  { %10998 = vmatmul.msk.bf16.gmra.mxu3 %vm4626_vm11, %v13697_v3 }
 0x440   :  { %v5556_v37 = vpop.f32.mrf.mxu2  ;;  %v4594_v56 = vpop.f32.mrf.mxu0 }
 0x441   :  { %v5585_v9 = vpop.f32.mrf.mxu3  ;;  %v4623_v27 = vpop.f32.mrf.mxu1  ;;  %v4595_v51 = vadd.f32 %v4594_v56, %v13840_v4  ;;  %v10959_v4 = vld [vmem:[#allocation8 + $0x430] sm:$0xf]  ;;  %v12071_v56 = vld [vmem:[#allocation8 + $0x164] sm:$0xf] }
 0x442   :  { %v13895_v59 = vadd.f32 %v5585_v9, %v5556_v37  ;;  %v10960_v9 = vor.u32 %v12164_v0, %v10959_v4  ;;  %v12065_v0 = vld [vmem:[#allocation8 + $0x134] sm:$0xf] }
 0x443   :  { %v13898_v62 = vadd.f32 %v4623_v27, %v4595_v51  ;;  %v10601_v27 = vld [vmem:[#allocation8 + $0x178] sm:$0xf0]  ;;  %v12167_v51 = vld [vmem:[#allocation8 + $0x464] sm:$0xf] }
 0x444   :  { %5939 = vmatpush.bf16.msrb.mxu0 %v10960_v9 }
 0x445   :  { %14807 = vst [vmem:[#allocation78_spill] sm:$0xff] %v13898_v62  ;;  %v10577_v62 = vld [vmem:[#allocation8 + $0x148] sm:$0xf0] }
 0x446   :  { %v10580_v16 = vor.u32 %v12065_v0, %v10577_v62  ;;  %v12059_v0 = vld [vmem:[#allocation8 + $0x104] sm:$0xf] }
 0x448   :  { %v5558_v54 = vpop.f32.mrf.mxu2  ;;  %v5599_v13 = vpop.f32.mrf.mxu0 }
 0x449   :  { %v5587_v29 = vpop.f32.mrf.mxu3  ;;  %v5628_v10 = vpop.f32.mrf.mxu1  ;;  %v5600_v22 = vadd.f32 %v5599_v13, %v13849_v52  ;;  %v10604_v52 = vor.u32 %v12071_v56, %v10601_v27  ;;  %v10988_v13 = vor.u32 %v12167_v51, %v10985_v25 }
 0x44a   :  { %v13902_v35 = vadd.f32 %v5587_v29, %v5558_v54  ;;  %v10796_v29 = vor.u32 %v12119_v30, %v10793_v41  ;;  %v10961_v41 = vld [vmem:[#allocation8 + $0x448] sm:$0xf0] }
 0x44b   :  { %5830 = vmatmul.bf16.vlgmr.msra.gmra.mxu0 %v13652_v47  ;;  %v6857_v37 = vadd.f32 %v5600_v22, %v13502_v1  ;;  %5967 = vmatpush.bf16.msrb.mxu1 %v10604_v52  ;;  %v10772_v52 = vor.u32 %v12113_v28, %v10769_v49  ;;  %v10556_v49 = vor.u32 %v12059_v0, %v10553_v58  ;;  %v10745_v28 = vld [vmem:[#allocation8 + $0x298] sm:$0xf0]  ;;  %v12053_v58 = vld [vmem:[#allocation8 + $0xd4] sm:$0xf] }
 0x44c   :  { %5859 = vmatmul.bf16.vlgmr.msra.gmra.mxu1 %v13753_v18  ;;  %5996 = vmatpush.bf16.msrb.mxu2 %v10796_v29  ;;  %v10935_v29 = vld [vmem:[#allocation8 + $0x400] sm:$0xf] }
 0x44d   :  { %5888 = vmatmul.bf16.vlgmr.msra.gmra.mxu2 %v13647_v44  ;;  %v7190_v54 = vadd.f32 %v13906_v32, %v6857_v37  ;;  %6025 = vmatpush.bf16.msrb.mxu3 %v10988_v13  ;;  %v12161_v37 = vld [vmem:[#allocation8 + $0x434] sm:$0xf] }
 0x44e   :  { %5917 = vmatmul.bf16.vlgmr.msra.gmra.mxu3 %v13652_v47  ;;  %v10964_v13 = vor.u32 %v12161_v37, %v10961_v41 }
 0x44f   :  { %v7214_v1 = vmax.f32 %v7190_v54, 0.0  ;;  %v13919_v54 = vperm.slane %v13900_v26, 1  ;;  %5968 = vmatpush.bf16.msrb.mxu1 %v10580_v16 }
 0x450   :  { %v5657_v22 = vpop.f32.mrf.mxu2  ;;  %v5601_v56 = vpop.f32.mrf.mxu0  ;;  %5997 = vmatpush.bf16.msrb.mxu2 %v10772_v52  ;;  %v12152_v52 = vld [vmem:[#allocation8 + $0x3e4] sm:$0xf0] }
 0x451   :  { %v5686_v4 = vpop.f32.mrf.mxu3  ;;  %v5658_v2 = vadd.f32 %v5657_v22, %v5628_v10  ;;  %v5630_v27 = vpop.f32.mrf.mxu1  ;;  %v7241_v9 = vsel %vm7238_vm12, %v7214_v1, 0.0  ;;  %v5602_v30 = vadd.f32 %v5601_v56, %v13854_v15  ;;  %v12158_v10 = vld [vmem:[#allocation8 + $0x414] sm:$0xf0]  ;;  %v12107_v1 = vld [vmem:[#allocation8 + $0x284] sm:$0xf]  ;;  %6026 = vmatpush.bf16.msrb.mxu3 %v10964_v13 }
 0x452   :  { %v7265_v51 = vrot.slane %v7241_v9, 4  ;;  %v10936_v22 = vor.u32 %v12158_v10, %v10935_v29  ;;  %v10748_v16 = vor.u32 %v12107_v1, %v10745_v28  ;;  %v12101_v28 = vld [vmem:[#allocation8 + $0x254] sm:$0xf] }
 0x453   :  { %v5687_v25 = vadd.f32 %v5686_v4, %v5658_v2  ;;  %v6860_v62 = vadd.f32 %v5602_v30, %v13512_v39  ;;  %v12155_v2 = vld [vmem:[#allocation8 + $0x404] sm:$0xf]  ;;  %v10937_v4 = vld [vmem:[#allocation8 + $0x418] sm:$0xf0]  ;;  %v10911_v30 = vld [vmem:[#allocation8 + $0x3d0] sm:$0xf]  ;;  %5969 = vmatpush.bf16.msrb.mxu1 %v10556_v49 }
 0x454   :  { %v7266_v36 = vmax.f32 %v7241_v9, %v7265_v51  ;;  %5940 = vmatpush.bf16.msrb.mxu0 %v10936_v22  ;;  %v10940_v37 = vor.u32 %v12155_v2, %v10937_v4  ;;  %5998 = vmatpush.bf16.msrb.mxu2 %v10748_v16  ;;  %v10721_v2 = vld [vmem:[#allocation8 + $0x268] sm:$0xf0] }
 0x455   :  { %v6858_v15 = vadd.f32 %v5687_v25, %v13573_v43  ;;  %v7193_v56 = vadd.f32 %v13906_v32, %v6860_v62  ;;  %v10912_v43 = vor.u32 %v12152_v52, %v10911_v30  ;;  %v10529_v25 = vld [vmem:[#allocation8 + $0xe8] sm:$0xf0]  ;;  %v10724_v4 = vor.u32 %v12101_v28, %v10721_v2  ;;  %v10887_v52 = vld [vmem:[#allocation8 + $0x3a0] sm:$0xf]  ;;  %v10697_v28 = vld [vmem:[#allocation8 + $0x238] sm:$0xf0] }
 0x456   :  { %v7267_v41 = vrot.slane %v7266_v36, 2  ;;  %6027 = vmatpush.bf16.msrb.mxu3 %v10940_v37  ;;  %v10532_v1 = vor.u32 %v12053_v58, %v10529_v25  ;;  %v10913_v16 = vld [vmem:[#allocation8 + $0x3e8] sm:$0xf0]  ;;  %v10505_v25 = vld [vmem:[#allocation8 + $0xb8] sm:$0xf0] }
 0x457   :  { %v7191_v39 = vadd.f32 %v13919_v54, %v6858_v15  ;;  %v7217_v29 = vmax.f32 %v7193_v56, 0.0  ;;  %v12149_v56 = vld [vmem:[#allocation8 + $0x3d4] sm:$0xf]  ;;  %v12143_v2 = vld [vmem:[#allocation8 + $0x3a4] sm:$0xf] }
 0x458   :  { %v5659_v9 = vpop.f32.mrf.mxu2  ;;  %v7268_v10 = vmax.f32 %v7266_v36, %v7267_v41  ;;  %v5604_v62 = vpop.f32.mrf.mxu0  ;;  %5941 = vmatpush.bf16.msrb.mxu0 %v10912_v43  ;;  %5970 = vmatpush.bf16.msrb.mxu1 %v10532_v1 }
 0x459   :  { %v5688_v51 = vpop.f32.mrf.mxu3  ;;  %v7215_v13 = vmax.f32 %v7191_v39, 0.0  ;;  %v5660_v0 = vadd.f32 %v5659_v9, %v5630_v27  ;;  %v5633_v22 = vpop.f32.mrf.mxu1  ;;  %v7244_v15 = vsel %vm7238_vm12, %v7217_v29, 0.0  ;;  %v5605_v49 = vadd.f32 %v5604_v62, %v13863_v46  ;;  %v12146_v46 = vld [vmem:[#allocation8 + $0x3b4] sm:$0xf0]  ;;  %5999 = vmatpush.bf16.msrb.mxu2 %v10724_v4 }
 0x45a   :  { %v7269_v30 = vrot.slane %v7268_v10, 1  ;;  %v7283_v27 = vrot.slane %v7244_v15, 4  ;;  %v10916_v29 = vor.u32 %v12149_v56, %v10913_v16  ;;  %v10888_v62 = vor.u32 %v12146_v46, %v10887_v52 }
 0x45b   :  { %v7242_v36 = vsel %vm7238_vm12, %v7215_v13, 0.0  ;;  %v5689_v41 = vadd.f32 %v5688_v51, %v5660_v0  ;;  %5835 = vmatmul.bf16.gmra.mxu0 %v13682_v20  ;;  %v6863_v39 = vadd.f32 %v5605_v49, %v13526_v34  ;;  %v12047_v51 = vld [vmem:[#allocation8 + $0xa4] sm:$0xf]  ;;  %v10889_v49 = vld [vmem:[#allocation8 + $0x3b8] sm:$0xf0] }
 0x45c   :  { %v7271_v37 = vrot.slane %v7242_v36, 4  ;;  %5864 = vmatmul.bf16.gmra.mxu1 %v13774_v38  ;;  %v7270_v9 = vmax.f32 %v7268_v10, %v7269_v30  ;;  %v7284_v43 = vmax.f32 %v7244_v15, %v7283_v27  ;;  %v12095_v13 = vld [vmem:[#allocation8 + $0x224] sm:$0xf]  ;;  %6028 = vmatpush.bf16.msrb.mxu3 %v10916_v29  ;;  %v10508_v1 = vor.u32 %v12047_v51, %v10505_v25  ;;  %v12041_v25 = vld [vmem:[#allocation8 + $0x74] sm:$0xf] }
 0x45d   :  { %v6861_v58 = vadd.f32 %v5689_v41, %v13583_v33  ;;  %5893 = vmatmul.bf16.gmra.mxu2 %v13671_v61  ;;  %v7196_v34 = vadd.f32 %v13906_v32, %v6863_v39  ;;  %v10700_v4 = vor.u32 %v12095_v13, %v10697_v28  ;;  %5942 = vmatpush.bf16.msrb.mxu0 %v10888_v62  ;;  %v10863_v41 = vld [vmem:[#allocation8 + $0x370] sm:$0xf] }
 0x45e   :  { %5922 = vmatmul.bf16.gmra.mxu3 %v13682_v20  ;;  %v7272_v0 = vmax.f32 %v7242_v36, %v7271_v37  ;;  %v7409_v10 = vpack.c.bf16 %v7270_v9, %v7270_v9  ;;  %v7285_v15 = vrot.slane %v7284_v43, 2  ;;  %v12140_v36 = vld [vmem:[#allocation8 + $0x384] sm:$0xf0]  ;;  %5971 = vmatpush.bf16.msrb.mxu1 %v10508_v1  ;;  %v10892_v37 = vor.u32 %v12143_v2, %v10889_v49  ;;  %v12089_v1 = vld [vmem:[#allocation8 + $0x1f4] sm:$0xf] }
 0x45f   :  { %v7194_v33 = vadd.f32 %v13919_v54, %v6861_v58  ;;  %v7220_v16 = vmax.f32 %v7196_v34, 0.0  ;;  %6000 = vmatpush.bf16.msrb.mxu2 %v10700_v4  ;;  %v10481_v58 = vld [vmem:[#allocation8 + $0x88] sm:$0xf0]  ;;  %v10864_v28 = vor.u32 %v12140_v36, %v10863_v41  ;;  %v10457_v20 = vld [vmem:[#allocation8 + $0x58] sm:$0xf0] }
 0x460   :  { %v7273_v56 = vrot.slane %v7272_v0, 2  ;;  %v5662_v30 = vpop.f32.mrf.mxu2  ;;  %v13938_v39 = vunpack.c.l.b16 %v7409_v10  ;;  %v7286_v52 = vmax.f32 %v7284_v43, %v7285_v15  ;;  %v5606_v51 = vpop.f32.mrf.mxu0  ;;  %6029 = vmatpush.bf16.msrb.mxu3 %v10892_v37  ;;  %v10673_v2 = vld [vmem:[#allocation8 + $0x208] sm:$0xf0]  ;;  %v12137_v15 = vld [vmem:[#allocation8 + $0x374] sm:$0xf] }
 0x461   :  { %v5691_v27 = vpop.f32.mrf.mxu3  ;;  %v7218_v46 = vmax.f32 %v7194_v33, 0.0  ;;  %v5663_v29 = vadd.f32 %v5662_v30, %v5633_v22  ;;  %v5635_v9 = vpop.f32.mrf.mxu1  ;;  %v7247_v34 = vsel %vm7238_vm12, %v7220_v16, 0.0  ;;  %v5607_v62 = vadd.f32 %v5606_v51, %v13868_v6  ;;  %5943 = vmatpush.bf16.msrb.mxu0 %v10864_v28  ;;  %v12134_v16 = vld [vmem:[#allocation8 + $0x354] sm:$0xf0]  ;;  %v10865_v51 = vld [vmem:[#allocation8 + $0x388] sm:$0xf0] }
 0x462   :  { %v7274_v13 = vmax.f32 %v7272_v0, %v7273_v56  ;;  %v7287_v49 = vrot.slane %v7286_v52, 1  ;;  %v7301_v22 = vrot.slane %v7247_v34, 4  ;;  %v10839_v56 = vld [vmem:[#allocation8 + $0x340] sm:$0xf]  ;;  %v10484_v30 = vor.u32 %v12041_v25, %v10481_v58 }
 0x463   :  { %v7245_v43 = vsel %vm7238_vm12, %v7218_v46, 0.0  ;;  %v5692_v10 = vadd.f32 %v5691_v27, %v5663_v29  ;;  %v6866_v0 = vadd.f32 %v5607_v62, %v13535_v17  ;;  %v10840_v37 = vor.u32 %v12134_v16, %v10839_v56  ;;  %v12128_v56 = vld [vmem:[#allocation8 + $0x324] sm:$0xf0]  ;;  %v12083_v16 = vld [vmem:[#allocation8 + $0x1c4] sm:$0xf] }
 0x464   :  { %v7275_v33 = vrot.slane %v7274_v13, 1  ;;  %v7289_v4 = vrot.slane %v7245_v43, 4  ;;  %v7288_v6 = vmax.f32 %v7286_v52, %v7287_v49  ;;  %v7302_v41 = vmax.f32 %v7247_v34, %v7301_v22  ;;  %5972 = vmatpush.bf16.msrb.mxu1 %v10484_v30 }
 0x465   :  { %v6864_v36 = vadd.f32 %v5692_v10, %v13589_v50  ;;  %v7199_v27 = vadd.f32 %v13906_v32, %v6866_v0  ;;  %v10676_v29 = vor.u32 %v12089_v1, %v10673_v2  ;;  %v10868_v28 = vor.u32 %v12137_v15, %v10865_v51  ;;  %5944 = vmatpush.bf16.msrb.mxu0 %v10840_v37  ;;  %v10815_v0 = vld [vmem:[#allocation8 + $0x310] sm:$0xf]  ;;  %v10841_v37 = vld [vmem:[#allocation8 + $0x358] sm:$0xf0] }
 0x466   :  { %v7276_v46 = vmax.f32 %v7274_v13, %v7275_v33  ;;  %v7290_v61 = vmax.f32 %v7245_v43, %v7289_v4  ;;  %v7412_v38 = vpack.c.bf16 %v7288_v6, %v7288_v6  ;;  %v7303_v17 = vrot.slane %v7302_v41, 2 }
 0x467   :  { %v7197_v62 = vadd.f32 %v13919_v54, %v6864_v36  ;;  %v7223_v58 = vmax.f32 %v7199_v27, 0.0  ;;  %6001 = vmatpush.bf16.msrb.mxu2 %v10676_v29  ;;  %v10460_v49 = vor.u32 %v12035_v60, %v10457_v20  ;;  %6030 = vmatpush.bf16.msrb.mxu3 %v10868_v28  ;;  %v12131_v36 = vld [vmem:[#allocation8 + $0x344] sm:$0xf]  ;;  %v10816_v27 = vor.u32 %v12128_v56, %v10815_v0 }
 0x468   :  { %v7410_v25 = vpack.c.bf16 %v7276_v46, %v7276_v46  ;;  %v7291_v52 = vrot.slane %v7290_v61, 2  ;;  %v5664_v34 = vpop.f32.mrf.mxu2  ;;  %v7807_v22 = vunpack.c.l.b16 %v7412_v38  ;;  %v7304_v13 = vmax.f32 %v7302_v41, %v7303_v17  ;;  %v5609_v33 = vpop.f32.mrf.mxu0 }
 0x469   :  { %v5693_v50 = vpop.f32.mrf.mxu3  ;;  %v7221_v43 = vmax.f32 %v7197_v62, 0.0  ;;  %v5665_v10 = vadd.f32 %v5664_v34, %v5635_v9  ;;  %v5638_v4 = vpop.f32.mrf.mxu1  ;;  %v7250_v2 = vsel %vm7238_vm12, %v7223_v58, 0.0  ;;  %v5610_v15 = vadd.f32 %v5609_v33, %v13877_v14  ;;  %5973 = vmatpush.bf16.msrb.mxu1 %v10460_v49  ;;  %5945 = vmatpush.bf16.msrb.mxu0 %v10816_v27 }
 0x46a   :  { %v7292_v1 = vmax.f32 %v7290_v61, %v7291_v52  ;;  %v7829_v60 = vsel %vm7828_vm4, %v7807_v22, %v13938_v39  ;;  %v7305_v20 = vrot.slane %v7304_v13, 1  ;;  %v7319_v9 = vrot.slane %v7250_v2, 4  ;;  %v10649_v61 = vld [vmem:[#allocation8 + $0x1d8] sm:$0xf0]  ;;  %v12029_v52 = vld [vmem:[#allocation8 + $0x14] sm:$0xf] }
 0x46b   :  { %v7248_v38 = vsel %vm7238_vm12, %v7221_v43, 0.0  ;;  %5840 = vmatmul.bf16.gmra.mxu0 %v13716_v45  ;;  %v5694_v41 = vadd.f32 %v5693_v50, %v5665_v10  ;;  %v6869_v14 = vadd.f32 %v5610_v15, %v13545_v53  ;;  %v7805_v51 = vunpack.c.l.b16 %v7410_v25  ;;  %v10433_v53 = vld [vmem:[#allocation8 + $0x28] sm:$0xf0] }
 0x46c   :  { %v7293_v30 = vrot.slane %v7292_v1, 1  ;;  %v7307_v6 = vrot.slane %v7248_v38, 4  ;;  %5869 = vmatmul.bf16.gmra.mxu1 %v13799_v40  ;;  %v7306_v46 = vmax.f32 %v7304_v13, %v7305_v20  ;;  %v7320_v39 = vmax.f32 %v7250_v2, %v7319_v9 }
 0x46d   :  { %5898 = vmatmul.bf16.gmra.mxu2 %v13706_v11  ;;  %v6867_v62 = vadd.f32 %v5694_v41, %v13599_v55  ;;  %v7202_v28 = vadd.f32 %v13906_v32, %v6869_v14  ;;  %v10652_v50 = vor.u32 %v12083_v16, %v10649_v61  ;;  %v10844_v25 = vor.u32 %v12131_v36, %v10841_v37  ;;  %v12077_v61 = vld [vmem:[#allocation8 + $0x194] sm:$0xf]  ;;  %v10817_v37 = vld [vmem:[#allocation8 + $0x328] sm:$0xf0] }
 0x46e   :  { %5927 = vmatmul.bf16.gmra.mxu3 %v13716_v45  ;;  %v7294_v29 = vmax.f32 %v7292_v1, %v7293_v30  ;;  %v7308_v17 = vmax.f32 %v7248_v38, %v7307_v6  ;;  %v7415_v58 = vpack.c.bf16 %v7306_v46, %v7306_v46  ;;  %v7321_v34 = vrot.slane %v7320_v39, 2  ;;  %v10625_v30 = vld [vmem:[#allocation8 + $0x1a8] sm:$0xf0] }
 0x46f   :  { %v7200_v13 = vadd.f32 %v13919_v54, %v6867_v62  ;;  %v7226_v43 = vmax.f32 %v7202_v28, 0.0  ;;  %6002 = vmatpush.bf16.msrb.mxu2 %v10652_v50  ;;  %6031 = vmatpush.bf16.msrb.mxu3 %v10844_v25  ;;  %v10436_v56 = vor.u32 %v12029_v52, %v10433_v53 }
 0x470   :  { %v7413_v49 = vpack.c.bf16 %v7294_v29, %v7294_v29  ;;  %v7309_v22 = vrot.slane %v7308_v17, 2  ;;  %v5667_v10 = vpop.f32.mrf.mxu2  ;;  %v7810_v1 = vunpack.c.l.b16 %v7415_v58  ;;  %v7322_v2 = vmax.f32 %v7320_v39, %v7321_v34  ;;  %v5611_v55 = vpop.f32.mrf.mxu0 }
 0x471   :  { %v5696_v33 = vpop.f32.mrf.mxu3  ;;  %v5668_v15 = vadd.f32 %v5667_v10, %v5638_v4  ;;  %v5640_v0 = vpop.f32.mrf.mxu1  ;;  %v7224_v9 = vmax.f32 %v7200_v13, 0.0  ;;  %v7253_v16 = vsel %vm7238_vm12, %v7226_v43, 0.0  ;;  %5974 = vmatpush.bf16.msrb.mxu1 %v10436_v56  ;;  %v12125_v4 = vld [vmem:[#allocation8 + $0x314] sm:$0xf]  ;;  %v5612_v29 = vadd.f32 %v5611_v55, %v13882_v24 }
 0x472   :  { %v7808_v20 = vunpack.c.l.b16 %v7413_v49  ;;  %v7310_v38 = vmax.f32 %v7308_v17, %v7309_v22  ;;  %v7831_v6 = vsel %vm7830_vm5, %v7810_v1, %v7829_v60  ;;  %v7323_v41 = vrot.slane %v7322_v2, 1 }
 0x473   :  { %v7337_v14 = vrot.slane %v7253_v16, 4  ;;  %v5697_v36 = vadd.f32 %v5696_v33, %v5668_v15  ;;  %v7251_v27 = vsel %vm7238_vm12, %v7224_v9, 0.0  ;;  %v6872_v53 = vadd.f32 %v5612_v29, %v13551_v42 }
 0x474   :  { %v7842_v46 = vsel %vm7828_vm4, %v7808_v20, %v7805_v51  ;;  %v7311_v39 = vrot.slane %v7310_v38, 1  ;;  %v7324_v17 = vmax.f32 %v7322_v2, %v7323_v41  ;;  %v7325_v62 = vrot.slane %v7251_v27, 4 }
 0x475   :  { %v7338_v28 = vmax.f32 %v7253_v16, %v7337_v14  ;;  %v6870_v52 = vadd.f32 %v5697_v36, %v13605_v57  ;;  %v10628_v58 = vor.u32 %v12077_v61, %v10625_v30  ;;  %v10820_v34 = vor.u32 %v12125_v4, %v10817_v37 }
 0x476   :  { %v7312_v60 = vmax.f32 %v7310_v38, %v7311_v39  ;;  %v7418_v50 = vpack.c.bf16 %v7324_v17, %v7324_v17  ;;  %v7326_v25 = vmax.f32 %v7251_v27, %v7325_v62  ;;  %v7205_v13 = vadd.f32 %v13906_v32, %v6872_v53 }
 0x477   :  { %v7339_v49 = vrot.slane %v7338_v28, 2  ;;  %v7203_v51 = vadd.f32 %v13919_v54, %v6870_v52  ;;  %6003 = vmatpush.bf16.msrb.mxu2 %v10628_v58  ;;  %6032 = vmatpush.bf16.msrb.mxu3 %v10820_v34 }
 0x478   :  { %v7416_v22 = vpack.c.bf16 %v7312_v60, %v7312_v60  ;;  %v5669_v43 = vpop.f32.mrf.mxu2  ;;  %v7813_v10 = vunpack.c.l.b16 %v7418_v50  ;;  %v7327_v33 = vrot.slane %v7326_v25, 2  ;;  %v5614_v2 = vpop.f32.mrf.mxu0  ;;  %v7229_v55 = vmax.f32 %v7205_v13, 0.0 }
 0x479   :  { %v5698_v24 = vpop.f32.mrf.mxu3  ;;  %v7340_v57 = vmax.f32 %v7338_v28, %v7339_v49  ;;  %v7227_v1 = vmax.f32 %v7203_v51, 0.0  ;;  %v5643_v42 = vpop.f32.mrf.mxu1  ;;  %v5670_v56 = vadd.f32 %v5669_v43, %v5640_v0  ;;  %v5615_v20 = vadd.f32 %v5614_v2, %v13895_v59 }
 0x47a   :  { %v7811_v15 = vunpack.c.l.b16 %v7416_v22  ;;  %v7833_v38 = vsel %vm7832_vm6, %v7813_v10, %v7831_v6  ;;  %v7328_v9 = vmax.f32 %v7326_v25, %v7327_v33  ;;  %v7256_v14 = vsel %vm7238_vm12, %v7229_v55, 0.0  ;;  %v11093_v33 = vld [vmem:[#allocation10 + $0xa8] sm:$0xf] }
 0x47b   :  { %v7341_v16 = vrot.slane %v7340_v57, 1  ;;  %v7254_v61 = vsel %vm7238_vm12, %v7227_v1, 0.0  ;;  %10999 = vmatmul.msk.bf16.gmra.mxu0 %vm4626_vm11, %v13700_v19  ;;  %v5699_v36 = vadd.f32 %v5698_v24, %v5670_v56  ;;  %v7355_v6 = vrot.slane %v7256_v14, 4 }
 0x47c   :  { %v7843_v30 = vsel %vm7830_vm5, %v7811_v15, %v7842_v46  ;;  %v7343_v41 = vrot.slane %v7254_v61, 4  ;;  %11000 = vmatmul.msk.bf16.gmra.mxu1 %vm4626_vm11, %v13793_v7  ;;  %v7329_v59 = vrot.slane %v7328_v9, 1  ;;  %v6875_v4 = vadd.f32 %v5615_v20, %v13561_v31 }
 0x47d   :  { %v7342_v0 = vmax.f32 %v7340_v57, %v7341_v16  ;;  %11001 = vmatmul.msk.bf16.gmra.mxu2 %vm4626_vm11, %v13697_v3  ;;  %v6873_v46 = vadd.f32 %v5699_v36, %v13615_v8  ;;  %v7356_v29 = vmax.f32 %v7256_v14, %v7355_v6  ;;  %v12193_v57 = vld [vmem:[#allocation10 + $0xb0] sm:$0xf0] }
 0x47e   :  { %11002 = vmatmul.msk.bf16.gmra.mxu3 %vm4626_vm11, %v13700_v19  ;;  %v7344_v37 = vmax.f32 %v7254_v61, %v7343_v41  ;;  %v7330_v39 = vmax.f32 %v7328_v9, %v7329_v59  ;;  %v7208_v17 = vadd.f32 %v13906_v32, %v6875_v4  ;;  %v11094_v61 = vor.u32 %v12193_v57, %v11093_v33  ;;  %v11285_v33 = vld [vmem:[#allocation10 + $0x228] sm:$0xf] }
 0x47f   :  { %v7421_v27 = vpack.c.bf16 %v7342_v0, %v7342_v0  ;;  %v7206_v28 = vadd.f32 %v13919_v54, %v6873_v46  ;;  %v7357_v58 = vrot.slane %v7356_v29, 2 }
 0x480   :  { %v7345_v62 = vrot.slane %v7344_v37, 2  ;;  %v5672_v52 = vpop.f32.mrf.mxu2  ;;  %v7419_v31 = vpack.c.bf16 %v7330_v39, %v7330_v39  ;;  %v7232_v34 = vmax.f32 %v7208_v17, 0.0  ;;  %v5616_v50 = vpop.f32.mrf.mxu0  ;;  %6596 = vmatpush.bf16.msra.mxu0 %v11094_v61 }
 0x481   :  { %v5701_v60 = vpop.f32.mrf.mxu3  ;;  %v7816_v53 = vunpack.c.l.b16 %v7421_v27  ;;  %v5645_v25 = vpop.f32.mrf.mxu1  ;;  %v7230_v51 = vmax.f32 %v7206_v28, 0.0  ;;  %v5673_v22 = vadd.f32 %v5672_v52, %v5643_v42  ;;  %v5617_v8 = vadd.f32 %v5616_v50, %v13902_v35  ;;  %v11081_v52 = vld [vmem:[#allocation10 + $0x90] sm:$0xf] }
 0x482   :  { %v7346_v49 = vmax.f32 %v7344_v37, %v7345_v62  ;;  %v7814_v13 = vunpack.c.l.b16 %v7419_v31  ;;  %v7358_v24 = vmax.f32 %v7356_v29, %v7357_v58  ;;  %v7259_v10 = vsel %vm7238_vm12, %v7232_v34, 0.0 }
 0x483   :  { %v13996_v43 = vsel %vm7834_vm7, %v7816_v53, %v7833_v38  ;;  %v7257_v2 = vsel %vm7238_vm12, %v7230_v51, 0.0  ;;  %v7373_v15 = vrot.slane %v7259_v10, 4  ;;  %v5702_v55 = vadd.f32 %v5701_v60, %v5673_v22  ;;  %v12190_v60 = vld [vmem:[#allocation10 + $0x98] sm:$0xf0]  ;;  %v11189_v51 = vld [vmem:[#allocation10 + $0x168] sm:$0xf] }
 0x484   :  { %v7347_v1 = vrot.slane %v7346_v49, 1  ;;  %v7844_v42 = vsel %vm7832_vm6, %v7814_v13, %v7843_v30  ;;  %v7359_v56 = vrot.slane %v7358_v24, 1  ;;  %v7361_v35 = vrot.slane %v7257_v2, 4 }
 0x485   :  { %v6878_v20 = vadd.f32 %v5617_v8, %v13567_v48  ;;  %v7374_v9 = vmax.f32 %v7259_v10, %v7373_v15  ;;  %v6876_v16 = vadd.f32 %v5702_v55, %v13621_v21  ;;  %v12217_v10 = vld [vmem:[#allocation10 + $0x170] sm:$0xf0]  ;;  %v12192_v55 = vld [vmem:[#allocation10 + $0xac] sm:$0xf] }
 0x486   :  { %v7348_v38 = vmax.f32 %v7346_v49, %v7347_v1  ;;  %v7360_v41 = vmax.f32 %v7358_v24, %v7359_v56  ;;  %v7362_v14 = vmax.f32 %v7257_v2, %v7361_v35  ;;  %v11082_v24 = vor.u32 %v12190_v60, %v11081_v52  ;;  %v12241_v15 = vld [vmem:[#allocation10 + $0x230] sm:$0xf0]  ;;  %v11083_v52 = vld [vmem:[#allocation10 + $0x9c] sm:$0xf0] }
 0x487   :  { %v7211_v36 = vadd.f32 %v13906_v32, %v6878_v20  ;;  %v7375_v0 = vrot.slane %v7374_v9, 2  ;;  %v7209_v6 = vadd.f32 %v13919_v54, %v6876_v16  ;;  %v11190_v2 = vor.u32 %v12217_v10, %v11189_v51 }
 0x488   :  { %v7422_v59 = vpack.c.bf16 %v7348_v38, %v7348_v38  ;;  %v5674_v4 = vpop.f32.mrf.mxu2  ;;  %v7424_v30 = vpack.c.bf16 %v7360_v41, %v7360_v41  ;;  %v7363_v46 = vrot.slane %v7362_v14, 2  ;;  %v5715_v27 = vpop.f32.mrf.mxu0  ;;  %6597 = vmatpush.bf16.msra.mxu0 %v11082_v24  ;;  %v11177_v41 = vld [vmem:[#allocation10 + $0x150] sm:$0xf] }
 0x489   :  { %v5703_v37 = vpop.f32.mrf.mxu3  ;;  %v7235_v39 = vmax.f32 %v7211_v36, 0.0  ;;  %v5675_v48 = vadd.f32 %v5674_v4, %v5645_v25  ;;  %v5744_v29 = vpop.f32.mrf.mxu1  ;;  %v7376_v21 = vmax.f32 %v7374_v9, %v7375_v0  ;;  %v7233_v62 = vmax.f32 %v7209_v6, 0.0  ;;  %6625 = vmatpush.bf16.msra.mxu1 %v11190_v2  ;;  %v11273_v4 = vld [vmem:[#allocation10 + $0x210] sm:$0xf] }
 0x48a   :  { %v7817_v17 = vunpack.c.l.b16 %v7422_v59  ;;  %v5745_v28 = vadd.f32 %v5744_v29, %v5715_v27  ;;  %v7819_v32 = vunpack.c.l.b16 %v7424_v30  ;;  %v7364_v31 = vmax.f32 %v7362_v14, %v7363_v46  ;;  %v12214_v14 = vld [vmem:[#allocation10 + $0x158] sm:$0xf0]  ;;  %v12189_v29 = vld [vmem:[#allocation10 + $0x94] sm:$0xf] }
 0x48b   :  { %v7262_v53 = vsel %vm7238_vm12, %v7235_v39, 0.0  ;;  %v5704_v58 = vadd.f32 %v5703_v37, %v5675_v48  ;;  %5946 = vmatmul.bf16.vlgmr.msrb.gmra.mxu0 %v13753_v18  ;;  %v7377_v50 = vrot.slane %v7376_v21, 1  ;;  %v7260_v25 = vsel %vm7238_vm12, %v7233_v62, 0.0  ;;  %v12238_v37 = vld [vmem:[#allocation10 + $0x218] sm:$0xf0] }
 0x48c   :  { %v14011_v34 = vsel %vm7834_vm7, %v7817_v17, %v7844_v42  ;;  %v7391_v49 = vrot.slane %v7262_v53, 4  ;;  %5975 = vmatmul.bf16.vlgmr.msrb.gmra.mxu1 %v13647_v44  ;;  %v7365_v22 = vrot.slane %v7364_v31, 1  ;;  %v7379_v8 = vrot.slane %v7260_v25, 4  ;;  %v11095_v42 = vld [vmem:[#allocation10 + $0xb4] sm:$0xf0] }
 0x48d   :  { %v6879_v13 = vadd.f32 %v5704_v58, %v13631_v12  ;;  %6004 = vmatmul.bf16.vlgmr.msrb.gmra.mxu2 %v13652_v47  ;;  %v7378_v57 = vmax.f32 %v7376_v21, %v7377_v50  ;;  %v7837_v44 = vsel %vm7836_vm8, %v7819_v32, %v13996_v43  ;;  %v11286_v47 = vor.u32 %v12241_v15, %v11285_v33  ;;  %v12187_v48 = vld [vmem:[#allocation10 + $0x80] sm:$0xf0]  ;;  %v11165_v58 = vld [vmem:[#allocation10 + $0x138] sm:$0xf]  ;;  %v12186_v33 = vld [vmem:[#allocation10 + $0x7c] sm:$0xf] }
 0x48e   :  { %6033 = vmatmul.bf16.vlgmr.msrb.gmra.mxu3 %v13753_v18  ;;  %v7392_v1 = vmax.f32 %v7262_v53, %v7391_v49  ;;  %v7366_v56 = vmax.f32 %v7364_v31, %v7365_v22  ;;  %v7380_v35 = vmax.f32 %v7260_v25, %v7379_v8  ;;  %v14023_v9 = vperm.slane %v13900_v26, 2  ;;  %v11069_v26 = vld [vmem:[#allocation10 + $0x78] sm:$0xf]  ;;  %v12211_v50 = vld [vmem:[#allocation10 + $0x140] sm:$0xf0] }
 0x48f   :  { %v7212_v12 = vadd.f32 %v13919_v54, %v6879_v13  ;;  %v7427_v20 = vpack.c.bf16 %v7378_v57, %v7378_v57  ;;  %v11098_v61 = vor.u32 %v12192_v55, %v11095_v42  ;;  %6654 = vmatpush.bf16.msra.mxu2 %v11286_v47  ;;  %v11178_v27 = vor.u32 %v12214_v14, %v11177_v41  ;;  %v11261_v8 = vld [vmem:[#allocation10 + $0x1f8] sm:$0xf]  ;;  %v12235_v13 = vld [vmem:[#allocation10 + $0x200] sm:$0xf0]  ;;  %v11071_v57 = vld [vmem:[#allocation10 + $0x84] sm:$0xf0] }
 0x490   :  { %v7393_v18 = vrot.slane %v7392_v1, 2  ;;  %v5773_v38 = vpop.f32.mrf.mxu2  ;;  %v7425_v36 = vpack.c.bf16 %v7366_v56, %v7366_v56  ;;  %v7381_v43 = vrot.slane %v7380_v35, 2  ;;  %v5717_v6 = vpop.f32.mrf.mxu0  ;;  %v11070_v31 = vor.u32 %v12187_v48, %v11069_v26  ;;  %v11057_v47 = vld [vmem:[#allocation10 + $0x60] sm:$0xf]  ;;  %v14808_v26 = vld [vmem:[#allocation59_spill] sm:$0xff] }
 0x491   :  { %v14025_v16 = vpop.f32.mrf.mxu3  ;;  %v7236_v59 = vmax.f32 %v7212_v12, 0.0  ;;  %v5774_v0 = vadd.f32 %v5773_v38, %v5745_v28  ;;  %v5746_v54 = vpop.f32.mrf.mxu1  ;;  %v7822_v30 = vunpack.c.l.b16 %v7427_v20  ;;  %6683 = vmatpush.bf16.msra.mxu3 %v11098_v61  ;;  %6626 = vmatpush.bf16.msra.mxu1 %v11178_v27  ;;  %v11274_v53 = vor.u32 %v12238_v37, %v11273_v4  ;;  %v12184_v20 = vld [vmem:[#allocation10 + $0x68] sm:$0xf0]  ;;  %v11249_v37 = vld [vmem:[#allocation10 + $0x1e0] sm:$0xf] }
 0x492   :  { %v7394_v46 = vmax.f32 %v7392_v1, %v7393_v18  ;;  %v5747_v39 = vadd.f32 %v5746_v54, %v5717_v6  ;;  %v7820_v17 = vunpack.c.l.b16 %v7425_v36  ;;  %v7382_v21 = vmax.f32 %v7380_v35, %v7381_v43  ;;  %6598 = vmatpush.bf16.msra.mxu0 %v11070_v31  ;;  %v12183_v27 = vld [vmem:[#allocation10 + $0x64] sm:$0xf]  ;;  %v14810_v31 = vld [vmem:[#allocation42_spill] sm:$0xff] }
 0x493   :  { %v7263_v62 = vsel %vm7238_vm12, %v7236_v59, 0.0  ;;  %v6859_v28 = vadd.f32 %v5774_v0, %v13639_v63  ;;  %v11086_v51 = vor.u32 %v12189_v29, %v11083_v52  ;;  %v11166_v22 = vor.u32 %v12211_v50, %v11165_v58  ;;  %6655 = vmatpush.bf16.msra.mxu2 %v11274_v53  ;;  %v12208_v59 = vld [vmem:[#allocation10 + $0x128] sm:$0xf0]  ;;  %v11059_v29 = vld [vmem:[#allocation10 + $0x6c] sm:$0xf0] }
 0x494   :  { %v7395_v60 = vrot.slane %v7394_v46, 1  ;;  %v7397_v32 = vrot.slane %v7263_v62, 4  ;;  %v7383_v25 = vrot.slane %v7382_v21, 1  ;;  %v11262_v63 = vor.u32 %v12235_v13, %v11261_v8  ;;  %v12181_v52 = vld [vmem:[#allocation10 + $0x50] sm:$0xf0] }
 0x495   :  { %v7192_v49 = vadd.f32 %v14023_v9, %v6859_v28  ;;  %6684 = vmatpush.bf16.msra.mxu3 %v11086_v51  ;;  %v11074_v15 = vor.u32 %v12186_v33, %v11071_v57  ;;  %v7839_v55 = vsel %vm7838_vm9, %v7822_v30, %v7837_v44  ;;  %6627 = vmatpush.bf16.msra.mxu1 %v11166_v22  ;;  %v11153_v44 = vld [vmem:[#allocation10 + $0x120] sm:$0xf]  ;;  %v12232_v30 = vld [vmem:[#allocation10 + $0x1e8] sm:$0xf0]  ;;  %v11045_v28 = vld [vmem:[#allocation10 + $0x48] sm:$0xf] }
 0x496   :  { %v7396_v24 = vmax.f32 %v7394_v46, %v7395_v60  ;;  %v7398_v10 = vmax.f32 %v7263_v62, %v7397_v32  ;;  %v7384_v1 = vmax.f32 %v7382_v21, %v7383_v25  ;;  %v7846_v18 = vsel %vm7836_vm8, %v7820_v17, %v14011_v34  ;;  %v14809_v62 = vld [vmem:[#allocation40_spill] sm:$0xff]  ;;  %v11141_v58 = vld [vmem:[#allocation10 + $0x108] sm:$0xf]  ;;  %v12205_v50 = vld [vmem:[#allocation10 + $0x110] sm:$0xf0] }
 0x497   :  { %v7216_v2 = vmax.f32 %v7192_v49, 0.0  ;;  %v11058_v43 = vor.u32 %v12184_v20, %v11057_v47  ;;  %6656 = vmatpush.bf16.msra.mxu2 %v11262_v63  ;;  %v11154_v48 = vor.u32 %v12208_v59, %v11153_v44  ;;  %v11062_v60 = vor.u32 %v12183_v27, %v11059_v29  ;;  %v11237_v25 = vld [vmem:[#allocation10 + $0x1c8] sm:$0xf]  ;;  %v12229_v8 = vld [vmem:[#allocation10 + $0x1d0] sm:$0xf0] }
 0x498   :  { %v7430_v42 = vpack.c.bf16 %v7396_v24, %v7396_v24  ;;  %v7399_v56 = vrot.slane %v7398_v10, 2  ;;  %v5775_v35 = vpop.f32.mrf.mxu2  ;;  %v7428_v38 = vpack.c.bf16 %v7384_v1, %v7384_v1  ;;  %v5720_v14 = vpop.f32.mrf.mxu0  ;;  %v11046_v53 = vor.u32 %v12181_v52, %v11045_v28  ;;  %v12180_v13 = vld [vmem:[#allocation10 + $0x4c] sm:$0xf]  ;;  %v11047_v33 = vld [vmem:[#allocation10 + $0x54] sm:$0xf0] }
 0x499   :  { %v14032_v12 = vpop.f32.mrf.mxu3  ;;  %v7243_v61 = vsel %vm7238_vm12, %v7216_v2, 0.0  ;;  %v5776_v41 = vadd.f32 %v5775_v35, %v5747_v39  ;;  %v5749_v36 = vpop.f32.mrf.mxu1  ;;  %6685 = vmatpush.bf16.msra.mxu3 %v11074_v15  ;;  %v11250_v39 = vor.u32 %v12232_v30, %v11249_v37  ;;  %6599 = vmatpush.bf16.msra.mxu0 %v11058_v43  ;;  %v11142_v22 = vor.u32 %v12205_v50, %v11141_v58  ;;  %v11129_v35 = vld [vmem:[#allocation10 + $0xf0] sm:$0xf]  ;;  %v12226_v59 = vld [vmem:[#allocation10 + $0x1b8] sm:$0xf0] }
 0x49a   :  { %v7825_v0 = vunpack.c.l.b16 %v7430_v42  ;;  %v7400_v6 = vmax.f32 %v7398_v10, %v7399_v56  ;;  %v7277_v54 = vrot.slane %v7243_v61, 4  ;;  %v5750_v4 = vadd.f32 %v5749_v36, %v5720_v14  ;;  %6628 = vmatpush.bf16.msra.mxu1 %v11154_v48  ;;  %v12178_v42 = vld [vmem:[#allocation10 + $0x38] sm:$0xf0]  ;;  %v11225_v14 = vld [vmem:[#allocation10 + $0x1b0] sm:$0xf] }
 0x49b   :  { %v7823_v46 = vunpack.c.l.b16 %v7428_v38  ;;  %v6862_v34 = vadd.f32 %v5776_v41, %v13659_v23  ;;  %5951 = vmatmul.bf16.gmra.mxu0 %v14808_v26  ;;  %6657 = vmatpush.bf16.msra.mxu2 %v11250_v39  ;;  %v11238_v63 = vor.u32 %v12229_v8, %v11237_v25  ;;  %v11050_v56 = vor.u32 %v12180_v13, %v11047_v33  ;;  %v12202_v41 = vld [vmem:[#allocation10 + $0xf8] sm:$0xf0]  ;;  %v12175_v48 = vld [vmem:[#allocation10 + $0x20] sm:$0xf0]  ;;  %v11117_v27 = vld [vmem:[#allocation10 + $0xd8] sm:$0xf] }
 0x49c   :  { %v7401_v17 = vrot.slane %v7400_v6, 1  ;;  %v7278_v21 = vmax.f32 %v7243_v61, %v7277_v54  ;;  %5980 = vmatmul.bf16.gmra.mxu1 %v14809_v62  ;;  %v14042_v32 = vsel %vm7840_vm10, %v7825_v0, %v7839_v55  ;;  %v11033_v55 = vld [vmem:[#allocation10 + $0x30] sm:$0xf]  ;;  %v12177_v0 = vld [vmem:[#allocation10 + $0x34] sm:$0xf]  ;;  %v11130_v30 = vor.u32 %v12202_v41, %v11129_v35 }
 0x49d   :  { %v7195_v23 = vadd.f32 %v14023_v9, %v6862_v34  ;;  %6009 = vmatmul.bf16.gmra.mxu2 %v14810_v31  ;;  %v7847_v24 = vsel %vm7838_vm9, %v7823_v46, %v7846_v18  ;;  %6686 = vmatpush.bf16.msra.mxu3 %v11062_v60  ;;  %v11034_v61 = vor.u32 %v12178_v42, %v11033_v55  ;;  %v14811_v54 = vld [vmem:[#allocation41_spill] sm:$0xff]  ;;  %v11035_v34 = vld [vmem:[#allocation10 + $0x3c] sm:$0xf0]  ;;  %v12199_v62 = vld [vmem:[#allocation10 + $0xe0] sm:$0xf0] }
 0x49e   :  { %6038 = vmatmul.bf16.gmra.mxu3 %v14808_v26  ;;  %v7402_v49 = vmax.f32 %v7400_v6, %v7401_v17  ;;  %v7279_v51 = vrot.slane %v7278_v21, 2  ;;  %6600 = vmatpush.bf16.msra.mxu0 %v11046_v53  ;;  %v11226_v46 = vor.u32 %v12226_v59, %v11225_v14  ;;  %v11021_v26 = vld [vmem:[#allocation10 + $0x18] sm:$0xf]  ;;  %v11038_v39 = vor.u32 %v12177_v0, %v11035_v34  ;;  %v12223_v52 = vld [vmem:[#allocation10 + $0x1a0] sm:$0xf0]  ;;  %v14812_v41 = vld [vmem:[#allocation48_spill] sm:$0xff] }
 0x49f   :  { %v7219_v10 = vmax.f32 %v7195_v23, 0.0  ;;  %6629 = vmatpush.bf16.msra.mxu1 %v11142_v22  ;;  %6658 = vmatpush.bf16.msra.mxu2 %v11238_v63  ;;  %v11213_v28 = vld [vmem:[#allocation10 + $0x198] sm:$0xf]  ;;  %v11118_v23 = vor.u32 %v12199_v62, %v11117_v27  ;;  %v12174_v53 = vld [vmem:[#allocation10 + $0x1c] sm:$0xf] }
 0x4a0   :  { %v7431_v57 = vpack.c.bf16 %v7402_v49, %v7402_v49  ;;  %v7280_v1 = vmax.f32 %v7278_v21, %v7279_v51  ;;  %v5778_v2 = vpop.f32.mrf.mxu2  ;;  %v5722_v38 = vpop.f32.mrf.mxu0  ;;  %v11022_v21 = vor.u32 %v12175_v48, %v11021_v26  ;;  %v11214_v31 = vor.u32 %v12223_v52, %v11213_v28  ;;  %v11023_v58 = vld [vmem:[#allocation10 + $0x24] sm:$0xf0]  ;;  %v11009_v13 = vld [vmem:[#allocation10] sm:$0xf]  ;;  %v12196_v42 = vld [vmem:[#allocation10 + $0xc8] sm:$0xf0] }
 0x4a1   :  { %v14048_v15 = vpop.f32.mrf.mxu3  ;;  %v7246_v47 = vsel %vm7238_vm12, %v7219_v10, 0.0  ;;  %v5779_v20 = vadd.f32 %v5778_v2, %v5750_v4  ;;  %v5751_v18 = vpop.f32.mrf.mxu1  ;;  %6687 = vmatpush.bf16.msra.mxu3 %v11050_v56  ;;  %v11026_v49 = vor.u32 %v12174_v53, %v11023_v58  ;;  %v11105_v10 = vld [vmem:[#allocation10 + $0xc0] sm:$0xf]  ;;  %v14813_v28 = vld [vmem:[#allocation52_spill] sm:$0xff] }
 0x4a2   :  { %v7826_v36 = vunpack.c.l.b16 %v7431_v57  ;;  %v7295_v43 = vrot.slane %v7246_v47, 4  ;;  %v5752_v44 = vadd.f32 %v5751_v18, %v5722_v38  ;;  %v7281_v6 = vrot.slane %v7280_v1, 1  ;;  %6601 = vmatpush.bf16.msra.mxu0 %v11034_v61  ;;  %v12220_v38 = vld [vmem:[#allocation10 + $0x188] sm:$0xf0]  ;;  %v12171_v18 = vld [vmem:[#allocation10 + $0x4] sm:$0xf] }
 0x4a3   :  { %v6865_v37 = vadd.f32 %v5779_v20, %v14811_v54  ;;  %6630 = vmatpush.bf16.msra.mxu1 %v11130_v30  ;;  %6659 = vmatpush.bf16.msra.mxu2 %v11226_v46  ;;  %v11106_v20 = vor.u32 %v12196_v42, %v11105_v10  ;;  %v14814_v42 = vld [vmem:[#allocation55_spill] sm:$0xff] }
 0x4a4   :  { %v7296_v4 = vmax.f32 %v7246_v47, %v7295_v43  ;;  %v14054_v29 = vsel %vm7840_vm10, %v7826_v36, %v7847_v24  ;;  %v7282_v50 = vmax.f32 %v7280_v1, %v7281_v6  ;;  %v12172_v24 = vld [vmem:[#allocation10 + $0x8] sm:$0xf0]  ;;  %v11201_v1 = vld [vmem:[#allocation10 + $0x180] sm:$0xf]  ;;  %v11011_v43 = vld [vmem:[#allocation10 + $0xc] sm:$0xf0] }
 0x4a5   :  { %v7198_v17 = vadd.f32 %v14023_v9, %v6865_v37  ;;  %6688 = vmatpush.bf16.msra.mxu3 %v11038_v39  ;;  %v11010_v55 = vor.u32 %v12172_v24, %v11009_v13  ;;  %v11202_v36 = vor.u32 %v12220_v38, %v11201_v1  ;;  %v11014_v0 = vor.u32 %v12171_v18, %v11011_v43 }
 0x4a6   :  { %v7297_v60 = vrot.slane %v7296_v4, 2  ;;  %6602 = vmatpush.bf16.msra.mxu0 %v11022_v21  ;;  %v7411_v61 = vpack.c.bf16 %v7282_v50, %v7282_v50 }
 0x4a7   :  { %v7222_v25 = vmax.f32 %v7198_v17, 0.0  ;;  %6631 = vmatpush.bf16.msra.mxu1 %v11118_v23  ;;  %6660 = vmatpush.bf16.msra.mxu2 %v11214_v31 }
 0x4a8   :  { %v7298_v51 = vmax.f32 %v7296_v4, %v7297_v60  ;;  %v5780_v22 = vpop.f32.mrf.mxu2  ;;  %v5725_v57 = vpop.f32.mrf.mxu0  ;;  %v7806_v46 = vunpack.c.l.b16 %v7411_v61 }
 0x4a9   :  { %v14057_v8 = vpop.f32.mrf.mxu3  ;;  %v7249_v63 = vsel %vm7238_vm12, %v7222_v25, 0.0  ;;  %v5781_v33 = vadd.f32 %v5780_v22, %v5752_v44  ;;  %v5754_v2 = vpop.f32.mrf.mxu1  ;;  %6689 = vmatpush.bf16.msra.mxu3 %v11026_v49 }
 0x4aa   :  { %v7299_v56 = vrot.slane %v7298_v51, 1  ;;  %v7313_v35 = vrot.slane %v7249_v63, 4  ;;  %v5755_v47 = vadd.f32 %v5754_v2, %v5725_v57  ;;  %6603 = vmatpush.bf16.msra.mxu0 %v11010_v55 }
 0x4ab   :  { %v6868_v14 = vadd.f32 %v5781_v33, %v14812_v41  ;;  %5956 = vmatmul.bf16.gmra.mxu0 %v13799_v40  ;;  %6632 = vmatpush.bf16.msra.mxu1 %v11106_v20  ;;  %v14818_v41 = vld [vmem:[#allocation25_spill] sm:$0xff] }
 0x4ac   :  { %v7300_v44 = vmax.f32 %v7298_v51, %v7299_v56  ;;  %v7314_v59 = vmax.f32 %v7249_v63, %v7313_v35  ;;  %5985 = vmatmul.bf16.gmra.mxu1 %v13706_v11  ;;  %6661 = vmatpush.bf16.msra.mxu2 %v11202_v36  ;;  %v14815_v56 = vld [vmem:[#allocation24_spill] sm:$0xff] }
 0x4ad   :  { %v7201_v6 = vadd.f32 %v14023_v9, %v6868_v14  ;;  %6014 = vmatmul.bf16.gmra.mxu2 %v13716_v45  ;;  %6690 = vmatpush.bf16.msra.mxu3 %v11014_v0  ;;  %v14816_v35 = vshrl.u32 %v14815_v56, 16  ;;  %v14817_v18 = vshll.u32 %v14815_v56, 16  ;;  %v14819_v14 = vshrl.u32 %v14818_v41, 16  ;;  %v14821_v0 = vld [vmem:[#allocation26_spill] sm:$0xff] }
 0x4ae   :  { %6043 = vmatmul.bf16.gmra.mxu3 %v13799_v40  ;;  %v7414_v54 = vpack.c.bf16 %v7300_v44, %v7300_v44  ;;  %v7315_v37 = vrot.slane %v7314_v59, 2  ;;  %v14820_v44 = vshll.u32 %v14818_v41, 16 }
 0x4af   :  { %v7225_v30 = vmax.f32 %v7201_v6, 0.0  ;;  %v6056_v61 = vrot.slane %v14817_v18, 2  ;;  %v6058_v36 = vrot.slane %v14819_v14, 1  ;;  %v14822_v6 = vshrl.u32 %v14821_v0, 16 }
 0x4b0   :  { %v7809_v34 = vunpack.c.l.b16 %v7414_v54  ;;  %v7316_v4 = vmax.f32 %v7314_v59, %v7315_v37  ;;  %v5783_v26 = vpop.f32.mrf.mxu2  ;;  %v5727_v27 = vpop.f32.mrf.mxu0  ;;  %v6059_v59 = vrot.slane %v14820_v44, 2  ;;  %v14823_v54 = vshll.u32 %v14821_v0, 16 }
 0x4b1   :  { %v14067_v48 = vpop.f32.mrf.mxu3  ;;  %v7252_v11 = vsel %vm7238_vm12, %v7225_v30, 0.0  ;;  %v5784_v39 = vadd.f32 %v5783_v26, %v5755_v47  ;;  %v5756_v45 = vpop.f32.mrf.mxu1  ;;  %v14084_v47 = vrot.slane %v14816_v35, 1  ;;  %v14833_v35 = vld [vmem:[#allocation56_spill] sm:$0xff] }
 0x4b2   :  { %v7849_v40 = vsel %vm7828_vm4, %v7809_v34, %v7806_v46  ;;  %v7317_v17 = vrot.slane %v7316_v4, 1  ;;  %v7331_v21 = vrot.slane %v7252_v11, 4  ;;  %v5757_v62 = vadd.f32 %v5756_v45, %v5727_v27  ;;  %v14824_v34 = vld [vmem:[#allocation27_spill] sm:$0xff]  ;;  %v14827_v27 = vld [vmem:[#allocation28_spill] sm:$0xff] }
 0x4b3   :  { %v6871_v52 = vadd.f32 %v5784_v39, %v14813_v28  ;;  %v6063_v37 = vrot.slane %v14823_v54, 2  ;;  %v14122_v14 = vor.u32 %v6059_v59, %v6058_v36  ;;  %v12210_v54 = vld [vmem:[#allocation10 + $0x13c] sm:$0xf] }
 0x4b4   :  { %v7318_v60 = vmax.f32 %v7316_v4, %v7317_v17  ;;  %v7332_v23 = vmax.f32 %v7252_v11, %v7331_v21  ;;  %v14825_v4 = vshrl.u32 %v14824_v34, 16  ;;  %v14826_v11 = vshll.u32 %v14824_v34, 16  ;;  %v14830_v21 = vld [vmem:[#allocation29_spill] sm:$0xff] }
 0x4b5   :  { %v7204_v31 = vadd.f32 %v14023_v9, %v6871_v52 }
 0x4b6   :  { %v7417_v53 = vpack.c.bf16 %v7318_v60, %v7318_v60  ;;  %v7333_v58 = vrot.slane %v7332_v23, 2  ;;  %v6065_v26 = vrot.slane %v14825_v4, 1 }
 0x4b7   :  { %v7228_v50 = vmax.f32 %v7204_v31, 0.0 }
 0x4b8   :  { %v7812_v25 = vunpack.c.l.b16 %v7417_v53  ;;  %v7334_v49 = vmax.f32 %v7332_v23, %v7333_v58  ;;  %v5785_v51 = vpop.f32.mrf.mxu2  ;;  %v5730_v10 = vpop.f32.mrf.mxu0  ;;  %v12216_v53 = vld [vmem:[#allocation10 + $0x16c] sm:$0xf]  ;;  %v11191_v58 = vld [vmem:[#allocation10 + $0x174] sm:$0xf0] }
 0x4b9   :  { %v14074_v22 = vpop.f32.mrf.mxu3  ;;  %v7255_v13 = vsel %vm7238_vm12, %v7228_v50, 0.0  ;;  %v5786_v24 = vadd.f32 %v5785_v51, %v5757_v62  ;;  %v5759_v63 = vpop.f32.mrf.mxu1  ;;  %v14831_v62 = vshrl.u32 %v14830_v21, 16  ;;  %v12213_v50 = vld [vmem:[#allocation10 + $0x154] sm:$0xf] }
 0x4ba   :  { %v7850_v33 = vsel %vm7830_vm5, %v7812_v25, %v7849_v40  ;;  %v7335_v57 = vrot.slane %v7334_v49, 1  ;;  %v7349_v2 = vrot.slane %v7255_v13, 4  ;;  %v5760_v55 = vadd.f32 %v5759_v63, %v5730_v10 }
 0x4bb   :  { %v6874_v1 = vadd.f32 %v5786_v24, %v14814_v42  ;;  %11003 = vmatmul.msk.bf16.gmra.mxu0 %vm4626_vm11, %v13793_v7  ;;  %v14829_v40 = vshll.u32 %v14827_v27, 16  ;;  %v6072_v28 = vrot.slane %v14831_v62, 1  ;;  %v14832_v24 = vshll.u32 %v14830_v21, 16 }
 0x4bc   :  { %v7336_v20 = vmax.f32 %v7334_v49, %v7335_v57  ;;  %v7350_v38 = vmax.f32 %v7255_v13, %v7349_v2  ;;  %11004 = vmatmul.msk.bf16.gmra.mxu1 %vm4626_vm11, %v13697_v3  ;;  %v6062_v3 = vrot.slane %v14822_v6, 1  ;;  %v11194_v63 = vor.u32 %v12216_v53, %v11191_v58  ;;  %v11179_v57 = vld [vmem:[#allocation10 + $0x15c] sm:$0xf0] }
 0x4bd   :  { %v7207_v43 = vadd.f32 %v14023_v9, %v6874_v1  ;;  %11005 = vmatmul.msk.bf16.gmra.mxu2 %vm4626_vm11, %v13700_v19  ;;  %v6066_v19 = vrot.slane %v14826_v11, 2  ;;  %v6070_v17 = vrot.slane %v14829_v40, 2  ;;  %v6073_v10 = vrot.slane %v14832_v24, 2 }
 0x4be   :  { %11006 = vmatmul.msk.bf16.gmra.mxu3 %vm4626_vm11, %v13793_v7  ;;  %v7420_v30 = vpack.c.bf16 %v7336_v20, %v7336_v20  ;;  %v7351_v46 = vrot.slane %v7350_v38, 2  ;;  %v14828_v7 = vshrl.u32 %v14827_v27, 16  ;;  %6712 = vmatpush.bf16.msrb.mxu0 %v11194_v63  ;;  %v11182_v18 = vor.u32 %v12213_v50, %v11179_v57  ;;  %v11287_v63 = vld [vmem:[#allocation10 + $0x234] sm:$0xf0]  ;;  %v14838_v57 = vld [vmem:[#allocation31_spill] sm:$0xff] }
 0x4bf   :  { %v7231_v39 = vmax.f32 %v7207_v43, 0.0  ;;  %v6064_v43 = vor.u32 %v6063_v37, %v6062_v3  ;;  %v14125_v0 = vor.u32 %v6066_v19, %v6065_v26  ;;  %v14127_v6 = vor.u32 %v6073_v10, %v6072_v28  ;;  %v12207_v3 = vld [vmem:[#allocation10 + $0x124] sm:$0xf]  ;;  %v11155_v37 = vld [vmem:[#allocation10 + $0x12c] sm:$0xf0] }
 0x4c0   :  { %v6069_v45 = vrot.slane %v14828_v7, 1  ;;  %v7815_v52 = vunpack.c.l.b16 %v7420_v30  ;;  %v7352_v60 = vmax.f32 %v7350_v38, %v7351_v46  ;;  %v5788_v23 = vpop.f32.mrf.mxu2  ;;  %v5732_v51 = vpop.f32.mrf.mxu0  ;;  %v6057_v38 = vor.u32 %v6056_v61, %v14084_v47  ;;  %v11167_v30 = vld [vmem:[#allocation10 + $0x144] sm:$0xf0]  ;;  %v12240_v10 = vld [vmem:[#allocation10 + $0x22c] sm:$0xf] }
 0x4c1   :  { %v14113_v31 = vpop.f32.mrf.mxu3  ;;  %v7258_v25 = vsel %vm7238_vm12, %v7231_v39, 0.0  ;;  %v5789_v49 = vadd.f32 %v5788_v23, %v5760_v55  ;;  %v5761_v13 = vpop.f32.mrf.mxu1  ;;  %v11170_v59 = vor.u32 %v12210_v54, %v11167_v30  ;;  %v14835_v23 = vld [vmem:[#allocation30_spill] sm:$0xff]  ;;  %v11158_v50 = vor.u32 %v12207_v3, %v11155_v37  ;;  %v14842_v54 = vld [vmem:[#allocation32_spill] sm:$0xff] }
 0x4c2   :  { %v7851_v2 = vsel %vm7832_vm6, %v7815_v52, %v7850_v33  ;;  %v7353_v42 = vrot.slane %v7352_v60, 1  ;;  %v7367_v1 = vrot.slane %v7258_v25, 4  ;;  %v5762_v56 = vadd.f32 %v5761_v13, %v5732_v51  ;;  %6713 = vmatpush.bf16.msrb.mxu0 %v11182_v18  ;;  %v14834_v52 = vld [vmem:[#allocation57_spill] sm:$0xff] }
 0x4c3   :  { %v6877_v20 = vadd.f32 %v5789_v49, %v14833_v35  ;;  %v6071_v33 = vor.u32 %v6070_v17, %v6069_v45  ;;  %v14133_v36 = vsel %vm6054_vm13, %v6057_v38, %v14122_v14  ;;  %v14139_v45 = vsel %vm6054_vm13, %v6064_v43, %v14125_v0  ;;  %v11101_v35 = vld [vmem:[#allocation10 + $0xb0] sm:$0xf]  ;;  %v12204_v43 = vld [vmem:[#allocation10 + $0x10c] sm:$0xf] }
 0x4c4   :  { %v7354_v55 = vmax.f32 %v7352_v60, %v7353_v42  ;;  %v7368_v41 = vmax.f32 %v7258_v25, %v7367_v1  ;;  %v14836_v53 = vshrl.u32 %v14835_v23, 16  ;;  %v14837_v13 = vshll.u32 %v14835_v23, 16 }
 0x4c5   :  { %v7210_v44 = vadd.f32 %v14023_v9, %v6877_v20  ;;  %v14143_v40 = vsel %vm6054_vm13, %v6071_v33, %v14127_v6  ;;  %v14840_v1 = vshll.u32 %v14838_v57, 16  ;;  %v12194_v20 = vld [vmem:[#allocation10 + $0xb8] sm:$0xf0]  ;;  %v14843_v30 = vshrl.u32 %v14842_v54, 16 }
 0x4c6   :  { %v7423_v46 = vpack.c.bf16 %v7354_v55, %v7354_v55  ;;  %v7369_v34 = vrot.slane %v7368_v41, 2  ;;  %v6076_v58 = vrot.slane %v14836_v53, 1  ;;  %v6077_v24 = vrot.slane %v14837_v13, 2  ;;  %6714 = vmatpush.bf16.msrb.mxu0 %v11170_v59  ;;  %v14841_v55 = vld [vmem:[#allocation39_spill] sm:$0xff] }
 0x4c7   :  { %v7234_v4 = vmax.f32 %v7210_v44, 0.0  ;;  %v11143_v44 = vld [vmem:[#allocation10 + $0x114] sm:$0xf0]  ;;  %v11102_v37 = vor.u32 %v12194_v20, %v11101_v35 }
 0x4c8   :  { %v7818_v47 = vunpack.c.l.b16 %v7423_v46  ;;  %v7370_v61 = vmax.f32 %v7368_v41, %v7369_v34  ;;  %v5790_v11 = vpop.f32.mrf.mxu2  ;;  %v5831_v27 = vpop.f32.mrf.mxu0  ;;  %v6084_v46 = vrot.slane %v14843_v30, 1  ;;  %v11146_v34 = vor.u32 %v12204_v43, %v11143_v44  ;;  %v14845_v30 = vld [vmem:[#allocation44_spill] sm:$0xff] }
 0x4c9   :  { %v14129_v39 = vpop.f32.mrf.mxu3  ;;  %v7261_v26 = vsel %vm7238_vm12, %v7234_v4, 0.0  ;;  %v5791_v19 = vadd.f32 %v5790_v11, %v5762_v56  ;;  %v5860_v7 = vpop.f32.mrf.mxu1  ;;  %v5832_v28 = vadd.f32 %v5831_v27, %v14025_v16  ;;  %v6081_v56 = vrot.slane %v14840_v1, 2  ;;  %v11197_v4 = vld [vmem:[#allocation10 + $0x170] sm:$0xf]  ;;  %v11275_v27 = vld [vmem:[#allocation10 + $0x21c] sm:$0xf0]  ;;  %6770 = vmatpush.bf16.msrb.mxu2 %v11102_v37 }
 0x4ca   :  { %v14146_v17 = vsel %vm7834_vm7, %v7818_v47, %v7851_v2  ;;  %v7371_v21 = vrot.slane %v7370_v61, 1  ;;  %v7385_v62 = vrot.slane %v7261_v26, 4  ;;  %v14839_v2 = vshrl.u32 %v14838_v57, 16  ;;  %v12218_v47 = vld [vmem:[#allocation10 + $0x178] sm:$0xf0]  ;;  %6715 = vmatpush.bf16.msrb.mxu0 %v11158_v50 }
 0x4cb   :  { %v6880_v60 = vadd.f32 %v5791_v19, %v14834_v52  ;;  %6604 = vmatmul.bf16.vlgmr.msra.gmra.mxu0 %v14133_v36  ;;  %v5861_v51 = vadd.f32 %v5860_v7, %v5832_v28  ;;  %v12237_v19 = vld [vmem:[#allocation10 + $0x214] sm:$0xf]  ;;  %v11089_v7 = vld [vmem:[#allocation10 + $0x98] sm:$0xf]  ;;  %v12231_v37 = vld [vmem:[#allocation10 + $0x1e4] sm:$0xf] }
 0x4cc   :  { %v7372_v25 = vmax.f32 %v7370_v61, %v7371_v21  ;;  %v7386_v49 = vmax.f32 %v7261_v26, %v7385_v62  ;;  %6633 = vmatmul.bf16.vlgmr.msra.gmra.mxu1 %v14139_v45  ;;  %v6080_v42 = vrot.slane %v14839_v2, 1  ;;  %v11198_v26 = vor.u32 %v12218_v47, %v11197_v4  ;;  %v11131_v4 = vld [vmem:[#allocation10 + $0xfc] sm:$0xf0] }
 0x4cd   :  { %v7213_v16 = vadd.f32 %v14023_v9, %v6880_v60  ;;  %6662 = vmatmul.bf16.vlgmr.msra.gmra.mxu2 %v14143_v40  ;;  %v14164_v41 = vadd.f32 %v5861_v51, %v14841_v55  ;;  %v11290_v9 = vor.u32 %v12240_v10, %v11287_v63  ;;  %v14844_v60 = vshll.u32 %v14842_v54, 16  ;;  %v12215_v63 = vld [vmem:[#allocation10 + $0x160] sm:$0xf0]  ;;  %v11077_v55 = vld [vmem:[#allocation10 + $0x80] sm:$0xf] }
 0x4ce   :  { %6691 = vmatmul.bf16.vlgmr.msra.gmra.mxu3 %v14133_v36  ;;  %v7426_v38 = vpack.c.bf16 %v7372_v25, %v7372_v25  ;;  %v7387_v18 = vrot.slane %v7386_v49, 2  ;;  %v11278_v53 = vor.u32 %v12237_v19, %v11275_v27  ;;  %v12191_v25 = vld [vmem:[#allocation10 + $0xa0] sm:$0xf0]  ;;  %6716 = vmatpush.bf16.msrb.mxu0 %v11146_v34  ;;  %v14179_v43 = vor.u32 %v6081_v56, %v6080_v42  ;;  %v12201_v34 = vld [vmem:[#allocation10 + $0xf4] sm:$0xf] }
 0x4cf   :  { %v7237_v33 = vmax.f32 %v7213_v16, 0.0  ;;  %6741 = vmatpush.bf16.msrb.mxu1 %v11290_v9  ;;  %v6085_v23 = vrot.slane %v14844_v60, 2  ;;  %6799 = vmatpush.bf16.msrb.mxu3 %v11198_v26  ;;  %v11090_v10 = vor.u32 %v12191_v25, %v11089_v7  ;;  %v14175_v16 = vor.u32 %v6077_v24, %v6076_v58  ;;  %v12188_v9 = vld [vmem:[#allocation10 + $0x88] sm:$0xf0]  ;;  %v11173_v58 = vld [vmem:[#allocation10 + $0x140] sm:$0xf] }
 0x4d0   :  { %v7821_v61 = vunpack.c.l.b16 %v7426_v38  ;;  %v7388_v11 = vmax.f32 %v7386_v49, %v7387_v18  ;;  %v5889_v59 = vpop.f32.mrf.mxu2  ;;  %v5833_v28 = vpop.f32.mrf.mxu0  ;;  %v11185_v49 = vld [vmem:[#allocation10 + $0x158] sm:$0xf]  ;;  %v12234_v38 = vld [vmem:[#allocation10 + $0x1fc] sm:$0xf]  ;;  %v11263_v18 = vld [vmem:[#allocation10 + $0x204] sm:$0xf0]  ;;  %v11078_v47 = vor.u32 %v12188_v9, %v11077_v55 }
 0x4d1   :  { %v5918_v3 = vpop.f32.mrf.mxu3  ;;  %v7264_v21 = vsel %vm7238_vm12, %v7237_v33, 0.0  ;;  %v5862_v52 = vpop.f32.mrf.mxu1  ;;  %v5834_v13 = vadd.f32 %v5833_v28, %v14032_v12  ;;  %v11186_v57 = vor.u32 %v12215_v63, %v11185_v49  ;;  %v14181_v12 = vor.u32 %v6085_v23, %v6084_v46  ;;  %v12212_v24 = vld [vmem:[#allocation10 + $0x148] sm:$0xf0]  ;;  %6771 = vmatpush.bf16.msrb.mxu2 %v11090_v10  ;;  %v11251_v26 = vld [vmem:[#allocation10 + $0x1ec] sm:$0xf0] }
 0x4d2   :  { %v14170_v62 = vadd.f32 %v5918_v3, %v5889_v59  ;;  %v7389_v50 = vrot.slane %v7388_v11, 1  ;;  %v7403_v51 = vrot.slane %v7264_v21, 4  ;;  %v7853_v2 = vsel %vm7836_vm8, %v7821_v61, %v14146_v17  ;;  %v11065_v19 = vld [vmem:[#allocation10 + $0x68] sm:$0xf]  ;;  %v12209_v23 = vld [vmem:[#allocation10 + $0x130] sm:$0xf0] }
 0x4d3   :  { %v5863_v20 = vadd.f32 %v5862_v52, %v5834_v13  ;;  %6742 = vmatpush.bf16.msrb.mxu1 %v11278_v53  ;;  %v11266_v44 = vor.u32 %v12234_v38, %v11263_v18  ;;  %6800 = vmatpush.bf16.msrb.mxu3 %v11186_v57  ;;  %v11134_v61 = vor.u32 %v12201_v34, %v11131_v4  ;;  %v11161_v60 = vld [vmem:[#allocation10 + $0x128] sm:$0xf]  ;;  %v11239_v63 = vld [vmem:[#allocation10 + $0x1d4] sm:$0xf0]  ;;  %v14849_v38 = vld [vmem:[#allocation34_spill] sm:$0xff] }
 0x4d4   :  { %v7390_v1 = vmax.f32 %v7388_v11, %v7389_v50  ;;  %v7404_v35 = vmax.f32 %v7264_v21, %v7403_v51  ;;  %v11174_v11 = vor.u32 %v12212_v24, %v11173_v58  ;;  %v14189_v3 = vsel %vm6054_vm13, %v14122_v14, %v14175_v16  ;;  %v12185_v14 = vld [vmem:[#allocation10 + $0x70] sm:$0xf0]  ;;  %v11053_v9 = vld [vmem:[#allocation10 + $0x50] sm:$0xf]  ;;  %v14852_v24 = vld [vmem:[#allocation50_spill] sm:$0xff] }
 0x4d5   :  { %v14184_v17 = vadd.f32 %v5863_v20, %v14845_v30  ;;  %v14196_v28 = vsel %vm6054_vm13, %v14125_v0, %v14179_v43  ;;  %v14201_v52 = vsel %vm6054_vm13, %v14127_v6, %v14181_v12  ;;  %6717 = vmatpush.bf16.msrb.mxu0 %v11134_v61  ;;  %6772 = vmatpush.bf16.msrb.mxu2 %v11078_v47  ;;  %v12228_v6 = vld [vmem:[#allocation10 + $0x1cc] sm:$0xf]  ;;  %v14850_v18 = vshrl.u32 %v14849_v38, 16  ;;  %v11119_v30 = vld [vmem:[#allocation10 + $0xe4] sm:$0xf0] }
 0x4d6   :  { %v7429_v33 = vpack.c.bf16 %v7390_v1, %v7390_v1  ;;  %v7405_v54 = vrot.slane %v7404_v35, 2  ;;  %v11254_v49 = vor.u32 %v12231_v37, %v11251_v26  ;;  %v11066_v50 = vor.u32 %v12185_v14, %v11065_v19  ;;  %v12182_v4 = vld [vmem:[#allocation10 + $0x58] sm:$0xf0]  ;;  %v14853_v47 = vld [vmem:[#allocation35_spill] sm:$0xff]  ;;  %v11149_v37 = vld [vmem:[#allocation10 + $0x110] sm:$0xf] }
 0x4d7   :  { %6743 = vmatpush.bf16.msrb.mxu1 %v11266_v44  ;;  %6801 = vmatpush.bf16.msrb.mxu3 %v11174_v11  ;;  %v11162_v0 = vor.u32 %v12209_v23, %v11161_v60  ;;  %v6092_v55 = vrot.slane %v14850_v18, 1  ;;  %v11242_v34 = vor.u32 %v12228_v6, %v11239_v63  ;;  %v14854_v61 = vshrl.u32 %v14853_v47, 16  ;;  %v12206_v26 = vld [vmem:[#allocation10 + $0x118] sm:$0xf0]  ;;  %v12225_v60 = vld [vmem:[#allocation10 + $0x1b4] sm:$0xf] }
 0x4d8   :  { %v7824_v42 = vunpack.c.l.b16 %v7429_v33  ;;  %v7406_v56 = vmax.f32 %v7404_v35, %v7405_v54  ;;  %v5891_v46 = vpop.f32.mrf.mxu2  ;;  %v5836_v7 = vpop.f32.mrf.mxu0  ;;  %v12198_v54 = vld [vmem:[#allocation10 + $0xdc] sm:$0xf]  ;;  %v11150_v14 = vor.u32 %v12206_v26, %v11149_v37  ;;  %v11227_v23 = vld [vmem:[#allocation10 + $0x1bc] sm:$0xf0]  ;;  %v12203_v6 = vld [vmem:[#allocation10 + $0x100] sm:$0xf0] }
 0x4d9   :  { %v5920_v59 = vpop.f32.mrf.mxu3  ;;  %v5865_v21 = vpop.f32.mrf.mxu1  ;;  %v5837_v25 = vadd.f32 %v5836_v7, %v14048_v15  ;;  %v14846_v15 = vld [vmem:[#allocation33_spill] sm:$0xff]  ;;  %6773 = vmatpush.bf16.msrb.mxu2 %v11066_v50  ;;  %v6096_v11 = vrot.slane %v14854_v61, 1  ;;  %v11230_v63 = vor.u32 %v12225_v60, %v11227_v23  ;;  %v11107_v61 = vld [vmem:[#allocation10 + $0xcc] sm:$0xf0]  ;;  %v11017_v37 = vld [vmem:[#allocation10 + $0x8] sm:$0xf] }
 0x4da   :  { %v14191_v27 = vadd.f32 %v5920_v59, %v5891_v46  ;;  %v7407_v53 = vrot.slane %v7406_v56, 1  ;;  %v7854_v51 = vsel %vm7838_vm9, %v7824_v42, %v7853_v2  ;;  %v14847_v57 = vshrl.u32 %v14846_v15, 16  ;;  %v11113_v60 = vld [vmem:[#allocation10 + $0xc8] sm:$0xf]  ;;  %v12197_v23 = vld [vmem:[#allocation10 + $0xd0] sm:$0xf0] }
 0x4db   :  { %6609 = vmatmul.bf16.gmra.mxu0 %v14189_v3  ;;  %v5866_v10 = vadd.f32 %v5865_v21, %v5837_v25  ;;  %v14848_v35 = vshll.u32 %v14846_v15, 16  ;;  %v14851_v2 = vshll.u32 %v14849_v38, 16  ;;  %6744 = vmatpush.bf16.msrb.mxu1 %v11254_v49  ;;  %v14855_v42 = vshll.u32 %v14853_v47, 16 }
 0x4dc   :  { %v7408_v13 = vmax.f32 %v7406_v56, %v7407_v53  ;;  %6638 = vmatmul.bf16.gmra.mxu1 %v14196_v28  ;;  %v6088_v1 = vrot.slane %v14847_v57, 1  ;;  %6802 = vmatpush.bf16.msrb.mxu3 %v11162_v0  ;;  %v11122_v46 = vor.u32 %v12198_v54, %v11119_v30  ;;  %v11054_v59 = vor.u32 %v12182_v4, %v11053_v9  ;;  %v11041_v53 = vld [vmem:[#allocation10 + $0x38] sm:$0xf]  ;;  %v11215_v9 = vld [vmem:[#allocation10 + $0x1a4] sm:$0xf0] }
 0x4dd   :  { %6667 = vmatmul.bf16.gmra.mxu2 %v14201_v52  ;;  %v6089_v20 = vrot.slane %v14848_v35, 2  ;;  %v6093_v44 = vrot.slane %v14851_v2, 2  ;;  %v14218_v33 = vadd.f32 %v5866_v10, %v14852_v24  ;;  %v6097_v56 = vrot.slane %v14855_v42, 2  ;;  %v11137_v10 = vld [vmem:[#allocation10 + $0xf8] sm:$0xf]  ;;  %v14856_v4 = vld [vmem:[#allocation43_spill] sm:$0xff] }
 0x4de   :  { %6696 = vmatmul.bf16.gmra.mxu3 %v14189_v3  ;;  %v7432_v58 = vpack.c.bf16 %v7408_v13, %v7408_v13  ;;  %6718 = vmatpush.bf16.msrb.mxu0 %v11122_v46  ;;  %v12179_v13 = vld [vmem:[#allocation10 + $0x40] sm:$0xf0]  ;;  %v11138_v57 = vor.u32 %v12203_v6, %v11137_v10  ;;  %v12222_v2 = vld [vmem:[#allocation10 + $0x19c] sm:$0xf]  ;;  %v11125_v30 = vld [vmem:[#allocation10 + $0xe0] sm:$0xf] }
 0x4df   :  { %6745 = vmatpush.bf16.msrb.mxu1 %v11242_v34  ;;  %6774 = vmatpush.bf16.msrb.mxu2 %v11054_v59  ;;  %v11042_v15 = vor.u32 %v12179_v13, %v11041_v53  ;;  %v14230_v18 = vor.u32 %v6089_v20, %v6088_v1  ;;  %v14232_v24 = vor.u32 %v6093_v44, %v6092_v55  ;;  %v12200_v34 = vld [vmem:[#allocation10 + $0xe8] sm:$0xf0]  ;;  %v12242_v10 = vld [vmem:[#allocation10 + $0x238] sm:$0xf0]  ;;  %v14857_v6 = vld [vmem:[#allocation45_spill] sm:$0xff] }
 0x4e0   :  { %v7827_v19 = vunpack.c.l.b16 %v7432_v58  ;;  %v5894_v7 = vpop.f32.mrf.mxu2  ;;  %v5838_v49 = vpop.f32.mrf.mxu0  ;;  %6803 = vmatpush.bf16.msrb.mxu3 %v11150_v14  ;;  %v11029_v58 = vld [vmem:[#allocation10 + $0x20] sm:$0xf]  ;;  %v14234_v54 = vor.u32 %v6097_v56, %v6096_v11  ;;  %v11218_v42 = vor.u32 %v12222_v2, %v11215_v9  ;;  %v11126_v46 = vor.u32 %v12200_v34, %v11125_v30  ;;  %v12219_v11 = vld [vmem:[#allocation10 + $0x184] sm:$0xf]  ;;  %v11203_v56 = vld [vmem:[#allocation10 + $0x18c] sm:$0xf0] }
 0x4e1   :  { %v5923_v21 = vpop.f32.mrf.mxu3  ;;  %v5867_v50 = vpop.f32.mrf.mxu1  ;;  %v5839_v0 = vadd.f32 %v5838_v49, %v14057_v8  ;;  %v12176_v8 = vld [vmem:[#allocation10 + $0x28] sm:$0xf0]  ;;  %v14242_v44 = vsel %vm6054_vm13, %v14175_v16, %v14230_v18  ;;  %v12173_v16 = vld [vmem:[#allocation10 + $0x10] sm:$0xf0]  ;;  %v11206_v49 = vor.u32 %v12219_v11, %v11203_v56  ;;  %v12239_v30 = vld [vmem:[#allocation10 + $0x220] sm:$0xf0] }
 0x4e2   :  { %v14224_v25 = vadd.f32 %v5923_v21, %v5894_v7  ;;  %v14228_v35 = vsel %vm7840_vm10, %v7827_v19, %v7854_v51  ;;  %v12195_v51 = vld [vmem:[#allocation10 + $0xc4] sm:$0xf]  ;;  %v11030_v1 = vor.u32 %v12176_v8, %v11029_v58  ;;  %v14249_v21 = vsel %vm6054_vm13, %v14179_v43, %v14232_v24  ;;  %v11281_v8 = vld [vmem:[#allocation10 + $0x218] sm:$0xf]  ;;  %v14858_v34 = vld [vmem:[#allocation46_spill] sm:$0xff] }
 0x4e3   :  { %v5868_v38 = vadd.f32 %v5867_v50, %v5839_v0  ;;  %6746 = vmatpush.bf16.msrb.mxu1 %v11230_v63  ;;  %6775 = vmatpush.bf16.msrb.mxu2 %v11042_v15  ;;  %v11110_v20 = vor.u32 %v12195_v51, %v11107_v61  ;;  %v14254_v14 = vsel %vm6054_vm13, %v14181_v12, %v14234_v54  ;;  %v11293_v12 = vld [vmem:[#allocation10 + $0x230] sm:$0xf]  ;;  %v14282_v11 = vsel %vm6112_vm14, %v14234_v54, 0  ;;  %v12274_v54 = vld [vmem:[#allocation14 + $0x38] sm:$0xff] }
 0x4e4   :  { %6804 = vmatpush.bf16.msrb.mxu3 %v11138_v57  ;;  %v11018_v50 = vor.u32 %v12173_v16, %v11017_v37  ;;  %v11114_v43 = vor.u32 %v12197_v23, %v11113_v60  ;;  %v11282_v51 = vor.u32 %v12239_v30, %v11281_v8  ;;  %v12236_v37 = vld [vmem:[#allocation10 + $0x208] sm:$0xf0]  ;;  %v12282_v60 = vld [vmem:[#allocation14 + $0x78] sm:$0xff] }
 0x4e5   :  { %v14237_v47 = vadd.f32 %v5868_v38, %v14856_v4  ;;  %6719 = vmatpush.bf16.msrb.mxu0 %v11110_v20  ;;  %v12290_v23 = vld [vmem:[#allocation14 + $0xb8] sm:$0xff]  ;;  %v12280_v8 = vld [vmem:[#allocation14 + $0x68] sm:$0xff] }
 0x4e6   :  { %v12288_v30 = vld [vmem:[#allocation14 + $0xa8] sm:$0xff] }
 0x4e7   :  { %6747 = vmatpush.bf16.msrb.mxu1 %v11218_v42  ;;  %6776 = vmatpush.bf16.msrb.mxu2 %v11030_v1  ;;  %v14273_v1 = vsel %vm6112_vm14, %v14230_v18, 0  ;;  %v11269_v18 = vld [vmem:[#allocation10 + $0x200] sm:$0xf] }
 0x4e8   :  { %v5896_v59 = vpop.f32.mrf.mxu2  ;;  %v5841_v19 = vpop.f32.mrf.mxu0  ;;  %6805 = vmatpush.bf16.msrb.mxu3 %v11126_v46 }
 0x4e9   :  { %v5925_v55 = vpop.f32.mrf.mxu3  ;;  %v5870_v7 = vpop.f32.mrf.mxu1  ;;  %v5842_v53 = vadd.f32 %v5841_v19, %v14067_v48  ;;  %v11294_v48 = vor.u32 %v12242_v10, %v11293_v12  ;;  %v14859_v19 = vld [vmem:[#allocation47_spill] sm:$0xff]  ;;  %v12273_v12 = vld [vmem:[#allocation14 + $0x30] sm:$0xff] }
 0x4ea   :  { %v14244_v26 = vadd.f32 %v5925_v55, %v5896_v59  ;;  %v14278_v59 = vsel %vm6112_vm14, %v14232_v24, 0  ;;  %v11270_v24 = vor.u32 %v12236_v37, %v11269_v18  ;;  %v12281_v10 = vld [vmem:[#allocation14 + $0x70] sm:$0xff]  ;;  %v12287_v18 = vld [vmem:[#allocation14 + $0xa0] sm:$0xff]  ;;  %v11245_v37 = vld [vmem:[#allocation10 + $0x1d0] sm:$0xf] }
 0x4eb   :  { %6614 = vmatmul.bf16.gmra.mxu0 %v14242_v44  ;;  %v5871_v13 = vadd.f32 %v5870_v7, %v5842_v53  ;;  %6748 = vmatpush.bf16.msrb.mxu1 %v11206_v49 }
 0x4ec   :  { %6643 = vmatmul.bf16.gmra.mxu1 %v14249_v21  ;;  %6777 = vmatpush.bf16.msrb.mxu2 %v11018_v50 }
 0x4ed   :  { %6672 = vmatmul.bf16.gmra.mxu2 %v14254_v14  ;;  %v14262_v0 = vadd.f32 %v5871_v13, %v14857_v6  ;;  %6806 = vmatpush.bf16.msrb.mxu3 %v11114_v43  ;;  %v12289_v6 = vld [vmem:[#allocation14 + $0xb0] sm:$0xff] }
 0x4ee   :  { %6701 = vmatmul.bf16.gmra.mxu3 %v14242_v44  ;;  %6828 = vmatpush.bf16.msra.mxu0 %v11294_v48  ;;  %v11257_v48 = vld [vmem:[#allocation10 + $0x1e8] sm:$0xf] }
 0x4ef   :  { %8006 = vmatpush.bf16.msra.mxu1 %v12274_v54  ;;  %v12278_v54 = vld [vmem:[#allocation14 + $0x58] sm:$0xff] }
 0x4f0   :  { %v5899_v63 = vpop.f32.mrf.mxu2  ;;  %v5843_v38 = vpop.f32.mrf.mxu0  ;;  %8019 = vmatpush.bf16.msra.mxu2 %v12282_v60  ;;  %v12286_v60 = vld [vmem:[#allocation14 + $0x98] sm:$0xff] }
 0x4f1   :  { %v5928_v15 = vpop.f32.mrf.mxu3  ;;  %v5872_v2 = vpop.f32.mrf.mxu1  ;;  %v5844_v9 = vadd.f32 %v5843_v38, %v14074_v22  ;;  %8032 = vmatpush.bf16.msra.mxu3 %v12290_v23 }
 0x4f2   :  { %v14264_v57 = vadd.f32 %v5928_v15, %v5899_v63  ;;  %6829 = vmatpush.bf16.msra.mxu0 %v11282_v51  ;;  %v12233_v63 = vld [vmem:[#allocation10 + $0x1f0] sm:$0xf0]  ;;  %v14860_v15 = vld [vmem:[#allocation58_spill] sm:$0xff] }
 0x4f3   :  { %v5873_v58 = vadd.f32 %v5872_v2, %v5844_v9  ;;  %v11258_v2 = vor.u32 %v12233_v63, %v11257_v48  ;;  %8007 = vmatpush.bf16.msra.mxu1 %v12273_v12  ;;  %v12269_v12 = vld [vmem:[#allocation14 + $0x10] sm:$0xff] }
 0x4f4   :  { %8020 = vmatpush.bf16.msra.mxu2 %v12281_v10  ;;  %v12277_v10 = vld [vmem:[#allocation14 + $0x50] sm:$0xff] }
 0x4f5   :  { %v14270_v4 = vadd.f32 %v5873_v58, %v14858_v34  ;;  %8033 = vmatpush.bf16.msra.mxu3 %v12289_v6  ;;  %v12285_v6 = vld [vmem:[#allocation14 + $0x90] sm:$0xff] }
 0x4f6   :  { %6830 = vmatpush.bf16.msra.mxu0 %v11270_v24  ;;  %v14863_v48 = vld [vmem:[#allocation65_spill] sm:$0xff] }
 0x4f8   :  { %v5901_v61 = vpop.f32.mrf.mxu2  ;;  %v5846_v46 = vpop.f32.mrf.mxu0  ;;  %8021 = vmatpush.bf16.msra.mxu2 %v12280_v8  ;;  %v12276_v8 = vld [vmem:[#allocation14 + $0x48] sm:$0xff] }
 0x4f9   :  { %v5930_v42 = vpop.f32.mrf.mxu3  ;;  %v5875_v22 = vpop.f32.mrf.mxu1  ;;  %v5847_v55 = vadd.f32 %v5846_v46, %v14113_v31  ;;  %8034 = vmatpush.bf16.msra.mxu3 %v12288_v30  ;;  %v14861_v46 = vld [vmem:[#allocation49_spill] sm:$0xff]  ;;  %v12284_v30 = vld [vmem:[#allocation14 + $0x88] sm:$0xff] }
 0x4fa   :  { %v14275_v20 = vadd.f32 %v5930_v42, %v5901_v61  ;;  %6831 = vmatpush.bf16.msra.mxu0 %v11258_v2  ;;  %v12227_v2 = vld [vmem:[#allocation10 + $0x1c0] sm:$0xf0] }
 0x4fb   :  { %6619 = vmatmul.bf16.gmra.mxu0 %v14273_v1  ;;  %v5876_v56 = vadd.f32 %v5875_v22, %v5847_v55  ;;  %v12271_v55 = vld [vmem:[#allocation14 + $0x20] sm:$0xff] }
 0x4fc   :  { %6648 = vmatmul.bf16.gmra.mxu1 %v14278_v59 }
 0x4fd   :  { %6677 = vmatmul.bf16.gmra.mxu2 %v14282_v11  ;;  %v14289_v7 = vadd.f32 %v5876_v56, %v14859_v19  ;;  %v12279_v56 = vld [vmem:[#allocation14 + $0x60] sm:$0xff]  ;;  %v12230_v19 = vld [vmem:[#allocation10 + $0x1d8] sm:$0xf0]  ;;  %8035 = vmatpush.bf16.msra.mxu3 %v12287_v18 }
 0x4fe   :  { %6706 = vmatmul.bf16.gmra.mxu3 %v14273_v1  ;;  %8022 = vmatpush.bf16.msra.mxu2 %v12279_v56  ;;  %v14864_v56 = vld [vmem:[#allocation60_spill] sm:$0xff] }
 0x500   :  { %v5904_v16 = vpop.f32.mrf.mxu2  ;;  %v5848_v49 = vpop.f32.mrf.mxu0 }
 0x501   :  { %v5933_v31 = vpop.f32.mrf.mxu3  ;;  %v5877_v50 = vpop.f32.mrf.mxu1  ;;  %v5849_v43 = vadd.f32 %v5848_v49, %v14129_v39  ;;  %v12272_v39 = vld [vmem:[#allocation14 + $0x28] sm:$0xff]  ;;  %8036 = vmatpush.bf16.msra.mxu3 %v12286_v60 }
 0x502   :  { %v14291_v53 = vadd.f32 %v5933_v31, %v5904_v16  ;;  %8008 = vmatpush.bf16.msra.mxu1 %v12272_v39  ;;  %v12270_v31 = vld [vmem:[#allocation14 + $0x18] sm:$0xff]  ;;  %8023 = vmatpush.bf16.msra.mxu2 %v12278_v54  ;;  %v12268_v39 = vld [vmem:[#allocation14 + $0x8] sm:$0xff] }
 0x503   :  { %v5878_v13 = vadd.f32 %v5877_v50, %v5849_v43  ;;  %v12250_v54 = vld [vmem:[#allocation13 + $0x38] sm:$0xff] }
 0x505   :  { %v14295_v38 = vadd.f32 %v5878_v13, %v14860_v15  ;;  %v11233_v15 = vld [vmem:[#allocation10 + $0x1b8] sm:$0xf]  ;;  %8037 = vmatpush.bf16.msra.mxu3 %v12285_v6 }
 0x506   :  { %8009 = vmatpush.bf16.msra.mxu1 %v12271_v55  ;;  %8024 = vmatpush.bf16.msra.mxu2 %v12277_v10  ;;  %v12265_v10 = vld [vmem:[#allocation13 + $0xb0] sm:$0xff] }
 0x508   :  { %v5906_v9 = vpop.f32.mrf.mxu2  ;;  %v5947_v51 = vpop.f32.mrf.mxu0 }
 0x509   :  { %v5935_v58 = vpop.f32.mrf.mxu3  ;;  %v5976_v61 = vpop.f32.mrf.mxu1  ;;  %v5948_v42 = vadd.f32 %v5947_v51, %v14170_v62  ;;  %v11246_v62 = vor.u32 %v12230_v19, %v11245_v37  ;;  %8038 = vmatpush.bf16.msra.mxu3 %v12284_v30  ;;  %v12267_v37 = vld [vmem:[#allocation14] sm:$0xff] }
 0x50a   :  { %v14297_v34 = vadd.f32 %v5935_v58, %v5906_v9  ;;  %8010 = vmatpush.bf16.msra.mxu1 %v12270_v31  ;;  %v11234_v9 = vor.u32 %v12227_v2, %v11233_v15  ;;  %8025 = vmatpush.bf16.msra.mxu2 %v12276_v8  ;;  %v12275_v19 = vld [vmem:[#allocation14 + $0x40] sm:$0xff]  ;;  %v12224_v31 = vld [vmem:[#allocation10 + $0x1a8] sm:$0xf0]  ;;  %v14866_v15 = vld [vmem:[#allocation53_spill] sm:$0xff] }
 0x50b   :  { %6720 = vmatmul.bf16.vlgmr.msrb.gmra.mxu0 %v14139_v45  ;;  %v14302_v22 = vadd.f32 %v5948_v42, %v14861_v46  ;;  %v12248_v8 = vld [vmem:[#allocation13 + $0x28] sm:$0xff] }
 0x50c   :  { %6749 = vmatmul.bf16.vlgmr.msrb.gmra.mxu1 %v14143_v40  ;;  %6832 = vmatpush.bf16.msra.mxu0 %v11246_v62  ;;  %v12283_v62 = vld [vmem:[#allocation14 + $0x80] sm:$0xff] }
 0x50d   :  { %6778 = vmatmul.bf16.vlgmr.msrb.gmra.mxu2 %v14133_v36  ;;  %8039 = vmatpush.bf16.msra.mxu3 %v12283_v62 }
 0x50e   :  { %6807 = vmatmul.bf16.vlgmr.msrb.gmra.mxu3 %v14139_v45  ;;  %v14862_v45 = vld [vmem:[#allocation51_spill] sm:$0xff]  ;;  %8011 = vmatpush.bf16.msra.mxu1 %v12269_v12 }
 0x50f   :  { %8026 = vmatpush.bf16.msra.mxu2 %v12275_v19  ;;  %v12255_v19 = vld [vmem:[#allocation13 + $0x60] sm:$0xff] }
 0x510   :  { %v6005_v24 = vpop.f32.mrf.mxu2  ;;  %v5949_v49 = vpop.f32.mrf.mxu0  ;;  %6833 = vmatpush.bf16.msra.mxu0 %v11234_v9  ;;  %v14867_v9 = vld [vmem:[#allocation69_spill] sm:$0xff] }
 0x511   :  { %v6034_v16 = vpop.f32.mrf.mxu3  ;;  %v6006_v23 = vadd.f32 %v6005_v24, %v5976_v61  ;;  %v5978_v50 = vpop.f32.mrf.mxu1  ;;  %v5950_v43 = vadd.f32 %v5949_v49, %v14191_v27  ;;  %v14865_v24 = vld [vmem:[#allocation67_spill] sm:$0xff]  ;;  %v12266_v49 = vld [vmem:[#allocation13 + $0xb8] sm:$0xff] }
 0x512   :  { %8012 = vmatpush.bf16.msra.mxu1 %v12268_v39  ;;  %8290 = vmatpush.bf16.msrb.mxu3 %v12266_v49  ;;  %v12221_v39 = vld [vmem:[#allocation10 + $0x190] sm:$0xf0]  ;;  %v12246_v49 = vld [vmem:[#allocation13 + $0x18] sm:$0xff] }
 0x513   :  { %v6035_v36 = vadd.f32 %v6034_v16, %v6006_v23  ;;  %v14309_v13 = vadd.f32 %v5950_v43, %v14862_v45  ;;  %v12258_v23 = vld [vmem:[#allocation13 + $0x78] sm:$0xff] }
 0x514   :  { %8277 = vmatpush.bf16.msrb.mxu2 %v12258_v23 }
 0x515   :  { %v14312_v63 = vadd.f32 %v6035_v36, %v14863_v48 }
 0x516   :  { %8013 = vmatpush.bf16.msra.mxu1 %v12267_v37  ;;  %8291 = vmatpush.bf16.msrb.mxu3 %v12265_v10  ;;  %v12247_v37 = vld [vmem:[#allocation13 + $0x20] sm:$0xff] }
 0x518   :  { %v6007_v27 = vpop.f32.mrf.mxu2  ;;  %v5952_v61 = vpop.f32.mrf.mxu0 }
 0x519   :  { %v6036_v58 = vpop.f32.mrf.mxu3  ;;  %v6008_v51 = vadd.f32 %v6007_v27, %v5978_v50  ;;  %v5981_v42 = vpop.f32.mrf.mxu1  ;;  %v5953_v46 = vadd.f32 %v5952_v61, %v14224_v25  ;;  %v11221_v25 = vld [vmem:[#allocation10 + $0x1a0] sm:$0xf]  ;;  %v12264_v61 = vld [vmem:[#allocation13 + $0xa8] sm:$0xff] }
 0x51a   :  { %v11222_v60 = vor.u32 %v12224_v31, %v11221_v25  ;;  %8264 = vmatpush.bf16.msrb.mxu1 %v12250_v54  ;;  %8292 = vmatpush.bf16.msrb.mxu3 %v12264_v61  ;;  %v14868_v31 = vld [vmem:[#allocation61_spill] sm:$0xff]  ;;  %v12260_v61 = vld [vmem:[#allocation13 + $0x88] sm:$0xff] }
 0x51b   :  { %v6037_v55 = vadd.f32 %v6036_v58, %v6008_v51  ;;  %6725 = vmatmul.bf16.gmra.mxu0 %v14196_v28  ;;  %v14317_v18 = vadd.f32 %v5953_v46, %v14864_v56  ;;  %v11209_v58 = vld [vmem:[#allocation10 + $0x188] sm:$0xf]  ;;  %v12256_v51 = vld [vmem:[#allocation13 + $0x68] sm:$0xff] }
 0x51c   :  { %6754 = vmatmul.bf16.gmra.mxu1 %v14201_v52  ;;  %6834 = vmatpush.bf16.msra.mxu0 %v11222_v60  ;;  %v11210_v30 = vor.u32 %v12221_v39, %v11209_v58  ;;  %v14869_v60 = vld [vmem:[#allocation71_spill] sm:$0xff] }
 0x51d   :  { %v14321_v16 = vadd.f32 %v6037_v55, %v14865_v24  ;;  %6783 = vmatmul.bf16.gmra.mxu2 %v14189_v3  ;;  %v12249_v3 = vld [vmem:[#allocation13 + $0x30] sm:$0xff]  ;;  %v12263_v24 = vld [vmem:[#allocation13 + $0xa0] sm:$0xff] }
 0x51e   :  { %6812 = vmatmul.bf16.gmra.mxu3 %v14196_v28  ;;  %v12257_v28 = vld [vmem:[#allocation13 + $0x70] sm:$0xff]  ;;  %8265 = vmatpush.bf16.msrb.mxu1 %v12249_v3 }
 0x51f   :  { %8278 = vmatpush.bf16.msrb.mxu2 %v12257_v28  ;;  %8293 = vmatpush.bf16.msrb.mxu3 %v12263_v24  ;;  %v12259_v24 = vld [vmem:[#allocation13 + $0x80] sm:$0xff] }
 0x520   :  { %v6010_v50 = vpop.f32.mrf.mxu2  ;;  %v5954_v45 = vpop.f32.mrf.mxu0  ;;  %6835 = vmatpush.bf16.msra.mxu0 %v11210_v30  ;;  %v12244_v30 = vld [vmem:[#allocation13 + $0x8] sm:$0xff] }
 0x521   :  { %v6039_v43 = vpop.f32.mrf.mxu3  ;;  %v6011_v36 = vadd.f32 %v6010_v50, %v5981_v42  ;;  %v5983_v12 = vpop.f32.mrf.mxu1  ;;  %v5955_v6 = vadd.f32 %v5954_v45, %v14244_v26  ;;  %v12262_v50 = vld [vmem:[#allocation13 + $0x98] sm:$0xff] }
 0x522   :  { %8266 = vmatpush.bf16.msrb.mxu1 %v12248_v8 }
 0x523   :  { %v6040_v48 = vadd.f32 %v6039_v43, %v6011_v36  ;;  %v14327_v2 = vadd.f32 %v5955_v6, %v14866_v15  ;;  %8279 = vmatpush.bf16.msrb.mxu2 %v12256_v51  ;;  %8294 = vmatpush.bf16.msrb.mxu3 %v12262_v50  ;;  %v14870_v6 = vld [vmem:[#allocation54_spill] sm:$0xff]  ;;  %v12261_v15 = vld [vmem:[#allocation13 + $0x90] sm:$0xff]  ;;  %v12252_v51 = vld [vmem:[#allocation13 + $0x48] sm:$0xff] }
 0x525   :  { %v14330_v27 = vadd.f32 %v6040_v48, %v14867_v9  ;;  %v14871_v9 = vld [vmem:[#allocation73_spill] sm:$0xff] }
 0x526   :  { %8267 = vmatpush.bf16.msrb.mxu1 %v12247_v37 }
 0x527   :  { %8280 = vmatpush.bf16.msrb.mxu2 %v12255_v19  ;;  %8295 = vmatpush.bf16.msrb.mxu3 %v12261_v15  ;;  %v12243_v19 = vld [vmem:[#allocation13] sm:$0xff] }
 0x528   :  { %v6012_v42 = vpop.f32.mrf.mxu2  ;;  %v5957_v55 = vpop.f32.mrf.mxu0 }
 0x529   :  { %v6041_v46 = vpop.f32.mrf.mxu3  ;;  %v6013_v26 = vadd.f32 %v6012_v42, %v5983_v12  ;;  %v5986_v56 = vpop.f32.mrf.mxu1  ;;  %v5958_v62 = vadd.f32 %v5957_v55, %v14264_v57  ;;  %v12254_v57 = vld [vmem:[#allocation13 + $0x58] sm:$0xff] }
 0x52a   :  { %8268 = vmatpush.bf16.msrb.mxu1 %v12246_v49 }
 0x52b   :  { %v6042_v25 = vadd.f32 %v6041_v46, %v6013_v26  ;;  %6730 = vmatmul.bf16.gmra.mxu0 %v14249_v21  ;;  %v14335_v54 = vadd.f32 %v5958_v62, %v14868_v31  ;;  %8281 = vmatpush.bf16.msrb.mxu2 %v12254_v57  ;;  %v12251_v62 = vld [vmem:[#allocation13 + $0x40] sm:$0xff] }
 0x52c   :  { %6759 = vmatmul.bf16.gmra.mxu1 %v14254_v14  ;;  %8296 = vmatpush.bf16.msrb.mxu3 %v12260_v61 }
 0x52d   :  { %v14339_v23 = vadd.f32 %v6042_v25, %v14869_v60  ;;  %6788 = vmatmul.bf16.gmra.mxu2 %v14242_v44  ;;  %v12245_v44 = vld [vmem:[#allocation13 + $0x10] sm:$0xff]  ;;  %v14873_v25 = vld [vmem:[#allocation75_spill] sm:$0xff] }
 0x52e   :  { %6817 = vmatmul.bf16.gmra.mxu3 %v14249_v21  ;;  %v12253_v21 = vld [vmem:[#allocation13 + $0x50] sm:$0xff]  ;;  %8269 = vmatpush.bf16.msrb.mxu1 %v12245_v44 }
 0x52f   :  { %8282 = vmatpush.bf16.msrb.mxu2 %v12253_v21  ;;  %v7856_v21 = vpack.c.b16 %v14042_v32, %v14042_v32 }
 0x530   :  { %v6015_v43 = vpop.f32.mrf.mxu2  ;;  %v5959_v12 = vpop.f32.mrf.mxu0  ;;  %8297 = vmatpush.bf16.msrb.mxu3 %v12259_v24 }
 0x531   :  { %v6044_v36 = vpop.f32.mrf.mxu3  ;;  %v6016_v45 = vadd.f32 %v6015_v43, %v5986_v56  ;;  %v5988_v3 = vpop.f32.mrf.mxu1  ;;  %v5960_v28 = vadd.f32 %v5959_v12, %v14275_v20  ;;  %v14872_v56 = vld [vmem:[#allocation62_spill] sm:$0xff] }
 0x532   :  { %8270 = vmatpush.bf16.msrb.mxu1 %v12244_v30  ;;  %v14381_v30 = vld [vmem:[%s14589_s7] sm:$0x7] }
 0x533   :  { %v6045_v10 = vadd.f32 %v6044_v36, %v6016_v45  ;;  %v14345_v48 = vadd.f32 %v5960_v28, %v14870_v6  ;;  %8283 = vmatpush.bf16.msrb.mxu2 %v12252_v51  ;;  %v14874_v45 = vld [vmem:[#allocation63_spill] sm:$0xff] }
 0x535   :  { %v14348_v58 = vadd.f32 %v6045_v10, %v14871_v9  ;;  %v7858_v9 = vpack.c.b16 %v14228_v35, %v14228_v35 }
 0x536   :  { %8271 = vmatpush.bf16.msrb.mxu1 %v12243_v19 }
 0x537   :  { %8284 = vmatpush.bf16.msrb.mxu2 %v12251_v62 }
 0x538   :  { %v6017_v39 = vpop.f32.mrf.mxu2  ;;  %v5962_v42 = vpop.f32.mrf.mxu0 }
 0x539   :  { %v6046_v8 = vpop.f32.mrf.mxu3  ;;  %v6018_v20 = vadd.f32 %v6017_v39, %v5988_v3  ;;  %v5991_v46 = vpop.f32.mrf.mxu1  ;;  %v5963_v26 = vadd.f32 %v5962_v42, %v14291_v53  ;;  %v14875_v3 = vld [vmem:[#allocation64_spill] sm:$0xff]  ;;  %v14876_v39 = vld [vmem:[#allocation78_spill] sm:$0xff] }
 0x53b   :  { %v6047_v55 = vadd.f32 %v6046_v8, %v6018_v20  ;;  %6735 = vmatmul.bf16.gmra.mxu0 %v14278_v59  ;;  %v14353_v37 = vadd.f32 %v5963_v26, %v14872_v56 }
 0x53c   :  { %6764 = vmatmul.bf16.gmra.mxu1 %v14282_v11 }
 0x53d   :  { %v14357_v31 = vadd.f32 %v6047_v55, %v14873_v25  ;;  %6793 = vmatmul.bf16.gmra.mxu2 %v14273_v1 }
 0x53e   :  { %6822 = vmatmul.bf16.gmra.mxu3 %v14278_v59 }
 0x540   :  { %v6020_v53 = vpop.f32.mrf.mxu2  ;;  %v5964_v57 = vpop.f32.mrf.mxu0 }
 0x541   :  { %v6049_v60 = vpop.f32.mrf.mxu3  ;;  %v6021_v49 = vadd.f32 %v6020_v53, %v5991_v46  ;;  %v5993_v50 = vpop.f32.mrf.mxu1  ;;  %v5965_v43 = vadd.f32 %v5964_v57, %v14297_v34  ;;  %v7857_v34 = vpack.c.b16 %v14054_v29, %v14054_v29  ;;  %v14386_v29 = vperm.slane %v14381_v30, 0 }
 0x543   :  { %v6050_v36 = vadd.f32 %v6049_v60, %v6021_v49  ;;  %v14363_v12 = vadd.f32 %v5965_v43, %v14874_v45  ;;  %v14877_v49 = vld [vmem:[#allocation36_spill] sm:$0xff] }
 0x544   :  { %v8114_v57 = vpack.c.b16 %v14877_v49, %v14877_v49 }
 0x545   :  { %v14366_v28 = vadd.f32 %v6050_v36, %v14875_v3  ;;  %v14879_v36 = vld [vmem:[#allocation38_spill] sm:$0xff] }
 0x546   :  { %v8116_v45 = vpack.c.b16 %v14879_v36, %v14879_v36 }
 0x548   :  { %v6022_v1 = vpop.f32.mrf.mxu2  ;;  %v6605_v6 = vpop.f32.mrf.mxu0 }
 0x549   :  { %v6051_v10 = vpop.f32.mrf.mxu3  ;;  %v6023_v59 = vadd.f32 %v6022_v1, %v5993_v50  ;;  %v6634_v44 = vpop.f32.mrf.mxu1  ;;  %v14878_v50 = vld [vmem:[#allocation37_spill] sm:$0xff] }
 0x54a   :  { %v6635_v32 = vadd.f32 %v6634_v44, %v6605_v6  ;;  %v8115_v43 = vpack.c.b16 %v14878_v50, %v14878_v50 }
 0x54b   :  { %v6052_v15 = vadd.f32 %v6051_v10, %v6023_v59  ;;  %6836 = vmatmul.bf16.vlgmr.msra.gmra.mxu0 %v14143_v40 }
 0x54c   :  { %8014 = vmatmul.bf16.vlgmr.msra.gmra.mxu1 %v7856_v21 }
 0x54d   :  { %v14376_v8 = vadd.f32 %v6052_v15, %v14876_v39  ;;  %8027 = vmatmul.bf16.vlgmr.msra.gmra.mxu2 %v7857_v34 }
 0x54e   :  { %8040 = vmatmul.bf16.vlgmr.msra.gmra.mxu3 %v7858_v9 }
 0x550   :  { %v6663_v51 = vpop.f32.mrf.mxu2  ;;  %v6607_v35 = vpop.f32.mrf.mxu0 }
 0x551   :  { %v14383_v40 = vpop.f32.mrf.mxu3  ;;  %v6664_v61 = vadd.f32 %v6663_v51, %v6635_v32  ;;  %v6636_v20 = vpop.f32.mrf.mxu1 }
 0x552   :  { %v6637_v55 = vadd.f32 %v6636_v20, %v6607_v35 }
 0x553   :  { %v6905_v42 = vadd.f32 %v14164_v41, %v6664_v61 }
 0x555   :  { %v7441_v46 = vadd.f32 %v14386_v29, %v6905_v42 }
 0x557   :  { %v7465_v26 = vmax.f32 %v7441_v46, 0.0 }
 0x558   :  { %v6665_v56 = vpop.f32.mrf.mxu2  ;;  %v6610_v25 = vpop.f32.mrf.mxu0 }
 0x559   :  { %v14391_v19 = vpop.f32.mrf.mxu3  ;;  %v7492_v62 = vsel %vm7489_vm15, %v7465_v26, 0.0  ;;  %v6666_v24 = vadd.f32 %v6665_v56, %v6637_v55  ;;  %v6639_v53 = vpop.f32.mrf.mxu1 }
 0x55a   :  { %v7516_v60 = vrot.slane %v7492_v62, 4  ;;  %v6640_v6 = vadd.f32 %v6639_v53, %v6610_v25 }
 0x55b   :  { %v6908_v41 = vadd.f32 %v14184_v17, %v6666_v24  ;;  %6841 = vmatmul.bf16.gmra.mxu0 %v14201_v52 }
 0x55c   :  { %v7517_v3 = vmax.f32 %v7492_v62, %v7516_v60  ;;  %8272 = vmatmul.bf16.vlgmr.msrb.gmra.mxu1 %v8114_v57 }
 0x55d   :  { %v7444_v1 = vadd.f32 %v14386_v29, %v6908_v41  ;;  %8285 = vmatmul.bf16.vlgmr.msrb.gmra.mxu2 %v8115_v43 }
 0x55e   :  { %8298 = vmatmul.bf16.vlgmr.msrb.gmra.mxu3 %v8116_v45  ;;  %v7518_v10 = vrot.slane %v7517_v3, 2 }
 0x55f   :  { %v7468_v59 = vmax.f32 %v7444_v1, 0.0 }
 0x560   :  { %v7519_v44 = vmax.f32 %v7517_v3, %v7518_v10  ;;  %v6668_v21 = vpop.f32.mrf.mxu2  ;;  %v6612_v34 = vpop.f32.mrf.mxu0 }
 0x561   :  { %v14404_v17 = vpop.f32.mrf.mxu3  ;;  %v7495_v52 = vsel %vm7489_vm15, %v7468_v59, 0.0  ;;  %v6669_v15 = vadd.f32 %v6668_v21, %v6640_v6  ;;  %v6641_v9 = vpop.f32.mrf.mxu1 }
 0x562   :  { %v7534_v39 = vrot.slane %v7495_v52, 4  ;;  %v7520_v51 = vrot.slane %v7519_v44, 1  ;;  %v6642_v46 = vadd.f32 %v6641_v9, %v6612_v34 }
 0x563   :  { %v6911_v32 = vadd.f32 %v14218_v33, %v6669_v15 }
 0x564   :  { %v7535_v61 = vmax.f32 %v7495_v52, %v7534_v39  ;;  %v7521_v26 = vmax.f32 %v7519_v44, %v7520_v51 }
 0x565   :  { %v7447_v35 = vadd.f32 %v14386_v29, %v6911_v32 }
 0x566   :  { %v7536_v20 = vrot.slane %v7535_v61, 2  ;;  %v7660_v41 = vpack.c.bf16 %v7521_v26, %v7521_v26 }
 0x567   :  { %v7471_v42 = vmax.f32 %v7447_v35, 0.0 }
 0x568   :  { %v7537_v55 = vmax.f32 %v7535_v61, %v7536_v20  ;;  %v6670_v56 = vpop.f32.mrf.mxu2  ;;  %v6615_v53 = vpop.f32.mrf.mxu0  ;;  %v8375_v59 = vunpack.c.l.b16 %v7660_v41 }
 0x569   :  { %v14410_v62 = vpop.f32.mrf.mxu3  ;;  %v7498_v24 = vsel %vm7489_vm15, %v7471_v42, 0.0  ;;  %v6671_v25 = vadd.f32 %v6670_v56, %v6642_v46  ;;  %v6644_v60 = vpop.f32.mrf.mxu1 }
 0x56a   :  { %v7538_v49 = vrot.slane %v7537_v55, 1  ;;  %v7552_v33 = vrot.slane %v7498_v24, 4  ;;  %v6645_v10 = vadd.f32 %v6644_v60, %v6615_v53  ;;  %v12298_v60 = vld [vmem:[#allocation16 + $0x38] sm:$0xff] }
 0x56b   :  { %v6914_v57 = vadd.f32 %v14237_v47, %v6671_v25  ;;  %6846 = vmatmul.bf16.gmra.mxu0 %v14254_v14 }
 0x56c   :  { %v7539_v50 = vmax.f32 %v7537_v55, %v7538_v49  ;;  %v7553_v43 = vmax.f32 %v7498_v24, %v7552_v33  ;;  %8570 = vmatpush.bf16.msrb.mxu0 %v12298_v60 }
 0x56d   :  { %v7450_v36 = vadd.f32 %v14386_v29, %v6914_v57 }
 0x56e   :  { %v7663_v45 = vpack.c.bf16 %v7539_v50, %v7539_v50  ;;  %v7554_v3 = vrot.slane %v7553_v43, 2 }
 0x56f   :  { %v7474_v1 = vmax.f32 %v7450_v36, 0.0 }
 0x570   :  { %v8378_v6 = vunpack.c.l.b16 %v7663_v45  ;;  %v7555_v44 = vmax.f32 %v7553_v43, %v7554_v3  ;;  %v6673_v21 = vpop.f32.mrf.mxu2  ;;  %v6617_v14 = vpop.f32.mrf.mxu0 }
 0x571   :  { %v14417_v52 = vpop.f32.mrf.mxu3  ;;  %v7501_v47 = vsel %vm7489_vm15, %v7474_v1, 0.0  ;;  %v6674_v15 = vadd.f32 %v6673_v21, %v6645_v10  ;;  %v6646_v34 = vpop.f32.mrf.mxu1 }
 0x572   :  { %v8399_v9 = vsel %vm7828_vm4, %v8378_v6, %v8375_v59  ;;  %v7556_v39 = vrot.slane %v7555_v44, 1  ;;  %v7570_v32 = vrot.slane %v7501_v47, 4  ;;  %v6647_v55 = vadd.f32 %v6646_v34, %v6617_v14  ;;  %v12297_v34 = vld [vmem:[#allocation16 + $0x30] sm:$0xff] }
 0x573   :  { %v6917_v51 = vadd.f32 %v14262_v0, %v6674_v15  ;;  %8571 = vmatpush.bf16.msrb.mxu0 %v12297_v34 }
 0x574   :  { %v7557_v61 = vmax.f32 %v7555_v44, %v7556_v39  ;;  %v7571_v35 = vmax.f32 %v7501_v47, %v7570_v32 }
 0x575   :  { %v7453_v20 = vadd.f32 %v14386_v29, %v6917_v51 }
 0x576   :  { %v7666_v42 = vpack.c.bf16 %v7557_v61, %v7557_v61  ;;  %v7572_v46 = vrot.slane %v7571_v35, 2 }
 0x577   :  { %v7477_v26 = vmax.f32 %v7453_v20, 0.0  ;;  %v12296_v20 = vld [vmem:[#allocation16 + $0x28] sm:$0xff] }
 0x578   :  { %v8381_v56 = vunpack.c.l.b16 %v7666_v42  ;;  %v7573_v24 = vmax.f32 %v7571_v35, %v7572_v46  ;;  %v6675_v25 = vpop.f32.mrf.mxu2  ;;  %v6620_v57 = vpop.f32.mrf.mxu0  ;;  %8572 = vmatpush.bf16.msrb.mxu0 %v12296_v20 }
 0x579   :  { %v14424_v53 = vpop.f32.mrf.mxu3  ;;  %v7504_v49 = vsel %vm7489_vm15, %v7477_v26, 0.0  ;;  %v6676_v33 = vadd.f32 %v6675_v25, %v6647_v55  ;;  %v6649_v0 = vpop.f32.mrf.mxu1 }
 0x57a   :  { %v8400_v41 = vsel %vm7830_vm5, %v8381_v56, %v8399_v9  ;;  %v7574_v50 = vrot.slane %v7573_v24, 1  ;;  %v7588_v43 = vrot.slane %v7504_v49, 4  ;;  %v6650_v44 = vadd.f32 %v6649_v0, %v6620_v57  ;;  %v12295_v0 = vld [vmem:[#allocation16 + $0x20] sm:$0xff] }
 0x57b   :  { %v6920_v36 = vadd.f32 %v14270_v4, %v6676_v33  ;;  %6851 = vmatmul.bf16.gmra.mxu0 %v14282_v11 }
 0x57c   :  { %v7575_v45 = vmax.f32 %v7573_v24, %v7574_v50  ;;  %v7589_v3 = vmax.f32 %v7504_v49, %v7588_v43  ;;  %8573 = vmatpush.bf16.msrb.mxu0 %v12295_v0 }
 0x57d   :  { %v7456_v1 = vadd.f32 %v14386_v29, %v6920_v36 }
 0x57e   :  { %v7669_v10 = vpack.c.bf16 %v7575_v45, %v7575_v45  ;;  %v7590_v59 = vrot.slane %v7589_v3, 2 }
 0x57f   :  { %v7480_v6 = vmax.f32 %v7456_v1, 0.0 }
 0x580   :  { %v8384_v21 = vunpack.c.l.b16 %v7669_v10  ;;  %v7591_v47 = vmax.f32 %v7589_v3, %v7590_v59  ;;  %v6678_v15 = vpop.f32.mrf.mxu2  ;;  %v6622_v39 = vpop.f32.mrf.mxu0 }
 0x581   :  { %v14432_v14 = vpop.f32.mrf.mxu3  ;;  %v7507_v9 = vsel %vm7489_vm15, %v7480_v6, 0.0  ;;  %v6679_v4 = vadd.f32 %v6678_v15, %v6650_v44  ;;  %v6651_v11 = vpop.f32.mrf.mxu1 }
 0x582   :  { %v8401_v32 = vsel %vm7832_vm6, %v8384_v21, %v8400_v41  ;;  %v7592_v51 = vrot.slane %v7591_v47, 1  ;;  %v7606_v61 = vrot.slane %v7507_v9, 4  ;;  %v6652_v25 = vadd.f32 %v6651_v11, %v6622_v39 }
 0x583   :  { %v6923_v35 = vadd.f32 %v14289_v7, %v6679_v4  ;;  %v14447_v21 = vperm.slane %v14381_v30, 1 }
 0x584   :  { %v7593_v42 = vmax.f32 %v7591_v47, %v7592_v51  ;;  %v7607_v46 = vmax.f32 %v7507_v9, %v7606_v61  ;;  %v12294_v47 = vld [vmem:[#allocation16 + $0x18] sm:$0xff]  ;;  %v12293_v61 = vld [vmem:[#allocation16 + $0x10] sm:$0xff] }
 0x585   :  { %v7459_v26 = vadd.f32 %v14386_v29, %v6923_v35  ;;  %8574 = vmatpush.bf16.msrb.mxu0 %v12294_v47 }
 0x586   :  { %v7672_v55 = vpack.c.bf16 %v7593_v42, %v7593_v42  ;;  %v7608_v56 = vrot.slane %v7607_v46, 2 }
 0x587   :  { %v7483_v24 = vmax.f32 %v7459_v26, 0.0 }
 0x588   :  { %v8387_v60 = vunpack.c.l.b16 %v7672_v55  ;;  %v7609_v49 = vmax.f32 %v7607_v46, %v7608_v56  ;;  %v6680_v33 = vpop.f32.mrf.mxu2  ;;  %v6721_v50 = vpop.f32.mrf.mxu0 }
 0x589   :  { %v14439_v57 = vpop.f32.mrf.mxu3  ;;  %v7510_v41 = vsel %vm7489_vm15, %v7483_v24, 0.0  ;;  %v6681_v7 = vadd.f32 %v6680_v33, %v6652_v25  ;;  %v6750_v43 = vpop.f32.mrf.mxu1  ;;  %v6722_v1 = vadd.f32 %v6721_v50, %v14383_v40  ;;  %8575 = vmatpush.bf16.msrb.mxu0 %v12293_v61  ;;  %v12292_v33 = vld [vmem:[#allocation16 + $0x8] sm:$0xff] }
 0x58a   :  { %v8402_v36 = vsel %vm7834_vm7, %v8387_v60, %v8401_v32  ;;  %v7610_v45 = vrot.slane %v7609_v49, 1  ;;  %v7624_v3 = vrot.slane %v7510_v41, 4 }
 0x58b   :  { %v6926_v10 = vadd.f32 %v14295_v38, %v6681_v7  ;;  %v6751_v44 = vadd.f32 %v6750_v43, %v6722_v1 }
 0x58c   :  { %v7611_v59 = vmax.f32 %v7609_v49, %v7610_v45  ;;  %v7625_v6 = vmax.f32 %v7510_v41, %v7624_v3 }
 0x58d   :  { %v7462_v15 = vadd.f32 %v14386_v29, %v6926_v10  ;;  %v6906_v4 = vadd.f32 %v14302_v22, %v6751_v44  ;;  %8576 = vmatpush.bf16.msrb.mxu0 %v12292_v33  ;;  %v12291_v10 = vld [vmem:[#allocation16] sm:$0xff] }
 0x58e   :  { %v7675_v34 = vpack.c.bf16 %v7611_v59, %v7611_v59  ;;  %v7626_v9 = vrot.slane %v7625_v6, 2 }
 0x58f   :  { %v7486_v39 = vmax.f32 %v7462_v15, 0.0  ;;  %v7442_v32 = vadd.f32 %v14447_v21, %v6906_v4 }
 0x590   :  { %v8390_v11 = vunpack.c.l.b16 %v7675_v34  ;;  %v7627_v40 = vmax.f32 %v7625_v6, %v7626_v9  ;;  %v6779_v38 = vpop.f32.mrf.mxu2  ;;  %v6723_v42 = vpop.f32.mrf.mxu0 }
 0x591   :  { %v6808_v51 = vpop.f32.mrf.mxu3  ;;  %v7513_v35 = vsel %vm7489_vm15, %v7486_v39, 0.0  ;;  %v6752_v29 = vpop.f32.mrf.mxu1  ;;  %v7466_v55 = vmax.f32 %v7442_v32, 0.0  ;;  %v6724_v22 = vadd.f32 %v6723_v42, %v14391_v19  ;;  %8577 = vmatpush.bf16.msrb.mxu0 %v12291_v10 }
 0x592   :  { %v14454_v20 = vadd.f32 %v6808_v51, %v6779_v38  ;;  %v7628_v46 = vrot.slane %v7627_v40, 1  ;;  %v7642_v26 = vrot.slane %v7513_v35, 4  ;;  %v8403_v56 = vsel %vm7836_vm8, %v8390_v11, %v8402_v36 }
 0x593   :  { %v7493_v60 = vsel %vm7489_vm15, %v7466_v55, 0.0  ;;  %v6753_v49 = vadd.f32 %v6752_v29, %v6724_v22 }
 0x594   :  { %v7629_v24 = vmax.f32 %v7627_v40, %v7628_v46  ;;  %v7643_v25 = vmax.f32 %v7513_v35, %v7642_v26  ;;  %v7522_v0 = vrot.slane %v7493_v60, 4 }
 0x595   :  { %v6909_v50 = vadd.f32 %v14309_v13, %v6753_v49 }
 0x596   :  { %v7678_v41 = vpack.c.bf16 %v7629_v24, %v7629_v24  ;;  %v7644_v7 = vrot.slane %v7643_v25, 2  ;;  %v7523_v43 = vmax.f32 %v7493_v60, %v7522_v0 }
 0x597   :  { %v7445_v19 = vadd.f32 %v14447_v21, %v6909_v50 }
 0x598   :  { %v8393_v45 = vunpack.c.l.b16 %v7678_v41  ;;  %v7645_v3 = vmax.f32 %v7643_v25, %v7644_v7  ;;  %v6781_v1 = vpop.f32.mrf.mxu2  ;;  %v7524_v59 = vrot.slane %v7523_v43, 2  ;;  %v6726_v44 = vpop.f32.mrf.mxu0 }
 0x599   :  { %v6810_v36 = vpop.f32.mrf.mxu3  ;;  %v6755_v47 = vpop.f32.mrf.mxu1  ;;  %v7469_v34 = vmax.f32 %v7445_v19, 0.0  ;;  %v6727_v9 = vadd.f32 %v6726_v44, %v14404_v17 }
 0x59a   :  { %v14462_v6 = vadd.f32 %v6810_v36, %v6781_v1  ;;  %v7646_v15 = vrot.slane %v7645_v3, 1  ;;  %v8404_v13 = vsel %vm7838_vm9, %v8393_v45, %v8403_v56  ;;  %v7525_v4 = vmax.f32 %v7523_v43, %v7524_v59 }
 0x59b   :  { %v7496_v11 = vsel %vm7489_vm15, %v7469_v34, 0.0  ;;  %v6756_v40 = vadd.f32 %v6755_v47, %v6727_v9 }
 0x59c   :  { %v7647_v39 = vmax.f32 %v7645_v3, %v7646_v15  ;;  %v7540_v32 = vrot.slane %v7496_v11, 4  ;;  %v7526_v61 = vrot.slane %v7525_v4, 1 }
 0x59d   :  { %v6912_v51 = vadd.f32 %v14317_v18, %v6756_v40 }
 0x59e   :  { %v7681_v38 = vpack.c.bf16 %v7647_v39, %v7647_v39  ;;  %v7541_v35 = vmax.f32 %v7496_v11, %v7540_v32  ;;  %v7527_v49 = vmax.f32 %v7525_v4, %v7526_v61 }
 0x59f   :  { %v7448_v29 = vadd.f32 %v14447_v21, %v6912_v51 }
 0x5a0   :  { %v8396_v42 = vunpack.c.l.b16 %v7681_v38  ;;  %v6784_v46 = vpop.f32.mrf.mxu2  ;;  %v7542_v26 = vrot.slane %v7541_v35, 2  ;;  %v6728_v22 = vpop.f32.mrf.mxu0  ;;  %v7661_v45 = vpack.c.bf16 %v7527_v49, %v7527_v49 }
 0x5a1   :  { %v6813_v17 = vpop.f32.mrf.mxu3  ;;  %v6757_v56 = vpop.f32.mrf.mxu1  ;;  %v7472_v24 = vmax.f32 %v7448_v29, 0.0  ;;  %v6729_v25 = vadd.f32 %v6728_v22, %v14410_v62 }
 0x5a2   :  { %v14470_v55 = vadd.f32 %v6813_v17, %v6784_v46  ;;  %v8405_v60 = vsel %vm7840_vm10, %v8396_v42, %v8404_v13  ;;  %v7543_v33 = vmax.f32 %v7541_v35, %v7542_v26  ;;  %v8376_v13 = vunpack.c.l.b16 %v7661_v45 }
 0x5a3   :  { %v8420_v18 = vpack.c.b16 %v8405_v60, %v8405_v60  ;;  %v7499_v0 = vsel %vm7489_vm15, %v7472_v24, 0.0  ;;  %v6758_v41 = vadd.f32 %v6757_v56, %v6729_v25 }
 0x5a4   :  { %v7544_v7 = vrot.slane %v7543_v33, 1  ;;  %v7558_v50 = vrot.slane %v7499_v0, 4 }
 0x5a5   :  { %8578 = vmatmul.bf16.vlgmr.msrb.gmra.mxu0 %v8420_v18  ;;  %v6915_v43 = vadd.f32 %v14327_v2, %v6758_v41 }
 0x5a6   :  { %v7545_v3 = vmax.f32 %v7543_v33, %v7544_v7  ;;  %v7559_v19 = vmax.f32 %v7499_v0, %v7558_v50 }
 0x5a7   :  { %v7451_v1 = vadd.f32 %v14447_v21, %v6915_v43 }
 0x5a8   :  { %v6786_v62 = vpop.f32.mrf.mxu2  ;;  %v7664_v10 = vpack.c.bf16 %v7545_v3, %v7545_v3  ;;  %v7560_v59 = vrot.slane %v7559_v19, 2  ;;  %v6731_v47 = vpop.f32.mrf.mxu0 }
 0x5a9   :  { %v6815_v36 = vpop.f32.mrf.mxu3  ;;  %v6760_v15 = vpop.f32.mrf.mxu1  ;;  %v7475_v34 = vmax.f32 %v7451_v1, 0.0  ;;  %v6732_v9 = vadd.f32 %v6731_v47, %v14417_v52  ;;  %v12306_v1 = vld [vmem:[#allocation16 + $0x78] sm:$0xff] }
 0x5aa   :  { %v14478_v44 = vadd.f32 %v6815_v36, %v6786_v62  ;;  %v8379_v4 = vunpack.c.l.b16 %v7664_v10  ;;  %v7561_v39 = vmax.f32 %v7559_v19, %v7560_v59  ;;  %8583 = vmatpush.bf16.msra.mxu1 %v12306_v1 }
 0x5ab   :  { %v7502_v2 = vsel %vm7489_vm15, %v7475_v34, 0.0  ;;  %v6761_v11 = vadd.f32 %v6760_v15, %v6732_v9 }
 0x5ac   :  { %v8406_v40 = vsel %vm7828_vm4, %v8379_v4, %v8376_v13  ;;  %v7562_v32 = vrot.slane %v7561_v39, 1  ;;  %v7576_v38 = vrot.slane %v7502_v2, 4 }
 0x5ad   :  { %v6918_v51 = vadd.f32 %v14335_v54, %v6761_v11 }
 0x5ae   :  { %v7563_v61 = vmax.f32 %v7561_v39, %v7562_v32  ;;  %v7577_v35 = vmax.f32 %v7502_v2, %v7576_v38 }
 0x5af   :  { %v7454_v42 = vadd.f32 %v14447_v21, %v6918_v51 }
 0x5b0   :  { %v6789_v29 = vpop.f32.mrf.mxu2  ;;  %v7667_v52 = vpack.c.bf16 %v7563_v61, %v7563_v61  ;;  %v7578_v17 = vrot.slane %v7577_v35, 2  ;;  %v6733_v22 = vpop.f32.mrf.mxu0 }
 0x5b1   :  { %v6818_v46 = vpop.f32.mrf.mxu3  ;;  %v6762_v56 = vpop.f32.mrf.mxu1  ;;  %v7478_v24 = vmax.f32 %v7454_v42, 0.0  ;;  %v6734_v25 = vadd.f32 %v6733_v22, %v14424_v53 }
 0x5b2   :  { %v14486_v26 = vadd.f32 %v6818_v46, %v6789_v29  ;;  %v8382_v60 = vunpack.c.l.b16 %v7667_v52  ;;  %v7579_v49 = vmax.f32 %v7577_v35, %v7578_v17  ;;  %v12304_v35 = vld [vmem:[#allocation16 + $0x68] sm:$0xff] }
 0x5b3   :  { %v7505_v54 = vsel %vm7489_vm15, %v7478_v24, 0.0  ;;  %v6763_v33 = vadd.f32 %v6762_v56, %v6734_v25  ;;  %v12303_v56 = vld [vmem:[#allocation16 + $0x60] sm:$0xff] }
 0x5b4   :  { %v8407_v18 = vsel %vm7830_vm5, %v8382_v60, %v8406_v40  ;;  %v7580_v0 = vrot.slane %v7579_v49, 1  ;;  %v7594_v41 = vrot.slane %v7505_v54, 4 }
 0x5b5   :  { %v6921_v7 = vadd.f32 %v14345_v48, %v6763_v33  ;;  %v12305_v48 = vld [vmem:[#allocation16 + $0x70] sm:$0xff] }
 0x5b6   :  { %v7581_v50 = vmax.f32 %v7579_v49, %v7580_v0  ;;  %v7595_v43 = vmax.f32 %v7505_v54, %v7594_v41  ;;  %8584 = vmatpush.bf16.msra.mxu1 %v12305_v48 }
 0x5b7   :  { %v7457_v45 = vadd.f32 %v14447_v21, %v6921_v7 }
 0x5b8   :  { %v6791_v3 = vpop.f32.mrf.mxu2  ;;  %v7670_v53 = vpack.c.bf16 %v7581_v50, %v7581_v50  ;;  %v7596_v62 = vrot.slane %v7595_v43, 2  ;;  %v6736_v10 = vpop.f32.mrf.mxu0 }
 0x5b9   :  { %v6820_v19 = vpop.f32.mrf.mxu3  ;;  %v6765_v59 = vpop.f32.mrf.mxu1  ;;  %v7481_v47 = vmax.f32 %v7457_v45, 0.0  ;;  %v6737_v15 = vadd.f32 %v6736_v10, %v14432_v14  ;;  %v14518_v10 = vperm.slane %v14381_v30, 2 }
 0x5ba   :  { %v14494_v36 = vadd.f32 %v6820_v19, %v6791_v3  ;;  %v8385_v34 = vunpack.c.l.b16 %v7670_v53  ;;  %v7597_v9 = vmax.f32 %v7595_v43, %v7596_v62  ;;  %8585 = vmatpush.bf16.msra.mxu1 %v12304_v35  ;;  %v12302_v43 = vld [vmem:[#allocation16 + $0x58] sm:$0xff] }
 0x5bb   :  { %v7508_v13 = vsel %vm7489_vm15, %v7481_v47, 0.0  ;;  %v6766_v4 = vadd.f32 %v6765_v59, %v6737_v15  ;;  %v12301_v47 = vld [vmem:[#allocation16 + $0x50] sm:$0xff] }
 0x5bc   :  { %v8408_v39 = vsel %vm7832_vm6, %v8385_v34, %v8407_v18  ;;  %v7598_v2 = vrot.slane %v7597_v9, 1  ;;  %v7612_v11 = vrot.slane %v7508_v13, 4 }
 0x5bd   :  { %v6924_v40 = vadd.f32 %v14353_v37, %v6766_v4 }
 0x5be   :  { %v7599_v32 = vmax.f32 %v7597_v9, %v7598_v2  ;;  %v7613_v38 = vmax.f32 %v7508_v13, %v7612_v11  ;;  %8586 = vmatpush.bf16.msra.mxu1 %v12303_v56  ;;  %v12300_v11 = vld [vmem:[#allocation16 + $0x48] sm:$0xff] }
 0x5bf   :  { %v7460_v51 = vadd.f32 %v14447_v21, %v6924_v40 }
 0x5c0   :  { %v14502_v14 = vpop.f32.mrf.mxu2  ;;  %v7673_v42 = vpack.c.bf16 %v7599_v32, %v7599_v32  ;;  %v7614_v29 = vrot.slane %v7613_v38, 2  ;;  %v6738_v46 = vpop.f32.mrf.mxu0 }
 0x5c1   :  { %v14504_v61 = vpop.f32.mrf.mxu3  ;;  %v6767_v52 = vpop.f32.mrf.mxu1  ;;  %v7484_v17 = vmax.f32 %v7460_v51, 0.0  ;;  %v6739_v22 = vadd.f32 %v6738_v46, %v14439_v57 }
 0x5c2   :  { %v8388_v37 = vunpack.c.l.b16 %v7673_v42  ;;  %v7615_v24 = vmax.f32 %v7613_v38, %v7614_v29  ;;  %8587 = vmatpush.bf16.msra.mxu1 %v12302_v43 }
 0x5c3   :  { %v7511_v25 = vsel %vm7489_vm15, %v7484_v17, 0.0  ;;  %v6768_v60 = vadd.f32 %v6767_v52, %v6739_v22  ;;  %v12299_v22 = vld [vmem:[#allocation16 + $0x40] sm:$0xff] }
 0x5c4   :  { %v8409_v49 = vsel %vm7834_vm7, %v8388_v37, %v8408_v39  ;;  %v7616_v54 = vrot.slane %v7615_v24, 1  ;;  %v7630_v33 = vrot.slane %v7511_v25, 4 }
 0x5c5   :  { %v6927_v18 = vadd.f32 %v14363_v12, %v6768_v60 }
 0x5c6   :  { %v7617_v0 = vmax.f32 %v7615_v24, %v7616_v54  ;;  %v7631_v41 = vmax.f32 %v7511_v25, %v7630_v33  ;;  %8588 = vmatpush.bf16.msra.mxu1 %v12301_v47 }
 0x5c7   :  { %v7463_v7 = vadd.f32 %v14447_v21, %v6927_v18 }
 0x5c8   :  { %v14512_v57 = vpop.f32.mrf.mxu2  ;;  %v7676_v45 = vpack.c.bf16 %v7617_v0, %v7617_v0  ;;  %v7632_v3 = vrot.slane %v7631_v41, 2  ;;  %v6837_v19 = vpop.f32.mrf.mxu0 }
 0x5c9   :  { %v14514_v50 = vpop.f32.mrf.mxu3  ;;  %v8015_v1 = vpop.f32.mrf.mxu1  ;;  %v7487_v53 = vmax.f32 %v7463_v7, 0.0  ;;  %v6838_v62 = vadd.f32 %v6837_v19, %v14454_v20 }
 0x5ca   :  { %v8391_v12 = vunpack.c.l.b16 %v7676_v45  ;;  %v7633_v59 = vmax.f32 %v7631_v41, %v7632_v3  ;;  %8589 = vmatpush.bf16.msra.mxu1 %v12300_v11 }
 0x5cb   :  { %v7514_v21 = vsel %vm7489_vm15, %v7487_v53, 0.0  ;;  %v6907_v15 = vadd.f32 %v14312_v63, %v6838_v62 }
 0x5cc   :  { %v7634_v34 = vrot.slane %v7633_v59, 1  ;;  %v7648_v9 = vrot.slane %v7514_v21, 4  ;;  %v8410_v48 = vsel %vm7836_vm8, %v8391_v12, %v8409_v49 }
 0x5cd   :  { %v7443_v13 = vadd.f32 %v14518_v10, %v6907_v15 }
 0x5ce   :  { %v7635_v20 = vmax.f32 %v7633_v59, %v7634_v34  ;;  %v7649_v4 = vmax.f32 %v7514_v21, %v7648_v9  ;;  %8590 = vmatpush.bf16.msra.mxu1 %v12299_v22 }
 0x5cf   :  { %v7467_v30 = vmax.f32 %v7443_v13, 0.0 }
 0x5d0   :  { %v8028_v39 = vpop.f32.mrf.mxu2  ;;  %v7679_v40 = vpack.c.bf16 %v7635_v20, %v7635_v20  ;;  %v7650_v32 = vrot.slane %v7649_v4, 2  ;;  %v6839_v51 = vpop.f32.mrf.mxu0 }
 0x5d1   :  { %v8041_v2 = vpop.f32.mrf.mxu3  ;;  %v8029_v38 = vadd.f32 %v8028_v39, %v8015_v1  ;;  %v8017_v35 = vpop.f32.mrf.mxu1  ;;  %v7494_v63 = vsel %vm7489_vm15, %v7467_v30, 0.0  ;;  %v6840_v42 = vadd.f32 %v6839_v51, %v14462_v6 }
 0x5d2   :  { %v8394_v29 = vunpack.c.l.b16 %v7679_v40  ;;  %v7651_v46 = vmax.f32 %v7649_v4, %v7650_v32  ;;  %v7528_v52 = vrot.slane %v7494_v63, 4 }
 0x5d3   :  { %v8042_v17 = vadd.f32 %v8041_v2, %v8029_v38  ;;  %v6910_v56 = vadd.f32 %v14321_v16, %v6840_v42 }
 0x5d4   :  { %v7652_v37 = vrot.slane %v7651_v46, 1  ;;  %v7529_v24 = vmax.f32 %v7494_v63, %v7528_v52  ;;  %v8411_v25 = vsel %vm7838_vm9, %v8394_v29, %v8410_v48 }
 0x5d5   :  { %v7446_v60 = vadd.f32 %v14518_v10, %v6910_v56 }
 0x5d6   :  { %v7653_v49 = vmax.f32 %v7651_v46, %v7652_v37  ;;  %v7530_v54 = vrot.slane %v7529_v24, 2 }
 0x5d7   :  { %v7470_v33 = vmax.f32 %v7446_v60, 0.0 }
 0x5d8   :  { %v8030_v18 = vpop.f32.mrf.mxu2  ;;  %v7682_v0 = vpack.c.bf16 %v7653_v49, %v7653_v49  ;;  %v7531_v41 = vmax.f32 %v7529_v24, %v7530_v54  ;;  %v6842_v7 = vpop.f32.mrf.mxu0 }
 0x5d9   :  { %v8043_v6 = vpop.f32.mrf.mxu3  ;;  %v8273_v43 = vpop.f32.mrf.mxu1  ;;  %v7497_v45 = vsel %vm7489_vm15, %v7470_v33, 0.0  ;;  %v6843_v16 = vadd.f32 %v6842_v7, %v14470_v55 }
 0x5da   :  { %v8274_v3 = vadd.f32 %v8273_v43, %v8042_v17  ;;  %v8397_v19 = vunpack.c.l.b16 %v7682_v0  ;;  %v7546_v1 = vrot.slane %v7497_v45, 4  ;;  %v7532_v62 = vrot.slane %v7531_v41, 1 }
 0x5db   :  { %v6913_v53 = vadd.f32 %v14330_v27, %v6843_v16 }
 0x5dc   :  { %v7547_v12 = vmax.f32 %v7497_v45, %v7546_v1  ;;  %v8412_v59 = vsel %vm7840_vm10, %v8397_v19, %v8411_v25  ;;  %v7533_v13 = vmax.f32 %v7531_v41, %v7532_v62 }
 0x5dd   :  { %v7449_v47 = vadd.f32 %v14518_v10, %v6913_v53  ;;  %v8421_v21 = vpack.c.b16 %v8412_v59, %v8412_v59 }
 0x5de   :  { %v7548_v15 = vrot.slane %v7547_v12, 2  ;;  %v7662_v38 = vpack.c.bf16 %v7533_v13, %v7533_v13 }
 0x5df   :  { %v7473_v34 = vmax.f32 %v7449_v47, 0.0  ;;  %8591 = vmatmul.bf16.vlgmr.msra.gmra.mxu1 %v8421_v21  ;;  %v6824_v47 = vadd.f32 %v14504_v61, %v14502_v14 }
 0x5e0   :  { %v8286_v9 = vpop.f32.mrf.mxu2  ;;  %v7549_v20 = vmax.f32 %v7547_v12, %v7548_v15  ;;  %v6844_v4 = vpop.f32.mrf.mxu0  ;;  %v8377_v22 = vunpack.c.l.b16 %v7662_v38 }
 0x5e1   :  { %v8299_v48 = vpop.f32.mrf.mxu3  ;;  %v8287_v55 = vadd.f32 %v8286_v9, %v8274_v3  ;;  %v8275_v30 = vpop.f32.mrf.mxu1  ;;  %v7500_v27 = vsel %vm7489_vm15, %v7473_v34, 0.0  ;;  %v6845_v39 = vadd.f32 %v6844_v4, %v14478_v44  ;;  %v12314_v3 = vld [vmem:[#allocation16 + $0xb8] sm:$0xff] }
 0x5e2   :  { %v7550_v2 = vrot.slane %v7549_v20, 1  ;;  %v7564_v11 = vrot.slane %v7500_v27, 4  ;;  %8596 = vmatpush.bf16.msra.mxu2 %v12314_v3 }
 0x5e3   :  { %v14540_v40 = vadd.f32 %v8299_v48, %v8287_v55  ;;  %v6916_v32 = vadd.f32 %v14339_v23, %v6845_v39  ;;  %v12312_v39 = vld [vmem:[#allocation16 + $0xa8] sm:$0xff] }
 0x5e4   :  { %v7551_v51 = vmax.f32 %v7549_v20, %v7550_v2  ;;  %v7565_v35 = vmax.f32 %v7500_v27, %v7564_v11  ;;  %v12313_v20 = vld [vmem:[#allocation16 + $0xb0] sm:$0xff] }
 0x5e5   :  { %v7452_v63 = vadd.f32 %v14518_v10, %v6916_v32 }
 0x5e6   :  { %v7665_v42 = vpack.c.bf16 %v7551_v51, %v7551_v51  ;;  %v7566_v29 = vrot.slane %v7565_v35, 2  ;;  %8597 = vmatpush.bf16.msra.mxu2 %v12313_v20  ;;  %v12311_v51 = vld [vmem:[#allocation16 + $0xa0] sm:$0xff] }
 0x5e7   :  { %v7476_v46 = vmax.f32 %v7452_v63, 0.0 }
 0x5e8   :  { %v8288_v52 = vpop.f32.mrf.mxu2  ;;  %v8380_v56 = vunpack.c.l.b16 %v7665_v42  ;;  %v7567_v37 = vmax.f32 %v7565_v35, %v7566_v29  ;;  %v6847_v44 = vpop.f32.mrf.mxu0  ;;  %v6826_v35 = vadd.f32 %v14514_v50, %v14512_v57 }
 0x5e9   :  { %v8301_v17 = vpop.f32.mrf.mxu3  ;;  %v7503_v24 = vsel %vm7489_vm15, %v7476_v46, 0.0  ;;  %v6848_v25 = vadd.f32 %v6847_v44, %v14486_v26 }
 0x5ea   :  { %v8413_v23 = vsel %vm7828_vm4, %v8380_v56, %v8377_v22  ;;  %v7568_v60 = vrot.slane %v7567_v37, 1  ;;  %v7582_v49 = vrot.slane %v7503_v24, 4  ;;  %8598 = vmatpush.bf16.msra.mxu2 %v12312_v39 }
 0x5eb   :  { %v6919_v54 = vadd.f32 %v14348_v58, %v6848_v25 }
 0x5ec   :  { %v7569_v33 = vmax.f32 %v7567_v37, %v7568_v60  ;;  %v7583_v18 = vmax.f32 %v7503_v24, %v7582_v49  ;;  %v12310_v37 = vld [vmem:[#allocation16 + $0x98] sm:$0xff]  ;;  %v12309_v60 = vld [vmem:[#allocation16 + $0x90] sm:$0xff] }
 0x5ed   :  { %v7455_v6 = vadd.f32 %v14518_v10, %v6919_v54 }
 0x5ee   :  { %v7668_v0 = vpack.c.bf16 %v7569_v33, %v7569_v33  ;;  %v7584_v41 = vrot.slane %v7583_v18, 2  ;;  %8599 = vmatpush.bf16.msra.mxu2 %v12311_v51 }
 0x5ef   :  { %v7479_v7 = vmax.f32 %v7455_v6, 0.0 }
 0x5f0   :  { %v8383_v43 = vunpack.c.l.b16 %v7668_v0  ;;  %v7585_v45 = vmax.f32 %v7583_v18, %v7584_v41  ;;  %v6849_v16 = vpop.f32.mrf.mxu0  ;;  %v12308_v41 = vld [vmem:[#allocation16 + $0x88] sm:$0xff] }
 0x5f1   :  { %v7506_v26 = vsel %vm7489_vm15, %v7479_v7, 0.0  ;;  %v6850_v19 = vadd.f32 %v6849_v16, %v14494_v36  ;;  %v12307_v16 = vld [vmem:[#allocation16 + $0x80] sm:$0xff] }
 0x5f2   :  { %v8414_v1 = vsel %vm7830_vm5, %v8383_v43, %v8413_v23  ;;  %v7586_v53 = vrot.slane %v7585_v45, 1  ;;  %v7600_v58 = vrot.slane %v7506_v26, 4  ;;  %8600 = vmatpush.bf16.msra.mxu2 %v12310_v37 }
 0x5f3   :  { %v6922_v62 = vadd.f32 %v14357_v31, %v6850_v19 }
 0x5f4   :  { %v7587_v12 = vmax.f32 %v7585_v45, %v7586_v53  ;;  %v7601_v59 = vmax.f32 %v7506_v26, %v7600_v58 }
 0x5f5   :  { %v7458_v21 = vadd.f32 %v14518_v10, %v6922_v62 }
 0x5f6   :  { %v7671_v15 = vpack.c.bf16 %v7587_v12, %v7587_v12  ;;  %v7602_v34 = vrot.slane %v7601_v59, 2  ;;  %8601 = vmatpush.bf16.msra.mxu2 %v12309_v60 }
 0x5f7   :  { %v7482_v9 = vmax.f32 %v7458_v21, 0.0 }
 0x5f8   :  { %v8386_v48 = vunpack.c.l.b16 %v7671_v15  ;;  %v7603_v13 = vmax.f32 %v7601_v59, %v7602_v34  ;;  %v6852_v36 = vpop.f32.mrf.mxu0 }
 0x5f9   :  { %v7509_v55 = vsel %vm7489_vm15, %v7482_v9, 0.0  ;;  %v6853_v4 = vadd.f32 %v6852_v36, %v6824_v47 }
 0x5fa   :  { %v8415_v31 = vsel %vm7832_vm6, %v8386_v48, %v8414_v1  ;;  %v7604_v30 = vrot.slane %v7603_v13, 1  ;;  %v7618_v27 = vrot.slane %v7509_v55, 4  ;;  %8602 = vmatpush.bf16.msra.mxu2 %v12308_v41 }
 0x5fb   :  { %v6925_v14 = vadd.f32 %v14366_v28, %v6853_v4 }
 0x5fc   :  { %v7605_v61 = vmax.f32 %v7603_v13, %v7604_v30  ;;  %v7619_v2 = vmax.f32 %v7509_v55, %v7618_v27  ;;  %v12333_v13 = vld [vmem:[%s14593_s11] ss:$0 sm:$0xff] }
 0x5fd   :  { %v7461_v11 = vadd.f32 %v14518_v10, %v6925_v14 }
 0x5fe   :  { %v7674_v32 = vpack.c.bf16 %v7605_v61, %v7605_v61  ;;  %v7620_v38 = vrot.slane %v7619_v2, 2  ;;  %8603 = vmatpush.bf16.msra.mxu2 %v12307_v16 }
 0x5ff   :  { %v7485_v63 = vmax.f32 %v7461_v11, 0.0 }
 0x600   :  { %v8389_v42 = vunpack.c.l.b16 %v7674_v32  ;;  %v7621_v29 = vmax.f32 %v7619_v2, %v7620_v38  ;;  %v6854_v46 = vpop.f32.mrf.mxu0 }
 0x601   :  { %v7512_v52 = vsel %vm7489_vm15, %v7485_v63, 0.0  ;;  %v6855_v17 = vadd.f32 %v6854_v46, %v6826_v35 }
 0x602   :  { %v8416_v28 = vsel %vm7834_vm7, %v8389_v42, %v8415_v31  ;;  %v7622_v22 = vrot.slane %v7621_v29, 1  ;;  %v7636_v56 = vrot.slane %v7512_v52, 4 }
 0x603   :  { %v6928_v44 = vadd.f32 %v14376_v8, %v6855_v17 }
 0x604   :  { %v7623_v24 = vmax.f32 %v7621_v29, %v7622_v22  ;;  %v7637_v25 = vmax.f32 %v7512_v52, %v7636_v56 }
 0x605   :  { %v7464_v57 = vadd.f32 %v14518_v10, %v6928_v44 }
 0x606   :  { %v7677_v50 = vpack.c.bf16 %v7623_v24, %v7623_v24  ;;  %v7638_v23 = vrot.slane %v7637_v25, 2 }
 0x607   :  { %v7488_v49 = vmax.f32 %v7464_v57, 0.0 }
 0x608   :  { %v8392_v54 = vunpack.c.l.b16 %v7677_v50  ;;  %v7639_v33 = vmax.f32 %v7637_v25, %v7638_v23 }
 0x609   :  { %v7515_v18 = vsel %vm7489_vm15, %v7488_v49, 0.0 }
 0x60a   :  { %v7640_v6 = vrot.slane %v7639_v33, 1  ;;  %v7654_v0 = vrot.slane %v7515_v18, 4  ;;  %v8417_v8 = vsel %vm7836_vm8, %v8392_v54, %v8416_v28 }
 0x60c   :  { %v7641_v7 = vmax.f32 %v7639_v33, %v7640_v6  ;;  %v7655_v43 = vmax.f32 %v7515_v18, %v7654_v0 }
 0x60e   :  { %v7680_v45 = vpack.c.bf16 %v7641_v7, %v7641_v7  ;;  %v7656_v10 = vrot.slane %v7655_v43, 2 }
 0x610   :  { %v8395_v3 = vunpack.c.l.b16 %v7680_v45  ;;  %v7657_v26 = vmax.f32 %v7655_v43, %v7656_v10 }
 0x612   :  { %v7658_v19 = vrot.slane %v7657_v26, 1  ;;  %v8418_v1 = vsel %vm7838_vm9, %v8395_v3, %v8417_v8 }
 0x614   :  { %v7659_v5 = vmax.f32 %v7657_v26, %v7658_v19 }
 0x616   :  { %v7683_v53 = vpack.c.bf16 %v7659_v5, %v7659_v5 }
 0x618   :  { %v8398_v58 = vunpack.c.l.b16 %v7683_v53 }
 0x61a   :  { %v8419_v62 = vsel %vm7840_vm10, %v8398_v58, %v8418_v1 }
 0x61b   :  { %v8422_v12 = vpack.c.b16 %v8419_v62, %v8419_v62 }
 0x61d   :  { %8604 = vmatmul.bf16.vlgmr.msra.gmra.mxu2 %v8422_v12 }
 0x622   :  { %v8579_v59 = vpop.f32.mrf.mxu0 }
 0x62a   :  { %v8581_v47 = vpop.f32.mrf.mxu0 }
 0x65c   :  { %v8592_v21 = vpop.f32.mrf.mxu1 }
 0x65d   :  { %v8593_v15 = vadd.f32 %v8592_v21, %v8579_v59 }
 0x664   :  { %v8594_v34 = vpop.f32.mrf.mxu1 }
 0x6a0   :  { %v8605_v9 = vpop.f32.mrf.mxu2 }
 0x6a1   :  { %v8606_v48 = vadd.f32 %v8605_v9, %v8593_v15 }
 0x6a3   :  { %v8609_v36 = vadd.f32 %v8606_v48, %v14540_v40 }
 0x6a5   :  { %v8614_v20 = vadd.f32 %v12333_v13, %v8609_v36 }
 0x6a7   :  { %8615 = vst [vmem:[#allocation17] sm:$0xff] %v8614_v20 }
 0x6a8   :  { %v8607_v55 = vpop.f32.mrf.mxu2  ;;  %8626 = dma.vmem_to_hbm [thread:$0]  %s8622_s1, 128, %s8624_s16, [#allocation4]  }
 0x6a9   :  { %12584 = dma.done.wait [#allocation4], 128  }
 0x6aa   :  { %12585 = vsyncadd [#allocation4], 4294967168 }
 0x6ab   :  { %8631 = vsyncpa [#allocation3], 1 }
 0x6ac   :  { %8632 = vsyncpa [#allocation6], 1 }
 0x6ad   :  { %8633 = vsyncpa [#allocation9], 1 }
 0x6ae   :  { %8634 = vsyncpa [#allocation12], 1 }
 0x6af   :  { %8635 = vsyncpa [#allocation15], 1 }
 0x6b0   :  { %8636 = vsyncpa [#allocation4], 1 }

</bundles_post_ra>
